<compile_context>
chip_gen: v5e
topology: v5e:2x2
jax: 0.10.0
libtpu: 0.0.40
codegen_flags: <defaults>
</compile_context>

<pallas_src>
import functools

import jax
import jax.numpy as jnp
from jax.experimental import pallas as pl
from jax.experimental.pallas import tpu as pltpu


# --------------------------- generation-aware config --------------------------

@functools.lru_cache(maxsize=None)
def _vmem_limit_bytes():
    """Scoped-VMEM cap derived from the chip: ~96 MiB on 128-MiB v5e/v6e,
    ~48 MiB on v7x's 64-MiB parts; conservative fallback if no info."""
    try:
        cap = int(pltpu.get_tpu_info().vmem_capacity_bytes)
        return min(cap * 3 // 4, 100 * 1024 * 1024)
    except Exception:            # pragma: no cover - fits even v7x's 64 MiB
        return 48 * 1024 * 1024


def _compiler_params():
    return pltpu.CompilerParams(
        dimension_semantics=("parallel",),        # sample axis -> both v7x TCs
        vmem_limit_bytes=_vmem_limit_bytes(),
    )


def _pick_bm_tile(bm, per_sample_bytes, weight_bytes, limit):
    """Largest per-step sample tile that divides `bm`, keeps >= 2 grid steps
    (v7x has 2 TensorCores and >=2 steps enables pipeline overlap), and fits
    VMEM with the weight blocks counted double-buffered."""
    budget = limit - 2 * weight_bytes - (4 << 20)     # 4 MiB Mosaic headroom
    cap = max(1, budget // max(int(per_sample_bytes), 1))
    min_steps = 2 if bm >= 2 else 1
    best = 1
    for t in range(1, bm + 1):
        if bm % t == 0 and t <= cap and (bm // t) >= min_steps:
            best = t
    return best


def _layernorm_f32(x, g, b, eps=1e-5):
    mu = jnp.mean(x, axis=-1, keepdims=True)
    var = jnp.mean(jnp.square(x - mu), axis=-1, keepdims=True)
    return (x - mu) * jax.lax.rsqrt(var + eps) * g + b


# --------------------------- Pallas kernels -----------------------------------

def _embed_kernel(x_ref, w_ref, b_ref, pe_ref, o_ref):
    # fused patch-embed linear + bias + (pos+temp) embedding add
    bm_t, s, p = x_ref.shape
    d = w_ref.shape[1]
    x = x_ref[...].reshape(bm_t * s, p).astype(jnp.bfloat16)
    y = jnp.dot(x, w_ref[...], preferred_element_type=jnp.float32)   # (bm_t*S, D)
    y = y.reshape(bm_t, s, d) + b_ref[...] + pe_ref[...]
    o_ref[...] = y.astype(o_ref.dtype)


def embed(xp, w, b, pe, *, bm_tile):
    bm, s, p = xp.shape
    d = w.shape[1]
    return pl.pallas_call(
        _embed_kernel,
        out_shape=jax.ShapeDtypeStruct((bm, s, d), jnp.bfloat16),    # bf16 stream
        grid=(bm // bm_tile,),
        in_specs=[
            pl.BlockSpec((bm_tile, s, p), lambda i: (i, 0, 0)),
            pl.BlockSpec((p, d), lambda i: (0, 0)),
            pl.BlockSpec((1, d), lambda i: (0, 0)),
            pl.BlockSpec((s, d), lambda i: (0, 0)),
        ],
        out_specs=pl.BlockSpec((bm_tile, s, d), lambda i: (i, 0, 0)),
        compiler_params=_compiler_params(),
    )(xp, w, b, pe)


def _block_kernel(h_ref, ln1g_ref, ln1b_ref,
                  wq_ref, bq_ref, wk_ref, bk_ref, wv_ref, bv_ref,
                  wp_ref, bp_ref, ln2g_ref, ln2b_ref,
                  w1_ref, b1_ref, w2_ref, b2_ref,
                  o_ref, *, num_heads, scale):
    """One whole pre-norm transformer block, fully fused in VMEM.

    Heads use per-head weight blocks (wq/wk/wv: (H, D, dh), wp: (H, dh, D)), so
    q/k/v never require misaligned lane slices or a concat; the attention
    einsums are batched over the bm_tile samples of this grid step, and the
    output projection accumulates over heads."""
    bm_t, s, d = h_ref.shape
    dh = d // num_heads
    r = bm_t * s

    x = h_ref[...].astype(jnp.float32)                               # (bm_t,S,D)

    # ---- LN1 (shared by all heads) ----
    xn = _layernorm_f32(x, ln1g_ref[...], ln1b_ref[...])
    xn_b = xn.reshape(r, d).astype(jnp.bfloat16)                     # MXU operand

    # ---- multi-head self-attention + output projection ----
    # small static unroll over heads; weight refs indexed on the leading axis
    # (free); for large H switch to lax.fori_loop with dynamic ref indexing.
    y = jnp.zeros((r, d), jnp.float32)
    for hd in range(num_heads):
        q = jnp.dot(xn_b, wq_ref[hd], preferred_element_type=jnp.float32) + bq_ref[hd]
        k = jnp.dot(xn_b, wk_ref[hd], preferred_element_type=jnp.float32) + bk_ref[hd]
        v = jnp.dot(xn_b, wv_ref[hd], preferred_element_type=jnp.float32) + bv_ref[hd]
        q = (q * scale).reshape(bm_t, s, dh).astype(jnp.bfloat16)
        k = k.reshape(bm_t, s, dh).astype(jnp.bfloat16)
        v = v.reshape(bm_t, s, dh).astype(jnp.bfloat16)
        sc = jnp.einsum('bqd,bkd->bqk', q, k,
                        preferred_element_type=jnp.float32)          # (bm_t,S,S)
        sc = sc - jnp.max(sc, axis=-1, keepdims=True)
        pr = jnp.exp(sc)
        pr = pr / jnp.sum(pr, axis=-1, keepdims=True)                # exact softmax
        ctx = jnp.einsum('bqk,bkd->bqd', pr.astype(jnp.bfloat16), v,
                         preferred_element_type=jnp.float32)         # (bm_t,S,dh)
        y = y + jnp.dot(ctx.reshape(r, dh).astype(jnp.bfloat16), wp_ref[hd],
                        preferred_element_type=jnp.float32)
    h1 = x + (y + bp_ref[...]).reshape(bm_t, s, d)                   # residual 1

    # ---- LN2 + MLP + residual ----
    xn2 = _layernorm_f32(h1, ln2g_ref[...], ln2b_ref[...])
    m = jnp.dot(xn2.reshape(r, d).astype(jnp.bfloat16), w1_ref[...],
                preferred_element_type=jnp.float32) + b1_ref[...]
    m = jax.nn.gelu(m, approximate=True)          # f32 element-wise (v5e-safe)
    m = jnp.dot(m.astype(jnp.bfloat16), w2_ref[...],
                preferred_element_type=jnp.float32) + b2_ref[...]
    o_ref[...] = (h1 + m.reshape(bm_t, s, d)).astype(o_ref.dtype)


def transformer_block(h, blk, *, num_heads, scale, bm_tile):
    bm, s, d = h.shape
    dh = d // num_heads
    hidden = blk["fc1_w"].shape[1]
    full2 = lambda i: (0, 0)
    full3 = lambda i: (0, 0, 0)
    kern = functools.partial(_block_kernel, num_heads=num_heads, scale=scale)
    return pl.pallas_call(
        kern,
        out_shape=jax.ShapeDtypeStruct((bm, s, d), h.dtype),
        grid=(bm // bm_tile,),
        in_specs=[
            pl.BlockSpec((bm_tile, s, d), lambda i: (i, 0, 0)),          # h
            pl.BlockSpec((1, d), full2), pl.BlockSpec((1, d), full2),    # ln1
            pl.BlockSpec((num_heads, d, dh), full3),                     # wq
            pl.BlockSpec((num_heads, 1, dh), full3),                     # bq
            pl.BlockSpec((num_heads, d, dh), full3),                     # wk
            pl.BlockSpec((num_heads, 1, dh), full3),                     # bk
            pl.BlockSpec((num_heads, d, dh), full3),                     # wv
            pl.BlockSpec((num_heads, 1, dh), full3),                     # bv
            pl.BlockSpec((num_heads, dh, d), full3),                     # wp
            pl.BlockSpec((1, d), full2),                                 # bp
            pl.BlockSpec((1, d), full2), pl.BlockSpec((1, d), full2),    # ln2
            pl.BlockSpec((d, hidden), full2), pl.BlockSpec((1, hidden), full2),
            pl.BlockSpec((hidden, d), full2), pl.BlockSpec((1, d), full2),
        ],
        out_specs=pl.BlockSpec((bm_tile, s, d), lambda i: (i, 0, 0)),
        compiler_params=_compiler_params(),
    )(h,
      blk["ln1_g"], blk["ln1_b"],
      blk["wq"], blk["bq"], blk["wk"], blk["bk"], blk["wv"], blk["bv"],
      blk["wp"], blk["bp"],
      blk["ln2_g"], blk["ln2_b"],
      blk["fc1_w"], blk["fc1_b"], blk["fc2_w"], blk["fc2_b"])


def _head_kernel(x_ref, g_ref, b_ref, w_ref, bh_ref, o_ref):
    # fused final LayerNorm -> mean-pool over all (M,T,J) tokens -> head FC,
    # all B rows in a single grid step.
    x = x_ref[...].astype(jnp.float32)                               # (B, L, D)
    xn = _layernorm_f32(x, g_ref[...], b_ref[...])
    feat = jnp.mean(xn, axis=1)                                       # (B, D)
    y = jnp.dot(feat.astype(jnp.bfloat16), w_ref[...],
                preferred_element_type=jnp.float32) + bh_ref[...]
    o_ref[...] = y.astype(o_ref.dtype)


def final_head(tokens, g, b, w, bh):
    bsz, l, d = tokens.shape
    nc = w.shape[1]
    return pl.pallas_call(
        _head_kernel,
        out_shape=jax.ShapeDtypeStruct((bsz, nc), jnp.float32),
        grid=(1,),
        in_specs=[
            pl.BlockSpec((bsz, l, d), lambda i: (0, 0, 0)),
            pl.BlockSpec((1, d), lambda i: (0, 0)),
            pl.BlockSpec((1, d), lambda i: (0, 0)),
            pl.BlockSpec((d, nc), lambda i: (0, 0)),
            pl.BlockSpec((1, nc), lambda i: (0, 0)),
        ],
        out_specs=pl.BlockSpec((bsz, nc), lambda i: (0, 0)),
        compiler_params=_compiler_params(),
    )(tokens, g, b, w, bh)


# --------------------------- parameters ---------------------------------------

def init_params(key, *, dim_in, dim_feat, depth, num_heads, mlp_ratio, tp, joints,
                num_classes, t_patch_size, patch_size):
    d = dim_feat
    nh = num_heads
    dh = d // nh
    hidden = d * mlp_ratio
    patch_dim = t_patch_size * patch_size * dim_in
    keys = jax.random.split(key, depth + 4)

    def dense(k, fi, fo):
        # weights stored bf16 (MXU operands); biases stay f32
        w = (jax.random.normal(k, (fi, fo), jnp.float32) * 0.02).astype(jnp.bfloat16)
        return w, jnp.zeros((fo,), jnp.float32)

    ew, eb = dense(keys[0], patch_dim, d)
    hw, hb = dense(keys[3], d, num_classes)
    params = {
        "embed_w": ew, "embed_b": eb.reshape(1, d),
        "pos_embed": jax.random.normal(keys[1], (1, 1, joints, d), jnp.float32) * 0.02,
        "temp_embed": jax.random.normal(keys[2], (1, tp, 1, d), jnp.float32) * 0.02,
        "norm_g": jnp.ones((1, d), jnp.float32),
        "norm_b": jnp.zeros((1, d), jnp.float32),
        "head_w": hw, "head_b": hb.reshape(1, num_classes),
        "blocks": [],
    }
    for i in range(depth):
        bk = jax.random.split(keys[4 + i], 4)
        qkv_w, qkv_b = dense(bk[0], d, 3 * d)
        # pre-split qkv per head at init -> (H, D, dh) / (H, 1, dh) blocks so the
        # kernel only ever indexes the leading head axis (no lane slicing).
        w3 = qkv_w.reshape(d, 3, nh, dh)
        b3 = qkv_b.reshape(3, nh, 1, dh)
        wq = jnp.transpose(w3[:, 0], (1, 0, 2))
        wk = jnp.transpose(w3[:, 1], (1, 0, 2))
        wv = jnp.transpose(w3[:, 2], (1, 0, 2))
        pw, pb = dense(bk[1], d, d)
        wp = pw.reshape(nh, dh, d)                    # per-head out-proj blocks
        w1, b1 = dense(bk[2], d, hidden)
        w2, b2 = dense(bk[3], hidden, d)
        params["blocks"].append({
            "ln1_g": jnp.ones((1, d), jnp.float32),
            "ln1_b": jnp.zeros((1, d), jnp.float32),
            "wq": wq, "bq": b3[0], "wk": wk, "bk": b3[1], "wv": wv, "bv": b3[2],
            "wp": wp, "bp": pb.reshape(1, d),
            "ln2_g": jnp.ones((1, d), jnp.float32),
            "ln2_b": jnp.zeros((1, d), jnp.float32),
            "fc1_w": w1, "fc1_b": b1.reshape(1, hidden),
            "fc2_w": w2, "fc2_b": b2.reshape(1, d),
        })
    return params


# --------------------------- forward pass --------------------------------------

def forward(x, params, *, t_patch_size, patch_size, num_heads, qk_scale=None):
    B, M, T, J, C = x.shape
    u, p = t_patch_size, patch_size
    tp, vp = T // u, J // p
    BM = B * M
    seq = tp * vp

    D = params["embed_w"].shape[1]
    dh = D // num_heads
    hidden = params["blocks"][0]["fc1_w"].shape[1] if params["blocks"] else D
    scale = qk_scale if qk_scale is not None else dh ** -0.5

    # patchify (plain XLA data shuffle; matches torch.einsum 'ntuvpc->ntvupc')
    xm = x.reshape(BM, T, J, C)
    xp = xm.reshape(BM, tp, u, vp, p, C)
    xp = jnp.transpose(xp, (0, 1, 3, 2, 4, 5)).reshape(BM, seq, u * p * C)

    # combined positional + temporal embedding, precomputed as one (seq, D) slab
    pe = (params["pos_embed"] + params["temp_embed"]).reshape(seq, D)

    # weight-aware per-generation sample tile (>= 2 parallel grid steps for v7x)
    limit = _vmem_limit_bytes()
    weight_bytes = 2 * (4 * D * D + 2 * D * hidden)            # bf16 block weights
    per_sample = seq * (24 * D + 6 * hidden) + 12 * seq * seq  # per-step activations
    bm_tile = _pick_bm_tile(BM, per_sample, weight_bytes, limit)

    h = embed(xp, params["embed_w"], params["embed_b"], pe, bm_tile=bm_tile)

    for blk in params["blocks"]:
        h = transformer_block(h, blk, num_heads=num_heads, scale=scale,
                              bm_tile=bm_tile)                   # (BM, seq, D)

    tokens = h.reshape(B, M * seq, D)                            # studentencoded
    pred = final_head(tokens, params["norm_g"], params["norm_b"],
                      params["head_w"], params["head_b"])        # (B, num_classes)
    return pred


# --------------------------- driver --------------------------------------------

if __name__ == "__main__":
    # small shapes consistent with the module (dim_in=3, t_patch_size=4, patch_size=1);
    # dim_feat=128 keeps the residual-stream stores lane-dense.
    B, M, T, J, dim_in = 2, 2, 16, 8, 3
    dim_feat, depth, num_heads, mlp_ratio = 128, 2, 4, 4
    t_patch_size, patch_size = 4, 1
    num_classes = 60

    key = jax.random.PRNGKey(0)
    kx, kp = jax.random.split(key)
    x = jax.random.normal(kx, (B, M, T, J, dim_in), jnp.float32)

    params = init_params(
        kp, dim_in=dim_in, dim_feat=dim_feat, depth=depth, num_heads=num_heads,
        mlp_ratio=mlp_ratio, tp=T // t_patch_size, joints=J // patch_size,
        num_classes=num_classes, t_patch_size=t_patch_size, patch_size=patch_size)

    fwd = jax.jit(functools.partial(
        forward, t_patch_size=t_patch_size, patch_size=patch_size,
        num_heads=num_heads, qk_scale=None))

    out = fwd(x, params)
    jax.block_until_ready(out)
    assert out.shape == (B, num_classes), out.shape
    assert bool(jnp.all(jnp.isfinite(out)))
    print("KERNEL_OK")
</pallas_src>

<mosaic_0001>
module attributes {stable_mosaic.version = 11 : i64} {
  func.func @_embed_kernel(%arg0: i32, %arg1: memref<2x32x12xf32, #tpu.memory_space<vmem>>, %arg2: memref<12x128xbf16, #tpu.memory_space<vmem>>, %arg3: memref<1x128xf32, #tpu.memory_space<vmem>>, %arg4: memref<32x128xf32, #tpu.memory_space<vmem>>, %arg5: memref<2x32x128xbf16, #tpu.memory_space<vmem>>) attributes {dimension_semantics = [#tpu.dimension_semantics<parallel>], iteration_bounds = array<i64: 2>, scalar_prefetch = 0 : i64, scratch_operands = 0 : i64, tpu.core_type = #tpu.core_type<tc>, window_params = [{transform_indices = @transform_0, window_bounds = array<i64: 2, 32, 12>}, {pipeline_mode = #tpu.pipeline_mode<synchronous>, transform_indices = @transform_1, window_bounds = array<i64: 12, 128>}, {pipeline_mode = #tpu.pipeline_mode<synchronous>, transform_indices = @transform_2, window_bounds = array<i64: 1, 128>}, {pipeline_mode = #tpu.pipeline_mode<synchronous>, transform_indices = @transform_3, window_bounds = array<i64: 32, 128>}, {transform_indices = @transform_4, window_bounds = array<i64: 2, 32, 128>}]} {
    %c0 = arith.constant 0 : index
    %c0_0 = arith.constant 0 : index
    %c0_1 = arith.constant 0 : index
    %0 = vector.load %arg1[%c0, %c0_0, %c0_1] : memref<2x32x12xf32, #tpu.memory_space<vmem>>, vector<2x32x12xf32>
    %1 = vector.shape_cast %0 : vector<2x32x12xf32> to vector<64x12xf32>
    %2 = arith.truncf %1 : vector<64x12xf32> to vector<64x12xbf16>
    %c0_2 = arith.constant 0 : index
    %c0_3 = arith.constant 0 : index
    %3 = vector.load %arg2[%c0_2, %c0_3] : memref<12x128xbf16, #tpu.memory_space<vmem>>, vector<12x128xbf16>
    %cst = arith.constant dense<0.000000e+00> : vector<64x128xf32>
    %4 = tpu.matmul %2, %3, %cst {dimension_numbers = #tpu.dot_dimension_numbers<[1], [0], [0], [1], [0, 0, 1, 1], [], []>} : vector<64x12xbf16>, vector<12x128xbf16>, vector<64x128xf32> -> vector<64x128xf32>
    %5 = vector.shape_cast %4 : vector<64x128xf32> to vector<2x32x128xf32>
    %c0_4 = arith.constant 0 : index
    %c0_5 = arith.constant 0 : index
    %6 = vector.load %arg3[%c0_4, %c0_5] : memref<1x128xf32, #tpu.memory_space<vmem>>, vector<1x128xf32>
    %7 = vector.shape_cast %6 : vector<1x128xf32> to vector<1x1x128xf32>
    %8 = vector.broadcast %7 : vector<1x1x128xf32> to vector<2x32x128xf32>
    %9 = arith.addf %5, %8 : vector<2x32x128xf32>
    %c0_6 = arith.constant 0 : index
    %c0_7 = arith.constant 0 : index
    %10 = vector.load %arg4[%c0_6, %c0_7] : memref<32x128xf32, #tpu.memory_space<vmem>>, vector<32x128xf32>
    %11 = vector.shape_cast %10 : vector<32x128xf32> to vector<1x32x128xf32>
    %12 = vector.broadcast %11 : vector<1x32x128xf32> to vector<2x32x128xf32>
    %13 = arith.addf %9, %12 : vector<2x32x128xf32>
    %14 = arith.truncf %13 : vector<2x32x128xf32> to vector<2x32x128xbf16>
    %c0_8 = arith.constant 0 : index
    %c0_9 = arith.constant 0 : index
    %c0_10 = arith.constant 0 : index
    %15 = vector.load %arg5[%c0_8, %c0_9, %c0_10] : memref<2x32x128xbf16, #tpu.memory_space<vmem>>, vector<2x32x128xbf16>
    tpu.vector_store %arg5[%c0_8, %c0_9, %c0_10], %14 {strides = array<i32>} : memref<2x32x128xbf16, #tpu.memory_space<vmem>>, vector<2x32x128xbf16>,
    return
  }
  func.func @transform_0(%arg0: i32) -> (i32, i32, i32) {
    %c0_i32 = arith.constant 0 : i32
    %c0_i32_0 = arith.constant 0 : i32
    %c0_i32_1 = arith.constant 0 : i32
    return %arg0, %c0_i32, %c0_i32_0 : i32, i32, i32
  }
  func.func @transform_1(%arg0: i32) -> (i32, i32) {
    %c0_i32 = arith.constant 0 : i32
    %c0_i32_0 = arith.constant 0 : i32
    %c0_i32_1 = arith.constant 0 : i32
    return %c0_i32, %c0_i32_0 : i32, i32
  }
  func.func @transform_2(%arg0: i32) -> (i32, i32) {
    %c0_i32 = arith.constant 0 : i32
    %c0_i32_0 = arith.constant 0 : i32
    %c0_i32_1 = arith.constant 0 : i32
    return %c0_i32, %c0_i32_0 : i32, i32
  }
  func.func @transform_3(%arg0: i32) -> (i32, i32) {
    %c0_i32 = arith.constant 0 : i32
    %c0_i32_0 = arith.constant 0 : i32
    %c0_i32_1 = arith.constant 0 : i32
    return %c0_i32, %c0_i32_0 : i32, i32
  }
  func.func @transform_4(%arg0: i32) -> (i32, i32, i32) {
    %c0_i32 = arith.constant 0 : i32
    %c0_i32_0 = arith.constant 0 : i32
    %c0_i32_1 = arith.constant 0 : i32
    return %arg0, %c0_i32, %c0_i32_0 : i32, i32, i32
  }
}

module attributes {stable_mosaic.version = 11 : i64} {
  func.func @_head_kernel(%arg0: i32, %arg1: memref<2x64x128xbf16, #tpu.memory_space<vmem>>, %arg2: memref<1x128xf32, #tpu.memory_space<vmem>>, %arg3: memref<1x128xf32, #tpu.memory_space<vmem>>, %arg4: memref<128x60xbf16, #tpu.memory_space<vmem>>, %arg5: memref<1x60xf32, #tpu.memory_space<vmem>>, %arg6: memref<2x60xf32, #tpu.memory_space<vmem>>) attributes {dimension_semantics = [#tpu.dimension_semantics<parallel>], iteration_bounds = array<i64: 1>, scalar_prefetch = 0 : i64, scratch_operands = 0 : i64, tpu.core_type = #tpu.core_type<tc>, window_params = [{pipeline_mode = #tpu.pipeline_mode<synchronous>, transform_indices = @transform_0, window_bounds = array<i64: 2, 64, 128>}, {pipeline_mode = #tpu.pipeline_mode<synchronous>, transform_indices = @transform_1, window_bounds = array<i64: 1, 128>}, {pipeline_mode = #tpu.pipeline_mode<synchronous>, transform_indices = @transform_2, window_bounds = array<i64: 1, 128>}, {pipeline_mode = #tpu.pipeline_mode<synchronous>, transform_indices = @transform_3, window_bounds = array<i64: 128, 60>}, {pipeline_mode = #tpu.pipeline_mode<synchronous>, transform_indices = @transform_4, window_bounds = array<i64: 1, 60>}, {pipeline_mode = #tpu.pipeline_mode<synchronous>, transform_indices = @transform_5, window_bounds = array<i64: 2, 60>}]} {
    %c0 = arith.constant 0 : index
    %c0_0 = arith.constant 0 : index
    %c0_1 = arith.constant 0 : index
    %0 = vector.load %arg1[%c0, %c0_0, %c0_1] : memref<2x64x128xbf16, #tpu.memory_space<vmem>>, vector<2x64x128xbf16>
    %1 = arith.extf %0 : vector<2x64x128xbf16> to vector<2x64x128xf32>
    %c0_2 = arith.constant 0 : index
    %c0_3 = arith.constant 0 : index
    %2 = vector.load %arg2[%c0_2, %c0_3] : memref<1x128xf32, #tpu.memory_space<vmem>>, vector<1x128xf32>
    %c0_4 = arith.constant 0 : index
    %c0_5 = arith.constant 0 : index
    %3 = vector.load %arg3[%c0_4, %c0_5] : memref<1x128xf32, #tpu.memory_space<vmem>>, vector<1x128xf32>
    %cst = arith.constant dense<0.000000e+00> : vector<2x64xf32>
    %4 = vector.multi_reduction <add>, %1, %cst [2] : vector<2x64x128xf32> to vector<2x64xf32>
    %5 = vector.shape_cast %4 : vector<2x64xf32> to vector<2x64x1xf32>
    %cst_6 = arith.constant 1.280000e+02 : f32
    %6 = vector.broadcast %cst_6 : f32 to vector<2x64x1xf32>
    %7 = arith.divf %5, %6 : vector<2x64x1xf32>
    %8 = vector.broadcast %7 : vector<2x64x1xf32> to vector<2x64x128xf32>
    %9 = arith.subf %1, %8 : vector<2x64x128xf32>
    %10 = arith.mulf %9, %9 : vector<2x64x128xf32>
    %cst_7 = arith.constant dense<0.000000e+00> : vector<2x64xf32>
    %11 = vector.multi_reduction <add>, %10, %cst_7 [2] : vector<2x64x128xf32> to vector<2x64xf32>
    %12 = vector.shape_cast %11 : vector<2x64xf32> to vector<2x64x1xf32>
    %cst_8 = arith.constant 1.280000e+02 : f32
    %13 = vector.broadcast %cst_8 : f32 to vector<2x64x1xf32>
    %14 = arith.divf %12, %13 : vector<2x64x1xf32>
    %15 = vector.broadcast %7 : vector<2x64x1xf32> to vector<2x64x128xf32>
    %16 = arith.subf %1, %15 : vector<2x64x128xf32>
    %cst_9 = arith.constant 9.99999974E-6 : f32
    %17 = vector.broadcast %cst_9 : f32 to vector<2x64x1xf32>
    %18 = arith.addf %14, %17 : vector<2x64x1xf32>
    %19 = math.rsqrt %18 : vector<2x64x1xf32>
    %20 = vector.broadcast %19 : vector<2x64x1xf32> to vector<2x64x128xf32>
    %21 = arith.mulf %16, %20 : vector<2x64x128xf32>
    %22 = vector.shape_cast %2 : vector<1x128xf32> to vector<1x1x128xf32>
    %23 = vector.broadcast %22 : vector<1x1x128xf32> to vector<2x64x128xf32>
    %24 = arith.mulf %21, %23 : vector<2x64x128xf32>
    %25 = vector.shape_cast %3 : vector<1x128xf32> to vector<1x1x128xf32>
    %26 = vector.broadcast %25 : vector<1x1x128xf32> to vector<2x64x128xf32>
    %27 = arith.addf %24, %26 : vector<2x64x128xf32>
    %cst_10 = arith.constant dense<0.000000e+00> : vector<2x128xf32>
    %28 = vector.multi_reduction <add>, %27, %cst_10 [1] : vector<2x64x128xf32> to vector<2x128xf32>
    %cst_11 = arith.constant 6.400000e+01 : f32
    %29 = vector.broadcast %cst_11 : f32 to vector<2x128xf32>
    %30 = arith.divf %28, %29 : vector<2x128xf32>
    %31 = arith.truncf %30 : vector<2x128xf32> to vector<2x128xbf16>
    %c0_12 = arith.constant 0 : index
    %c0_13 = arith.constant 0 : index
    %32 = vector.load %arg4[%c0_12, %c0_13] : memref<128x60xbf16, #tpu.memory_space<vmem>>, vector<128x60xbf16>
    %cst_14 = arith.constant dense<0.000000e+00> : vector<2x60xf32>
    %33 = tpu.matmul %31, %32, %cst_14 {dimension_numbers = #tpu.dot_dimension_numbers<[1], [0], [0], [1], [0, 0, 1, 1], [], []>} : vector<2x128xbf16>, vector<128x60xbf16>, vector<2x60xf32> -> vector<2x60xf32>
    %c0_15 = arith.constant 0 : index
    %c0_16 = arith.constant 0 : index
    %34 = vector.load %arg5[%c0_15, %c0_16] : memref<1x60xf32, #tpu.memory_space<vmem>>, vector<1x60xf32>
    %35 = vector.broadcast %34 : vector<1x60xf32> to vector<2x60xf32>
    %36 = arith.addf %33, %35 : vector<2x60xf32>
    %c0_17 = arith.constant 0 : index
    %c0_18 = arith.constant 0 : index
    %37 = vector.load %arg6[%c0_17, %c0_18] : memref<2x60xf32, #tpu.memory_space<vmem>>, vector<2x60xf32>
    tpu.vector_store %arg6[%c0_17, %c0_18], %36 {strides = array<i32>} : memref<2x60xf32, #tpu.memory_space<vmem>>, vector<2x60xf32>,
    return
  }
  func.func @transform_0(%arg0: i32) -> (i32, i32, i32) {
    %c0_i32 = arith.constant 0 : i32
    %c0_i32_0 = arith.constant 0 : i32
    %c0_i32_1 = arith.constant 0 : i32
    %c0_i32_2 = arith.constant 0 : i32
    return %c0_i32, %c0_i32_0, %c0_i32_1 : i32, i32, i32
  }
  func.func @transform_1(%arg0: i32) -> (i32, i32) {
    %c0_i32 = arith.constant 0 : i32
    %c0_i32_0 = arith.constant 0 : i32
    %c0_i32_1 = arith.constant 0 : i32
    return %c0_i32, %c0_i32_0 : i32, i32
  }
  func.func @transform_2(%arg0: i32) -> (i32, i32) {
    %c0_i32 = arith.constant 0 : i32
    %c0_i32_0 = arith.constant 0 : i32
    %c0_i32_1 = arith.constant 0 : i32
    return %c0_i32, %c0_i32_0 : i32, i32
  }
  func.func @transform_3(%arg0: i32) -> (i32, i32) {
    %c0_i32 = arith.constant 0 : i32
    %c0_i32_0 = arith.constant 0 : i32
    %c0_i32_1 = arith.constant 0 : i32
    return %c0_i32, %c0_i32_0 : i32, i32
  }
  func.func @transform_4(%arg0: i32) -> (i32, i32) {
    %c0_i32 = arith.constant 0 : i32
    %c0_i32_0 = arith.constant 0 : i32
    %c0_i32_1 = arith.constant 0 : i32
    return %c0_i32, %c0_i32_0 : i32, i32
  }
  func.func @transform_5(%arg0: i32) -> (i32, i32) {
    %c0_i32 = arith.constant 0 : i32
    %c0_i32_0 = arith.constant 0 : i32
    %c0_i32_1 = arith.constant 0 : i32
    return %c0_i32, %c0_i32_0 : i32, i32
  }
}

module attributes {stable_mosaic.version = 11 : i64} {
  func.func @_block_kernel(%arg0: i32, %arg1: memref<2x32x128xbf16, #tpu.memory_space<vmem>>, %arg2: memref<1x128xf32, #tpu.memory_space<vmem>>, %arg3: memref<1x128xf32, #tpu.memory_space<vmem>>, %arg4: memref<4x128x32xbf16, #tpu.memory_space<vmem>>, %arg5: memref<4x1x32xf32, #tpu.memory_space<vmem>>, %arg6: memref<4x128x32xbf16, #tpu.memory_space<vmem>>, %arg7: memref<4x1x32xf32, #tpu.memory_space<vmem>>, %arg8: memref<4x128x32xbf16, #tpu.memory_space<vmem>>, %arg9: memref<4x1x32xf32, #tpu.memory_space<vmem>>, %arg10: memref<4x32x128xbf16, #tpu.memory_space<vmem>>, %arg11: memref<1x128xf32, #tpu.memory_space<vmem>>, %arg12: memref<1x128xf32, #tpu.memory_space<vmem>>, %arg13: memref<1x128xf32, #tpu.memory_space<vmem>>, %arg14: memref<128x512xbf16, #tpu.memory_space<vmem>>, %arg15: memref<1x512xf32, #tpu.memory_space<vmem>>, %arg16: memref<512x128xbf16, #tpu.memory_space<vmem>>, %arg17: memref<1x128xf32, #tpu.memory_space<vmem>>, %arg18: memref<2x32x128xbf16, #tpu.memory_space<vmem>>) attributes {dimension_semantics = [#tpu.dimension_semantics<parallel>], iteration_bounds = array<i64: 2>, scalar_prefetch = 0 : i64, scratch_operands = 0 : i64, tpu.core_type = #tpu.core_type<tc>, window_params = [{transform_indices = @transform_0, window_bounds = array<i64: 2, 32, 128>}, {pipeline_mode = #tpu.pipeline_mode<synchronous>, transform_indices = @transform_1, window_bounds = array<i64: 1, 128>}, {pipeline_mode = #tpu.pipeline_mode<synchronous>, transform_indices = @transform_2, window_bounds = array<i64: 1, 128>}, {pipeline_mode = #tpu.pipeline_mode<synchronous>, transform_indices = @transform_3, window_bounds = array<i64: 4, 128, 32>}, {pipeline_mode = #tpu.pipeline_mode<synchronous>, transform_indices = @transform_4, window_bounds = array<i64: 4, 1, 32>}, {pipeline_mode = #tpu.pipeline_mode<synchronous>, transform_indices = @transform_5, window_bounds = array<i64: 4, 128, 32>}, {pipeline_mode = #tpu.pipeline_mode<synchronous>, transform_indices = @transform_6, window_bounds = array<i64: 4, 1, 32>}, {pipeline_mode = #tpu.pipeline_mode<synchronous>, transform_indices = @transform_7, window_bounds = array<i64: 4, 128, 32>}, {pipeline_mode = #tpu.pipeline_mode<synchronous>, transform_indices = @transform_8, window_bounds = array<i64: 4, 1, 32>}, {pipeline_mode = #tpu.pipeline_mode<synchronous>, transform_indices = @transform_9, window_bounds = array<i64: 4, 32, 128>}, {pipeline_mode = #tpu.pipeline_mode<synchronous>, transform_indices = @transform_10, window_bounds = array<i64: 1, 128>}, {pipeline_mode = #tpu.pipeline_mode<synchronous>, transform_indices = @transform_11, window_bounds = array<i64: 1, 128>}, {pipeline_mode = #tpu.pipeline_mode<synchronous>, transform_indices = @transform_12, window_bounds = array<i64: 1, 128>}, {pipeline_mode = #tpu.pipeline_mode<synchronous>, transform_indices = @transform_13, window_bounds = array<i64: 128, 512>}, {pipeline_mode = #tpu.pipeline_mode<synchronous>, transform_indices = @transform_14, window_bounds = array<i64: 1, 512>}, {pipeline_mode = #tpu.pipeline_mode<synchronous>, transform_indices = @transform_15, window_bounds = array<i64: 512, 128>}, {pipeline_mode = #tpu.pipeline_mode<synchronous>, transform_indices = @transform_16, window_bounds = array<i64: 1, 128>}, {transform_indices = @transform_17, window_bounds = array<i64: 2, 32, 128>}]} {
    %c0 = arith.constant 0 : index
    %c0_0 = arith.constant 0 : index
    %c0_1 = arith.constant 0 : index
    %0 = vector.load %arg1[%c0, %c0_0, %c0_1] : memref<2x32x128xbf16, #tpu.memory_space<vmem>>, vector<2x32x128xbf16>
    %1 = arith.extf %0 : vector<2x32x128xbf16> to vector<2x32x128xf32>
    %c0_2 = arith.constant 0 : index
    %c0_3 = arith.constant 0 : index
    %2 = vector.load %arg2[%c0_2, %c0_3] : memref<1x128xf32, #tpu.memory_space<vmem>>, vector<1x128xf32>
    %c0_4 = arith.constant 0 : index
    %c0_5 = arith.constant 0 : index
    %3 = vector.load %arg3[%c0_4, %c0_5] : memref<1x128xf32, #tpu.memory_space<vmem>>, vector<1x128xf32>
    %cst = arith.constant dense<0.000000e+00> : vector<2x32xf32>
    %4 = vector.multi_reduction <add>, %1, %cst [2] : vector<2x32x128xf32> to vector<2x32xf32>
    %5 = vector.shape_cast %4 : vector<2x32xf32> to vector<2x32x1xf32>
    %cst_6 = arith.constant 1.280000e+02 : f32
    %6 = vector.broadcast %cst_6 : f32 to vector<2x32x1xf32>
    %7 = arith.divf %5, %6 : vector<2x32x1xf32>
    %8 = vector.broadcast %7 : vector<2x32x1xf32> to vector<2x32x128xf32>
    %9 = arith.subf %1, %8 : vector<2x32x128xf32>
    %10 = arith.mulf %9, %9 : vector<2x32x128xf32>
    %cst_7 = arith.constant dense<0.000000e+00> : vector<2x32xf32>
    %11 = vector.multi_reduction <add>, %10, %cst_7 [2] : vector<2x32x128xf32> to vector<2x32xf32>
    %12 = vector.shape_cast %11 : vector<2x32xf32> to vector<2x32x1xf32>
    %cst_8 = arith.constant 1.280000e+02 : f32
    %13 = vector.broadcast %cst_8 : f32 to vector<2x32x1xf32>
    %14 = arith.divf %12, %13 : vector<2x32x1xf32>
    %15 = vector.broadcast %7 : vector<2x32x1xf32> to vector<2x32x128xf32>
    %16 = arith.subf %1, %15 : vector<2x32x128xf32>
    %cst_9 = arith.constant 9.99999974E-6 : f32
    %17 = vector.broadcast %cst_9 : f32 to vector<2x32x1xf32>
    %18 = arith.addf %14, %17 : vector<2x32x1xf32>
    %19 = math.rsqrt %18 : vector<2x32x1xf32>
    %20 = vector.broadcast %19 : vector<2x32x1xf32> to vector<2x32x128xf32>
    %21 = arith.mulf %16, %20 : vector<2x32x128xf32>
    %22 = vector.shape_cast %2 : vector<1x128xf32> to vector<1x1x128xf32>
    %23 = vector.broadcast %22 : vector<1x1x128xf32> to vector<2x32x128xf32>
    %24 = arith.mulf %21, %23 : vector<2x32x128xf32>
    %25 = vector.shape_cast %3 : vector<1x128xf32> to vector<1x1x128xf32>
    %26 = vector.broadcast %25 : vector<1x1x128xf32> to vector<2x32x128xf32>
    %27 = arith.addf %24, %26 : vector<2x32x128xf32>
    %28 = vector.shape_cast %27 : vector<2x32x128xf32> to vector<64x128xf32>
    %29 = arith.truncf %28 : vector<64x128xf32> to vector<64x128xbf16>
    %cst_10 = arith.constant 0.000000e+00 : f32
    %30 = vector.broadcast %cst_10 : f32 to vector<64x128xf32>
    %c0_11 = arith.constant 0 : index
    %c0_12 = arith.constant 0 : index
    %c0_13 = arith.constant 0 : index
    %31 = vector.load %arg4[%c0_11, %c0_12, %c0_13] : memref<4x128x32xbf16, #tpu.memory_space<vmem>>, vector<1x128x32xbf16>
    %32 = vector.shape_cast %31 : vector<1x128x32xbf16> to vector<128x32xbf16>
    %cst_14 = arith.constant dense<0.000000e+00> : vector<64x32xf32>
    %33 = tpu.matmul %29, %32, %cst_14 {dimension_numbers = #tpu.dot_dimension_numbers<[1], [0], [0], [1], [0, 0, 1, 1], [], []>} : vector<64x128xbf16>, vector<128x32xbf16>, vector<64x32xf32> -> vector<64x32xf32>
    %c0_15 = arith.constant 0 : index
    %c0_16 = arith.constant 0 : index
    %c0_17 = arith.constant 0 : index
    %34 = vector.load %arg5[%c0_15, %c0_16, %c0_17] : memref<4x1x32xf32, #tpu.memory_space<vmem>>, vector<1x1x32xf32>
    %35 = vector.shape_cast %34 : vector<1x1x32xf32> to vector<1x32xf32>
    %36 = vector.broadcast %35 : vector<1x32xf32> to vector<64x32xf32>
    %37 = arith.addf %33, %36 : vector<64x32xf32>
    %c0_18 = arith.constant 0 : index
    %c0_19 = arith.constant 0 : index
    %c0_20 = arith.constant 0 : index
    %38 = vector.load %arg6[%c0_18, %c0_19, %c0_20] : memref<4x128x32xbf16, #tpu.memory_space<vmem>>, vector<1x128x32xbf16>
    %39 = vector.shape_cast %38 : vector<1x128x32xbf16> to vector<128x32xbf16>
    %cst_21 = arith.constant dense<0.000000e+00> : vector<64x32xf32>
    %40 = tpu.matmul %29, %39, %cst_21 {dimension_numbers = #tpu.dot_dimension_numbers<[1], [0], [0], [1], [0, 0, 1, 1], [], []>} : vector<64x128xbf16>, vector<128x32xbf16>, vector<64x32xf32> -> vector<64x32xf32>
    %c0_22 = arith.constant 0 : index
    %c0_23 = arith.constant 0 : index
    %c0_24 = arith.constant 0 : index
    %41 = vector.load %arg7[%c0_22, %c0_23, %c0_24] : memref<4x1x32xf32, #tpu.memory_space<vmem>>, vector<1x1x32xf32>
    %42 = vector.shape_cast %41 : vector<1x1x32xf32> to vector<1x32xf32>
    %43 = vector.broadcast %42 : vector<1x32xf32> to vector<64x32xf32>
    %44 = arith.addf %40, %43 : vector<64x32xf32>
    %c0_25 = arith.constant 0 : index
    %c0_26 = arith.constant 0 : index
    %c0_27 = arith.constant 0 : index
    %45 = vector.load %arg8[%c0_25, %c0_26, %c0_27] : memref<4x128x32xbf16, #tpu.memory_space<vmem>>, vector<1x128x32xbf16>
    %46 = vector.shape_cast %45 : vector<1x128x32xbf16> to vector<128x32xbf16>
    %cst_28 = arith.constant dense<0.000000e+00> : vector<64x32xf32>
    %47 = tpu.matmul %29, %46, %cst_28 {dimension_numbers = #tpu.dot_dimension_numbers<[1], [0], [0], [1], [0, 0, 1, 1], [], []>} : vector<64x128xbf16>, vector<128x32xbf16>, vector<64x32xf32> -> vector<64x32xf32>
    %c0_29 = arith.constant 0 : index
    %c0_30 = arith.constant 0 : index
    %c0_31 = arith.constant 0 : index
    %48 = vector.load %arg9[%c0_29, %c0_30, %c0_31] : memref<4x1x32xf32, #tpu.memory_space<vmem>>, vector<1x1x32xf32>
    %49 = vector.shape_cast %48 : vector<1x1x32xf32> to vector<1x32xf32>
    %50 = vector.broadcast %49 : vector<1x32xf32> to vector<64x32xf32>
    %51 = arith.addf %47, %50 : vector<64x32xf32>
    %cst_32 = arith.constant 0.176776692 : f32
    %52 = vector.broadcast %cst_32 : f32 to vector<64x32xf32>
    %53 = arith.mulf %37, %52 : vector<64x32xf32>
    %54 = vector.shape_cast %53 : vector<64x32xf32> to vector<2x32x32xf32>
    %55 = arith.truncf %54 : vector<2x32x32xf32> to vector<2x32x32xbf16>
    %56 = vector.shape_cast %44 : vector<64x32xf32> to vector<2x32x32xf32>
    %57 = arith.truncf %56 : vector<2x32x32xf32> to vector<2x32x32xbf16>
    %58 = vector.shape_cast %51 : vector<64x32xf32> to vector<2x32x32xf32>
    %59 = arith.truncf %58 : vector<2x32x32xf32> to vector<2x32x32xbf16>
    "tpu.trace_start"() <{level = 10 : i32, message = "bqd,bkd->bqk"}> : () -> ()
    %cst_33 = arith.constant dense<0.000000e+00> : vector<2x32x32xf32>
    %60 = tpu.matmul %55, %57, %cst_33 {dimension_numbers = #tpu.dot_dimension_numbers<[2], [2], [1], [1], [0, 0, 0, 1, 1, 1], [0], [0]>} : vector<2x32x32xbf16>, vector<2x32x32xbf16>, vector<2x32x32xf32> -> vector<2x32x32xf32>
    "tpu.trace_stop"() : () -> ()
    %cst_34 = arith.constant dense<0xFF800000> : vector<2x32xf32>
    %61 = vector.multi_reduction <maximumf>, %60, %cst_34 [2] : vector<2x32x32xf32> to vector<2x32xf32>
    %62 = vector.shape_cast %61 : vector<2x32xf32> to vector<2x32x1xf32>
    %63 = vector.broadcast %62 : vector<2x32x1xf32> to vector<2x32x32xf32>
    %64 = arith.subf %60, %63 : vector<2x32x32xf32>
    %65 = math.exp %64 : vector<2x32x32xf32>
    %cst_35 = arith.constant dense<0.000000e+00> : vector<2x32xf32>
    %66 = vector.multi_reduction <add>, %65, %cst_35 [2] : vector<2x32x32xf32> to vector<2x32xf32>
    %67 = vector.shape_cast %66 : vector<2x32xf32> to vector<2x32x1xf32>
    %68 = vector.broadcast %67 : vector<2x32x1xf32> to vector<2x32x32xf32>
    %69 = arith.divf %65, %68 : vector<2x32x32xf32>
    %70 = arith.truncf %69 : vector<2x32x32xf32> to vector<2x32x32xbf16>
    "tpu.trace_start"() <{level = 10 : i32, message = "bqk,bkd->bqd"}> : () -> ()
    %cst_36 = arith.constant dense<0.000000e+00> : vector<2x32x32xf32>
    %71 = tpu.matmul %70, %59, %cst_36 {dimension_numbers = #tpu.dot_dimension_numbers<[2], [1], [1], [2], [0, 0, 0, 1, 1, 2], [0], [0]>} : vector<2x32x32xbf16>, vector<2x32x32xbf16>, vector<2x32x32xf32> -> vector<2x32x32xf32>
    "tpu.trace_stop"() : () -> ()
    %72 = vector.shape_cast %71 : vector<2x32x32xf32> to vector<64x32xf32>
    %73 = arith.truncf %72 : vector<64x32xf32> to vector<64x32xbf16>
    %c0_37 = arith.constant 0 : index
    %c0_38 = arith.constant 0 : index
    %c0_39 = arith.constant 0 : index
    %74 = vector.load %arg10[%c0_37, %c0_38, %c0_39] : memref<4x32x128xbf16, #tpu.memory_space<vmem>>, vector<1x32x128xbf16>
    %75 = vector.shape_cast %74 : vector<1x32x128xbf16> to vector<32x128xbf16>
    %cst_40 = arith.constant dense<0.000000e+00> : vector<64x128xf32>
    %76 = tpu.matmul %73, %75, %cst_40 {dimension_numbers = #tpu.dot_dimension_numbers<[1], [0], [0], [1], [0, 0, 1, 1], [], []>} : vector<64x32xbf16>, vector<32x128xbf16>, vector<64x128xf32> -> vector<64x128xf32>
    %77 = arith.addf %30, %76 : vector<64x128xf32>
    %c1 = arith.constant 1 : index
    %c0_41 = arith.constant 0 : index
    %c0_42 = arith.constant 0 : index
    %78 = vector.load %arg4[%c1, %c0_41, %c0_42] : memref<4x128x32xbf16, #tpu.memory_space<vmem>>, vector<1x128x32xbf16>
    %79 = vector.shape_cast %78 : vector<1x128x32xbf16> to vector<128x32xbf16>
    %cst_43 = arith.constant dense<0.000000e+00> : vector<64x32xf32>
    %80 = tpu.matmul %29, %79, %cst_43 {dimension_numbers = #tpu.dot_dimension_numbers<[1], [0], [0], [1], [0, 0, 1, 1], [], []>} : vector<64x128xbf16>, vector<128x32xbf16>, vector<64x32xf32> -> vector<64x32xf32>
    %c1_44 = arith.constant 1 : index
    %c0_45 = arith.constant 0 : index
    %c0_46 = arith.constant 0 : index
    %81 = vector.load %arg5[%c1_44, %c0_45, %c0_46] : memref<4x1x32xf32, #tpu.memory_space<vmem>>, vector<1x1x32xf32>
    %82 = vector.shape_cast %81 : vector<1x1x32xf32> to vector<1x32xf32>
    %83 = vector.broadcast %82 : vector<1x32xf32> to vector<64x32xf32>
    %84 = arith.addf %80, %83 : vector<64x32xf32>
    %c1_47 = arith.constant 1 : index
    %c0_48 = arith.constant 0 : index
    %c0_49 = arith.constant 0 : index
    %85 = vector.load %arg6[%c1_47, %c0_48, %c0_49] : memref<4x128x32xbf16, #tpu.memory_space<vmem>>, vector<1x128x32xbf16>
    %86 = vector.shape_cast %85 : vector<1x128x32xbf16> to vector<128x32xbf16>
    %cst_50 = arith.constant dense<0.000000e+00> : vector<64x32xf32>
    %87 = tpu.matmul %29, %86, %cst_50 {dimension_numbers = #tpu.dot_dimension_numbers<[1], [0], [0], [1], [0, 0, 1, 1], [], []>} : vector<64x128xbf16>, vector<128x32xbf16>, vector<64x32xf32> -> vector<64x32xf32>
    %c1_51 = arith.constant 1 : index
    %c0_52 = arith.constant 0 : index
    %c0_53 = arith.constant 0 : index
    %88 = vector.load %arg7[%c1_51, %c0_52, %c0_53] : memref<4x1x32xf32, #tpu.memory_space<vmem>>, vector<1x1x32xf32>
    %89 = vector.shape_cast %88 : vector<1x1x32xf32> to vector<1x32xf32>
    %90 = vector.broadcast %89 : vector<1x32xf32> to vector<64x32xf32>
    %91 = arith.addf %87, %90 : vector<64x32xf32>
    %c1_54 = arith.constant 1 : index
    %c0_55 = arith.constant 0 : index
    %c0_56 = arith.constant 0 : index
    %92 = vector.load %arg8[%c1_54, %c0_55, %c0_56] : memref<4x128x32xbf16, #tpu.memory_space<vmem>>, vector<1x128x32xbf16>
    %93 = vector.shape_cast %92 : vector<1x128x32xbf16> to vector<128x32xbf16>
    %cst_57 = arith.constant dense<0.000000e+00> : vector<64x32xf32>
    %94 = tpu.matmul %29, %93, %cst_57 {dimension_numbers = #tpu.dot_dimension_numbers<[1], [0], [0], [1], [0, 0, 1, 1], [], []>} : vector<64x128xbf16>, vector<128x32xbf16>, vector<64x32xf32> -> vector<64x32xf32>
    %c1_58 = arith.constant 1 : index
    %c0_59 = arith.constant 0 : index
    %c0_60 = arith.constant 0 : index
    %95 = vector.load %arg9[%c1_58, %c0_59, %c0_60] : memref<4x1x32xf32, #tpu.memory_space<vmem>>, vector<1x1x32xf32>
    %96 = vector.shape_cast %95 : vector<1x1x32xf32> to vector<1x32xf32>
    %97 = vector.broadcast %96 : vector<1x32xf32> to vector<64x32xf32>
    %98 = arith.addf %94, %97 : vector<64x32xf32>
    %cst_61 = arith.constant 0.176776692 : f32
    %99 = vector.broadcast %cst_61 : f32 to vector<64x32xf32>
    %100 = arith.mulf %84, %99 : vector<64x32xf32>
    %101 = vector.shape_cast %100 : vector<64x32xf32> to vector<2x32x32xf32>
    %102 = arith.truncf %101 : vector<2x32x32xf32> to vector<2x32x32xbf16>
    %103 = vector.shape_cast %91 : vector<64x32xf32> to vector<2x32x32xf32>
    %104 = arith.truncf %103 : vector<2x32x32xf32> to vector<2x32x32xbf16>
    %105 = vector.shape_cast %98 : vector<64x32xf32> to vector<2x32x32xf32>
    %106 = arith.truncf %105 : vector<2x32x32xf32> to vector<2x32x32xbf16>
    "tpu.trace_start"() <{level = 10 : i32, message = "bqd,bkd->bqk"}> : () -> ()
    %cst_62 = arith.constant dense<0.000000e+00> : vector<2x32x32xf32>
    %107 = tpu.matmul %102, %104, %cst_62 {dimension_numbers = #tpu.dot_dimension_numbers<[2], [2], [1], [1], [0, 0, 0, 1, 1, 1], [0], [0]>} : vector<2x32x32xbf16>, vector<2x32x32xbf16>, vector<2x32x32xf32> -> vector<2x32x32xf32>
    "tpu.trace_stop"() : () -> ()
    %cst_63 = arith.constant dense<0xFF800000> : vector<2x32xf32>
    %108 = vector.multi_reduction <maximumf>, %107, %cst_63 [2] : vector<2x32x32xf32> to vector<2x32xf32>
    %109 = vector.shape_cast %108 : vector<2x32xf32> to vector<2x32x1xf32>
    %110 = vector.broadcast %109 : vector<2x32x1xf32> to vector<2x32x32xf32>
    %111 = arith.subf %107, %110 : vector<2x32x32xf32>
    %112 = math.exp %111 : vector<2x32x32xf32>
    %cst_64 = arith.constant dense<0.000000e+00> : vector<2x32xf32>
    %113 = vector.multi_reduction <add>, %112, %cst_64 [2] : vector<2x32x32xf32> to vector<2x32xf32>
    %114 = vector.shape_cast %113 : vector<2x32xf32> to vector<2x32x1xf32>
    %115 = vector.broadcast %114 : vector<2x32x1xf32> to vector<2x32x32xf32>
    %116 = arith.divf %112, %115 : vector<2x32x32xf32>
    %117 = arith.truncf %116 : vector<2x32x32xf32> to vector<2x32x32xbf16>
    "tpu.trace_start"() <{level = 10 : i32, message = "bqk,bkd->bqd"}> : () -> ()
    %cst_65 = arith.constant dense<0.000000e+00> : vector<2x32x32xf32>
    %118 = tpu.matmul %117, %106, %cst_65 {dimension_numbers = #tpu.dot_dimension_numbers<[2], [1], [1], [2], [0, 0, 0, 1, 1, 2], [0], [0]>} : vector<2x32x32xbf16>, vector<2x32x32xbf16>, vector<2x32x32xf32> -> vector<2x32x32xf32>
    "tpu.trace_stop"() : () -> ()
    %119 = vector.shape_cast %118 : vector<2x32x32xf32> to vector<64x32xf32>
    %120 = arith.truncf %119 : vector<64x32xf32> to vector<64x32xbf16>
    %c1_66 = arith.constant 1 : index
    %c0_67 = arith.constant 0 : index
    %c0_68 = arith.constant 0 : index
    %121 = vector.load %arg10[%c1_66, %c0_67, %c0_68] : memref<4x32x128xbf16, #tpu.memory_space<vmem>>, vector<1x32x128xbf16>
    %122 = vector.shape_cast %121 : vector<1x32x128xbf16> to vector<32x128xbf16>
    %cst_69 = arith.constant dense<0.000000e+00> : vector<64x128xf32>
    %123 = tpu.matmul %120, %122, %cst_69 {dimension_numbers = #tpu.dot_dimension_numbers<[1], [0], [0], [1], [0, 0, 1, 1], [], []>} : vector<64x32xbf16>, vector<32x128xbf16>, vector<64x128xf32> -> vector<64x128xf32>
    %124 = arith.addf %77, %123 : vector<64x128xf32>
    %c2 = arith.constant 2 : index
    %c0_70 = arith.constant 0 : index
    %c0_71 = arith.constant 0 : index
    %125 = vector.load %arg4[%c2, %c0_70, %c0_71] : memref<4x128x32xbf16, #tpu.memory_space<vmem>>, vector<1x128x32xbf16>
    %126 = vector.shape_cast %125 : vector<1x128x32xbf16> to vector<128x32xbf16>
    %cst_72 = arith.constant dense<0.000000e+00> : vector<64x32xf32>
    %127 = tpu.matmul %29, %126, %cst_72 {dimension_numbers = #tpu.dot_dimension_numbers<[1], [0], [0], [1], [0, 0, 1, 1], [], []>} : vector<64x128xbf16>, vector<128x32xbf16>, vector<64x32xf32> -> vector<64x32xf32>
    %c2_73 = arith.constant 2 : index
    %c0_74 = arith.constant 0 : index
    %c0_75 = arith.constant 0 : index
    %128 = vector.load %arg5[%c2_73, %c0_74, %c0_75] : memref<4x1x32xf32, #tpu.memory_space<vmem>>, vector<1x1x32xf32>
    %129 = vector.shape_cast %128 : vector<1x1x32xf32> to vector<1x32xf32>
    %130 = vector.broadcast %129 : vector<1x32xf32> to vector<64x32xf32>
    %131 = arith.addf %127, %130 : vector<64x32xf32>
    %c2_76 = arith.constant 2 : index
    %c0_77 = arith.constant 0 : index
    %c0_78 = arith.constant 0 : index
    %132 = vector.load %arg6[%c2_76, %c0_77, %c0_78] : memref<4x128x32xbf16, #tpu.memory_space<vmem>>, vector<1x128x32xbf16>
    %133 = vector.shape_cast %132 : vector<1x128x32xbf16> to vector<128x32xbf16>
    %cst_79 = arith.constant dense<0.000000e+00> : vector<64x32xf32>
    %134 = tpu.matmul %29, %133, %cst_79 {dimension_numbers = #tpu.dot_dimension_numbers<[1], [0], [0], [1], [0, 0, 1, 1], [], []>} : vector<64x128xbf16>, vector<128x32xbf16>, vector<64x32xf32> -> vector<64x32xf32>
    %c2_80 = arith.constant 2 : index
    %c0_81 = arith.constant 0 : index
    %c0_82 = arith.constant 0 : index
    %135 = vector.load %arg7[%c2_80, %c0_81, %c0_82] : memref<4x1x32xf32, #tpu.memory_space<vmem>>, vector<1x1x32xf32>
    %136 = vector.shape_cast %135 : vector<1x1x32xf32> to vector<1x32xf32>
    %137 = vector.broadcast %136 : vector<1x32xf32> to vector<64x32xf32>
    %138 = arith.addf %134, %137 : vector<64x32xf32>
    %c2_83 = arith.constant 2 : index
    %c0_84 = arith.constant 0 : index
    %c0_85 = arith.constant 0 : index
    %139 = vector.load %arg8[%c2_83, %c0_84, %c0_85] : memref<4x128x32xbf16, #tpu.memory_space<vmem>>, vector<1x128x32xbf16>
    %140 = vector.shape_cast %139 : vector<1x128x32xbf16> to vector<128x32xbf16>
    %cst_86 = arith.constant dense<0.000000e+00> : vector<64x32xf32>
    %141 = tpu.matmul %29, %140, %cst_86 {dimension_numbers = #tpu.dot_dimension_numbers<[1], [0], [0], [1], [0, 0, 1, 1], [], []>} : vector<64x128xbf16>, vector<128x32xbf16>, vector<64x32xf32> -> vector<64x32xf32>
    %c2_87 = arith.constant 2 : index
    %c0_88 = arith.constant 0 : index
    %c0_89 = arith.constant 0 : index
    %142 = vector.load %arg9[%c2_87, %c0_88, %c0_89] : memref<4x1x32xf32, #tpu.memory_space<vmem>>, vector<1x1x32xf32>
    %143 = vector.shape_cast %142 : vector<1x1x32xf32> to vector<1x32xf32>
    %144 = vector.broadcast %143 : vector<1x32xf32> to vector<64x32xf32>
    %145 = arith.addf %141, %144 : vector<64x32xf32>
    %cst_90 = arith.constant 0.176776692 : f32
    %146 = vector.broadcast %cst_90 : f32 to vector<64x32xf32>
    %147 = arith.mulf %131, %146 : vector<64x32xf32>
    %148 = vector.shape_cast %147 : vector<64x32xf32> to vector<2x32x32xf32>
    %149 = arith.truncf %148 : vector<2x32x32xf32> to vector<2x32x32xbf16>
    %150 = vector.shape_cast %138 : vector<64x32xf32> to vector<2x32x32xf32>
    %151 = arith.truncf %150 : vector<2x32x32xf32> to vector<2x32x32xbf16>
    %152 = vector.shape_cast %145 : vector<64x32xf32> to vector<2x32x32xf32>
    %153 = arith.truncf %152 : vector<2x32x32xf32> to vector<2x32x32xbf16>
    "tpu.trace_start"() <{level = 10 : i32, message = "bqd,bkd->bqk"}> : () -> ()
    %cst_91 = arith.constant dense<0.000000e+00> : vector<2x32x32xf32>
    %154 = tpu.matmul %149, %151, %cst_91 {dimension_numbers = #tpu.dot_dimension_numbers<[2], [2], [1], [1], [0, 0, 0, 1, 1, 1], [0], [0]>} : vector<2x32x32xbf16>, vector<2x32x32xbf16>, vector<2x32x32xf32> -> vector<2x32x32xf32>
    "tpu.trace_stop"() : () -> ()
    %cst_92 = arith.constant dense<0xFF800000> : vector<2x32xf32>
    %155 = vector.multi_reduction <maximumf>, %154, %cst_92 [2] : vector<2x32x32xf32> to vector<2x32xf32>
    %156 = vector.shape_cast %155 : vector<2x32xf32> to vector<2x32x1xf32>
    %157 = vector.broadcast %156 : vector<2x32x1xf32> to vector<2x32x32xf32>
    %158 = arith.subf %154, %157 : vector<2x32x32xf32>
    %159 = math.exp %158 : vector<2x32x32xf32>
    %cst_93 = arith.constant dense<0.000000e+00> : vector<2x32xf32>
    %160 = vector.multi_reduction <add>, %159, %cst_93 [2] : vector<2x32x32xf32> to vector<2x32xf32>
    %161 = vector.shape_cast %160 : vector<2x32xf32> to vector<2x32x1xf32>
    %162 = vector.broadcast %161 : vector<2x32x1xf32> to vector<2x32x32xf32>
    %163 = arith.divf %159, %162 : vector<2x32x32xf32>
    %164 = arith.truncf %163 : vector<2x32x32xf32> to vector<2x32x32xbf16>
    "tpu.trace_start"() <{level = 10 : i32, message = "bqk,bkd->bqd"}> : () -> ()
    %cst_94 = arith.constant dense<0.000000e+00> : vector<2x32x32xf32>
    %165 = tpu.matmul %164, %153, %cst_94 {dimension_numbers = #tpu.dot_dimension_numbers<[2], [1], [1], [2], [0, 0, 0, 1, 1, 2], [0], [0]>} : vector<2x32x32xbf16>, vector<2x32x32xbf16>, vector<2x32x32xf32> -> vector<2x32x32xf32>
    "tpu.trace_stop"() : () -> ()
    %166 = vector.shape_cast %165 : vector<2x32x32xf32> to vector<64x32xf32>
    %167 = arith.truncf %166 : vector<64x32xf32> to vector<64x32xbf16>
    %c2_95 = arith.constant 2 : index
    %c0_96 = arith.constant 0 : index
    %c0_97 = arith.constant 0 : index
    %168 = vector.load %arg10[%c2_95, %c0_96, %c0_97] : memref<4x32x128xbf16, #tpu.memory_space<vmem>>, vector<1x32x128xbf16>
    %169 = vector.shape_cast %168 : vector<1x32x128xbf16> to vector<32x128xbf16>
    %cst_98 = arith.constant dense<0.000000e+00> : vector<64x128xf32>
    %170 = tpu.matmul %167, %169, %cst_98 {dimension_numbers = #tpu.dot_dimension_numbers<[1], [0], [0], [1], [0, 0, 1, 1], [], []>} : vector<64x32xbf16>, vector<32x128xbf16>, vector<64x128xf32> -> vector<64x128xf32>
    %171 = arith.addf %124, %170 : vector<64x128xf32>
    %c3 = arith.constant 3 : index
    %c0_99 = arith.constant 0 : index
    %c0_100 = arith.constant 0 : index
    %172 = vector.load %arg4[%c3, %c0_99, %c0_100] : memref<4x128x32xbf16, #tpu.memory_space<vmem>>, vector<1x128x32xbf16>
    %173 = vector.shape_cast %172 : vector<1x128x32xbf16> to vector<128x32xbf16>
    %cst_101 = arith.constant dense<0.000000e+00> : vector<64x32xf32>
    %174 = tpu.matmul %29, %173, %cst_101 {dimension_numbers = #tpu.dot_dimension_numbers<[1], [0], [0], [1], [0, 0, 1, 1], [], []>} : vector<64x128xbf16>, vector<128x32xbf16>, vector<64x32xf32> -> vector<64x32xf32>
    %c3_102 = arith.constant 3 : index
    %c0_103 = arith.constant 0 : index
    %c0_104 = arith.constant 0 : index
    %175 = vector.load %arg5[%c3_102, %c0_103, %c0_104] : memref<4x1x32xf32, #tpu.memory_space<vmem>>, vector<1x1x32xf32>
    %176 = vector.shape_cast %175 : vector<1x1x32xf32> to vector<1x32xf32>
    %177 = vector.broadcast %176 : vector<1x32xf32> to vector<64x32xf32>
    %178 = arith.addf %174, %177 : vector<64x32xf32>
    %c3_105 = arith.constant 3 : index
    %c0_106 = arith.constant 0 : index
    %c0_107 = arith.constant 0 : index
    %179 = vector.load %arg6[%c3_105, %c0_106, %c0_107] : memref<4x128x32xbf16, #tpu.memory_space<vmem>>, vector<1x128x32xbf16>
    %180 = vector.shape_cast %179 : vector<1x128x32xbf16> to vector<128x32xbf16>
    %cst_108 = arith.constant dense<0.000000e+00> : vector<64x32xf32>
    %181 = tpu.matmul %29, %180, %cst_108 {dimension_numbers = #tpu.dot_dimension_numbers<[1], [0], [0], [1], [0, 0, 1, 1], [], []>} : vector<64x128xbf16>, vector<128x32xbf16>, vector<64x32xf32> -> vector<64x32xf32>
    %c3_109 = arith.constant 3 : index
    %c0_110 = arith.constant 0 : index
    %c0_111 = arith.constant 0 : index
    %182 = vector.load %arg7[%c3_109, %c0_110, %c0_111] : memref<4x1x32xf32, #tpu.memory_space<vmem>>, vector<1x1x32xf32>
    %183 = vector.shape_cast %182 : vector<1x1x32xf32> to vector<1x32xf32>
    %184 = vector.broadcast %183 : vector<1x32xf32> to vector<64x32xf32>
    %185 = arith.addf %181, %184 : vector<64x32xf32>
    %c3_112 = arith.constant 3 : index
    %c0_113 = arith.constant 0 : index
    %c0_114 = arith.constant 0 : index
    %186 = vector.load %arg8[%c3_112, %c0_113, %c0_114] : memref<4x128x32xbf16, #tpu.memory_space<vmem>>, vector<1x128x32xbf16>
    %187 = vector.shape_cast %186 : vector<1x128x32xbf16> to vector<128x32xbf16>
    %cst_115 = arith.constant dense<0.000000e+00> : vector<64x32xf32>
    %188 = tpu.matmul %29, %187, %cst_115 {dimension_numbers = #tpu.dot_dimension_numbers<[1], [0], [0], [1], [0, 0, 1, 1], [], []>} : vector<64x128xbf16>, vector<128x32xbf16>, vector<64x32xf32> -> vector<64x32xf32>
    %c3_116 = arith.constant 3 : index
    %c0_117 = arith.constant 0 : index
    %c0_118 = arith.constant 0 : index
    %189 = vector.load %arg9[%c3_116, %c0_117, %c0_118] : memref<4x1x32xf32, #tpu.memory_space<vmem>>, vector<1x1x32xf32>
    %190 = vector.shape_cast %189 : vector<1x1x32xf32> to vector<1x32xf32>
    %191 = vector.broadcast %190 : vector<1x32xf32> to vector<64x32xf32>
    %192 = arith.addf %188, %191 : vector<64x32xf32>
    %cst_119 = arith.constant 0.176776692 : f32
    %193 = vector.broadcast %cst_119 : f32 to vector<64x32xf32>
    %194 = arith.mulf %178, %193 : vector<64x32xf32>
    %195 = vector.shape_cast %194 : vector<64x32xf32> to vector<2x32x32xf32>
    %196 = arith.truncf %195 : vector<2x32x32xf32> to vector<2x32x32xbf16>
    %197 = vector.shape_cast %185 : vector<64x32xf32> to vector<2x32x32xf32>
    %198 = arith.truncf %197 : vector<2x32x32xf32> to vector<2x32x32xbf16>
    %199 = vector.shape_cast %192 : vector<64x32xf32> to vector<2x32x32xf32>
    %200 = arith.truncf %199 : vector<2x32x32xf32> to vector<2x32x32xbf16>
    "tpu.trace_start"() <{level = 10 : i32, message = "bqd,bkd->bqk"}> : () -> ()
    %cst_120 = arith.constant dense<0.000000e+00> : vector<2x32x32xf32>
    %201 = tpu.matmul %196, %198, %cst_120 {dimension_numbers = #tpu.dot_dimension_numbers<[2], [2], [1], [1], [0, 0, 0, 1, 1, 1], [0], [0]>} : vector<2x32x32xbf16>, vector<2x32x32xbf16>, vector<2x32x32xf32> -> vector<2x32x32xf32>
    "tpu.trace_stop"() : () -> ()
    %cst_121 = arith.constant dense<0xFF800000> : vector<2x32xf32>
    %202 = vector.multi_reduction <maximumf>, %201, %cst_121 [2] : vector<2x32x32xf32> to vector<2x32xf32>
    %203 = vector.shape_cast %202 : vector<2x32xf32> to vector<2x32x1xf32>
    %204 = vector.broadcast %203 : vector<2x32x1xf32> to vector<2x32x32xf32>
    %205 = arith.subf %201, %204 : vector<2x32x32xf32>
    %206 = math.exp %205 : vector<2x32x32xf32>
    %cst_122 = arith.constant dense<0.000000e+00> : vector<2x32xf32>
    %207 = vector.multi_reduction <add>, %206, %cst_122 [2] : vector<2x32x32xf32> to vector<2x32xf32>
    %208 = vector.shape_cast %207 : vector<2x32xf32> to vector<2x32x1xf32>
    %209 = vector.broadcast %208 : vector<2x32x1xf32> to vector<2x32x32xf32>
    %210 = arith.divf %206, %209 : vector<2x32x32xf32>
    %211 = arith.truncf %210 : vector<2x32x32xf32> to vector<2x32x32xbf16>
    "tpu.trace_start"() <{level = 10 : i32, message = "bqk,bkd->bqd"}> : () -> ()
    %cst_123 = arith.constant dense<0.000000e+00> : vector<2x32x32xf32>
    %212 = tpu.matmul %211, %200, %cst_123 {dimension_numbers = #tpu.dot_dimension_numbers<[2], [1], [1], [2], [0, 0, 0, 1, 1, 2], [0], [0]>} : vector<2x32x32xbf16>, vector<2x32x32xbf16>, vector<2x32x32xf32> -> vector<2x32x32xf32>
    "tpu.trace_stop"() : () -> ()
    %213 = vector.shape_cast %212 : vector<2x32x32xf32> to vector<64x32xf32>
    %214 = arith.truncf %213 : vector<64x32xf32> to vector<64x32xbf16>
    %c3_124 = arith.constant 3 : index
    %c0_125 = arith.constant 0 : index
    %c0_126 = arith.constant 0 : index
    %215 = vector.load %arg10[%c3_124, %c0_125, %c0_126] : memref<4x32x128xbf16, #tpu.memory_space<vmem>>, vector<1x32x128xbf16>
    %216 = vector.shape_cast %215 : vector<1x32x128xbf16> to vector<32x128xbf16>
    %cst_127 = arith.constant dense<0.000000e+00> : vector<64x128xf32>
    %217 = tpu.matmul %214, %216, %cst_127 {dimension_numbers = #tpu.dot_dimension_numbers<[1], [0], [0], [1], [0, 0, 1, 1], [], []>} : vector<64x32xbf16>, vector<32x128xbf16>, vector<64x128xf32> -> vector<64x128xf32>
    %218 = arith.addf %171, %217 : vector<64x128xf32>
    %c0_128 = arith.constant 0 : index
    %c0_129 = arith.constant 0 : index
    %219 = vector.load %arg11[%c0_128, %c0_129] : memref<1x128xf32, #tpu.memory_space<vmem>>, vector<1x128xf32>
    %220 = vector.broadcast %219 : vector<1x128xf32> to vector<64x128xf32>
    %221 = arith.addf %218, %220 : vector<64x128xf32>
    %222 = vector.shape_cast %221 : vector<64x128xf32> to vector<2x32x128xf32>
    %223 = arith.addf %1, %222 : vector<2x32x128xf32>
    %c0_130 = arith.constant 0 : index
    %c0_131 = arith.constant 0 : index
    %224 = vector.load %arg12[%c0_130, %c0_131] : memref<1x128xf32, #tpu.memory_space<vmem>>, vector<1x128xf32>
    %c0_132 = arith.constant 0 : index
    %c0_133 = arith.constant 0 : index
    %225 = vector.load %arg13[%c0_132, %c0_133] : memref<1x128xf32, #tpu.memory_space<vmem>>, vector<1x128xf32>
    %cst_134 = arith.constant dense<0.000000e+00> : vector<2x32xf32>
    %226 = vector.multi_reduction <add>, %223, %cst_134 [2] : vector<2x32x128xf32> to vector<2x32xf32>
    %227 = vector.shape_cast %226 : vector<2x32xf32> to vector<2x32x1xf32>
    %cst_135 = arith.constant 1.280000e+02 : f32
    %228 = vector.broadcast %cst_135 : f32 to vector<2x32x1xf32>
    %229 = arith.divf %227, %228 : vector<2x32x1xf32>
    %230 = vector.broadcast %229 : vector<2x32x1xf32> to vector<2x32x128xf32>
    %231 = arith.subf %223, %230 : vector<2x32x128xf32>
    %232 = arith.mulf %231, %231 : vector<2x32x128xf32>
    %cst_136 = arith.constant dense<0.000000e+00> : vector<2x32xf32>
    %233 = vector.multi_reduction <add>, %232, %cst_136 [2] : vector<2x32x128xf32> to vector<2x32xf32>
    %234 = vector.shape_cast %233 : vector<2x32xf32> to vector<2x32x1xf32>
    %cst_137 = arith.constant 1.280000e+02 : f32
    %235 = vector.broadcast %cst_137 : f32 to vector<2x32x1xf32>
    %236 = arith.divf %234, %235 : vector<2x32x1xf32>
    %237 = vector.broadcast %229 : vector<2x32x1xf32> to vector<2x32x128xf32>
    %238 = arith.subf %223, %237 : vector<2x32x128xf32>
    %cst_138 = arith.constant 9.99999974E-6 : f32
    %239 = vector.broadcast %cst_138 : f32 to vector<2x32x1xf32>
    %240 = arith.addf %236, %239 : vector<2x32x1xf32>
    %241 = math.rsqrt %240 : vector<2x32x1xf32>
    %242 = vector.broadcast %241 : vector<2x32x1xf32> to vector<2x32x128xf32>
    %243 = arith.mulf %238, %242 : vector<2x32x128xf32>
    %244 = vector.shape_cast %224 : vector<1x128xf32> to vector<1x1x128xf32>
    %245 = vector.broadcast %244 : vector<1x1x128xf32> to vector<2x32x128xf32>
    %246 = arith.mulf %243, %245 : vector<2x32x128xf32>
    %247 = vector.shape_cast %225 : vector<1x128xf32> to vector<1x1x128xf32>
    %248 = vector.broadcast %247 : vector<1x1x128xf32> to vector<2x32x128xf32>
    %249 = arith.addf %246, %248 : vector<2x32x128xf32>
    %250 = vector.shape_cast %249 : vector<2x32x128xf32> to vector<64x128xf32>
    %251 = arith.truncf %250 : vector<64x128xf32> to vector<64x128xbf16>
    %c0_139 = arith.constant 0 : index
    %c0_140 = arith.constant 0 : index
    %252 = vector.load %arg14[%c0_139, %c0_140] : memref<128x512xbf16, #tpu.memory_space<vmem>>, vector<128x512xbf16>
    %cst_141 = arith.constant dense<0.000000e+00> : vector<64x512xf32>
    %253 = tpu.matmul %251, %252, %cst_141 {dimension_numbers = #tpu.dot_dimension_numbers<[1], [0], [0], [1], [0, 0, 1, 1], [], []>} : vector<64x128xbf16>, vector<128x512xbf16>, vector<64x512xf32> -> vector<64x512xf32>
    %c0_142 = arith.constant 0 : index
    %c0_143 = arith.constant 0 : index
    %254 = vector.load %arg15[%c0_142, %c0_143] : memref<1x512xf32, #tpu.memory_space<vmem>>, vector<1x512xf32>
    %255 = vector.broadcast %254 : vector<1x512xf32> to vector<64x512xf32>
    %256 = arith.addf %253, %255 : vector<64x512xf32>
    %257 = arith.mulf %256, %256 : vector<64x512xf32>
    %258 = arith.mulf %256, %257 : vector<64x512xf32>
    %cst_144 = arith.constant 4.471500e-02 : f32
    %259 = vector.broadcast %cst_144 : f32 to vector<64x512xf32>
    %260 = arith.mulf %259, %258 : vector<64x512xf32>
    %261 = arith.addf %256, %260 : vector<64x512xf32>
    %cst_145 = arith.constant 0.797884583 : f32
    %262 = vector.broadcast %cst_145 : f32 to vector<64x512xf32>
    %263 = arith.mulf %262, %261 : vector<64x512xf32>
    %264 = math.tanh %263 : vector<64x512xf32>
    %cst_146 = arith.constant 1.000000e+00 : f32
    %265 = vector.broadcast %cst_146 : f32 to vector<64x512xf32>
    %266 = arith.addf %265, %264 : vector<64x512xf32>
    %cst_147 = arith.constant 5.000000e-01 : f32
    %267 = vector.broadcast %cst_147 : f32 to vector<64x512xf32>
    %268 = arith.mulf %267, %266 : vector<64x512xf32>
    %269 = arith.mulf %256, %268 : vector<64x512xf32>
    %270 = arith.truncf %269 : vector<64x512xf32> to vector<64x512xbf16>
    %c0_148 = arith.constant 0 : index
    %c0_149 = arith.constant 0 : index
    %271 = vector.load %arg16[%c0_148, %c0_149] : memref<512x128xbf16, #tpu.memory_space<vmem>>, vector<512x128xbf16>
    %cst_150 = arith.constant dense<0.000000e+00> : vector<64x128xf32>
    %272 = tpu.matmul %270, %271, %cst_150 {dimension_numbers = #tpu.dot_dimension_numbers<[1], [0], [0], [1], [0, 0, 1, 1], [], []>} : vector<64x512xbf16>, vector<512x128xbf16>, vector<64x128xf32> -> vector<64x128xf32>
    %c0_151 = arith.constant 0 : index
    %c0_152 = arith.constant 0 : index
    %273 = vector.load %arg17[%c0_151, %c0_152] : memref<1x128xf32, #tpu.memory_space<vmem>>, vector<1x128xf32>
    %274 = vector.broadcast %273 : vector<1x128xf32> to vector<64x128xf32>
    %275 = arith.addf %272, %274 : vector<64x128xf32>
    %276 = vector.shape_cast %275 : vector<64x128xf32> to vector<2x32x128xf32>
    %277 = arith.addf %223, %276 : vector<2x32x128xf32>
    %278 = arith.truncf %277 : vector<2x32x128xf32> to vector<2x32x128xbf16>
    %c0_153 = arith.constant 0 : index
    %c0_154 = arith.constant 0 : index
    %c0_155 = arith.constant 0 : index
    %279 = vector.load %arg18[%c0_153, %c0_154, %c0_155] : memref<2x32x128xbf16, #tpu.memory_space<vmem>>, vector<2x32x128xbf16>
    tpu.vector_store %arg18[%c0_153, %c0_154, %c0_155], %278 {strides = array<i32>} : memref<2x32x128xbf16, #tpu.memory_space<vmem>>, vector<2x32x128xbf16>,
    return
  }
  func.func @transform_0(%arg0: i32) -> (i32, i32, i32) {
    %c0_i32 = arith.constant 0 : i32
    %c0_i32_0 = arith.constant 0 : i32
    %c0_i32_1 = arith.constant 0 : i32
    return %arg0, %c0_i32, %c0_i32_0 : i32, i32, i32
  }
  func.func @transform_1(%arg0: i32) -> (i32, i32) {
    %c0_i32 = arith.constant 0 : i32
    %c0_i32_0 = arith.constant 0 : i32
    %c0_i32_1 = arith.constant 0 : i32
    return %c0_i32, %c0_i32_0 : i32, i32
  }
  func.func @transform_2(%arg0: i32) -> (i32, i32) {
    %c0_i32 = arith.constant 0 : i32
    %c0_i32_0 = arith.constant 0 : i32
    %c0_i32_1 = arith.constant 0 : i32
    return %c0_i32, %c0_i32_0 : i32, i32
  }
  func.func @transform_3(%arg0: i32) -> (i32, i32, i32) {
    %c0_i32 = arith.constant 0 : i32
    %c0_i32_0 = arith.constant 0 : i32
    %c0_i32_1 = arith.constant 0 : i32
    %c0_i32_2 = arith.constant 0 : i32
    return %c0_i32, %c0_i32_0, %c0_i32_1 : i32, i32, i32
  }
  func.func @transform_4(%arg0: i32) -> (i32, i32, i32) {
    %c0_i32 = arith.constant 0 : i32
    %c0_i32_0 = arith.constant 0 : i32
    %c0_i32_1 = arith.constant 0 : i32
    %c0_i32_2 = arith.constant 0 : i32
    return %c0_i32, %c0_i32_0, %c0_i32_1 : i32, i32, i32
  }
  func.func @transform_5(%arg0: i32) -> (i32, i32, i32) {
    %c0_i32 = arith.constant 0 : i32
    %c0_i32_0 = arith.constant 0 : i32
    %c0_i32_1 = arith.constant 0 : i32
    %c0_i32_2 = arith.constant 0 : i32
    return %c0_i32, %c0_i32_0, %c0_i32_1 : i32, i32, i32
  }
  func.func @transform_6(%arg0: i32) -> (i32, i32, i32) {
    %c0_i32 = arith.constant 0 : i32
    %c0_i32_0 = arith.constant 0 : i32
    %c0_i32_1 = arith.constant 0 : i32
    %c0_i32_2 = arith.constant 0 : i32
    return %c0_i32, %c0_i32_0, %c0_i32_1 : i32, i32, i32
  }
  func.func @transform_7(%arg0: i32) -> (i32, i32, i32) {
    %c0_i32 = arith.constant 0 : i32
    %c0_i32_0 = arith.constant 0 : i32
    %c0_i32_1 = arith.constant 0 : i32
    %c0_i32_2 = arith.constant 0 : i32
    return %c0_i32, %c0_i32_0, %c0_i32_1 : i32, i32, i32
  }
  func.func @transform_8(%arg0: i32) -> (i32, i32, i32) {
    %c0_i32 = arith.constant 0 : i32
    %c0_i32_0 = arith.constant 0 : i32
    %c0_i32_1 = arith.constant 0 : i32
    %c0_i32_2 = arith.constant 0 : i32
    return %c0_i32, %c0_i32_0, %c0_i32_1 : i32, i32, i32
  }
  func.func @transform_9(%arg0: i32) -> (i32, i32, i32) {
    %c0_i32 = arith.constant 0 : i32
    %c0_i32_0 = arith.constant 0 : i32
    %c0_i32_1 = arith.constant 0 : i32
    %c0_i32_2 = arith.constant 0 : i32
    return %c0_i32, %c0_i32_0, %c0_i32_1 : i32, i32, i32
  }
  func.func @transform_10(%arg0: i32) -> (i32, i32) {
    %c0_i32 = arith.constant 0 : i32
    %c0_i32_0 = arith.constant 0 : i32
    %c0_i32_1 = arith.constant 0 : i32
    return %c0_i32, %c0_i32_0 : i32, i32
  }
  func.func @transform_11(%arg0: i32) -> (i32, i32) {
    %c0_i32 = arith.constant 0 : i32
    %c0_i32_0 = arith.constant 0 : i32
    %c0_i32_1 = arith.constant 0 : i32
    return %c0_i32, %c0_i32_0 : i32, i32
  }
  func.func @transform_12(%arg0: i32) -> (i32, i32) {
    %c0_i32 = arith.constant 0 : i32
    %c0_i32_0 = arith.constant 0 : i32
    %c0_i32_1 = arith.constant 0 : i32
    return %c0_i32, %c0_i32_0 : i32, i32
  }
  func.func @transform_13(%arg0: i32) -> (i32, i32) {
    %c0_i32 = arith.constant 0 : i32
    %c0_i32_0 = arith.constant 0 : i32
    %c0_i32_1 = arith.constant 0 : i32
    return %c0_i32, %c0_i32_0 : i32, i32
  }
  func.func @transform_14(%arg0: i32) -> (i32, i32) {
    %c0_i32 = arith.constant 0 : i32
    %c0_i32_0 = arith.constant 0 : i32
    %c0_i32_1 = arith.constant 0 : i32
    return %c0_i32, %c0_i32_0 : i32, i32
  }
  func.func @transform_15(%arg0: i32) -> (i32, i32) {
    %c0_i32 = arith.constant 0 : i32
    %c0_i32_0 = arith.constant 0 : i32
    %c0_i32_1 = arith.constant 0 : i32
    return %c0_i32, %c0_i32_0 : i32, i32
  }
  func.func @transform_16(%arg0: i32) -> (i32, i32) {
    %c0_i32 = arith.constant 0 : i32
    %c0_i32_0 = arith.constant 0 : i32
    %c0_i32_1 = arith.constant 0 : i32
    return %c0_i32, %c0_i32_0 : i32, i32
  }
  func.func @transform_17(%arg0: i32) -> (i32, i32, i32) {
    %c0_i32 = arith.constant 0 : i32
    %c0_i32_0 = arith.constant 0 : i32
    %c0_i32_1 = arith.constant 0 : i32
    return %arg0, %c0_i32, %c0_i32_0 : i32, i32, i32
  }
}

</mosaic_0001>

<bundles_post_ra>
// kernel: forward.7
= control target key start
LH: loop header
LB: loop body
LE: loop exit
PB: predicated region body
PF: predicated region fallthrough
CT: control target
= control target key end

     0   :  { %s1316_s0 = inlined_call_operand.vmem [shape: bf16[2,64,128], index: 0, kind: input, shape index: {}]   ;;  %s1317_s1 = inlined_call_operand.vmem [shape: f32[1,128], index: 1, kind: input, shape index: {}]   ;;  %s1318_s2 = inlined_call_operand.vmem [shape: f32[1,128], index: 2, kind: input, shape index: {}]   ;;  %s1319_s3 = inlined_call_operand.vmem [shape: bf16[128,60], index: 3, kind: input, shape index: {}]   ;;  %s1320_s4 = inlined_call_operand.vmem [shape: f32[1,60], index: 4, kind: input, shape index: {}]   ;;  %s1321_s5 = inlined_call_operand.hbm [shape: f32[2,60], index: 5, kind: output, shape index: {}]  }
   0x1   :  { %v747_v0 = vld [vmem:[%s1316_s0 + $0x20] sm:$0xff]   ;;  %v752_v1 = vld [vmem:[%s1316_s0 + $0x8] sm:$0xff]  }
   0x2   :  { %v757_v2 = vld [vmem:[%s1316_s0] sm:$0xff]   ;;  %v622_v3 = vunpack.c.l.bf16 %v747_v0  ;;  %v610_v4 = vunpack.c.l.bf16 %v752_v1 }
   0x3   :  { %v606_v5 = vunpack.c.l.bf16 %v757_v2 }
   0x4   :  { %71 = vadd.xlane.f32.xlu1 %v622_v3  ;;  %59 = vadd.xlane.f32.xlu2 %v610_v4 }
   0x5   :  { %10 = vsyncpa [#allocation3], 0  ;;  %55 = vadd.xlane.f32.xlu0 %v606_v5  ;;  %v767_v6 = vld [vmem:[%s1316_s0 + $0x28] sm:$0xff]   ;;  %v623_v7 = vunpack.c.h.bf16 %v747_v0  ;;  %v607_v9 = vunpack.c.h.bf16 %v757_v2  ;;  %v775_v10 = vld [vmem:[%s1316_s0 + $0x10] sm:$0xff]   ;;  %v611_v13 = vunpack.c.h.bf16 %v752_v1  ;;  %v711_v24 = vmov 128.0   ;;  %s713_s27 = smov [#allocation2]  }
   0x6   :  { %v626_v8 = vunpack.c.l.bf16 %v767_v6  ;;  %v614_v11 = vunpack.c.l.bf16 %v775_v10  ;;  %v627_v12 = vunpack.c.h.bf16 %v767_v6  ;;  %v789_v14 = vld [vmem:[%s1316_s0 + $0x30] sm:$0xff]   ;;  %v615_v16 = vunpack.c.h.bf16 %v775_v10  ;;  %v803_v18 = vld [vmem:[%s1316_s0 + $0x18] sm:$0xff]   ;;  %s553_s28 = sshll.u32 %s713_s27, 4  ;;  %s555_s6 = sshll.u32 %s1321_s5, 4  ;;  %s554_s28 = int_to_ptr.vmem [resolvable:$true] %s553_s28  ;;  %s556_s6 = int_to_ptr.hbm [resolvable:$true] %s555_s6 }
   0x7   :  { %v631_v15 = vunpack.c.h.bf16 %v789_v14  ;;  %v630_v17 = vunpack.c.l.bf16 %v789_v14  ;;  %v808_v19 = vld [vmem:[%s1316_s0 + $0x38] sm:$0xff]   ;;  %v619_v20 = vunpack.c.h.bf16 %v803_v18  ;;  %v618_v22 = vunpack.c.l.bf16 %v803_v18 }
   0x8   :  { %v634_v21 = vunpack.c.l.bf16 %v808_v19  ;;  %v635_v23 = vunpack.c.h.bf16 %v808_v19  ;;  %649 = vrcp.f32 %v711_v24 }
   0xc   :  { %73 = vadd.xlane.f32.xlu1 %v623_v7  ;;  %75 = vadd.xlane.f32.xlu2 %v626_v8 }
   0xd   :  { %57 = vadd.xlane.f32.xlu0 %v607_v9 }
   0xe   :  { %v650_v25 = vpop.eup %649 }
   0xf   :  { %v88_v26 = vmul.f32 128.0, %v650_v25  ;;  %vm92_vm0 = vweird.f32 %v650_v25 }
  0x11   :  { %v89_v27 = vsub.f32 1.0, %v88_v26 }
  0x13   :  { %v90_v28 = vmul.f32 %v650_v25, %v89_v27 }
  0x14   :  { %63 = vadd.xlane.f32.xlu2 %v614_v11  ;;  %77 = vadd.xlane.f32.xlu1 %v627_v12 }
  0x15   :  { %61 = vadd.xlane.f32.xlu0 %v611_v13  ;;  %v91_v29 = vadd.f32 %v650_v25, %v90_v28 }
  0x17   :  { %v822_v30 = vsel %vm92_vm0, %v650_v25, %v91_v29 }
  0x1c   :  { %81 = vadd.xlane.f32.xlu2 %v631_v15  ;;  %65 = vadd.xlane.f32.xlu1 %v615_v16 }
  0x1d   :  { %79 = vadd.xlane.f32.xlu0 %v630_v17 }
  0x24   :  { %69 = vadd.xlane.f32.xlu2 %v619_v20  ;;  %83 = vadd.xlane.f32.xlu1 %v634_v21 }
  0x25   :  { %67 = vadd.xlane.f32.xlu0 %v618_v22 }
  0x2d   :  { %85 = vadd.xlane.f32.xlu0 %v635_v23 }
  0x77   :  { %v72_v31 = vpop.xlane.xlu1 %71  ;;  %v60_v32 = vpop.xlane.xlu2 %59 }
  0x78   :  { %v102_v33 = vmul.f32 %v822_v30, %v72_v31  ;;  %v56_v34 = vpop.xlane.xlu0 %55  ;;  %v96_v51 = vmul.f32 %v822_v30, %v60_v32 }
  0x79   :  { %v94_v35 = vmul.f32 %v822_v30, %v56_v34 }
  0x7a   :  { %v826_v36 = vsub.f32 %v622_v3, %v102_v33  ;;  %v853_v57 = vsub.f32 %v610_v4, %v96_v51 }
  0x7b   :  { %v828_v37 = vsub.f32 %v606_v5, %v94_v35 }
  0x7c   :  { %v134_v38 = vmul.f32 %v826_v36, %v826_v36  ;;  %v128_v63 = vmul.f32 %v853_v57, %v853_v57 }
  0x7d   :  { %v126_v39 = vmul.f32 %v828_v37, %v828_v37 }
  0x7e   :  { %158 = vadd.xlane.f32.xlu0 %v134_v38 }
  0x7f   :  { %142 = vadd.xlane.f32.xlu1 %v126_v39  ;;  %v74_v40 = vpop.xlane.xlu1 %73  ;;  %v76_v41 = vpop.xlane.xlu2 %75 }
  0x80   :  { %v103_v42 = vmul.f32 %v822_v30, %v74_v40  ;;  %v104_v43 = vmul.f32 %v822_v30, %v76_v41  ;;  %v58_v44 = vpop.xlane.xlu0 %57 }
  0x81   :  { %v95_v45 = vmul.f32 %v822_v30, %v58_v44 }
  0x82   :  { %v837_v46 = vsub.f32 %v623_v7, %v103_v42  ;;  %v839_v47 = vsub.f32 %v626_v8, %v104_v43 }
  0x83   :  { %v841_v48 = vsub.f32 %v607_v9, %v95_v45 }
  0x84   :  { %v136_v49 = vmul.f32 %v839_v47, %v839_v47  ;;  %v135_v50 = vmul.f32 %v837_v46, %v837_v46 }
  0x85   :  { %v127_v52 = vmul.f32 %v841_v48, %v841_v48 }
  0x86   :  { %162 = vadd.xlane.f32.xlu0 %v136_v49 }
  0x87   :  { %160 = vadd.xlane.f32.xlu1 %v135_v50  ;;  %144 = vadd.xlane.f32.xlu2 %v127_v52  ;;  %v64_v53 = vpop.xlane.xlu2 %63  ;;  %v78_v54 = vpop.xlane.xlu1 %77 }
  0x88   :  { %v98_v55 = vmul.f32 %v822_v30, %v64_v53  ;;  %v62_v56 = vpop.xlane.xlu0 %61  ;;  %v105_v61 = vmul.f32 %v822_v30, %v78_v54 }
  0x89   :  { %v97_v58 = vmul.f32 %v822_v30, %v62_v56 }
  0x8a   :  { %v858_v59 = vsub.f32 %v614_v11, %v98_v55  ;;  %v873_v2 = vsub.f32 %v627_v12, %v105_v61 }
  0x8b   :  { %v862_v60 = vsub.f32 %v611_v13, %v97_v58 }
  0x8c   :  { %v130_v62 = vmul.f32 %v858_v59, %v858_v59  ;;  %v137_v6 = vmul.f32 %v873_v2, %v873_v2 }
  0x8d   :  { %v129_v0 = vmul.f32 %v862_v60, %v862_v60 }
  0x8e   :  { %150 = vadd.xlane.f32.xlu0 %v130_v62 }
  0x8f   :  { %146 = vadd.xlane.f32.xlu2 %v128_v63  ;;  %148 = vadd.xlane.f32.xlu1 %v129_v0  ;;  %v82_v1 = vpop.xlane.xlu2 %81  ;;  %v66_v3 = vpop.xlane.xlu1 %65 }
  0x90   :  { %v107_v4 = vmul.f32 %v822_v30, %v82_v1  ;;  %v80_v5 = vpop.xlane.xlu0 %79  ;;  %v99_v11 = vmul.f32 %v822_v30, %v66_v3 }
  0x91   :  { %v106_v7 = vmul.f32 %v822_v30, %v80_v5 }
  0x92   :  { %v879_v8 = vsub.f32 %v631_v15, %v107_v4  ;;  %v894_v15 = vsub.f32 %v615_v16, %v99_v11 }
  0x93   :  { %v883_v9 = vsub.f32 %v630_v17, %v106_v7 }
  0x94   :  { %v139_v12 = vmul.f32 %v879_v8, %v879_v8  ;;  %v131_v10 = vmul.f32 %v894_v15, %v894_v15 }
  0x95   :  { %v138_v13 = vmul.f32 %v883_v9, %v883_v9 }
  0x96   :  { %168 = vadd.xlane.f32.xlu0 %v139_v12 }
  0x97   :  { %164 = vadd.xlane.f32.xlu2 %v137_v6  ;;  %166 = vadd.xlane.f32.xlu1 %v138_v13  ;;  %v70_v14 = vpop.xlane.xlu2 %69  ;;  %v84_v25 = vpop.xlane.xlu1 %83 }
  0x98   :  { %v101_v17 = vmul.f32 %v822_v30, %v70_v14  ;;  %v68_v24 = vpop.xlane.xlu0 %67  ;;  %v108_v16 = vmul.f32 %v822_v30, %v84_v25 }
  0x99   :  { %v100_v26 = vmul.f32 %v822_v30, %v68_v24 }
  0x9a   :  { %v900_v27 = vsub.f32 %v619_v20, %v101_v17  ;;  %v915_v20 = vsub.f32 %v634_v21, %v108_v16 }
  0x9b   :  { %v904_v28 = vsub.f32 %v618_v22, %v100_v26 }
  0x9c   :  { %v133_v29 = vmul.f32 %v900_v27, %v900_v27  ;;  %v140_v33 = vmul.f32 %v915_v20, %v915_v20 }
  0x9d   :  { %v132_v31 = vmul.f32 %v904_v28, %v904_v28 }
  0x9e   :  { %156 = vadd.xlane.f32.xlu0 %v133_v29 }
  0x9f   :  { %152 = vadd.xlane.f32.xlu2 %v131_v10  ;;  %154 = vadd.xlane.f32.xlu1 %v132_v31 }
  0xa0   :  { %v86_v18 = vpop.xlane.xlu0 %85 }
  0xa1   :  { %v109_v22 = vmul.f32 %v822_v30, %v86_v18 }
  0xa3   :  { %v920_v32 = vsub.f32 %v635_v23, %v109_v22 }
  0xa5   :  { %v141_v34 = vmul.f32 %v920_v32, %v920_v32 }
  0xa7   :  { %170 = vadd.xlane.f32.xlu2 %v140_v33  ;;  %172 = vadd.xlane.f32.xlu1 %v141_v34 }
  0xf1   :  { %v159_v35 = vpop.xlane.xlu0 %158 }
  0xf2   :  { %v143_v38 = vpop.xlane.xlu1 %142  ;;  %v182_v21 = vmul.f32 %v159_v35, %v822_v30 }
  0xf3   :  { %v174_v39 = vmul.f32 %v143_v38, %v822_v30 }
  0xf4   :  { %v198_v40 = vadd.f32 1e-05, %v182_v21 }
  0xf5   :  { %v928_v41 = vadd.f32 1e-05, %v174_v39 }
  0xf6   :  { %651 = vrsqrt.f32 %v198_v40  ;;  %vm292_vm2 = vweird.f32 %v198_v40 }
  0xf7   :  { %653 = vrsqrt.f32 %v928_v41  ;;  %vm212_vm3 = vweird.f32 %v928_v41 }
  0xf9   :  { %v163_v19 = vpop.xlane.xlu0 %162 }
  0xfa   :  { %v161_v23 = vpop.xlane.xlu1 %160  ;;  %v145_v42 = vpop.xlane.xlu2 %144  ;;  %v184_v43 = vmul.f32 %v163_v19, %v822_v30 }
  0xfb   :  { %v183_v44 = vmul.f32 %v161_v23, %v822_v30  ;;  %v175_v45 = vmul.f32 %v145_v42, %v822_v30 }
  0xfc   :  { %v934_v49 = vpop.eup %651  ;;  %v936_v50 = vadd.f32 1e-05, %v184_v43 }
  0xfd   :  { %v938_v51 = vpop.eup %653  ;;  %v287_v52 = vmul.f32 %v934_v49, %v198_v40  ;;  %v941_v53 = vadd.f32 1e-05, %v183_v44  ;;  %v943_v54 = vadd.f32 1e-05, %v175_v45  ;;  %vm293_vm1 = vweird.f32 %v934_v49 }
  0xfe   :  { %v207_v55 = vmul.f32 %v938_v51, %v928_v41  ;;  %655 = vrsqrt.f32 %v936_v50  ;;  %vm213_vm4 = vweird.f32 %v938_v51  ;;  %vm985_vm5 = vmor %vm292_vm2, %vm293_vm1  ;;  %vm312_vm13 = vweird.f32 %v936_v50 }
  0xff   :  { %v288_v56 = vmul.f32 %v934_v49, %v287_v52  ;;  %657 = vrsqrt.f32 %v941_v53  ;;  %vm302_vm6 = vweird.f32 %v941_v53  ;;  %vm1009_vm9 = vmor %vm212_vm3, %vm213_vm4  ;;  %vm222_vm10 = vweird.f32 %v943_v54 }
 0x100   :  { %659 = vrsqrt.f32 %v943_v54  ;;  %v208_v58 = vmul.f32 %v938_v51, %v207_v55 }
 0x101   :  { %v151_v61 = vpop.xlane.xlu0 %150  ;;  %v289_v62 = vmul.f32 0.5, %v288_v56 }
 0x102   :  { %v147_v63 = vpop.xlane.xlu2 %146  ;;  %v149_v0 = vpop.xlane.xlu1 %148  ;;  %v178_v4 = vmul.f32 %v151_v61, %v822_v30  ;;  %v209_v6 = vmul.f32 0.5, %v208_v58 }
 0x103   :  { %v176_v1 = vmul.f32 %v147_v63, %v822_v30  ;;  %v177_v3 = vmul.f32 %v149_v0, %v822_v30  ;;  %v290_v14 = vsub.f32 1.5, %v289_v62 }
 0x104   :  { %v955_v5 = vpop.eup %655  ;;  %v971_v26 = vadd.f32 1e-05, %v178_v4  ;;  %v210_v29 = vsub.f32 1.5, %v209_v6 }
 0x105   :  { %v957_v7 = vpop.eup %657  ;;  %v307_v11 = vmul.f32 %v955_v5, %v936_v50  ;;  %v961_v12 = vadd.f32 1e-05, %v176_v1  ;;  %v967_v24 = vadd.f32 1e-05, %v177_v3  ;;  %v291_v18 = vmul.f32 %v934_v49, %v290_v14 }
 0x106   :  { %v963_v13 = vpop.eup %659  ;;  %v297_v17 = vmul.f32 %v957_v7, %v941_v53  ;;  %v211_v39 = vmul.f32 %v938_v51, %v210_v29  ;;  %vm303_vm7 = vweird.f32 %v957_v7  ;;  %vm313_vm14 = vweird.f32 %v955_v5 }
 0x107   :  { %v217_v25 = vmul.f32 %v963_v13, %v943_v54  ;;  %v308_v16 = vmul.f32 %v955_v5, %v307_v11  ;;  %661 = vrsqrt.f32 %v961_v12  ;;  %v295_v40 = vsel %vm985_vm5, %v934_v49, %v291_v18  ;;  %vm1025_vm11 = vmor %vm302_vm6, %vm303_vm7  ;;  %v1103_v49 = vld [vmem:[%s1318_s2] ss:$0 sm:$0xff] }
 0x108   :  { %v298_v10 = vmul.f32 %v957_v7, %v297_v17  ;;  %663 = vrsqrt.f32 %v967_v24  ;;  %vm223_vm8 = vweird.f32 %v963_v13  ;;  %v215_v0 = vsel %vm1009_vm9, %v938_v51, %v211_v39  ;;  %vm1073_vm0 = vmor %vm312_vm13, %vm313_vm14 }
 0x109   :  { %v218_v31 = vmul.f32 %v963_v13, %v217_v25  ;;  %665 = vrsqrt.f32 %v971_v26  ;;  %v309_v38 = vmul.f32 0.5, %v308_v16  ;;  %v169_v45 = vpop.xlane.xlu0 %168  ;;  %v374_v4 = vmul.f32 %v295_v40, %v826_v36  ;;  %vm1036_vm12 = vmor %vm222_vm10, %vm223_vm8 }
 0x10a   :  { %v299_v22 = vmul.f32 0.5, %v298_v10  ;;  %v165_v33 = vpop.xlane.xlu2 %164  ;;  %v167_v42 = vpop.xlane.xlu1 %166  ;;  %v187_v3 = vmul.f32 %v169_v45, %v822_v30  ;;  %v366_v17 = vmul.f32 %v215_v0, %v828_v37  ;;  %vm232_vm1 = vweird.f32 %v961_v12 }
 0x10b   :  { %v219_v34 = vmul.f32 0.5, %v218_v31  ;;  %v185_v21 = vmul.f32 %v165_v33, %v822_v30  ;;  %v310_v61 = vsub.f32 1.5, %v309_v38  ;;  %v186_v62 = vmul.f32 %v167_v42, %v822_v30 }
 0x10c   :  { %v300_v35 = vsub.f32 1.5, %v299_v22  ;;  %vm242_vm4 = vweird.f32 %v967_v24  ;;  %vm252_vm6 = vweird.f32 %v971_v26 }
 0x10d   :  { %v220_v23 = vsub.f32 1.5, %v219_v34  ;;  %v989_v43 = vpop.eup %661  ;;  %v996_v44 = vadd.f32 1e-05, %v185_v21  ;;  %v311_v25 = vmul.f32 %v955_v5, %v310_v61  ;;  %v1054_v16 = vadd.f32 1e-05, %v186_v62 }
 0x10e   :  { %v301_v52 = vmul.f32 %v957_v7, %v300_v35  ;;  %v227_v56 = vmul.f32 %v989_v43, %v961_v12  ;;  %v1003_v58 = vpop.eup %663  ;;  %vm233_vm15 = vweird.f32 %v989_v43  ;;  %v1067_v34 = vld [vmem:[%s1317_s1] ss:$0 sm:$0xff] }
 0x10f   :  { %v221_v55 = vmul.f32 %v963_v13, %v220_v23  ;;  %667 = vrsqrt.f32 %v996_v44  ;;  %v1016_v63 = vpop.eup %665  ;;  %v237_v1 = vmul.f32 %v1003_v58, %v967_v24  ;;  %v315_v39 = vsel %vm1073_vm0, %v955_v5, %v311_v25  ;;  %vm234_vm2 = vmor %vm232_vm1, %vm233_vm15 }
 0x110   :  { %v228_v54 = vmul.f32 %v989_v43, %v227_v56  ;;  %v247_v53 = vmul.f32 %v1016_v63, %v971_v26  ;;  %v305_v6 = vsel %vm1025_vm11, %v957_v7, %v301_v52  ;;  %v1057_v7 = vadd.f32 1e-05, %v187_v3 }
 0x111   :  { %v225_v36 = vsel %vm1036_vm12, %v963_v13, %v221_v55  ;;  %v238_v14 = vmul.f32 %v1003_v58, %v237_v1  ;;  %v375_v13 = vmul.f32 %v305_v6, %v837_v46  ;;  %669 = vrsqrt.f32 %v1054_v16  ;;  %v157_v0 = vpop.xlane.xlu0 %156 }
 0x112   :  { %v229_v11 = vmul.f32 0.5, %v228_v54  ;;  %v248_v10 = vmul.f32 %v1016_v63, %v247_v53  ;;  %v367_v22 = vmul.f32 %v225_v36, %v841_v48  ;;  %v153_v37 = vpop.xlane.xlu2 %152  ;;  %v155_v21 = vpop.xlane.xlu1 %154  ;;  %vm243_vm3 = vweird.f32 %v1003_v58 }
 0x113   :  { %v239_v31 = vmul.f32 0.5, %v238_v14  ;;  %671 = vrsqrt.f32 %v1057_v7  ;;  %v394_v42 = vmul.f32 %v1067_v34, %v375_v13  ;;  %v179_v45 = vmul.f32 %v153_v37, %v822_v30  ;;  %vm1108_vm5 = vmor %vm242_vm4, %vm243_vm3  ;;  %v602_v13 = vld [vmem:[%s1319_s3 + $0x30] sm:$0xff] }
 0x114   :  { %v230_v29 = vsub.f32 1.5, %v229_v11  ;;  %v249_v33 = vmul.f32 0.5, %v248_v10  ;;  %v386_v40 = vmul.f32 %v1067_v34, %v367_v22  ;;  %v385_v52 = vmul.f32 %v1067_v34, %v366_v17 }
 0x115   :  { %v1059_v18 = vpop.eup %667  ;;  %v240_v48 = vsub.f32 1.5, %v239_v31  ;;  %v393_v55 = vmul.f32 %v1067_v34, %v374_v4  ;;  %v376_v61 = vmul.f32 %v315_v39, %v839_v47  ;;  %v1113_v62 = vadd.f32 1e-05, %v179_v45 }
 0x116   :  { %v231_v46 = vmul.f32 %v989_v43, %v230_v29  ;;  %v317_v38 = vmul.f32 %v1059_v18, %v996_v44  ;;  %v250_v19 = vsub.f32 1.5, %v249_v33  ;;  %v180_v24 = vmul.f32 %v155_v21, %v822_v30 }
 0x117   :  { %v241_v12 = vmul.f32 %v1003_v58, %v240_v48  ;;  %v1098_v56 = vpop.eup %669  ;;  %vm253_vm7 = vweird.f32 %v1016_v63  ;;  %v413_v3 = vadd.f32 %v1103_v49, %v394_v42  ;;  %v405_v4 = vadd.f32 %v1103_v49, %v386_v40  ;;  %v601_v42 = vld [vmem:[%s1319_s3 + $0x28] sm:$0xff] }
 0x118   :  { %v235_v50 = vsel %vm234_vm2, %v989_v43, %v231_v46  ;;  %v318_v23 = vmul.f32 %v1059_v18, %v317_v38  ;;  %v251_v54 = vmul.f32 %v1016_v63, %v250_v19  ;;  %v327_v47 = vmul.f32 %v1098_v56, %v1054_v16  ;;  %vm1143_vm8 = vmor %vm252_vm6, %vm253_vm7 }
 0x119   :  { %v368_v5 = vmul.f32 %v235_v50, %v853_v57  ;;  %v245_v41 = vsel %vm1108_vm5, %v1003_v58, %v241_v12  ;;  %v1123_v1 = vpop.eup %671  ;;  %673 = vrsqrt.f32 %v1113_v62  ;;  %v603_v58 = vld [vmem:[%s1319_s3 + $0x38] sm:$0xff]  ;;  %v181_v11 = vmul.f32 %v157_v0, %v822_v30 }
 0x11a   :  { %v319_v43 = vmul.f32 0.5, %v318_v23  ;;  %v328_v6 = vmul.f32 %v1098_v56, %v327_v47  ;;  %v337_v36 = vmul.f32 %v1123_v1, %v1057_v7  ;;  %v404_v14 = vadd.f32 %v1103_v49, %v385_v52  ;;  %v171_v31 = vpop.xlane.xlu2 %170  ;;  %533 = vmatpush.bf16.msra.mxu0 %v603_v58  ;;  %v173_v37 = vpop.xlane.xlu1 %172 }
 0x11b   :  { %v387_v51 = vmul.f32 %v1067_v34, %v368_v5  ;;  %v412_v17 = vadd.f32 %v1103_v49, %v393_v55  ;;  %v369_v25 = vmul.f32 %v245_v41, %v862_v60  ;;  %v1147_v29 = vadd.f32 1e-05, %v180_v24 }
 0x11c   :  { %v320_v53 = vsub.f32 1.5, %v319_v43  ;;  %v395_v22 = vmul.f32 %v1067_v34, %v376_v61  ;;  %v255_v60 = vsel %vm1143_vm8, %v1016_v63, %v251_v54  ;;  %v329_v33 = vmul.f32 0.5, %v328_v6  ;;  %v600_v54 = vld [vmem:[%s1319_s3 + $0x20] sm:$0xff] }
 0x11d   :  { %v338_v26 = vmul.f32 %v1123_v1, %v337_v36  ;;  %v433_v35 = vadd.f32 %v413_v3, %v412_v17  ;;  %v420_v46 = vadd.f32 %v405_v4, %v404_v14  ;;  %v406_v48 = vadd.f32 %v1103_v49, %v387_v51  ;;  %v599_v14 = vld [vmem:[%s1319_s3 + $0x18] sm:$0xff] }
 0x11e   :  { %675 = vrsqrt.f32 %v1147_v29  ;;  %v321_v38 = vmul.f32 %v1059_v18, %v320_v53  ;;  %vm323_vm9 = vweird.f32 %v1059_v18  ;;  %v1161_v21 = vadd.f32 1e-05, %v181_v11  ;;  %534 = vmatpush.bf16.msra.mxu0 %v602_v13 }
 0x11f   :  { %v188_v39 = vmul.f32 %v171_v31, %v822_v30  ;;  %v1164_v50 = vpop.eup %673  ;;  %v388_v63 = vmul.f32 %v1067_v34, %v369_v25  ;;  %v370_v12 = vmul.f32 %v255_v60, %v858_v59  ;;  %v339_v19 = vmul.f32 0.5, %v338_v26 }
 0x120   :  { %v189_v23 = vmul.f32 %v173_v37, %v822_v30  ;;  %v414_v40 = vadd.f32 %v1103_v49, %v395_v22  ;;  %vm322_vm10 = vweird.f32 %v996_v44  ;;  %v330_v5 = vsub.f32 1.5, %v329_v33 }
 0x121   :  { %v257_v45 = vmul.f32 %v1164_v50, %v1113_v62  ;;  %v421_v52 = vadd.f32 %v420_v46, %v406_v48  ;;  %vm1178_vm11 = vmor %vm322_vm10, %vm323_vm9  ;;  %vm332_vm12 = vweird.f32 %v1054_v16  ;;  %677 = vrsqrt.f32 %v1161_v21  ;;  %v598_v48 = vld [vmem:[%s1319_s3 + $0x10] sm:$0xff] }
 0x122   :  { %v1184_v30 = vadd.f32 1e-05, %v188_v39  ;;  %v1186_v55 = vadd.f32 %v433_v35, %v414_v40  ;;  %v325_v44 = vsel %vm1178_vm11, %v1059_v18, %v321_v38  ;;  %v1192_v61 = vadd.f32 1e-05, %v189_v23  ;;  %535 = vmatpush.bf16.msra.mxu0 %v601_v42 }
 0x123   :  { %v258_v43 = vmul.f32 %v1164_v50, %v257_v45  ;;  %v407_v24 = vadd.f32 %v1103_v49, %v388_v63  ;;  %v389_v0 = vmul.f32 %v1067_v34, %v370_v12  ;;  %v340_v41 = vsub.f32 1.5, %v339_v19 }
 0x124   :  { %v1194_v57 = vpop.eup %675  ;;  %679 = vrsqrt.f32 %v1184_v30  ;;  %v331_v18 = vmul.f32 %v1098_v56, %v330_v5  ;;  %vm333_vm13 = vweird.f32 %v1098_v56  ;;  %v377_v51 = vmul.f32 %v325_v44, %v873_v2 }
 0x125   :  { %v259_v47 = vmul.f32 0.5, %v258_v43  ;;  %v267_v3 = vmul.f32 %v1194_v57, %v1147_v29  ;;  %v422_v4 = vadd.f32 %v421_v52, %v407_v24  ;;  %vm342_vm14 = vweird.f32 %v1057_v7  ;;  %vm1217_vm1 = vmor %vm332_vm12, %vm333_vm13 }
 0x126   :  { %681 = vrsqrt.f32 %v1192_v61  ;;  %vm262_vm15 = vweird.f32 %v1113_v62  ;;  %vm263_vm0 = vweird.f32 %v1164_v50  ;;  %v408_v36 = vadd.f32 %v1103_v49, %v389_v0  ;;  %536 = vmatpush.bf16.msra.mxu0 %v600_v54 }
 0x127   :  { %v260_v58 = vsub.f32 1.5, %v259_v47  ;;  %v268_v53 = vmul.f32 %v1194_v57, %v267_v3  ;;  %v1212_v6 = vpop.eup %677  ;;  %v341_v2 = vmul.f32 %v1123_v1, %v340_v41  ;;  %vm343_vm2 = vweird.f32 %v1123_v1  ;;  %vm264_vm3 = vmor %vm262_vm15, %vm263_vm0 }
 0x128   :  { %v335_v17 = vsel %vm1217_vm1, %v1098_v56, %v331_v18  ;;  %v277_v10 = vmul.f32 %v1212_v6, %v1161_v21  ;;  %v423_v13 = vadd.f32 %v422_v4, %v408_v36  ;;  %v396_v22 = vmul.f32 %v1067_v34, %v377_v51  ;;  %vm1243_vm6 = vmor %vm342_vm14, %vm343_vm2 }
 0x129   :  { %v261_v25 = vmul.f32 %v1164_v50, %v260_v58  ;;  %v269_v16 = vmul.f32 0.5, %v268_v53  ;;  %vm272_vm4 = vweird.f32 %v1147_v29  ;;  %vm273_vm5 = vweird.f32 %v1194_v57  ;;  %v597_v29 = vld [vmem:[%s1319_s3 + $0x8] sm:$0xff] }
 0x12a   :  { %v1232_v31 = vpop.eup %679  ;;  %v278_v26 = vmul.f32 %v1212_v6, %v277_v10  ;;  %v378_v35 = vmul.f32 %v335_v17, %v883_v9  ;;  %v345_v46 = vsel %vm1243_vm6, %v1123_v1, %v341_v2  ;;  %537 = vmatpush.bf16.msra.mxu0 %v599_v14  ;;  %v712_v38 = vmov 64.0   ;;  %vm274_vm7 = vmor %vm272_vm4, %vm273_vm5 }
 0x12b   :  { %v265_v60 = vsel %vm264_vm3, %v1164_v50, %v261_v25  ;;  %v270_v33 = vsub.f32 1.5, %v269_v16  ;;  %v347_v37 = vmul.f32 %v1232_v31, %v1184_v30  ;;  %683 = vrcp.f32 %v712_v38 }
 0x12c   :  { %v682_v62 = vpop.eup %681  ;;  %v371_v7 = vmul.f32 %v265_v60, %v894_v15  ;;  %v279_v50 = vmul.f32 0.5, %v278_v26  ;;  %v415_v12 = vadd.f32 %v1103_v49, %v396_v22  ;;  %vm282_vm8 = vweird.f32 %v1161_v21  ;;  %v596_v21 = vld [vmem:[%s1319_s3] sm:$0xff] }
 0x12d   :  { %v271_v39 = vmul.f32 %v1194_v57, %v270_v33  ;;  %v348_v63 = vmul.f32 %v1232_v31, %v347_v37  ;;  %v357_v9 = vmul.f32 %v682_v62, %v1192_v61  ;;  %vm283_vm9 = vweird.f32 %v1212_v6 }
 0x12e   :  { %v390_v1 = vmul.f32 %v1067_v34, %v371_v7  ;;  %v280_v19 = vsub.f32 1.5, %v279_v50  ;;  %v397_v40 = vmul.f32 %v1067_v34, %v378_v35  ;;  %v379_v5 = vmul.f32 %v345_v46, %v879_v8  ;;  %538 = vmatpush.bf16.msra.mxu0 %v598_v48  ;;  %vm284_vm11 = vmor %vm282_vm8, %vm283_vm9 }
 0x12f   :  { %v275_v15 = vsel %vm274_vm7, %v1194_v57, %v271_v39  ;;  %v349_v23 = vmul.f32 0.5, %v348_v63  ;;  %v358_v42 = vmul.f32 %v682_v62, %v357_v9  ;;  %vm353_vm10 = vweird.f32 %v1232_v31 }
 0x130   :  { %v409_v45 = vadd.f32 %v1103_v49, %v390_v1  ;;  %v372_v52 = vmul.f32 %v275_v15, %v904_v28  ;;  %v281_v59 = vmul.f32 %v1212_v6, %v280_v19  ;;  %v435_v24 = vadd.f32 %v1186_v55, %v415_v12 }
 0x131   :  { %v350_v44 = vsub.f32 1.5, %v349_v23  ;;  %v359_v43 = vmul.f32 0.5, %v358_v42  ;;  %v684_v57 = vpop.eup %683  ;;  %vm352_vm12 = vweird.f32 %v1184_v30  ;;  %vm363_vm13 = vweird.f32 %v682_v62  ;;  %v648_v42 = vld [vmem:[%s1320_s4] ss:$0 sm:$0xff] }
 0x132   :  { %v424_v0 = vadd.f32 %v423_v13, %v409_v45  ;;  %v391_v8 = vmul.f32 %v1067_v34, %v372_v52  ;;  %v285_v28 = vsel %vm284_vm11, %v1212_v6, %v281_v59  ;;  %v416_v18 = vadd.f32 %v1103_v49, %v397_v40  ;;  %vm354_vm14 = vmor %vm352_vm12, %vm353_vm10  ;;  %539 = vmatpush.bf16.msra.mxu0 %v597_v29 }
 0x133   :  { %v351_v41 = vmul.f32 %v1232_v31, %v350_v44  ;;  %v360_v54 = vsub.f32 1.5, %v359_v43  ;;  %v398_v55 = vmul.f32 %v1067_v34, %v379_v5  ;;  %v373_v3 = vmul.f32 %v285_v28, %v900_v27 }
 0x134   :  { %v410_v47 = vadd.f32 %v1103_v49, %v391_v8  ;;  %vm362_vm15 = vweird.f32 %v1192_v61  ;;  %v447_v51 = vmul.f32 64.0, %v684_v57  ;;  %v436_v58 = vadd.f32 %v435_v24, %v416_v18 }
 0x135   :  { %v355_v30 = vsel %vm354_vm14, %v1232_v31, %v351_v41  ;;  %v361_v4 = vmul.f32 %v682_v62, %v360_v54  ;;  %v392_v6 = vmul.f32 %v1067_v34, %v373_v3  ;;  %vm364_vm0 = vmor %vm362_vm15, %vm363_vm13  ;;  %v417_v11 = vadd.f32 %v1103_v49, %v398_v55 }
 0x136   :  { %v425_v53 = vadd.f32 %v424_v0, %v410_v47  ;;  %v380_v27 = vmul.f32 %v355_v30, %v915_v20  ;;  %540 = vmatpush.bf16.msra.mxu0 %v596_v21  ;;  %v448_v61 = vsub.f32 1.0, %v447_v51  ;;  %vm451_vm1 = vweird.f32 %v684_v57 }
 0x137   :  { %v365_v36 = vsel %vm364_vm0, %v682_v62, %v361_v4  ;;  %v411_v2 = vadd.f32 %v1103_v49, %v392_v6  ;;  %v437_v25 = vadd.f32 %v436_v58, %v417_v11  ;;  %vm481_vm2 = vcmask 1041409  }
 0x138   :  { %v399_v14 = vmul.f32 %v1067_v34, %v380_v27  ;;  %v381_v17 = vmul.f32 %v365_v36, %v920_v32  ;;  %v449_v56 = vmul.f32 %v684_v57, %v448_v61  ;;  %vm546_vm3 = vcmask 484352  }
 0x139   :  { %v426_v31 = vadd.f32 %v425_v53, %v411_v2 }
 0x13a   :  { %v418_v16 = vadd.f32 %v1103_v49, %v399_v14  ;;  %v400_v10 = vmul.f32 %v1067_v34, %v381_v17  ;;  %v450_v62 = vadd.f32 %v684_v57, %v449_v56 }
 0x13b   :  { %v427_v22 = vrot.slane %v426_v31, 4 }
 0x13c   :  { %v438_v20 = vadd.f32 %v437_v25, %v418_v16  ;;  %v419_v13 = vadd.f32 %v1103_v49, %v400_v10  ;;  %v452_v48 = vsel %vm451_vm1, %v684_v57, %v450_v62 }
 0x13d   :  { %v428_v60 = vadd.f32 %v427_v22, %v426_v31 }
 0x13e   :  { %v439_v33 = vadd.f32 %v438_v20, %v419_v13 }
 0x13f   :  { %v429_v26 = vrot.slane %v428_v60, 2 }
 0x140   :  { %v440_v37 = vrot.slane %v439_v33, 4 }
 0x141   :  { %v430_v35 = vadd.f32 %v429_v26, %v428_v60 }
 0x142   :  { %v441_v32 = vadd.f32 %v440_v37, %v439_v33 }
 0x143   :  { %v431_v46 = vrot.slane %v430_v35, 1 }
 0x144   :  { %v442_v7 = vrot.slane %v441_v32, 2 }
 0x145   :  { %v432_v38 = vadd.f32 %v431_v46, %v430_v35 }
 0x146   :  { %v443_v39 = vadd.f32 %v442_v7, %v441_v32 }
 0x147   :  { %v453_v50 = vmul.f32 %v452_v48, %v432_v38 }
 0x148   :  { %v444_v34 = vrot.slane %v443_v39, 1 }
 0x149   :  { %v455_v49 = vpack.c.bf16 %v453_v50, %v453_v50 }
 0x14a   :  { %v445_v63 = vadd.f32 %v444_v34, %v443_v39 }
 0x14b   :  { %v479_v1 = vunpack.c.l.b16 %v455_v49 }
 0x14c   :  { %v454_v9 = vmul.f32 %v452_v48, %v445_v63 }
 0x14e   :  { %v456_v12 = vpack.c.bf16 %v454_v9, %v454_v9 }
 0x150   :  { %v480_v15 = vunpack.c.l.b16 %v456_v12 }
 0x152   :  { %v482_v19 = vsel %vm481_vm2, %v480_v15, %v479_v1 }
 0x153   :  { %v483_v23 = vpack.c.b16 %v482_v19, %v482_v19 }
 0x155   :  { %541 = vmatmul.bf16.vlgmr.msra.gmra.mxu0 %v483_v23 }
 0x1d2   :  { %v542_v40 = vpop.f32.mrf.mxu0 }
 0x1d3   :  { %v543_v5 = vadd.f32 %v648_v42, %v542_v40 }
 0x1d5   :  { %547 = vst.msk [vmem:[#allocation2] sm:$0x3] %vm546_vm3, %v543_v5 }
 0x1d6   :  { %558 = dma.vmem_to_hbm [thread:$0]  %s554_s28, 32, %s556_s6, [#allocation3]  }
 0x1da   :  { %v544_v45 = vpop.f32.mrf.mxu0 }
 0x1db   :  { %709 = dma.done.wait [#allocation3], 32  }
 0x1dc   :  { %710 = vsyncadd [#allocation3], 4294967264 }
 0x1dd   :  { %563 = vsyncpa [#allocation3], 1 }

// kernel: forward.4
= control target key start
LH: loop header
LB: loop body
LE: loop exit
PB: predicated region body
PF: predicated region fallthrough
CT: control target
= control target key end

     0   :  { %s462_s15 = smov 0   ;;  %s504_s0 = inlined_call_operand.vmem [shape: f32[4,32,12], index: 0, kind: input, shape index: {}]   ;;  %s505_s1 = inlined_call_operand.vmem [shape: bf16[12,128], index: 1, kind: input, shape index: {}]   ;;  %s506_s2 = inlined_call_operand.vmem [shape: f32[1,128], index: 2, kind: input, shape index: {}]   ;;  %s507_s3 = inlined_call_operand.vmem [shape: f32[32,128], index: 3, kind: input, shape index: {}]   ;;  %s508_s4 = inlined_call_operand.vmem [shape: bf16[4,32,128], index: 4, kind: output, shape index: {}]  }
   0x1 LB: > { %s370_s16 = sadd.s32 4294967295, %s435_s15   ;;  %p374_p0 = scmp.ge.s32.totalorder %s435_s15, 1  ;;  %s435_s15 = sphi %s462_s15, %s14_s15  }
   0x2   : > { %p164_p1 = scmp.lt.s32.totalorder %s435_s15, 3 }
   0x4   : > { %p165_p2 = pnand %p374_p0, %p164_p1 }
   0x5   : > { %s375_s21 = sshll.u32 (!%p165_p2), %s370_s16, 1 }
   0x6   : > { %168 = sbr.rel (%p165_p2) target bundleno = 167 (0xa7), region = 36  ;;  %p193_p3 = scmp.lt.s32.totalorder (!%p165_p2), %s375_s21, 3 }
   0xb   : > { %v383_v0 = vld [vmem:[%s505_s1] sm:$0xf]  ;;  %v393_v1 = vld [vmem:[%s505_s1] sm:$0x30]  ;;  %vm239_vm0 = vcmask 1045504   ;;  %s510_s21 = smov (!%p193_p3, %s375_s21), 3 }
   0xc   : > { %v384_v2 = vor.u32 %v393_v1, %v383_v0  ;;  %s391_s22 = sshll.u32 %s510_s21, 5  ;;  %vm226_vm1 = vcmask 97280   ;;  %v428_v18 = vld [vmem:[%s506_s2] ss:$0 sm:$0xff]  ;;  %v285_v25 = vld [vmem:[%s507_s3 + $0x8] sm:$0xff]  ;;  %v286_v26 = vld [vmem:[%s507_s3 + $0x10] sm:$0xff] }
   0xd   : > { %s197_s25 = scalar_lea.vmem %s504_s0, %s391_s22  ;;  %v284_v21 = vld [vmem:[%s507_s3] sm:$0xff]  ;;  %s392_s8 = sshll.u32 %s510_s21, 4  ;;  %v287_v29 = vld [vmem:[%s507_s3 + $0x18] sm:$0xff] }
   0xe   : > { %v241_v3 = vsel %vm239_vm0, %v384_v2, 0  ;;  %v207_v4 = vld [vmem:[%s197_s25] sm:$0xff]  ;;  %v208_v5 = vld [vmem:[%s197_s25 + $0x8] sm:$0xff]  ;;  %v209_v6 = vld [vmem:[%s197_s25 + $0x10] sm:$0xff]  ;;  %s204_s13 = scalar_lea.vmem %s508_s4, %s392_s8 }
   0xf   : > { %250 = vmatpush.bf16.msra.mxu0 %v241_v3  ;;  %417 = vmatpush.bf16.msra.mxu1 %v241_v3  ;;  %v215_v7 = vpack.c.bf16 %v208_v5, %v207_v4  ;;  %v210_v8 = vld [vmem:[%s197_s25 + $0x18] sm:$0xff]  ;;  %v211_v9 = vld [vmem:[%s197_s25 + $0x20] sm:$0xff]  ;;  %v212_v10 = vld [vmem:[%s197_s25 + $0x28] sm:$0xff] }
  0x10   : > { %418 = vmatpush.bf16.msra.mxu2 %v241_v3  ;;  %419 = vmatpush.bf16.msra.mxu3 %v241_v3  ;;  %v216_v11 = vpack.c.bf16 %v210_v8, %v209_v6  ;;  %v217_v12 = vpack.c.bf16 %v212_v10, %v211_v9  ;;  %v213_v13 = vld [vmem:[%s197_s25 + $0x30] sm:$0xff]  ;;  %v214_v14 = vld [vmem:[%s197_s25 + $0x38] sm:$0xff] }
  0x11   : > { %v218_v15 = vpack.c.bf16 %v214_v14, %v213_v13 }
  0x12   : > { %385 = vmatmul.msk.bf16.vlgmr.msra.gmra.mxu0 %vm226_vm1, %v215_v7  ;;  %386 = vmatmul.msk.bf16.vlgmr.msra.gmra.mxu1 %vm226_vm1, %v216_v11 }
  0x13   : > { %387 = vmatmul.msk.bf16.vlgmr.msra.gmra.mxu2 %vm226_vm1, %v217_v12  ;;  %388 = vmatmul.msk.bf16.vlgmr.msra.gmra.mxu3 %vm226_vm1, %v218_v15 }
  0x8f   : > { %v252_v16 = vpop.f32.mrf.mxu0  ;;  %v257_v17 = vpop.f32.mrf.mxu1 }
  0x90   : > { %v276_v19 = vadd.f32 %v428_v18, %v252_v16  ;;  %v278_v22 = vadd.f32 %v428_v18, %v257_v17 }
  0x92   : > { %v288_v31 = vadd.f32 %v284_v21, %v276_v19  ;;  %v290_v33 = vadd.f32 %v286_v26, %v278_v22 }
  0x96   : > { %v262_v20 = vpop.f32.mrf.mxu2  ;;  %v267_v23 = vpop.f32.mrf.mxu3 }
  0x97   : > { %v254_v24 = vpop.f32.mrf.mxu0  ;;  %v259_v28 = vpop.f32.mrf.mxu1  ;;  %v280_v36 = vadd.f32 %v428_v18, %v262_v20  ;;  %v282_v38 = vadd.f32 %v428_v18, %v267_v23 }
  0x98   : > { %v277_v27 = vadd.f32 %v428_v18, %v254_v24  ;;  %v279_v30 = vadd.f32 %v428_v18, %v259_v28 }
  0x99   : > { %v292_v43 = vadd.f32 %v284_v21, %v280_v36  ;;  %v294_v45 = vadd.f32 %v286_v26, %v282_v38 }
  0x9a   : > { %v289_v32 = vadd.f32 %v285_v25, %v277_v27  ;;  %v291_v34 = vadd.f32 %v287_v29, %v279_v30 }
  0x9c   : > { %v397_v35 = vpack.c.bf16 %v289_v32, %v288_v31  ;;  %v402_v37 = vpack.c.bf16 %v291_v34, %v290_v33 }
  0x9e   : > { %398 = vst [vmem:[%s204_s13] sm:$0xff] %v397_v35   ;;  %v264_v39 = vpop.f32.mrf.mxu2  ;;  %v269_v41 = vpop.f32.mrf.mxu3 }
  0x9f   : > { %414 = vst [vmem:[%s204_s13 + $0x8] sm:$0xff] %v402_v37   ;;  %v281_v40 = vadd.f32 %v428_v18, %v264_v39  ;;  %v283_v42 = vadd.f32 %v428_v18, %v269_v41 }
  0xa1   : > { %v293_v44 = vadd.f32 %v285_v25, %v281_v40  ;;  %v295_v46 = vadd.f32 %v287_v29, %v283_v42 }
  0xa3   : > { %v407_v47 = vpack.c.bf16 %v293_v44, %v292_v43  ;;  %v412_v48 = vpack.c.bf16 %v295_v46, %v294_v45 }
  0xa5   : > { %415 = vst [vmem:[%s204_s13 + $0x10] sm:$0xff] %v407_v47  }
  0xa6   : > { %416 = vst [vmem:[%s204_s13 + $0x18] sm:$0xff] %v412_v48  }
  0xa7 PF: > { %s14_s15 = sadd.s32 1, %s435_s15  }
  0xa8   : > { %p11_p4 = scmp.ge.s32.totalorder %s14_s15, 4  }
  0xaa   :  { %13 = sbr.rel (!%p11_p4) target bundleno = 1 (0x1), region = 66 }

// kernel: forward.5
= control target key start
LH: loop header
LB: loop body
LE: loop exit
PB: predicated region body
PF: predicated region fallthrough
CT: control target
= control target key end

     0   :  { %s6685_s24 = smov 0   ;;  %s8667_s0 = inlined_call_operand.vmem [shape: bf16[4,32,128], index: 0, kind: input, shape index: {}]   ;;  %s8668_s1 = inlined_call_operand.vmem [shape: f32[1,128], index: 1, kind: input, shape index: {}]   ;;  %s8669_s2 = inlined_call_operand.vmem [shape: f32[1,128], index: 2, kind: input, shape index: {}]   ;;  %s8670_s3 = inlined_call_operand.vmem [shape: bf16[4,128,32], index: 3, kind: input, shape index: {}]   ;;  %s8671_s4 = inlined_call_operand.vmem [shape: f32[4,1,32], index: 4, kind: input, shape index: {}]   ;;  %s8672_s5 = inlined_call_operand.vmem [shape: bf16[4,128,32], index: 5, kind: input, shape index: {}]   ;;  %s8673_s6 = inlined_call_operand.vmem [shape: f32[4,1,32], index: 6, kind: input, shape index: {}]   ;;  %s8674_s7 = inlined_call_operand.vmem [shape: bf16[4,128,32], index: 7, kind: input, shape index: {}]   ;;  %s8675_s8 = inlined_call_operand.vmem [shape: f32[4,1,32], index: 8, kind: input, shape index: {}]   ;;  %s8676_s9 = inlined_call_operand.vmem [shape: bf16[4,32,128], index: 9, kind: input, shape index: {}]   ;;  %s8677_s10 = inlined_call_operand.vmem [shape: f32[1,128], index: 10, kind: input, shape index: {}]   ;;  %s8678_s11 = inlined_call_operand.vmem [shape: f32[1,128], index: 11, kind: input, shape index: {}]   ;;  %s8679_s12 = inlined_call_operand.vmem [shape: f32[1,128], index: 12, kind: input, shape index: {}]   ;;  %s8680_s13 = inlined_call_operand.vmem [shape: bf16[128,512], index: 13, kind: input, shape index: {}]   ;;  %s8681_s14 = inlined_call_operand.vmem [shape: f32[1,512], index: 14, kind: input, shape index: {}]   ;;  %s8682_s15 = inlined_call_operand.vmem [shape: bf16[512,128], index: 15, kind: input, shape index: {}]   ;;  %s8683_s16 = inlined_call_operand.vmem [shape: f32[1,128], index: 16, kind: input, shape index: {}]   ;;  %s8684_s17 = inlined_call_operand.vmem [shape: bf16[4,32,128], index: 17, kind: output, shape index: {}]  }
   0x1   :  { %8685 = sst [smem:[#allocation2_spill]] %s8667_s0 }
   0x2   :  { %8686 = sst [smem:[#allocation3_spill]] %s8668_s1 }
   0x3 LB: > { %s5215_s25 = sadd.s32 4294967295, %s6592_s24   ;;  %p5219_p0 = scmp.ge.s32.totalorder %s6592_s24, 1  ;;  %s6592_s24 = sphi %s6685_s24, %s27_s24  }
   0x4   : > { %p489_p1 = scmp.lt.s32.totalorder %s6592_s24, 3 }
   0x6   : > { %p490_p2 = pnand %p5219_p0, %p489_p1 }
   0x7   : > { %s5220_s26 = sshll.u32 (!%p490_p2), %s5215_s25, 1  ;;  %s8687_s0 = sld [smem:[#allocation2_spill]] (!%p490_p2) }
   0x8   : > { %493 = sbr.rel (%p490_p2) target bundleno = 3677 (0xe5d), region = 88  ;;  %p544_p3 = scmp.lt.s32.totalorder (!%p490_p2), %s5220_s26, 3 }
   0x9   : > { %s8690_s21 = sld [smem:[#allocation3_spill]] (!%p490_p2) }
   0xd   : > { %s8712_s26 = smov (!%p544_p3, %s5220_s26), 3  ;;  %v6594_v12 = vmov 128.0   ;;  %v6122_v51 = vld [vmem:[%s8670_s3 + $0x38] sm:$0xff]  ;;  %v6121_v53 = vld [vmem:[%s8670_s3 + $0x30] sm:$0xff]  ;;  %v6120_v55 = vld [vmem:[%s8670_s3 + $0x28] sm:$0xff] }
   0xe   : > { %s6113_s27 = sshll.u32 %s8712_s26, 4  ;;  %6360 = vrcp.f32 %v6594_v12  ;;  %v6130_v52 = vld [vmem:[%s8672_s5 + $0x38] sm:$0xff]  ;;  %837 = vmatpush.bf16.msra.mxu0 %v6122_v51  ;;  %v6129_v54 = vld [vmem:[%s8672_s5 + $0x30] sm:$0xff]  ;;  %v6128_v56 = vld [vmem:[%s8672_s5 + $0x28] sm:$0xff] }
   0xf   : > { %s548_s30 = scalar_lea.vmem %s8687_s0, %s6113_s27  ;;  %934 = vmatpush.bf16.msra.mxu1 %v6130_v52  ;;  %6325 = vmatpush.bf16.msra.mxu2 %v6130_v52  ;;  %v6119_v57 = vld [vmem:[%s8670_s3 + $0x20] sm:$0xff]  ;;  %v6118_v59 = vld [vmem:[%s8670_s3 + $0x18] sm:$0xff]  ;;  %v6117_v61 = vld [vmem:[%s8670_s3 + $0x10] sm:$0xff]  ;;  %s8646_s29 = scalar_lea.vmem %s8684_s17, %s6113_s27 }
  0x10   : > { %v6320_v0 = vld [vmem:[%s548_s30 + $0x10] sm:$0xff]   ;;  %v6319_v1 = vld [vmem:[%s548_s30 + $0x8] sm:$0xff]   ;;  %v6284_v2 = vld [vmem:[%s548_s30] sm:$0xff]  }
  0x11   : > { %v6701_v3 = vunpack.c.l.bf16 %v6320_v0  ;;  %v6703_v4 = vunpack.c.l.bf16 %v6319_v1  ;;  %v6705_v5 = vunpack.c.l.bf16 %v6284_v2  ;;  %v6710_v6 = vunpack.c.h.bf16 %v6320_v0  ;;  %v6321_v9 = vld [vmem:[%s548_s30 + $0x18] sm:$0xff]   ;;  %v6127_v58 = vld [vmem:[%s8672_s5 + $0x20] sm:$0xff]  ;;  %v6125_v62 = vld [vmem:[%s8672_s5 + $0x10] sm:$0xff] }
  0x12   : > { %v6712_v7 = vunpack.c.h.bf16 %v6319_v1  ;;  %v6714_v8 = vunpack.c.h.bf16 %v6284_v2  ;;  %v6719_v10 = vunpack.c.h.bf16 %v6321_v9  ;;  %v6721_v11 = vunpack.c.l.bf16 %v6321_v9  ;;  %838 = vmatpush.bf16.msra.mxu0 %v6121_v53  ;;  %v6126_v60 = vld [vmem:[%s8672_s5 + $0x18] sm:$0xff]  ;;  %v6116_v2 = vld [vmem:[%s8670_s3 + $0x8] sm:$0xff] }
  0x13   : > { %584 = vadd.xlane.f32.xlu2 %v6701_v3  ;;  %580 = vadd.xlane.f32.xlu1 %v6703_v4  ;;  %v6124_v9 = vld [vmem:[%s8672_s5 + $0x8] sm:$0xff] }
  0x14   : > { %576 = vadd.xlane.f32.xlu0 %v6705_v5  ;;  %v6361_v13 = vpop.eup %6360  ;;  %935 = vmatpush.bf16.msra.mxu1 %v6129_v54 }
  0x15   : > { %v593_v14 = vmul.f32 128.0, %v6361_v13  ;;  %vm597_vm0 = vweird.f32 %v6361_v13  ;;  %6326 = vmatpush.bf16.msra.mxu2 %v6129_v54 }
  0x16   : > { %839 = vmatpush.bf16.msra.mxu0 %v6120_v55 }
  0x17   : > { %v594_v15 = vsub.f32 1.0, %v593_v14  ;;  %v6115_v14 = vld [vmem:[%s8670_s3] sm:$0xff] }
  0x18   : > { %936 = vmatpush.bf16.msra.mxu1 %v6128_v56 }
  0x19   : > { %v595_v16 = vmul.f32 %v6361_v13, %v594_v15  ;;  %6327 = vmatpush.bf16.msra.mxu2 %v6128_v56  ;;  %v6123_v15 = vld [vmem:[%s8672_s5] sm:$0xff] }
  0x1a   : > { %840 = vmatpush.bf16.msra.mxu0 %v6119_v57 }
  0x1b   : > { %586 = vadd.xlane.f32.xlu2 %v6710_v6  ;;  %582 = vadd.xlane.f32.xlu1 %v6712_v7  ;;  %v596_v17 = vadd.f32 %v6361_v13, %v595_v16 }
  0x1c   : > { %578 = vadd.xlane.f32.xlu0 %v6714_v8  ;;  %937 = vmatpush.bf16.msra.mxu1 %v6127_v58 }
  0x1d   : > { %v6725_v18 = vsel %vm597_vm0, %v6361_v13, %v596_v17  ;;  %6328 = vmatpush.bf16.msra.mxu2 %v6127_v58 }
  0x1e   : > { %841 = vmatpush.bf16.msra.mxu0 %v6118_v59 }
  0x20   : > { %938 = vmatpush.bf16.msra.mxu1 %v6126_v60 }
  0x21   : > { %6329 = vmatpush.bf16.msra.mxu2 %v6126_v60  ;;  %v6137_v60 = vld [vmem:[%s8674_s7 + $0x30] sm:$0xff] }
  0x22   : > { %842 = vmatpush.bf16.msra.mxu0 %v6117_v61  ;;  %v6145_v61 = vld [vmem:[%s8670_s3 + $0x60] sm:$0xff] }
  0x23   : > { %590 = vadd.xlane.f32.xlu1 %v6719_v10 }
  0x24   : > { %588 = vadd.xlane.f32.xlu0 %v6721_v11  ;;  %939 = vmatpush.bf16.msra.mxu1 %v6125_v62 }
  0x25   : > { %6330 = vmatpush.bf16.msra.mxu2 %v6125_v62 }
  0x26   : > { %843 = vmatpush.bf16.msra.mxu0 %v6116_v2 }
  0x28   : > { %940 = vmatpush.bf16.msra.mxu1 %v6124_v9 }
  0x29   : > { %6331 = vmatpush.bf16.msra.mxu2 %v6124_v9 }
  0x2a   : > { %844 = vmatpush.bf16.msra.mxu0 %v6115_v14 }
  0x2c   : > { %941 = vmatpush.bf16.msra.mxu1 %v6123_v15 }
  0x2d   : > { %6332 = vmatpush.bf16.msra.mxu2 %v6123_v15 }
  0x86   : > { %v585_v19 = vpop.xlane.xlu2 %584  ;;  %v581_v20 = vpop.xlane.xlu1 %580 }
  0x87   : > { %v601_v21 = vmul.f32 %v6725_v18, %v581_v20  ;;  %v577_v22 = vpop.xlane.xlu0 %576  ;;  %v603_v36 = vmul.f32 %v6725_v18, %v585_v19 }
  0x88   : > { %v599_v23 = vmul.f32 %v6725_v18, %v577_v22 }
  0x89   : > { %v6730_v24 = vsub.f32 %v6703_v4, %v601_v21  ;;  %v6759_v41 = vsub.f32 %v6701_v3, %v603_v36 }
  0x8a   : > { %v6733_v25 = vsub.f32 %v6705_v5, %v599_v23 }
  0x8b   : > { %v617_v26 = vmul.f32 %v6730_v24, %v6730_v24  ;;  %v619_v46 = vmul.f32 %v6759_v41, %v6759_v41 }
  0x8c   : > { %v615_v27 = vmul.f32 %v6733_v25, %v6733_v25 }
  0x8d   : > { %627 = vadd.xlane.f32.xlu1 %v617_v26  ;;  %v6148_v26 = vld [vmem:[%s8670_s3 + $0x78] sm:$0xff] }
  0x8e   : > { %623 = vadd.xlane.f32.xlu2 %v615_v27  ;;  %v587_v28 = vpop.xlane.xlu2 %586  ;;  %v583_v29 = vpop.xlane.xlu1 %582  ;;  %1567 = vmatpush.bf16.msrb.mxu1 %v6148_v26 }
  0x8f   : > { %v604_v30 = vmul.f32 %v6725_v18, %v587_v28  ;;  %v602_v31 = vmul.f32 %v6725_v18, %v583_v29  ;;  %v579_v32 = vpop.xlane.xlu0 %578 }
  0x90   : > { %v600_v33 = vmul.f32 %v6725_v18, %v579_v32  ;;  %v6147_v32 = vld [vmem:[%s8670_s3 + $0x70] sm:$0xff] }
  0x91   : > { %v6743_v34 = vsub.f32 %v6710_v6, %v604_v30  ;;  %v6746_v35 = vsub.f32 %v6712_v7, %v602_v31 }
  0x92   : > { %v6750_v37 = vsub.f32 %v6714_v8, %v600_v33  ;;  %1568 = vmatpush.bf16.msrb.mxu1 %v6147_v32 }
  0x93   : > { %v620_v38 = vmul.f32 %v6743_v34, %v6743_v34  ;;  %v618_v39 = vmul.f32 %v6746_v35, %v6746_v35 }
  0x94   : > { %v616_v40 = vmul.f32 %v6750_v37, %v6750_v37 }
  0x95   : > { %633 = vadd.xlane.f32.xlu1 %v620_v38 }
  0x96   : > { %629 = vadd.xlane.f32.xlu2 %v618_v39  ;;  %625 = vadd.xlane.f32.xlu0 %v616_v40  ;;  %v591_v43 = vpop.xlane.xlu1 %590 }
  0x97   : > { %v589_v42 = vpop.xlane.xlu0 %588  ;;  %v606_v47 = vmul.f32 %v6725_v18, %v591_v43 }
  0x98   : > { %v605_v44 = vmul.f32 %v6725_v18, %v589_v42 }
  0x99   : > { %v6771_v49 = vsub.f32 %v6719_v10, %v606_v47 }
  0x9a   : > { %v6763_v45 = vsub.f32 %v6721_v11, %v605_v44  ;;  %v6138_v44 = vld [vmem:[%s8674_s7 + $0x38] sm:$0xff] }
  0x9b   : > { %v622_v50 = vmul.f32 %v6771_v49, %v6771_v49  ;;  %1031 = vmatpush.bf16.msrb.mxu2 %v6138_v44 }
  0x9c   : > { %v621_v48 = vmul.f32 %v6763_v45, %v6763_v45 }
  0x9e   : > { %631 = vadd.xlane.f32.xlu0 %v619_v46  ;;  %635 = vadd.xlane.f32.xlu2 %v621_v48  ;;  %v6146_v46 = vld [vmem:[%s8670_s3 + $0x68] sm:$0xff] }
  0x9f   : > { %1569 = vmatpush.bf16.msrb.mxu1 %v6146_v46  ;;  %1032 = vmatpush.bf16.msrb.mxu2 %v6137_v60  ;;  %v6935_v46 = vld [vmem:[%s8669_s2] ss:$0 sm:$0xff] }
  0xa3   : > { %1570 = vmatpush.bf16.msrb.mxu1 %v6145_v61  ;;  %v6133_v61 = vld [vmem:[%s8674_s7 + $0x10] sm:$0xff] }
  0xa6   : > { %637 = vadd.xlane.f32.xlu0 %v622_v50 }
 0x100   : > { %v628_v63 = vpop.xlane.xlu1 %627 }
 0x101   : > { %v624_v0 = vpop.xlane.xlu2 %623  ;;  %v641_v12 = vmul.f32 %v628_v63, %v6725_v18 }
 0x102   : > { %v639_v1 = vmul.f32 %v624_v0, %v6725_v18 }
 0x103   : > { %v6828_v16 = vadd.f32 1e-05, %v641_v12  ;;  %v6136_v12 = vld [vmem:[%s8674_s7 + $0x28] sm:$0xff] }
 0x104   : > { %v6819_v13 = vadd.f32 1e-05, %v639_v1  ;;  %1033 = vmatpush.bf16.msrb.mxu2 %v6136_v12  ;;  %v6141_v12 = vld [vmem:[%s8670_s3 + $0x40] sm:$0xff] }
 0x105   : > { %vm681_vm12 = vweird.f32 %v6828_v16 }
 0x106   : > { %6362 = vrsqrt.f32 %v6819_v13  ;;  %vm661_vm2 = vweird.f32 %v6819_v13 }
 0x107   : > { %6364 = vrsqrt.f32 %v6828_v16 }
 0x108   : > { %v634_v17 = vpop.xlane.xlu1 %633 }
 0x109   : > { %v644_v19 = vmul.f32 %v634_v17, %v6725_v18  ;;  %v630_v20 = vpop.xlane.xlu2 %629  ;;  %v626_v21 = vpop.xlane.xlu0 %625 }
 0x10a   : > { %v642_v22 = vmul.f32 %v630_v20, %v6725_v18  ;;  %v640_v23 = vmul.f32 %v626_v21, %v6725_v18 }
 0x10b   : > { %v6836_v27 = vadd.f32 1e-05, %v644_v19 }
 0x10c   : > { %v6838_v28 = vpop.eup %6362  ;;  %v6841_v29 = vadd.f32 1e-05, %v642_v22  ;;  %v6843_v30 = vadd.f32 1e-05, %v640_v23  ;;  %v6135_v23 = vld [vmem:[%s8674_s7 + $0x20] sm:$0xff] }
 0x10d   : > { %v656_v31 = vmul.f32 %v6838_v28, %v6819_v13  ;;  %6366 = vrsqrt.f32 %v6836_v27  ;;  %v6854_v40 = vpop.eup %6364  ;;  %vm662_vm1 = vweird.f32 %v6838_v28  ;;  %v6144_v13 = vld [vmem:[%s8670_s3 + $0x58] sm:$0xff]  ;;  %vm711_vm5 = vweird.f32 %v6836_v27  ;;  %1034 = vmatpush.bf16.msrb.mxu2 %v6135_v23 }
 0x10e   : > { %6368 = vrsqrt.f32 %v6841_v29  ;;  %v676_v54 = vmul.f32 %v6854_v40, %v6828_v16  ;;  %vm6892_vm3 = vmor %vm661_vm2, %vm662_vm1  ;;  %1571 = vmatpush.bf16.msrb.mxu1 %v6144_v13  ;;  %vm671_vm7 = vweird.f32 %v6843_v30  ;;  %vm691_vm10 = vweird.f32 %v6841_v29  ;;  %v6132_v16 = vld [vmem:[%s8674_s7 + $0x8] sm:$0xff] }
 0x10f   : > { %v657_v33 = vmul.f32 %v6838_v28, %v656_v31  ;;  %6370 = vrsqrt.f32 %v6843_v30  ;;  %vm682_vm13 = vweird.f32 %v6854_v40 }
 0x110   : > { %v677_v1 = vmul.f32 %v6854_v40, %v676_v54  ;;  %vm6986_vm1 = vmor %vm681_vm12, %vm682_vm13 }
 0x111   : > { %v658_v36 = vmul.f32 0.5, %v657_v33  ;;  %v636_v38 = vpop.xlane.xlu2 %635  ;;  %v632_v39 = vpop.xlane.xlu0 %631  ;;  %v6143_v33 = vld [vmem:[%s8670_s3 + $0x50] sm:$0xff] }
 0x112   : > { %v645_v42 = vmul.f32 %v636_v38, %v6725_v18  ;;  %v643_v43 = vmul.f32 %v632_v39, %v6725_v18  ;;  %v678_v31 = vmul.f32 0.5, %v677_v1  ;;  %1572 = vmatpush.bf16.msrb.mxu1 %v6143_v33 }
 0x113   : > { %v6864_v47 = vpop.eup %6366  ;;  %v659_v48 = vsub.f32 1.5, %v658_v36 }
 0x114   : > { %v6866_v50 = vpop.eup %6368  ;;  %v706_v51 = vmul.f32 %v6864_v47, %v6836_v27  ;;  %v6870_v52 = vadd.f32 1e-05, %v645_v42  ;;  %v6876_v56 = vadd.f32 1e-05, %v643_v43  ;;  %vm712_vm6 = vweird.f32 %v6864_v47  ;;  %v6142_v27 = vld [vmem:[%s8670_s3 + $0x48] sm:$0xff] }
 0x115   : > { %v6371_v53 = vpop.eup %6370  ;;  %v686_v55 = vmul.f32 %v6866_v50, %v6841_v29  ;;  %v660_v57 = vmul.f32 %v6838_v28, %v659_v48  ;;  %vm6942_vm9 = vmor %vm711_vm5, %vm712_vm6  ;;  %vm692_vm11 = vweird.f32 %v6866_v50 }
 0x116   : > { %v707_v58 = vmul.f32 %v6864_v47, %v706_v51  ;;  %v666_v59 = vmul.f32 %v6371_v53, %v6843_v30  ;;  %6372 = vrsqrt.f32 %v6870_v52  ;;  %vm672_vm4 = vweird.f32 %v6371_v53  ;;  %vm6972_vm14 = vmor %vm691_vm10, %vm692_vm11  ;;  %1573 = vmatpush.bf16.msrb.mxu1 %v6142_v27 }
 0x117   : > { %v687_v62 = vmul.f32 %v6866_v50, %v686_v55  ;;  %6374 = vrsqrt.f32 %v6876_v56  ;;  %v664_v14 = vsel %vm6892_vm3, %v6838_v28, %v660_v57  ;;  %v6917_v28 = vld [vmem:[%s8690_s21] ss:$0 sm:$0xff]  ;;  %vm673_vm8 = vmor %vm671_vm7, %vm672_vm4  ;;  %v679_v30 = vsub.f32 1.5, %v678_v31  ;;  %v6134_v55 = vld [vmem:[%s8674_s7 + $0x18] sm:$0xff] }
 0x118   : > { %v708_v63 = vmul.f32 0.5, %v707_v58  ;;  %v667_v0 = vmul.f32 %v6371_v53, %v666_v59  ;;  %v735_v32 = vmul.f32 %v664_v14, %v6733_v25  ;;  %1035 = vmatpush.bf16.msrb.mxu2 %v6134_v55  ;;  %vm701_vm15 = vweird.f32 %v6876_v56 }
 0x119   : > { %v638_v9 = vpop.xlane.xlu0 %637  ;;  %v688_v19 = vmul.f32 0.5, %v687_v62  ;;  %vm721_vm5 = vweird.f32 %v6870_v52 }
 0x11a   : > { %v668_v15 = vmul.f32 0.5, %v667_v0  ;;  %v646_v17 = vmul.f32 %v638_v9, %v6725_v18  ;;  %v709_v20 = vsub.f32 1.5, %v708_v63  ;;  %v746_v48 = vmul.f32 %v6917_v28, %v735_v32  ;;  %1574 = vmatpush.bf16.msrb.mxu1 %v6141_v12 }
 0x11b   : > { %v689_v39 = vsub.f32 1.5, %v688_v19  ;;  %v680_v63 = vmul.f32 %v6854_v40, %v679_v30 }
 0x11c   : > { %v669_v21 = vsub.f32 1.5, %v668_v15  ;;  %v6907_v22 = vadd.f32 1e-05, %v646_v17  ;;  %v6912_v26 = vpop.eup %6372  ;;  %v710_v42 = vmul.f32 %v6864_v47, %v709_v20  ;;  %v757_v0 = vadd.f32 %v6935_v46, %v746_v48  ;;  %1036 = vmatpush.bf16.msrb.mxu2 %v6133_v61 }
 0x11d   : > { %v6375_v38 = vpop.eup %6374  ;;  %v716_v43 = vmul.f32 %v6912_v26, %v6870_v52  ;;  %v690_v58 = vmul.f32 %v6866_v50, %v689_v39  ;;  %vm722_vm6 = vweird.f32 %v6912_v26 }
 0x11e   : > { %v670_v36 = vmul.f32 %v6371_v53, %v669_v21  ;;  %6376 = vrsqrt.f32 %v6907_v22  ;;  %v696_v44 = vmul.f32 %v6375_v38, %v6876_v56  ;;  %v714_v57 = vsel %vm6942_vm9, %v6864_v47, %v710_v42 }
 0x11f   : > { %v717_v59 = vmul.f32 %v6912_v26, %v716_v43  ;;  %vm702_vm0 = vweird.f32 %v6375_v38  ;;  %v740_v13 = vmul.f32 %v714_v57, %v6743_v34  ;;  %v694_v56 = vsel %vm6972_vm14, %v6866_v50, %v690_v58  ;;  %v6152_v57 = vld [vmem:[%s8672_s5 + $0x58] sm:$0xff]  ;;  %v6151_v58 = vld [vmem:[%s8672_s5 + $0x50] sm:$0xff] }
 0x120   : > { %v674_v25 = vsel %vm673_vm8, %v6371_v53, %v670_v36  ;;  %v697_v54 = vmul.f32 %v6375_v38, %v696_v44  ;;  %vm703_vm2 = vmor %vm701_vm15, %vm702_vm0  ;;  %v684_v34 = vsel %vm6986_vm1, %v6854_v40, %v680_v63  ;;  %v738_v23 = vmul.f32 %v694_v56, %v6746_v35  ;;  %1037 = vmatpush.bf16.msrb.mxu2 %v6132_v16  ;;  %v6131_v36 = vld [vmem:[%s8674_s7] sm:$0xff] }
 0x121   : > { %v736_v53 = vmul.f32 %v674_v25, %v6750_v37  ;;  %v718_v15 = vmul.f32 0.5, %v717_v59  ;;  %v751_v50 = vmul.f32 %v6917_v28, %v740_v13  ;;  %vm731_vm3 = vweird.f32 %v6907_v22  ;;  %vm723_vm8 = vmor %vm721_vm5, %vm722_vm6  ;;  %v6150_v59 = vld [vmem:[%s8672_s5 + $0x48] sm:$0xff] }
 0x122   : > { %v698_v60 = vmul.f32 0.5, %v697_v54  ;;  %v737_v40 = vmul.f32 %v684_v34, %v6730_v24  ;;  %v749_v39 = vmul.f32 %v6917_v28, %v738_v23  ;;  %vm1112_vm9 = vcmask 261120  }
 0x123   : > { %v747_v37 = vmul.f32 %v6917_v28, %v736_v53  ;;  %v719_v32 = vsub.f32 1.5, %v718_v15 }
 0x124   : > { %v6377_v62 = vpop.eup %6376  ;;  %v699_v2 = vsub.f32 1.5, %v698_v60  ;;  %1038 = vmatpush.bf16.msrb.mxu2 %v6131_v36  ;;  %v748_v25 = vmul.f32 %v6917_v28, %v737_v40  ;;  %v760_v52 = vadd.f32 %v6935_v46, %v749_v39  ;;  %v6149_v60 = vld [vmem:[%s8672_s5 + $0x40] sm:$0xff] }
 0x125   : > { %v758_v1 = vadd.f32 %v6935_v46, %v747_v37  ;;  %v726_v9 = vmul.f32 %v6377_v62, %v6907_v22  ;;  %vm732_vm4 = vweird.f32 %v6377_v62  ;;  %v720_v42 = vmul.f32 %v6912_v26, %v719_v32 }
 0x126   : > { %v700_v17 = vmul.f32 %v6375_v38, %v699_v2  ;;  %vm733_vm7 = vmor %vm731_vm3, %vm732_vm4  ;;  %v759_v30 = vadd.f32 %v6935_v46, %v748_v25  ;;  %v6345_v2 = vld [vmem:[%s8673_s6] ss:$0 sm:$0xff] }
 0x127   : > { %v6991_v14 = vpack.c.bf16 %v758_v1, %v757_v0  ;;  %v727_v19 = vmul.f32 %v6377_v62, %v726_v9  ;;  %v724_v44 = vsel %vm723_vm8, %v6912_v26, %v720_v42 }
 0x128   : > { %v704_v20 = vsel %vm703_vm2, %v6375_v38, %v700_v17  ;;  %v7027_v51 = vpack.c.bf16 %v760_v52, %v759_v30  ;;  %v741_v53 = vmul.f32 %v724_v44, %v6763_v45  ;;  %v6156_v45 = vld [vmem:[%s8672_s5 + $0x78] sm:$0xff] }
 0x129   : > { %845 = vmatmul.bf16.vlgmr.msra.gmra.mxu0 %v6991_v14  ;;  %942 = vmatmul.bf16.vlgmr.msra.gmra.mxu1 %v6991_v14  ;;  %v728_v21 = vmul.f32 0.5, %v727_v19  ;;  %v739_v31 = vmul.f32 %v704_v20, %v6759_v41  ;;  %v762_v41 = vadd.f32 %v6935_v46, %v751_v50  ;;  %v7083_v50 = vld [vmem:[%s8671_s4] ss:$0 sm:$0xff] }
 0x12a   : > { %v752_v55 = vmul.f32 %v6917_v28, %v741_v53 }
 0x12b   : > { %v729_v33 = vsub.f32 1.5, %v728_v21  ;;  %v750_v38 = vmul.f32 %v6917_v28, %v739_v31 }
 0x12c   : > { %v763_v26 = vadd.f32 %v6935_v46, %v752_v55 }
 0x12d   : > { %v730_v35 = vmul.f32 %v6377_v62, %v729_v33  ;;  %v761_v22 = vadd.f32 %v6935_v46, %v750_v38 }
 0x12f   : > { %v7020_v24 = vpack.c.bf16 %v762_v41, %v761_v22  ;;  %v734_v43 = vsel %vm733_vm7, %v6377_v62, %v730_v35 }
 0x130   : > { %v742_v48 = vmul.f32 %v734_v43, %v6771_v49  ;;  %v6155_v49 = vld [vmem:[%s8672_s5 + $0x70] sm:$0xff] }
 0x131   : > { %952 = vmatmul.bf16.vlgmr.msra.gmra.mxu2 %v7020_v24 }
 0x132   : > { %v753_v54 = vmul.f32 %v6917_v28, %v742_v48  ;;  %1666 = vmatpush.bf16.msra.mxu2 %v6156_v45  ;;  %v6154_v28 = vld [vmem:[%s8672_s5 + $0x68] sm:$0xff] }
 0x134   : > { %v764_v27 = vadd.f32 %v6935_v46, %v753_v54  ;;  %v6153_v46 = vld [vmem:[%s8672_s5 + $0x60] sm:$0xff] }
 0x136   : > { %v7036_v37 = vpack.c.bf16 %v764_v27, %v763_v26  ;;  %1667 = vmatpush.bf16.msra.mxu2 %v6155_v49 }
 0x139   : > { %850 = vmatmul.bf16.gmra.mxu0 %v7027_v51  ;;  %947 = vmatmul.bf16.gmra.mxu1 %v7027_v51 }
 0x13a   : > { %1668 = vmatpush.bf16.msra.mxu2 %v6154_v28 }
 0x13e   : > { %1669 = vmatpush.bf16.msra.mxu2 %v6153_v46 }
 0x141   : > { %957 = vmatmul.bf16.gmra.mxu2 %v7036_v37 }
 0x142   : > { %1670 = vmatpush.bf16.msra.mxu2 %v6152_v57 }
 0x146   : > { %1671 = vmatpush.bf16.msra.mxu2 %v6151_v58 }
 0x149   : > { %855 = vmatmul.bf16.gmra.mxu0 %v7020_v24  ;;  %1575 = vmatmul.bf16.vlgmr.msrb.gmra.mxu1 %v6991_v14 }
 0x14a   : > { %1672 = vmatpush.bf16.msra.mxu2 %v6150_v59 }
 0x14e   : > { %1673 = vmatpush.bf16.msra.mxu2 %v6149_v60 }
 0x151   : > { %1039 = vmatmul.bf16.vlgmr.msrb.gmra.mxu2 %v6991_v14 }
 0x159   : > { %860 = vmatmul.bf16.gmra.mxu0 %v7036_v37  ;;  %1580 = vmatmul.bf16.gmra.mxu1 %v7027_v51 }
 0x161   : > { %1044 = vmatmul.bf16.gmra.mxu2 %v7027_v51 }
 0x169   : > { %1585 = vmatmul.bf16.gmra.mxu1 %v7020_v24 }
 0x171   : > { %1049 = vmatmul.bf16.gmra.mxu2 %v7020_v24 }
 0x179   : > { %1590 = vmatmul.bf16.gmra.mxu1 %v7036_v37 }
 0x181   : > { %1054 = vmatmul.bf16.gmra.mxu2 %v7036_v37 }
 0x191   : > { %1674 = vmatmul.bf16.vlgmr.msra.gmra.mxu2 %v6991_v14 }
 0x1a1   : > { %1679 = vmatmul.bf16.gmra.mxu2 %v7027_v51 }
 0x1a6   : > { %v943_v61 = vpop.f32.mrf.mxu1  ;;  %v846_v62 = vpop.f32.mrf.mxu0 }
 0x1a7   : > { %v944_v17 = vadd.f32 %v6345_v2, %v943_v61  ;;  %v847_v38 = vadd.f32 %v7083_v50, %v846_v62 }
 0x1a9   : > { %v1076_v23 = vpack.c.bf16 %v944_v17, %v944_v17  ;;  %v1060_v25 = vmul.f32 0.17677669, %v847_v38 }
 0x1ab   : > { %v1106_v35 = vunpack.c.l.b16 %v1076_v23  ;;  %v1068_v54 = vpack.c.bf16 %v1060_v25, %v1060_v25 }
 0x1ad   : > { %v1096_v46 = vunpack.c.l.b16 %v1068_v54 }
 0x1ae   : > { %v945_v63 = vpop.f32.mrf.mxu1  ;;  %v848_v1 = vpop.f32.mrf.mxu0 }
 0x1af   : > { %v946_v13 = vadd.f32 %v6345_v2, %v945_v63  ;;  %v849_v33 = vadd.f32 %v7083_v50, %v848_v1 }
 0x1b1   : > { %1684 = vmatmul.bf16.gmra.mxu2 %v7020_v24  ;;  %v1077_v34 = vpack.c.bf16 %v946_v13, %v946_v13  ;;  %v1061_v41 = vmul.f32 0.17677669, %v849_v33 }
 0x1b3   : > { %v1107_v36 = vunpack.c.l.b16 %v1077_v34  ;;  %v1069_v52 = vpack.c.bf16 %v1061_v41, %v1061_v41 }
 0x1b4   : > { %v953_v0 = vpop.f32.mrf.mxu2 }
 0x1b5   : > { %v1110_v42 = vpack.c.b16 %v1107_v36, %v1106_v35  ;;  %v954_v55 = vadd.f32 %v6345_v2, %v953_v0  ;;  %v1097_v26 = vunpack.c.l.b16 %v1069_v52 }
 0x1b6   : > { %v948_v47 = vpop.f32.mrf.mxu1  ;;  %v851_v19 = vpop.f32.mrf.mxu0 }
 0x1b7   : > { %v949_v9 = vadd.f32 %v6345_v2, %v948_v47  ;;  %v1120_v53 = vsel %vm1112_vm9, %v1110_v42, 0  ;;  %v1080_v57 = vpack.c.bf16 %v954_v55, %v954_v55  ;;  %v1100_v47 = vpack.c.b16 %v1097_v26, %v1096_v46 }
 0x1b8   : > { %v852_v0 = vadd.f32 %v7083_v50, %v851_v19 }
 0x1b9   : > { %v1078_v56 = vpack.c.bf16 %v949_v9, %v949_v9  ;;  %v1158_v1 = vunpack.c.l.b16 %v1080_v57 }
 0x1bb   : > { %v1108_v20 = vunpack.c.l.b16 %v1078_v56 }
 0x1bc   : > { %v955_v12 = vpop.f32.mrf.mxu2 }
 0x1bd   : > { %v956_v44 = vadd.f32 %v6345_v2, %v955_v12  ;;  %v1062_v12 = vmul.f32 0.17677669, %v852_v0 }
 0x1be   : > { %v950_v29 = vpop.f32.mrf.mxu1  ;;  %v853_v22 = vpop.f32.mrf.mxu0 }
 0x1bf   : > { %v951_v15 = vadd.f32 %v6345_v2, %v950_v29  ;;  %v1081_v45 = vpack.c.bf16 %v956_v44, %v956_v44  ;;  %v854_v62 = vadd.f32 %v7083_v50, %v853_v22  ;;  %v1070_v17 = vpack.c.bf16 %v1062_v12, %v1062_v12 }
 0x1c1   : > { %v1079_v16 = vpack.c.bf16 %v951_v15, %v951_v15  ;;  %1689 = vmatmul.bf16.gmra.mxu2 %v7036_v37  ;;  %v1159_v61 = vunpack.c.l.b16 %v1081_v45  ;;  %v1098_v34 = vunpack.c.l.b16 %v1070_v17 }
 0x1c3   : > { %v1109_v21 = vunpack.c.l.b16 %v1079_v16  ;;  %v1162_v9 = vpack.c.b16 %v1159_v61, %v1158_v1 }
 0x1c4   : > { %v958_v31 = vpop.f32.mrf.mxu2 }
 0x1c5   : > { %v1111_v32 = vpack.c.b16 %v1109_v21, %v1108_v20  ;;  %v959_v39 = vadd.f32 %v6345_v2, %v958_v31  ;;  %v1171_v56 = vsel %vm1112_vm9, %v1162_v9, 0  ;;  %v6347_v31 = vld [vmem:[%s8675_s8] ss:$0 sm:$0xff] }
 0x1c6   : > { %v856_v59 = vpop.f32.mrf.mxu0 }
 0x1c7   : > { %v1123_v40 = vsel %vm1112_vm9, %v1111_v32, 0  ;;  %v1082_v30 = vpack.c.bf16 %v959_v39, %v959_v39  ;;  %v857_v19 = vadd.f32 %v7083_v50, %v856_v59 }
 0x1c8   : > { %1131 = vmatpush.bf16.xpose.msra.mxu3 %v1123_v40 }
 0x1c9   : > { %v1160_v49 = vunpack.c.l.b16 %v1082_v30  ;;  %v1064_v40 = vmul.f32 0.17677669, %v857_v19 }
 0x1cb   : > { %v1072_v25 = vpack.c.bf16 %v1064_v40, %v1064_v40 }
 0x1cc   : > { %v960_v43 = vpop.f32.mrf.mxu2 }
 0x1cd   : > { %v961_v48 = vadd.f32 %v6345_v2, %v960_v43  ;;  %v1063_v2 = vmul.f32 0.17677669, %v854_v62  ;;  %v1148_v55 = vunpack.c.l.b16 %v1072_v25 }
 0x1ce   : > { %v858_v15 = vpop.f32.mrf.mxu0 }
 0x1cf   : > { %v1083_v27 = vpack.c.bf16 %v961_v48, %v961_v48  ;;  %v1071_v13 = vpack.c.bf16 %v1063_v2, %v1063_v2  ;;  %v859_v21 = vadd.f32 %v7083_v50, %v858_v15 }
 0x1d0   : > { %1132 = vmatpush.bf16.xpose.msra.mxu3 %v1120_v53 }
 0x1d1   : > { %v1161_v28 = vunpack.c.l.b16 %v1083_v27  ;;  %v1099_v16 = vunpack.c.l.b16 %v1071_v13  ;;  %v1065_v33 = vmul.f32 0.17677669, %v859_v21 }
 0x1d3   : > { %v1163_v58 = vpack.c.b16 %v1161_v28, %v1160_v49  ;;  %v1101_v23 = vpack.c.b16 %v1099_v16, %v1098_v34  ;;  %v1073_v41 = vpack.c.bf16 %v1065_v33, %v1065_v33 }
 0x1d4   : > { %v1040_v60 = vpop.f32.mrf.mxu2 }
 0x1d5   : > { %v1174_v63 = vsel %vm1112_vm9, %v1163_v58, 0  ;;  %v1041_v39 = vadd.f32 %v6347_v31, %v1040_v60  ;;  %v1149_v44 = vunpack.c.l.b16 %v1073_v41 }
 0x1d6   : > { %v861_v32 = vpop.f32.mrf.mxu0 }
 0x1d7   : > { %5322 = vmatmul.msk.bf16.vlgmr.msra.gmra.mxu3 %vm1112_vm9, %v1100_v47  ;;  %v1084_v30 = vpack.c.bf16 %v1041_v39, %v1041_v39  ;;  %v1152_v49 = vpack.c.b16 %v1149_v44, %v1148_v55  ;;  %v862_v57 = vadd.f32 %v7083_v50, %v861_v32 }
 0x1d8   : > { %1182 = vmatpush.bf16.xpose.msrb.mxu3 %v1174_v63 }
 0x1d9   : > { %v1409_v28 = vunpack.c.l.b16 %v1084_v30  ;;  %v1066_v60 = vmul.f32 0.17677669, %v862_v57 }
 0x1db   : > { %v1074_v63 = vpack.c.bf16 %v1066_v60, %v1066_v60 }
 0x1dc   : > { %v1042_v29 = vpop.f32.mrf.mxu2 }
 0x1dd   : > { %v1043_v38 = vadd.f32 %v6347_v31, %v1042_v29  ;;  %v1150_v1 = vunpack.c.l.b16 %v1074_v63 }
 0x1de   : > { %v863_v54 = vpop.f32.mrf.mxu0 }
 0x1df   : > { %v1085_v43 = vpack.c.bf16 %v1043_v38, %v1043_v38  ;;  %v864_v46 = vadd.f32 %v7083_v50, %v863_v54  ;;  %v7107_v38 = vld [vmem:[%s8673_s6 + $0x1] ss:$0 sm:$0xff] }
 0x1e0   : > { %1183 = vmatpush.bf16.xpose.msrb.mxu3 %v1171_v56 }
 0x1e1   : > { %v1410_v27 = vunpack.c.l.b16 %v1085_v43  ;;  %v1067_v59 = vmul.f32 0.17677669, %v864_v46 }
 0x1e3   : > { %v1413_v58 = vpack.c.b16 %v1410_v27, %v1409_v28  ;;  %v1075_v62 = vpack.c.bf16 %v1067_v59, %v1067_v59 }
 0x1e4   : > { %v1045_v20 = vpop.f32.mrf.mxu2 }
 0x1e5   : > { %v1046_v36 = vadd.f32 %v6347_v31, %v1045_v20  ;;  %v1151_v47 = vunpack.c.l.b16 %v1075_v62 }
 0x1e7   : > { %5323 = vmatmul.msk.bf16.gmra.mxu3 %vm1112_vm9, %v1101_v23  ;;  %v1086_v22 = vpack.c.bf16 %v1046_v36, %v1046_v36  ;;  %v1153_v2 = vpack.c.b16 %v1151_v47, %v1150_v1 }
 0x1e9   : > { %v1411_v48 = vunpack.c.l.b16 %v1086_v22 }
 0x1ec   : > { %v1047_v35 = vpop.f32.mrf.mxu2 }
 0x1ed   : > { %v1048_v42 = vadd.f32 %v6347_v31, %v1047_v35 }
 0x1ef   : > { %v1087_v52 = vpack.c.bf16 %v1048_v42, %v1048_v42 }
 0x1f1   : > { %v1412_v53 = vunpack.c.l.b16 %v1087_v52 }
 0x1f3   : > { %v1414_v26 = vpack.c.b16 %v1412_v53, %v1411_v48 }
 0x1f4   : > { %v1050_v45 = vpop.f32.mrf.mxu2 }
 0x1f5   : > { %1429 = vmatpush.bf16.msra.mxu3 %v1414_v26  ;;  %v1051_v13 = vadd.f32 %v6347_v31, %v1050_v45 }
 0x1f7   : > { %5324 = vmatmul.msk.bf16.vlgmr.msrb.gmra.mxu3 %vm1112_vm9, %v1152_v49  ;;  %v1088_v16 = vpack.c.bf16 %v1051_v13, %v1051_v13 }
 0x1f9   : > { %1430 = vmatpush.bf16.msra.mxu3 %v1413_v58  ;;  %v1456_v32 = vunpack.c.l.b16 %v1088_v16 }
 0x1fc   : > { %v1052_v61 = vpop.f32.mrf.mxu2 }
 0x1fd   : > { %v1053_v12 = vadd.f32 %v6347_v31, %v1052_v61 }
 0x1ff   : > { %v1089_v15 = vpack.c.bf16 %v1053_v12, %v1053_v12 }
 0x201   : > { %v1457_v21 = vunpack.c.l.b16 %v1089_v15 }
 0x203   : > { %v1460_v33 = vpack.c.b16 %v1457_v21, %v1456_v32 }
 0x204   : > { %v1055_v0 = vpop.f32.mrf.mxu2 }
 0x205   : > { %v1056_v9 = vadd.f32 %v6347_v31, %v1055_v0 }
 0x207   : > { %5325 = vmatmul.msk.bf16.gmra.mxu3 %vm1112_vm9, %v1153_v2  ;;  %v1090_v50 = vpack.c.bf16 %v1056_v9, %v1056_v9 }
 0x209   : > { %v1458_v34 = vunpack.c.l.b16 %v1090_v50 }
 0x20c   : > { %v1057_v29 = vpop.f32.mrf.mxu2 }
 0x20d   : > { %v1058_v56 = vadd.f32 %v6347_v31, %v1057_v29 }
 0x20f   : > { %v1091_v17 = vpack.c.bf16 %v1058_v56, %v1058_v56 }
 0x211   : > { %v1459_v20 = vunpack.c.l.b16 %v1091_v17 }
 0x213   : > { %v1461_v23 = vpack.c.b16 %v1459_v20, %v1458_v34 }
 0x214   : > { %v1675_v19 = vpop.f32.mrf.mxu2 }
 0x215   : > { %1476 = vmatpush.bf16.msrb.mxu0 %v1461_v23  ;;  %v1676_v42 = vadd.f32 %v7107_v38, %v1675_v19 }
 0x217   : > { %v1810_v30 = vpack.c.bf16 %v1676_v42, %v1676_v42 }
 0x219   : > { %1477 = vmatpush.bf16.msrb.mxu0 %v1460_v33  ;;  %v1840_v55 = vunpack.c.l.b16 %v1810_v30 }
 0x21c   : > { %v1677_v36 = vpop.f32.mrf.mxu2 }
 0x21d   : > { %v1678_v41 = vadd.f32 %v7107_v38, %v1677_v36 }
 0x21f   : > { %v1811_v43 = vpack.c.bf16 %v1678_v41, %v1678_v41 }
 0x221   : > { %v1841_v53 = vunpack.c.l.b16 %v1811_v43 }
 0x223   : > { %v1844_v27 = vpack.c.b16 %v1841_v53, %v1840_v55 }
 0x224   : > { %v1680_v40 = vpop.f32.mrf.mxu2 }
 0x225   : > { %v1681_v31 = vadd.f32 %v7107_v38, %v1680_v40  ;;  %v1853_v26 = vsel %vm1112_vm9, %v1844_v27, 0 }
 0x227   : > { %v1812_v39 = vpack.c.bf16 %v1681_v31, %v1681_v31 }
 0x229   : > { %v1842_v52 = vunpack.c.l.b16 %v1812_v39 }
 0x22c   : > { %v1682_v35 = vpop.f32.mrf.mxu2 }
 0x22d   : > { %v1683_v22 = vadd.f32 %v7107_v38, %v1682_v35 }
 0x22f   : > { %v1813_v25 = vpack.c.bf16 %v1683_v22, %v1683_v22 }
 0x231   : > { %v1843_v44 = vunpack.c.l.b16 %v1813_v25 }
 0x233   : > { %v1845_v48 = vpack.c.b16 %v1843_v44, %v1842_v52 }
 0x234   : > { %v1685_v39 = vpop.f32.mrf.mxu2 }
 0x235   : > { %v1856_v54 = vsel %vm1112_vm9, %v1845_v48, 0 }
 0x236   : > { %1864 = vmatpush.bf16.xpose.msra.mxu0 %v1856_v54 }
 0x23c   : > { %v1687_v22 = vpop.f32.mrf.mxu2 }
 0x23e   : > { %1865 = vmatpush.bf16.xpose.msra.mxu0 %v1853_v26 }
 0x244   : > { %v1690_v25 = vpop.f32.mrf.mxu2 }
 0x24c   : > { %v1692_v27 = vpop.f32.mrf.mxu2 }
 0x25a   : > { %v7115_v45 = vpop.f32.mrf.mxu3 }
 0x25b   : > { %v1195_v32 = vsel %vm1112_vm9, %v7115_v45, -inf }
 0x262   : > { %v7117_v49 = vpop.f32.mrf.mxu3 }
 0x263   : > { %v1198_v31 = vsel %vm1112_vm9, %v7117_v49, -inf }
 0x26a   : > { %v7119_v28 = vpop.f32.mrf.mxu3 }
 0x26b   : > { %v1201_v41 = vsel %vm1112_vm9, %v7119_v28, -inf }
 0x272   : > { %v7121_v46 = vpop.f32.mrf.mxu3 }
 0x273   : > { %v1204_v40 = vsel %vm1112_vm9, %v7121_v46, -inf }
 0x27a   : > { %v1185_v57 = vpop.f32.mrf.mxu3 }
 0x27b   : > { %v1207_v58 = vsel %vm1112_vm9, %v1185_v57, -inf }
 0x27c   : > { %1208 = vmax.xlane.f32.xlu1 %v1207_v58 }
 0x282   : > { %v1187_v59 = vpop.f32.mrf.mxu3 }
 0x283   : > { %v1210_v60 = vsel %vm1112_vm9, %v1187_v59, -inf }
 0x284   : > { %1211 = vmax.xlane.f32.xlu2 %v1210_v60 }
 0x28a   : > { %v1190_v61 = vpop.f32.mrf.mxu3 }
 0x28b   : > { %v1213_v62 = vsel %vm1112_vm9, %v1190_v61, -inf }
 0x28c   : > { %1214 = vmax.xlane.f32.xlu0 %v1213_v62  ;;  %v1693_v62 = vadd.f32 %v7107_v38, %v1692_v27 }
 0x292   : > { %v1192_v63 = vpop.f32.mrf.mxu3 }
 0x293   : > { %v1216_v47 = vsel %vm1112_vm9, %v1192_v63, -inf }
 0x294   : > { %1217 = vmax.xlane.f32.xlu1 %v1216_v47 }
 0x2ef   : > { %v1209_v1 = vpop.xlane.xlu1 %1208 }
 0x2f0   : > { %v1223_v0 = vsub.f32 %v1185_v57, %v1209_v1  ;;  %v1691_v1 = vadd.f32 %v7107_v38, %v1690_v25 }
 0x2f2   : > { %v1235_v2 = vmul.f32 1.442695, %v1223_v0 }
 0x2f4   : > { %6378 = vpow2.f32 %v1235_v2 }
 0x2f7   : > { %v1212_v9 = vpop.xlane.xlu2 %1211 }
 0x2f8   : > { %v1224_v12 = vsub.f32 %v1187_v59, %v1212_v9 }
 0x2fa   : > { %v7127_v29 = vpop.eup %6378  ;;  %v1237_v13 = vmul.f32 1.442695, %v1224_v12 }
 0x2fb   : > { %v1255_v50 = vsel %vm1112_vm9, %v7127_v29, 0.0 }
 0x2fc   : > { %6380 = vpow2.f32 %v1237_v13  ;;  %1256 = vadd.xlane.f32.xlu2 %v1255_v50  ;;  %v1817_v50 = vpack.c.bf16 %v1693_v62, %v1693_v62 }
 0x2fe   : > { %v1894_v25 = vunpack.c.l.b16 %v1817_v50 }
 0x2ff   : > { %v1215_v56 = vpop.xlane.xlu0 %1214 }
 0x300   : > { %v1225_v15 = vsub.f32 %v1190_v61, %v1215_v56 }
 0x302   : > { %v7131_v17 = vpop.eup %6380  ;;  %v1239_v16 = vmul.f32 1.442695, %v1225_v15  ;;  %v7159_v15 = vpop.f32.mrf.mxu1 }
 0x303   : > { %v1258_v34 = vsel %vm1112_vm9, %v7131_v17, 0.0 }
 0x304   : > { %6382 = vpow2.f32 %v1239_v16  ;;  %1259 = vadd.xlane.f32.xlu0 %v1258_v34  ;;  %v1686_v16 = vadd.f32 %v7107_v38, %v1685_v39 }
 0x307   : > { %v1218_v20 = vpop.xlane.xlu1 %1217 }
 0x308   : > { %v1226_v21 = vsub.f32 %v1192_v63, %v1218_v20 }
 0x30a   : > { %v7135_v23 = vpop.eup %6382  ;;  %v1241_v19 = vmul.f32 1.442695, %v1226_v21  ;;  %v1816_v21 = vpack.c.bf16 %v1691_v1, %v1691_v1 }
 0x30b   : > { %v1261_v33 = vsel %vm1112_vm9, %v7135_v23, 0.0 }
 0x30c   : > { %6384 = vpow2.f32 %v1241_v19  ;;  %1196 = vmax.xlane.f32.xlu0 %v1195_v32  ;;  %1262 = vadd.xlane.f32.xlu1 %v1261_v33 }
 0x312   : > { %v7141_v36 = vpop.eup %6384 }
 0x313   : > { %v1264_v35 = vsel %vm1112_vm9, %v7141_v36, 0.0 }
 0x314   : > { %1205 = vmax.xlane.f32.xlu0 %v1204_v40  ;;  %1199 = vmax.xlane.f32.xlu1 %v1198_v31  ;;  %v1688_v31 = vadd.f32 %v7107_v38, %v1687_v22 }
 0x315   : > { %1265 = vadd.xlane.f32.xlu2 %v1264_v35 }
 0x316   : > { %v1815_v22 = vpack.c.bf16 %v1688_v31, %v1688_v31 }
 0x31d   : > { %1202 = vmax.xlane.f32.xlu2 %v1201_v41 }
 0x36f   : > { %v1257_v42 = vpop.xlane.xlu2 %1256 }
 0x370   : > { %6386 = vrcp.f32 %v1257_v42  ;;  %v1338_v54 = vand.u32 2147483648, %v1257_v42  ;;  %vm1332_vm11 = vweird.f32 %v1257_v42  ;;  %v1336_v26 = vand.u32 2147483647, %v1257_v42 }
 0x372   : > { %v1339_v63 = vor.u32 1.1754944e-38, %v1338_v54  ;;  %vm1337_vm13 = vcmp.eq.f32.partialorder %v1336_v26, 8.507059e+37  ;;  %v1893_v54 = vunpack.c.l.b16 %v1816_v21 }
 0x376   : > { %v6387_v43 = vpop.eup %6386 }
 0x377   : > { %v1328_v52 = vmul.f32 %v6387_v43, %v1257_v42  ;;  %v1260_v44 = vpop.xlane.xlu0 %1259  ;;  %vm1333_vm10 = vweird.f32 %v6387_v43 }
 0x378   : > { %6388 = vrcp.f32 %v1260_v44  ;;  %vm1334_vm12 = vmor %vm1332_vm11, %vm1333_vm10  ;;  %v1353_v0 = vand.u32 2147483648, %v1260_v44  ;;  %v1351_v13 = vand.u32 2147483647, %v1260_v44  ;;  %vm1347_vm15 = vweird.f32 %v1260_v44 }
 0x379   : > { %v1329_v30 = vsub.f32 1.0, %v1328_v52 }
 0x37a   : > { %v1354_v34 = vor.u32 1.1754944e-38, %v1353_v0  ;;  %vm1352_vm1 = vcmp.eq.f32.partialorder %v1351_v13, 8.507059e+37  ;;  %v1578_v0 = vpop.f32.mrf.mxu1  ;;  %v1892_v13 = vunpack.c.l.b16 %v1815_v22 }
 0x37b   : > { %v1330_v48 = vmul.f32 %v6387_v43, %v1329_v30 }
 0x37d   : > { %v1331_v53 = vadd.f32 %v6387_v43, %v1330_v48 }
 0x37e   : > { %v6389_v55 = vpop.eup %6388 }
 0x37f   : > { %v1343_v57 = vmul.f32 %v6389_v55, %v1260_v44  ;;  %v1197_v58 = vpop.xlane.xlu0 %1196  ;;  %v7151_v59 = vpop.xlane.xlu1 %1262  ;;  %v1335_v60 = vsel %vm1334_vm12, %v6387_v43, %v1331_v53  ;;  %vm1348_vm14 = vweird.f32 %v6389_v55  ;;  %v1814_v53 = vpack.c.bf16 %v1686_v16, %v1686_v16 }
 0x380   : > { %v1219_v61 = vsub.f32 %v7115_v45, %v1197_v58  ;;  %6390 = vrcp.f32 %v7151_v59  ;;  %v1340_v9 = vsel %vm1337_vm13, %v1339_v63, %v1335_v60  ;;  %vm1349_vm0 = vmor %vm1347_vm15, %vm1348_vm14  ;;  %v1368_v26 = vand.u32 2147483648, %v7151_v59 }
 0x381   : > { %v1344_v47 = vsub.f32 1.0, %v1343_v57  ;;  %v1341_v20 = vmul.f32 %v7127_v29, %v1340_v9  ;;  %vm1362_vm3 = vweird.f32 %v7151_v59 }
 0x382   : > { %v1227_v2 = vmul.f32 1.442695, %v1219_v61  ;;  %v1369_v9 = vor.u32 1.1754944e-38, %v1368_v26 }
 0x383   : > { %v1345_v12 = vmul.f32 %v6389_v55, %v1344_v47  ;;  %v1391_v48 = vpack.c.bf16 %v1341_v20, %v1341_v20 }
 0x384   : > { %6392 = vpow2.f32 %v1227_v2  ;;  %v1891_v2 = vunpack.c.l.b16 %v1814_v53 }
 0x385   : > { %v1346_v56 = vadd.f32 %v6389_v55, %v1345_v12  ;;  %v1446_v57 = vunpack.c.l.b16 %v1391_v48 }
 0x386   : > { %v7157_v45 = vpop.eup %6390 }
 0x387   : > { %v1350_v19 = vsel %vm1349_vm0, %v6389_v55, %v1346_v56  ;;  %v1358_v32 = vmul.f32 %v7157_v45, %v7151_v59  ;;  %v1206_v33 = vpop.xlane.xlu0 %1205  ;;  %v1200_v40 = vpop.xlane.xlu1 %1199  ;;  %vm1363_vm2 = vweird.f32 %v7157_v45  ;;  %v1896_v55 = vpack.c.b16 %v1894_v25, %v1893_v54 }
 0x388   : > { %v1355_v35 = vsel %vm1352_vm1, %v1354_v34, %v1350_v19  ;;  %v1222_v41 = vsub.f32 %v7121_v46, %v1206_v33  ;;  %v1266_v42 = vpop.xlane.xlu2 %1265  ;;  %v1220_v39 = vsub.f32 %v7117_v49, %v1200_v40  ;;  %vm7179_vm4 = vmor %vm1362_vm3, %vm1363_vm2  ;;  %v1895_v40 = vpack.c.b16 %v1892_v13, %v1891_v2 }
 0x389   : > { %v1359_v43 = vsub.f32 1.0, %v1358_v32  ;;  %6394 = vrcp.f32 %v1266_v42  ;;  %v1356_v30 = vmul.f32 %v7131_v17, %v1355_v35  ;;  %v1366_v17 = vand.u32 2147483647, %v7151_v59 }
 0x38a   : > { %v7168_v29 = vpop.eup %6392  ;;  %v1233_v52 = vmul.f32 1.442695, %v1222_v41  ;;  %v1229_v44 = vmul.f32 1.442695, %v1220_v39  ;;  %v1907_v56 = vsel %vm1112_vm9, %v1896_v55, 0  ;;  %v1383_v34 = vand.u32 2147483648, %v1266_v42 }
 0x38b   : > { %v1360_v38 = vmul.f32 %v7157_v45, %v1359_v43  ;;  %v1243_v46 = vsel %vm1112_vm9, %v7168_v29, 0.0  ;;  %v1392_v49 = vpack.c.bf16 %v1356_v30, %v1356_v30  ;;  %vm1367_vm5 = vcmp.eq.f32.partialorder %v1366_v17, 8.507059e+37  ;;  %v1581_v30 = vpop.f32.mrf.mxu1 }
 0x38c   : > { %6396 = vpow2.f32 %v1233_v52  ;;  %1244 = vadd.xlane.f32.xlu1 %v1243_v46  ;;  %vm1377_vm7 = vweird.f32 %v1266_v42  ;;  %v1384_v35 = vor.u32 1.1754944e-38, %v1383_v34  ;;  %v1904_v25 = vsel %vm1112_vm9, %v1895_v40, 0 }
 0x38d   : > { %v1361_v27 = vadd.f32 %v7157_v45, %v1360_v38  ;;  %6398 = vpow2.f32 %v1229_v44  ;;  %v1447_v58 = vunpack.c.l.b16 %v1392_v49 }
 0x38f   : > { %v6395_v60 = vpop.eup %6394  ;;  %v1450_v47 = vpack.c.b16 %v1447_v58, %v1446_v57  ;;  %v1365_v1 = vsel %vm7179_vm4, %v7157_v45, %v1361_v27 }
 0x390   : > { %v1373_v62 = vmul.f32 %v6395_v60, %v1266_v42  ;;  %v1203_v63 = vpop.xlane.xlu2 %1202  ;;  %v1370_v21 = vsel %vm1367_vm5, %v1369_v9, %v1365_v1  ;;  %vm1378_vm6 = vweird.f32 %v6395_v60 }
 0x391   : > { %v1221_v12 = vsub.f32 %v7119_v28, %v1203_v63  ;;  %5328 = vmatmul.msk.bf16.vlgmr.msrb.gmra.mxu0 %vm1112_vm9, %v1450_v47  ;;  %v1381_v28 = vand.u32 2147483647, %v1266_v42  ;;  %v1371_v31 = vmul.f32 %v7135_v23, %v1370_v21  ;;  %vm1379_vm8 = vmor %vm1377_vm7, %vm1378_vm6  ;;  %v6346_v23 = vld [vmem:[%s8671_s4 + $0x1] ss:$0 sm:$0xff] }
 0x392   : > { %v7187_v59 = vpop.eup %6396  ;;  %v1374_v50 = vsub.f32 1.0, %v1373_v62  ;;  %1915 = vmatpush.bf16.xpose.msrb.mxu0 %v1907_v56  ;;  %v1579_v38 = vadd.f32 %v6346_v23, %v1578_v0  ;;  %v1582_v62 = vadd.f32 %v6346_v23, %v1581_v30 }
 0x393   : > { %v7191_v16 = vpop.eup %6398  ;;  %v1231_v20 = vmul.f32 1.442695, %v1221_v12  ;;  %v1252_v45 = vsel %vm1112_vm9, %v7187_v59, 0.0  ;;  %vm1382_vm10 = vcmp.eq.f32.partialorder %v1381_v28, 8.507059e+37  ;;  %v1393_v52 = vpack.c.bf16 %v1371_v31, %v1371_v31  ;;  %v1583_v49 = vpop.f32.mrf.mxu1 }
 0x394   : > { %v1375_v19 = vmul.f32 %v6395_v60, %v1374_v50  ;;  %1253 = vadd.xlane.f32.xlu1 %v1252_v45  ;;  %v1246_v32 = vsel %vm1112_vm9, %v7191_v16, 0.0  ;;  %v1795_v22 = vmul.f32 0.17677669, %v1579_v38  ;;  %v1584_v61 = vadd.f32 %v6346_v23, %v1583_v49 }
 0x395   : > { %6400 = vpow2.f32 %v1231_v20  ;;  %1247 = vadd.xlane.f32.xlu2 %v1246_v32  ;;  %v1448_v53 = vunpack.c.l.b16 %v1393_v52  ;;  %v1796_v47 = vmul.f32 0.17677669, %v1582_v62 }
 0x396   : > { %v1376_v33 = vadd.f32 %v6395_v60, %v1375_v19  ;;  %v1803_v27 = vpack.c.bf16 %v1795_v22, %v1795_v22  ;;  %v1797_v63 = vmul.f32 0.17677669, %v1584_v61 }
 0x398   : > { %v1380_v41 = vsel %vm1379_vm8, %v6395_v60, %v1376_v33  ;;  %v1831_v17 = vunpack.c.l.b16 %v1803_v27  ;;  %v1805_v1 = vpack.c.bf16 %v1797_v63, %v1797_v63 }
 0x399   : > { %v1385_v39 = vsel %vm1382_vm10, %v1384_v35, %v1380_v41 }
 0x39a   : > { %v1386_v43 = vmul.f32 %v7141_v36, %v1385_v39  ;;  %1916 = vmatpush.bf16.xpose.msrb.mxu0 %v1904_v25  ;;  %v1577_v36 = vadd.f32 %v6346_v23, %v7159_v15  ;;  %v1804_v15 = vpack.c.bf16 %v1796_v47, %v1796_v47  ;;  %v1833_v2 = vunpack.c.l.b16 %v1805_v1 }
 0x39b   : > { %v7200_v44 = vpop.eup %6400  ;;  %v1586_v58 = vpop.f32.mrf.mxu1 }
 0x39c   : > { %v1249_v42 = vsel %vm1112_vm9, %v7200_v44, 0.0  ;;  %v1394_v48 = vpack.c.bf16 %v1386_v43, %v1386_v43  ;;  %v1794_v55 = vmul.f32 0.17677669, %v1577_v36  ;;  %v1832_v9 = vunpack.c.l.b16 %v1804_v15  ;;  %v6162_v36 = vld [vmem:[%s8674_s7 + $0x68] sm:$0xff]  ;;  %v6160_v15 = vld [vmem:[%s8674_s7 + $0x58] sm:$0xff] }
 0x39d   : > { %1250 = vadd.xlane.f32.xlu0 %v1249_v42  ;;  %v1587_v50 = vadd.f32 %v6346_v23, %v1586_v58 }
 0x39e   : > { %v1449_v54 = vunpack.c.l.b16 %v1394_v48  ;;  %v1802_v26 = vpack.c.bf16 %v1794_v55, %v1794_v55  ;;  %v1835_v13 = vpack.c.b16 %v1833_v2, %v1832_v9  ;;  %v6164_v48 = vld [vmem:[%s8674_s7 + $0x78] sm:$0xff]  ;;  %v6161_v55 = vld [vmem:[%s8674_s7 + $0x60] sm:$0xff] }
 0x39f   : > { %v1798_v20 = vmul.f32 0.17677669, %v1587_v50  ;;  %1765 = vmatpush.bf16.msrb.mxu3 %v6164_v48 }
 0x3a0   : > { %v1451_v46 = vpack.c.b16 %v1449_v54, %v1448_v53  ;;  %v1830_v57 = vunpack.c.l.b16 %v1802_v26 }
 0x3a1   : > { %v1806_v21 = vpack.c.bf16 %v1798_v20, %v1798_v20 }
 0x3a2   : > { %5329 = vmatmul.msk.bf16.gmra.mxu0 %vm1112_vm9, %v1451_v46  ;;  %v1834_v60 = vpack.c.b16 %v1831_v17, %v1830_v57 }
 0x3a3   : > { %v1588_v0 = vpop.f32.mrf.mxu1  ;;  %v1881_v32 = vunpack.c.l.b16 %v1806_v21 }
 0x3a4   : > { %v1589_v12 = vadd.f32 %v6346_v23, %v1588_v0 }
 0x3a6   : > { %v1799_v34 = vmul.f32 0.17677669, %v1589_v12 }
 0x3a8   : > { %v1807_v45 = vpack.c.bf16 %v1799_v34, %v1799_v34 }
 0x3aa   : > { %v1882_v19 = vunpack.c.l.b16 %v1807_v45 }
 0x3ab   : > { %v1591_v56 = vpop.f32.mrf.mxu1 }
 0x3ac   : > { %v1885_v33 = vpack.c.b16 %v1882_v19, %v1881_v32  ;;  %v1592_v31 = vadd.f32 %v6346_v23, %v1591_v56  ;;  %v6159_v56 = vld [vmem:[%s8674_s7 + $0x50] sm:$0xff] }
 0x3ae   : > { %v1800_v41 = vmul.f32 0.17677669, %v1592_v31 }
 0x3b0   : > { %v1808_v25 = vpack.c.bf16 %v1800_v41, %v1800_v41 }
 0x3b2   : > { %5477 = vmatmul.msk.bf16.vlgmr.msra.gmra.mxu0 %vm1112_vm9, %v1834_v60  ;;  %v1883_v52 = vunpack.c.l.b16 %v1808_v25 }
 0x3b3   : > { %v1593_v28 = vpop.f32.mrf.mxu1 }
 0x3b4   : > { %v1594_v40 = vadd.f32 %v6346_v23, %v1593_v28  ;;  %v6163_v23 = vld [vmem:[%s8674_s7 + $0x70] sm:$0xff] }
 0x3b5   : > { %1766 = vmatpush.bf16.msrb.mxu3 %v6163_v23 }
 0x3b6   : > { %v1801_v35 = vmul.f32 0.17677669, %v1594_v40  ;;  %v6158_v40 = vld [vmem:[%s8674_s7 + $0x48] sm:$0xff] }
 0x3b8   : > { %v1809_v39 = vpack.c.bf16 %v1801_v35, %v1801_v35 }
 0x3b9   : > { %1767 = vmatpush.bf16.msrb.mxu3 %v6162_v36 }
 0x3ba   : > { %v1884_v43 = vunpack.c.l.b16 %v1809_v39 }
 0x3bc   : > { %v1886_v30 = vpack.c.b16 %v1884_v43, %v1883_v52 }
 0x3bd   : > { %1768 = vmatpush.bf16.msrb.mxu3 %v6161_v55 }
 0x3c1   : > { %1769 = vmatpush.bf16.msrb.mxu3 %v6160_v15 }
 0x3c2   : > { %5478 = vmatmul.msk.bf16.gmra.mxu0 %vm1112_vm9, %v1835_v13 }
 0x3c5   : > { %1770 = vmatpush.bf16.msrb.mxu3 %v6159_v56 }
 0x3c9   : > { %1771 = vmatpush.bf16.msrb.mxu3 %v6158_v40  ;;  %v6140_v40 = vld [vmem:[%s8676_s9 + $0x8] sm:$0xff] }
 0x3ca   : > { %2314 = vmatpush.bf16.msra.mxu0 %v6140_v40 }
 0x3d2   : > { %5479 = vmatmul.msk.bf16.vlgmr.msrb.gmra.mxu0 %vm1112_vm9, %v1885_v33 }
 0x3e2   : > { %5480 = vmatmul.msk.bf16.gmra.mxu0 %vm1112_vm9, %v1886_v30 }
 0x3ff   : > { %v1245_v42 = vpop.xlane.xlu1 %1244 }
 0x400   : > { %6402 = vrcp.f32 %v1245_v42  ;;  %v1278_v26 = vand.u32 2147483648, %v1245_v42  ;;  %vm1272_vm12 = vweird.f32 %v1245_v42  ;;  %v1276_v57 = vand.u32 2147483647, %v1245_v42 }
 0x402   : > { %v1279_v1 = vor.u32 1.1754944e-38, %v1278_v26  ;;  %vm1277_vm14 = vcmp.eq.f32.partialorder %v1276_v57, 8.507059e+37 }
 0x406   : > { %v6403_v53 = vpop.eup %6402 }
 0x407   : > { %v1268_v54 = vmul.f32 %v6403_v53, %v1245_v42  ;;  %v7219_v38 = vpop.xlane.xlu1 %1253  ;;  %vm1273_vm11 = vweird.f32 %v6403_v53  ;;  %v6157_v42 = vld [vmem:[%s8674_s7 + $0x40] sm:$0xff] }
 0x408   : > { %v1248_v46 = vpop.xlane.xlu2 %1247  ;;  %6404 = vrcp.f32 %v7219_v38  ;;  %vm1274_vm13 = vmor %vm1272_vm12, %vm1273_vm11  ;;  %vm1317_vm5 = vweird.f32 %v7219_v38  ;;  %v1321_v48 = vand.u32 2147483647, %v7219_v38  ;;  %1772 = vmatpush.bf16.msrb.mxu3 %v6157_v42 }
 0x409   : > { %v1269_v22 = vsub.f32 1.0, %v1268_v54  ;;  %6406 = vrcp.f32 %v1248_v46  ;;  %v1293_v9 = vand.u32 2147483648, %v1248_v46  ;;  %v1291_v13 = vand.u32 2147483647, %v1248_v46 }
 0x40a   : > { %vm1287_vm0 = vweird.f32 %v1248_v46  ;;  %vm1322_vm11 = vcmp.eq.f32.partialorder %v1321_v48, 8.507059e+37 }
 0x40b   : > { %v1270_v49 = vmul.f32 %v6403_v53, %v1269_v22  ;;  %v1294_v21 = vor.u32 1.1754944e-38, %v1293_v9  ;;  %vm1292_vm2 = vcmp.eq.f32.partialorder %v1291_v13, 8.507059e+37 }
 0x40d   : > { %v1271_v27 = vadd.f32 %v6403_v53, %v1270_v49 }
 0x40e   : > { %v7228_v17 = vpop.eup %6404  ;;  %v7230_v60 = vpop.f32.mrf.mxu0 }
 0x40f   : > { %v6407_v58 = vpop.eup %6406  ;;  %v1275_v61 = vsel %vm1274_vm13, %v6403_v53, %v1271_v27  ;;  %v1313_v63 = vmul.f32 %v7228_v17, %v7219_v38  ;;  %vm1318_vm3 = vweird.f32 %v7228_v17 }
 0x410   : > { %v1283_v62 = vmul.f32 %v6407_v58, %v1248_v46  ;;  %v1251_v47 = vpop.xlane.xlu0 %1250  ;;  %v1280_v2 = vsel %vm1277_vm14, %v1279_v1, %v1275_v61  ;;  %vm1288_vm15 = vweird.f32 %v6407_v58  ;;  %vm7256_vm6 = vmor %vm1317_vm5, %vm1318_vm3 }
 0x411   : > { %6408 = vrcp.f32 %v1251_v47  ;;  %v1314_v50 = vsub.f32 1.0, %v1313_v63  ;;  %v1281_v34 = vmul.f32 %v7168_v29, %v1280_v2  ;;  %vm1289_vm1 = vmor %vm1287_vm0, %vm1288_vm15  ;;  %v1306_v39 = vand.u32 2147483647, %v1251_v47 }
 0x412   : > { %v1284_v0 = vsub.f32 1.0, %v1283_v62  ;;  %v1308_v25 = vand.u32 2147483648, %v1251_v47  ;;  %vm1302_vm7 = vweird.f32 %v1251_v47 }
 0x413   : > { %v1315_v32 = vmul.f32 %v7228_v17, %v1314_v50  ;;  %v1387_v35 = vpack.c.bf16 %v1281_v34, %v1281_v34  ;;  %vm1307_vm10 = vcmp.eq.f32.partialorder %v1306_v39, 8.507059e+37 }
 0x414   : > { %v1285_v12 = vmul.f32 %v6407_v58, %v1284_v0  ;;  %v1309_v36 = vor.u32 1.1754944e-38, %v1308_v25 }
 0x415   : > { %v1316_v52 = vadd.f32 %v7228_v17, %v1315_v32  ;;  %v1399_v53 = vunpack.c.l.b16 %v1387_v35 }
 0x416   : > { %v1286_v20 = vadd.f32 %v6407_v58, %v1285_v12  ;;  %v7241_v19 = vpop.f32.mrf.mxu0 }
 0x417   : > { %v6409_v45 = vpop.eup %6408  ;;  %v1320_v27 = vsel %vm7256_vm6, %v7228_v17, %v1316_v52  ;;  %v1491_v54 = vpack.c.bf16 %v7241_v19, %v7230_v60  ;;  %v7319_v19 = vld [vmem:[%s8675_s8 + $0x1] ss:$0 sm:$0xff] }
 0x418   : > { %v1290_v28 = vsel %vm1289_vm1, %v6407_v58, %v1286_v20  ;;  %v1298_v33 = vmul.f32 %v6409_v45, %v1251_v47  ;;  %vm1303_vm4 = vweird.f32 %v6409_v45 }
 0x419   : > { %v1295_v31 = vsel %vm1292_vm2, %v1294_v21, %v1290_v28  ;;  %vm1304_vm8 = vmor %vm1302_vm7, %vm1303_vm4 }
 0x41a   : > { %v1296_v29 = vmul.f32 %v7191_v16, %v1295_v31  ;;  %v1299_v41 = vsub.f32 1.0, %v1298_v33  ;;  %v1323_v16 = vand.u32 2147483648, %v7219_v38  ;;  %v6139_v31 = vld [vmem:[%s8676_s9] sm:$0xff] }
 0x41b   : > { %2315 = vmatpush.bf16.msra.mxu0 %v6139_v31 }
 0x41c   : > { %v1388_v43 = vpack.c.bf16 %v1296_v29, %v1296_v29  ;;  %v1300_v30 = vmul.f32 %v6409_v45, %v1299_v41  ;;  %v1324_v38 = vor.u32 1.1754944e-38, %v1323_v16 }
 0x41e   : > { %v1400_v23 = vunpack.c.l.b16 %v1388_v43  ;;  %v1301_v46 = vadd.f32 %v6409_v45, %v1300_v30  ;;  %v1325_v57 = vsel %vm1322_vm11, %v1324_v38, %v1320_v27 }
 0x41f   : > { %v7260_v22 = vpop.f32.mrf.mxu0  ;;  %v1326_v61 = vmul.f32 %v7187_v59, %v1325_v57 }
 0x420   : > { %v1403_v49 = vpack.c.b16 %v1400_v23, %v1399_v53  ;;  %v1305_v55 = vsel %vm1304_vm8, %v6409_v45, %v1301_v46 }
 0x421   : > { %v1310_v26 = vsel %vm1307_vm10, %v1309_v36, %v1305_v55  ;;  %v1390_v47 = vpack.c.bf16 %v1326_v61, %v1326_v61 }
 0x422   : > { %5326 = vmatmul.msk.bf16.vlgmr.msra.gmra.mxu3 %vm1112_vm9, %v1403_v49  ;;  %v1311_v58 = vmul.f32 %v7200_v44, %v1310_v26 }
 0x423   : > { %v1402_v0 = vunpack.c.l.b16 %v1390_v47 }
 0x424   : > { %v1389_v63 = vpack.c.bf16 %v1311_v58, %v1311_v58 }
 0x426   : > { %v1401_v1 = vunpack.c.l.b16 %v1389_v63 }
 0x427   : > { %v7268_v62 = vpop.f32.mrf.mxu0 }
 0x428   : > { %v1404_v17 = vpack.c.b16 %v1402_v0, %v1401_v1 }
 0x42f   : > { %v7270_v15 = vpop.f32.mrf.mxu0 }
 0x430   : > { %v1928_v34 = vsel %vm1112_vm9, %v7270_v15, -inf }
 0x432   : > { %5327 = vmatmul.msk.bf16.gmra.mxu3 %vm1112_vm9, %v1404_v17  ;;  %v1492_v17 = vpack.c.bf16 %v7268_v62, %v7260_v22 }
 0x437   : > { %v7273_v2 = vpop.f32.mrf.mxu0 }
 0x438   : > { %v1931_v28 = vsel %vm1112_vm9, %v7273_v2, -inf }
 0x43f   : > { %v7275_v9 = vpop.f32.mrf.mxu0 }
 0x440   : > { %v1934_v33 = vsel %vm1112_vm9, %v7275_v9, -inf }
 0x442   : > { %1773 = vmatmul.bf16.vlgmr.msrb.gmra.mxu3 %v6991_v14 }
 0x447   : > { %v7278_v44 = vpop.f32.mrf.mxu0 }
 0x448   : > { %v1937_v21 = vsel %vm1112_vm9, %v7278_v44, -inf }
 0x44f   : > { %v1918_v59 = vpop.f32.mrf.mxu0 }
 0x450   : > { %v1940_v12 = vsel %vm1112_vm9, %v1918_v59, -inf }
 0x451   : > { %1941 = vmax.xlane.f32.xlu2 %v1940_v12 }
 0x452   : > { %1778 = vmatmul.bf16.gmra.mxu3 %v7027_v51 }
 0x457   : > { %v1920_v13 = vpop.f32.mrf.mxu0 }
 0x458   : > { %v1943_v50 = vsel %vm1112_vm9, %v1920_v13, -inf }
 0x459   : > { %1944 = vmax.xlane.f32.xlu0 %v1943_v50 }
 0x45f   : > { %v1923_v56 = vpop.f32.mrf.mxu0 }
 0x460   : > { %v1946_v20 = vsel %vm1112_vm9, %v1923_v56, -inf }
 0x461   : > { %1929 = vmax.xlane.f32.xlu0 %v1928_v34  ;;  %1947 = vmax.xlane.f32.xlu1 %v1946_v20 }
 0x462   : > { %1783 = vmatmul.bf16.gmra.mxu3 %v7020_v24 }
 0x467   : > { %v7287_v45 = vpop.f32.mrf.mxu0 }
 0x468   : > { %v1949_v32 = vsel %vm1112_vm9, %v7287_v45, -inf }
 0x469   : > { %1938 = vmax.xlane.f32.xlu0 %v1937_v21  ;;  %1932 = vmax.xlane.f32.xlu1 %v1931_v28 }
 0x46a   : > { %1950 = vmax.xlane.f32.xlu2 %v1949_v32 }
 0x472   : > { %1935 = vmax.xlane.f32.xlu2 %v1934_v33  ;;  %1788 = vmatmul.bf16.gmra.mxu3 %v7036_v37 }
 0x4a5   : > { %v1432_v35 = vpop.f32.mrf.mxu3 }
 0x4ad   : > { %v1434_v29 = vpop.f32.mrf.mxu3 }
 0x4ae   : > { %v1489_v41 = vpack.c.bf16 %v1434_v29, %v1432_v35 }
 0x4b0   : > { %5509 = vmatmul.msk.bf16.vlgmr.msra.gmra.mxu0 %vm1112_vm9, %v1489_v41 }
 0x4b5   : > { %v1437_v39 = vpop.f32.mrf.mxu3 }
 0x4bd   : > { %v1439_v25 = vpop.f32.mrf.mxu3 }
 0x4be   : > { %v1490_v43 = vpack.c.bf16 %v1439_v25, %v1437_v39 }
 0x4c0   : > { %5510 = vmatmul.msk.bf16.gmra.mxu0 %vm1112_vm9, %v1490_v43 }
 0x4c4   : > { %v1942_v52 = vpop.xlane.xlu2 %1941 }
 0x4c5   : > { %v1956_v30 = vsub.f32 %v1918_v59, %v1942_v52  ;;  %v1774_v42 = vpop.f32.mrf.mxu3 }
 0x4c7   : > { %v1968_v48 = vmul.f32 1.442695, %v1956_v30 }
 0x4c9   : > { %6410 = vpow2.f32 %v1968_v48 }
 0x4cc   : > { %v1945_v16 = vpop.xlane.xlu0 %1944 }
 0x4cd   : > { %v1957_v53 = vsub.f32 %v1920_v13, %v1945_v16  ;;  %v1776_v23 = vpop.f32.mrf.mxu3 }
 0x4ce   : > { %v1777_v1 = vadd.f32 %v7319_v19, %v1776_v23 }
 0x4cf   : > { %v7308_v46 = vpop.eup %6410  ;;  %v1970_v36 = vmul.f32 1.442695, %v1957_v53 }
 0x4d0   : > { %5511 = vmatmul.msk.bf16.gmra.mxu0 %vm1112_vm9, %v1491_v54  ;;  %v1988_v49 = vsel %vm1112_vm9, %v7308_v46, 0.0  ;;  %v1819_v22 = vpack.c.bf16 %v1777_v1, %v1777_v1 }
 0x4d1   : > { %6412 = vpow2.f32 %v1970_v36  ;;  %1989 = vadd.xlane.f32.xlu1 %v1988_v49 }
 0x4d2   : > { %v2143_v41 = vunpack.c.l.b16 %v1819_v22  ;;  %v6181_v22 = vld [vmem:[%s8672_s5 + $0xb0] sm:$0xff] }
 0x4d4   : > { %v1930_v55 = vpop.xlane.xlu0 %1929  ;;  %v1948_v27 = vpop.xlane.xlu1 %1947 }
 0x4d5   : > { %v1952_v38 = vsub.f32 %v7270_v15, %v1930_v55  ;;  %v1958_v26 = vsub.f32 %v1923_v56, %v1948_v27  ;;  %v1779_v57 = vpop.f32.mrf.mxu3  ;;  %v1775_v56 = vadd.f32 %v7319_v19, %v1774_v42 }
 0x4d6   : > { %v1780_v47 = vadd.f32 %v7319_v19, %v1779_v57 }
 0x4d7   : > { %v7314_v58 = vpop.eup %6412  ;;  %v1960_v61 = vmul.f32 1.442695, %v1952_v38  ;;  %v1972_v60 = vmul.f32 1.442695, %v1958_v26  ;;  %v1818_v31 = vpack.c.bf16 %v1775_v56, %v1775_v56 }
 0x4d8   : > { %v1991_v63 = vsel %vm1112_vm9, %v7314_v58, 0.0  ;;  %v1820_v34 = vpack.c.bf16 %v1780_v47, %v1780_v47 }
 0x4d9   : > { %6414 = vpow2.f32 %v1960_v61  ;;  %1992 = vadd.xlane.f32.xlu2 %v1991_v63  ;;  %v2142_v52 = vunpack.c.l.b16 %v1818_v31 }
 0x4da   : > { %6416 = vpow2.f32 %v1972_v60  ;;  %v2144_v35 = vunpack.c.l.b16 %v1820_v34 }
 0x4db   : > { %v2146_v23 = vpack.c.b16 %v2143_v41, %v2142_v52  ;;  %v6179_v52 = vld [vmem:[%s8672_s5 + $0xa0] sm:$0xff] }
 0x4dc   : > { %v1939_v0 = vpop.xlane.xlu0 %1938  ;;  %v1933_v15 = vpop.xlane.xlu1 %1932 }
 0x4dd   : > { %v1955_v59 = vsub.f32 %v7278_v44, %v1939_v0  ;;  %v1951_v12 = vpop.xlane.xlu2 %1950  ;;  %v1953_v13 = vsub.f32 %v7273_v2, %v1933_v15  ;;  %v1781_v50 = vpop.f32.mrf.mxu3 }
 0x4de   : > { %v1959_v20 = vsub.f32 %v7287_v45, %v1951_v12  ;;  %v1782_v21 = vadd.f32 %v7319_v19, %v1781_v50 }
 0x4df   : > { %v7332_v28 = vpop.eup %6414  ;;  %v1966_v32 = vmul.f32 1.442695, %v1955_v59  ;;  %v1962_v33 = vmul.f32 1.442695, %v1953_v13 }
 0x4e0   : > { %v7334_v40 = vpop.eup %6416  ;;  %v1974_v62 = vmul.f32 1.442695, %v1959_v20  ;;  %v1821_v44 = vpack.c.bf16 %v1782_v21, %v1782_v21  ;;  %5512 = vmatmul.msk.bf16.gmra.mxu0 %vm1112_vm9, %v1492_v17  ;;  %v1976_v2 = vsel %vm1112_vm9, %v7332_v28, 0.0  ;;  %v6182_v21 = vld [vmem:[%s8672_s5 + $0xb8] sm:$0xff] }
 0x4e1   : > { %6418 = vpow2.f32 %v1966_v32  ;;  %1977 = vadd.xlane.f32.xlu2 %v1976_v2  ;;  %v1994_v45 = vsel %vm1112_vm9, %v7334_v40, 0.0 }
 0x4e2   : > { %6420 = vpow2.f32 %v1974_v62  ;;  %v2145_v29 = vunpack.c.l.b16 %v1821_v44  ;;  %1995 = vadd.xlane.f32.xlu0 %v1994_v45 }
 0x4e3   : > { %6422 = vpow2.f32 %v1962_v33 }
 0x4e4   : > { %v2147_v39 = vpack.c.b16 %v2145_v29, %v2144_v35  ;;  %v6180_v35 = vld [vmem:[%s8672_s5 + $0xa8] sm:$0xff] }
 0x4e5   : > { %v1936_v25 = vpop.xlane.xlu2 %1935  ;;  %v1784_v43 = vpop.f32.mrf.mxu3 }
 0x4e6   : > { %v1954_v30 = vsub.f32 %v7275_v9, %v1936_v25  ;;  %2162 = vmatpush.bf16.msra.mxu1 %v2147_v39  ;;  %v1785_v60 = vadd.f32 %v7319_v19, %v1784_v43 }
 0x4e7   : > { %v7342_v42 = vpop.eup %6418 }
 0x4e8   : > { %v7344_v48 = vpop.eup %6420  ;;  %v1964_v16 = vmul.f32 1.442695, %v1954_v30  ;;  %v1985_v53 = vsel %vm1112_vm9, %v7342_v42, 0.0  ;;  %v1822_v15 = vpack.c.bf16 %v1785_v60, %v1785_v60 }
 0x4e9   : > { %v7348_v54 = vpop.eup %6422  ;;  %1986 = vadd.xlane.f32.xlu2 %v1985_v53  ;;  %v1997_v36 = vsel %vm1112_vm9, %v7344_v48, 0.0 }
 0x4ea   : > { %6424 = vpow2.f32 %v1964_v16  ;;  %1998 = vadd.xlane.f32.xlu1 %v1997_v36  ;;  %v1979_v9 = vsel %vm1112_vm9, %v7348_v54, 0.0  ;;  %2163 = vmatpush.bf16.msra.mxu1 %v2146_v23  ;;  %v2189_v50 = vunpack.c.l.b16 %v1822_v15 }
 0x4eb   : > { %1980 = vadd.xlane.f32.xlu0 %v1979_v9 }
 0x4ed   : > { %v1786_v49 = vpop.f32.mrf.mxu3 }
 0x4ee   : > { %v1787_v57 = vadd.f32 %v7319_v19, %v1786_v49 }
 0x4f0   : > { %v7354_v55 = vpop.eup %6424  ;;  %v1823_v1 = vpack.c.bf16 %v1787_v57, %v1787_v57 }
 0x4f1   : > { %v1982_v27 = vsel %vm1112_vm9, %v7354_v55, 0.0 }
 0x4f2   : > { %1983 = vadd.xlane.f32.xlu1 %v1982_v27  ;;  %v2190_v12 = vunpack.c.l.b16 %v1823_v1  ;;  %v6174_v27 = vld [vmem:[%s8670_s3 + $0xb8] sm:$0xff] }
 0x4f3   : > { %2407 = vmatpush.bf16.msrb.mxu1 %v6174_v27 }
 0x4f4   : > { %v2193_v56 = vpack.c.b16 %v2190_v12, %v2189_v50 }
 0x4f5   : > { %v1789_v38 = vpop.f32.mrf.mxu3 }
 0x4f6   : > { %v1790_v26 = vadd.f32 %v7319_v19, %v1789_v38  ;;  %v6178_v38 = vld [vmem:[%s8672_s5 + $0x98] sm:$0xff] }
 0x4f8   : > { %v1824_v63 = vpack.c.bf16 %v1790_v26, %v1790_v26 }
 0x4fa   : > { %v2191_v17 = vunpack.c.l.b16 %v1824_v63 }
 0x4fd   : > { %v1791_v61 = vpop.f32.mrf.mxu3 }
 0x4fe   : > { %v1792_v47 = vadd.f32 %v7319_v19, %v1791_v61 }
 0x500   : > { %v1825_v0 = vpack.c.bf16 %v1792_v47, %v1792_v47  ;;  %v6173_v47 = vld [vmem:[%s8670_s3 + $0xb0] sm:$0xff] }
 0x501   : > { %2408 = vmatpush.bf16.msrb.mxu1 %v6173_v47 }
 0x502   : > { %v2192_v59 = vunpack.c.l.b16 %v1825_v0 }
 0x504   : > { %v2194_v13 = vpack.c.b16 %v2192_v59, %v2191_v17  ;;  %v6177_v17 = vld [vmem:[%s8672_s5 + $0x90] sm:$0xff] }
 0x506   : > { %2209 = vmatpush.bf16.msrb.mxu2 %v2194_v13 }
 0x50a   : > { %2210 = vmatpush.bf16.msrb.mxu2 %v2193_v56 }
 0x50e   : > { %2506 = vmatpush.bf16.msra.mxu2 %v6182_v21  ;;  %v6172_v21 = vld [vmem:[%s8670_s3 + $0xa8] sm:$0xff] }
 0x50f   : > { %2409 = vmatpush.bf16.msrb.mxu1 %v6172_v21  ;;  %v6169_v21 = vld [vmem:[%s8670_s3 + $0x90] sm:$0xff] }
 0x512   : > { %2507 = vmatpush.bf16.msra.mxu2 %v6181_v22 }
 0x516   : > { %2508 = vmatpush.bf16.msra.mxu2 %v6180_v35 }
 0x51a   : > { %2509 = vmatpush.bf16.msra.mxu2 %v6179_v52 }
 0x51e   : > { %2510 = vmatpush.bf16.msra.mxu2 %v6178_v38 }
 0x522   : > { %2511 = vmatpush.bf16.msra.mxu2 %v6177_v17 }
 0x544   : > { %v1990_v34 = vpop.xlane.xlu1 %1989 }
 0x545   : > { %6426 = vrcp.f32 %v1990_v34  ;;  %v2071_v44 = vand.u32 2147483648, %v1990_v34  ;;  %vm2065_vm13 = vweird.f32 %v1990_v34  ;;  %v2069_v45 = vand.u32 2147483647, %v1990_v34 }
 0x547   : > { %v2072_v25 = vor.u32 1.1754944e-38, %v2071_v44  ;;  %vm2070_vm15 = vcmp.eq.f32.partialorder %v2069_v45, 8.507059e+37 }
 0x54b   : > { %v6427_v20 = vpop.eup %6426 }
 0x54c   : > { %v2061_v32 = vmul.f32 %v6427_v20, %v1990_v34  ;;  %v1993_v19 = vpop.xlane.xlu2 %1992  ;;  %vm2066_vm12 = vweird.f32 %v6427_v20 }
 0x54d   : > { %6428 = vrcp.f32 %v1993_v19  ;;  %vm2067_vm14 = vmor %vm2065_vm13, %vm2066_vm12  ;;  %v2086_v53 = vand.u32 2147483648, %v1993_v19  ;;  %v2084_v36 = vand.u32 2147483647, %v1993_v19  ;;  %vm2080_vm1 = vweird.f32 %v1993_v19 }
 0x54e   : > { %v2062_v33 = vsub.f32 1.0, %v2061_v32 }
 0x54f   : > { %v2087_v57 = vor.u32 1.1754944e-38, %v2086_v53  ;;  %vm2085_vm3 = vcmp.eq.f32.partialorder %v2084_v36, 8.507059e+37 }
 0x550   : > { %v2063_v62 = vmul.f32 %v6427_v20, %v2062_v33 }
 0x552   : > { %v2064_v2 = vadd.f32 %v6427_v20, %v2063_v62 }
 0x553   : > { %v6429_v31 = vpop.eup %6428 }
 0x554   : > { %v2068_v29 = vsel %vm2067_vm14, %v6427_v20, %v2064_v2  ;;  %v2076_v41 = vmul.f32 %v6429_v31, %v1993_v19  ;;  %v7371_v39 = vpop.xlane.xlu2 %1977  ;;  %vm2081_vm0 = vweird.f32 %v6429_v31 }
 0x555   : > { %6430 = vrcp.f32 %v7371_v39  ;;  %v7374_v43 = vpop.xlane.xlu0 %1995  ;;  %v2073_v16 = vsel %vm2070_vm15, %v2072_v25, %v2068_v29  ;;  %vm2082_vm2 = vmor %vm2080_vm1, %vm2081_vm0  ;;  %v2011_v44 = vand.u32 2147483648, %v7371_v39  ;;  %vm2005_vm6 = vweird.f32 %v7371_v39  ;;  %v6171_v29 = vld [vmem:[%s8670_s3 + $0xa0] sm:$0xff] }
 0x556   : > { %v2077_v30 = vsub.f32 1.0, %v2076_v41  ;;  %6432 = vrcp.f32 %v7374_v43  ;;  %v2074_v9 = vmul.f32 %v7308_v46, %v2073_v16  ;;  %v2009_v45 = vand.u32 2147483647, %v7371_v39  ;;  %v6175_v16 = vld [vmem:[%s8672_s5 + $0x80] sm:$0xff]  ;;  %2410 = vmatpush.bf16.msrb.mxu1 %v6171_v29 }
 0x557   : > { %vm2095_vm8 = vweird.f32 %v7374_v43  ;;  %v2099_v52 = vand.u32 2147483647, %v7374_v43 }
 0x558   : > { %v2078_v23 = vmul.f32 %v6429_v31, %v2077_v30  ;;  %v2124_v59 = vpack.c.bf16 %v2074_v9, %v2074_v9  ;;  %v2012_v9 = vor.u32 1.1754944e-38, %v2011_v44  ;;  %vm2010_vm11 = vcmp.eq.f32.partialorder %v2009_v45, 8.507059e+37 }
 0x559   : > { %vm2100_vm12 = vcmp.eq.f32.partialorder %v2099_v52, 8.507059e+37 }
 0x55a   : > { %v2079_v49 = vadd.f32 %v6429_v31, %v2078_v23  ;;  %v2179_v19 = vunpack.c.l.b16 %v2124_v59 }
 0x55b   : > { %v7387_v26 = vpop.eup %6430 }
 0x55c   : > { %v7389_v61 = vpop.eup %6432  ;;  %v2083_v60 = vsel %vm2082_vm2, %v6429_v31, %v2079_v49  ;;  %v2001_v46 = vmul.f32 %v7387_v26, %v7371_v39  ;;  %v7393_v63 = vpop.xlane.xlu2 %1986  ;;  %vm2006_vm4 = vweird.f32 %v7387_v26  ;;  %v2101_v31 = vand.u32 2147483648, %v7374_v43 }
 0x55d   : > { %v2088_v1 = vsel %vm2085_vm3, %v2087_v57, %v2083_v60  ;;  %v2091_v0 = vmul.f32 %v7389_v61, %v7374_v43  ;;  %6434 = vrcp.f32 %v7393_v63  ;;  %v7401_v15 = vpop.xlane.xlu1 %1998  ;;  %vm2096_vm5 = vweird.f32 %v7389_v61  ;;  %vm7432_vm7 = vmor %vm2005_vm6, %vm2006_vm4 }
 0x55e   : > { %v2089_v12 = vmul.f32 %v7314_v58, %v2088_v1  ;;  %v2002_v13 = vsub.f32 1.0, %v2001_v46  ;;  %v7407_v50 = vpop.xlane.xlu0 %1980  ;;  %v6176_v58 = vld [vmem:[%s8672_s5 + $0x88] sm:$0xff]  ;;  %vm7450_vm10 = vmor %vm2095_vm8, %vm2096_vm5  ;;  %v2102_v38 = vor.u32 1.1754944e-38, %v2101_v31  ;;  %vm2110_vm2 = vweird.f32 %v7401_v15 }
 0x55f   : > { %v2092_v56 = vsub.f32 1.0, %v2091_v0  ;;  %6436 = vrcp.f32 %v7407_v50  ;;  %2512 = vmatpush.bf16.msra.mxu2 %v6176_v58  ;;  %v2024_v49 = vand.u32 2147483647, %v7407_v50  ;;  %v2026_v47 = vand.u32 2147483648, %v7407_v50 }
 0x560   : > { %v2125_v34 = vpack.c.bf16 %v2089_v12, %v2089_v12  ;;  %v2003_v20 = vmul.f32 %v7387_v26, %v2002_v13  ;;  %6438 = vrcp.f32 %v7401_v15  ;;  %vm2020_vm14 = vweird.f32 %v7407_v50 }
 0x561   : > { %v2093_v32 = vmul.f32 %v7389_v61, %v2092_v56  ;;  %vm7467_vm15 = vcmp.eq.f32.partialorder %v2024_v49, 8.507059e+37  ;;  %v2114_v12 = vand.u32 2147483647, %v7401_v15  ;;  %v2116_v13 = vand.u32 2147483648, %v7401_v15 }
 0x562   : > { %v2180_v33 = vunpack.c.l.b16 %v2125_v34  ;;  %v2004_v22 = vadd.f32 %v7387_v26, %v2003_v20  ;;  %v2027_v58 = vor.u32 1.1754944e-38, %v2026_v47 }
 0x563   : > { %v7421_v62 = vpop.eup %6434  ;;  %v2094_v2 = vadd.f32 %v7389_v61, %v2093_v32  ;;  %2513 = vmatpush.bf16.msra.mxu2 %v6175_v16  ;;  %vm2115_vm5 = vcmp.eq.f32.partialorder %v2114_v12, 8.507059e+37 }
 0x564   : > { %v2183_v35 = vpack.c.b16 %v2180_v33, %v2179_v19  ;;  %v2046_v39 = vmul.f32 %v7421_v62, %v7393_v63  ;;  %v2008_v53 = vsel %vm7432_vm7, %v7387_v26, %v2004_v22  ;;  %vm2051_vm3 = vweird.f32 %v7421_v62 }
 0x565   : > { %v6437_v41 = vpop.eup %6436  ;;  %v7440_v30 = vpop.xlane.xlu1 %1983  ;;  %v2098_v27 = vsel %vm7450_vm10, %v7389_v61, %v2094_v2  ;;  %v2013_v60 = vsel %vm2010_vm11, %v2012_v9, %v2008_v53  ;;  %v6170_v61 = vld [vmem:[%s8670_s3 + $0x98] sm:$0xff]  ;;  %v2117_v2 = vor.u32 1.1754944e-38, %v2116_v13  ;;  %vm2050_vm7 = vweird.f32 %v7393_v63 }
 0x566   : > { %v2016_v43 = vmul.f32 %v6437_v41, %v7407_v50  ;;  %5483 = vmatmul.msk.bf16.vlgmr.msrb.gmra.mxu2 %vm1112_vm9, %v2183_v35  ;;  %v6439_v36 = vpop.eup %6438  ;;  %6440 = vrcp.f32 %v7440_v30  ;;  %v2047_v46 = vsub.f32 1.0, %v2046_v39  ;;  %vm2021_vm13 = vweird.f32 %v6437_v41  ;;  %2411 = vmatpush.bf16.msrb.mxu1 %v6170_v61  ;;  %vm7499_vm10 = vmor %vm2050_vm7, %vm2051_vm3 }
 0x567   : > { %v2106_v57 = vmul.f32 %v6439_v36, %v7401_v15  ;;  %v2103_v17 = vsel %vm2100_vm12, %v2102_v38, %v2098_v27  ;;  %v2014_v56 = vmul.f32 %v7332_v28, %v2013_v60  ;;  %vm2111_vm0 = vweird.f32 %v6439_v36  ;;  %vm2022_vm1 = vmor %vm2020_vm14, %vm2021_vm13 }
 0x568   : > { %v2017_v26 = vsub.f32 1.0, %v2016_v43  ;;  %v2048_v50 = vmul.f32 %v7421_v62, %v2047_v46  ;;  %v2104_v19 = vmul.f32 %v7334_v40, %v2103_v17  ;;  %vm2112_vm4 = vmor %vm2110_vm2, %vm2111_vm0  ;;  %v2039_v45 = vand.u32 2147483647, %v7440_v30  ;;  %v6168_v40 = vld [vmem:[%s8670_s3 + $0x88] sm:$0xff] }
 0x569   : > { %v2107_v0 = vsub.f32 1.0, %v2106_v57  ;;  %v2120_v31 = vpack.c.bf16 %v2014_v56, %v2014_v56  ;;  %v2041_v25 = vand.u32 2147483648, %v7440_v30  ;;  %v2056_v43 = vand.u32 2147483648, %v7393_v63 }
 0x56a   : > { %v2018_v1 = vmul.f32 %v6437_v41, %v2017_v26  ;;  %2412 = vmatpush.bf16.msrb.mxu1 %v6169_v21  ;;  %v2126_v39 = vpack.c.bf16 %v2104_v19, %v2104_v19  ;;  %vm2035_vm8 = vweird.f32 %v7440_v30  ;;  %vm2040_vm12 = vcmp.eq.f32.partialorder %v2039_v45, 8.507059e+37 }
 0x56b   : > { %v2108_v20 = vmul.f32 %v6439_v36, %v2107_v0  ;;  %v2057_v47 = vor.u32 1.1754944e-38, %v2056_v43 }
 0x56c   : > { %v2019_v34 = vadd.f32 %v6437_v41, %v2018_v1  ;;  %v6441_v32 = vpop.eup %6440  ;;  %v2181_v57 = vunpack.c.l.b16 %v2126_v39 }
 0x56d   : > { %v2109_v33 = vadd.f32 %v6439_v36, %v2108_v20  ;;  %v2031_v22 = vmul.f32 %v6441_v32, %v7440_v30  ;;  %vm2036_vm6 = vweird.f32 %v6441_v32  ;;  %v6167_v30 = vld [vmem:[%s8670_s3 + $0x80] sm:$0xff] }
 0x56e   : > { %v2023_v28 = vsel %vm2022_vm1, %v6437_v41, %v2019_v34  ;;  %v2049_v41 = vadd.f32 %v7421_v62, %v2048_v50  ;;  %2413 = vmatpush.bf16.msrb.mxu1 %v6168_v40  ;;  %vm2037_vm11 = vmor %vm2035_vm8, %vm2036_vm6 }
 0x56f   : > { %v2028_v44 = vsel %vm7467_vm15, %v2027_v58, %v2023_v28  ;;  %v2032_v15 = vsub.f32 1.0, %v2031_v22  ;;  %v2113_v29 = vsel %vm2112_vm4, %v6439_v36, %v2109_v33  ;;  %v2132_v36 = vunpack.c.l.b16 %v2120_v31  ;;  %v6190_v28 = vld [vmem:[%s8674_s7 + $0xb8] sm:$0xff] }
 0x570   : > { %v2029_v35 = vmul.f32 %v7348_v54, %v2028_v44  ;;  %v2118_v52 = vsel %vm2115_vm5, %v2117_v2, %v2113_v29  ;;  %v2054_v54 = vand.u32 2147483647, %v7393_v63  ;;  %v2053_v63 = vsel %vm7499_vm10, %v7421_v62, %v2049_v41  ;;  %v6189_v44 = vld [vmem:[%s8674_s7 + $0xb0] sm:$0xff]  ;;  %v6188_v2 = vld [vmem:[%s8674_s7 + $0xa8] sm:$0xff]  ;;  %v6186_v29 = vld [vmem:[%s8674_s7 + $0x98] sm:$0xff] }
 0x571   : > { %v2033_v53 = vmul.f32 %v6441_v32, %v2032_v15  ;;  %v2119_v23 = vmul.f32 %v7344_v48, %v2118_v52  ;;  %v2042_v48 = vor.u32 1.1754944e-38, %v2041_v25  ;;  %v6187_v15 = vld [vmem:[%s8674_s7 + $0xa0] sm:$0xff]  ;;  %v6185_v25 = vld [vmem:[%s8674_s7 + $0x90] sm:$0xff]  ;;  %v6184_v52 = vld [vmem:[%s8674_s7 + $0x88] sm:$0xff] }
 0x572   : > { %v2121_v16 = vpack.c.bf16 %v2029_v35, %v2029_v35  ;;  %vm2055_vm13 = vcmp.eq.f32.partialorder %v2054_v54, 8.507059e+37  ;;  %2414 = vmatpush.bf16.msrb.mxu1 %v6167_v30  ;;  %v6350_v54 = vld [vmem:[%s8673_s6 + $0x2] ss:$0 sm:$0xff] }
 0x573   : > { %v2034_v27 = vadd.f32 %v6441_v32, %v2033_v53  ;;  %v2127_v38 = vpack.c.bf16 %v2119_v23, %v2119_v23  ;;  %v2058_v17 = vsel %vm2055_vm13, %v2057_v47, %v2053_v63  ;;  %v6183_v23 = vld [vmem:[%s8674_s7 + $0x80] sm:$0xff] }
 0x574   : > { %v2133_v49 = vunpack.c.l.b16 %v2121_v16  ;;  %v2059_v61 = vmul.f32 %v7342_v42, %v2058_v17  ;;  %v6166_v42 = vld [vmem:[%s8676_s9 + $0x18] sm:$0xff] }
 0x575   : > { %v2182_v60 = vunpack.c.l.b16 %v2127_v38  ;;  %v2038_v46 = vsel %vm2037_vm11, %v6441_v32, %v2034_v27  ;;  %2261 = vmatpush.bf16.msra.mxu3 %v6166_v42 }
 0x576   : > { %v2136_v26 = vpack.c.b16 %v2133_v49, %v2132_v36  ;;  %v2043_v1 = vsel %vm2040_vm12, %v2042_v48, %v2038_v46  ;;  %v2123_v12 = vpack.c.bf16 %v2059_v61, %v2059_v61 }
 0x577   : > { %v2184_v0 = vpack.c.b16 %v2182_v60, %v2181_v57  ;;  %v2044_v62 = vmul.f32 %v7354_v55, %v2043_v1  ;;  %v6165_v55 = vld [vmem:[%s8676_s9 + $0x10] sm:$0xff] }
 0x578   : > { %5481 = vmatmul.msk.bf16.vlgmr.msra.gmra.mxu1 %vm1112_vm9, %v2136_v26  ;;  %v2135_v56 = vunpack.c.l.b16 %v2123_v12  ;;  %v7561_v26 = vld [vmem:[%s8671_s4 + $0x2] ss:$0 sm:$0xff] }
 0x579   : > { %5484 = vmatmul.msk.bf16.gmra.mxu2 %vm1112_vm9, %v2184_v0  ;;  %v2122_v59 = vpack.c.bf16 %v2044_v62, %v2044_v62  ;;  %2262 = vmatpush.bf16.msra.mxu3 %v6165_v55 }
 0x57b   : > { %v2134_v13 = vunpack.c.l.b16 %v2122_v59 }
 0x57d   : > { %v2137_v34 = vpack.c.b16 %v2135_v56, %v2134_v13  ;;  %2605 = vmatpush.bf16.msrb.mxu3 %v6190_v28 }
 0x581   : > { %2606 = vmatpush.bf16.msrb.mxu3 %v6189_v44 }
 0x585   : > { %2607 = vmatpush.bf16.msrb.mxu3 %v6188_v2 }
 0x588   : > { %5482 = vmatmul.msk.bf16.gmra.mxu1 %vm1112_vm9, %v2137_v34 }
 0x589   : > { %2514 = vmatmul.bf16.vlgmr.msra.gmra.mxu2 %v6991_v14  ;;  %2608 = vmatpush.bf16.msrb.mxu3 %v6187_v15  ;;  %v6207_v15 = vld [vmem:[%s8672_s5 + $0xf0] sm:$0xff] }
 0x58d   : > { %2609 = vmatpush.bf16.msrb.mxu3 %v6186_v29 }
 0x591   : > { %2610 = vmatpush.bf16.msrb.mxu3 %v6185_v25 }
 0x595   : > { %2611 = vmatpush.bf16.msrb.mxu3 %v6184_v52 }
 0x598   : > { %2415 = vmatmul.bf16.vlgmr.msrb.gmra.mxu1 %v6991_v14 }
 0x599   : > { %2519 = vmatmul.bf16.gmra.mxu2 %v7027_v51  ;;  %2612 = vmatpush.bf16.msrb.mxu3 %v6183_v23 }
 0x5a8   : > { %2420 = vmatmul.bf16.gmra.mxu1 %v7027_v51 }
 0x5a9   : > { %2524 = vmatmul.bf16.gmra.mxu2 %v7020_v24 }
 0x5b8   : > { %2425 = vmatmul.bf16.gmra.mxu1 %v7020_v24 }
 0x5b9   : > { %2529 = vmatmul.bf16.gmra.mxu2 %v7036_v37 }
 0x5c8   : > { %2430 = vmatmul.bf16.gmra.mxu1 %v7036_v37 }
 0x5e9   : > { %v2212_v20 = vpop.f32.mrf.mxu2 }
 0x5f1   : > { %v2214_v21 = vpop.f32.mrf.mxu2 }
 0x5f2   : > { %v2224_v53 = vpack.c.bf16 %v2214_v21, %v2212_v20 }
 0x5f5   : > { %v2165_v32 = vpop.f32.mrf.mxu1 }
 0x5fc   : > { %v2217_v50 = vpop.f32.mrf.mxu2 }
 0x5fd   : > { %v2167_v58 = vpop.f32.mrf.mxu1 }
 0x5fe   : > { %v2222_v19 = vpack.c.bf16 %v2167_v58, %v2165_v32 }
 0x600   : > { %5497 = vmatmul.msk.bf16.vlgmr.msra.gmra.mxu3 %vm1112_vm9, %v2222_v19 }
 0x604   : > { %v2219_v33 = vpop.f32.mrf.mxu2 }
 0x605   : > { %v2170_v22 = vpop.f32.mrf.mxu1  ;;  %v2225_v17 = vpack.c.bf16 %v2219_v33, %v2217_v50 }
 0x60c   : > { %v2515_v45 = vpop.f32.mrf.mxu2 }
 0x60d   : > { %v2172_v31 = vpop.f32.mrf.mxu1  ;;  %v2516_v48 = vadd.f32 %v6350_v54, %v2515_v45  ;;  %v6208_v45 = vld [vmem:[%s8672_s5 + $0xf8] sm:$0xff] }
 0x60e   : > { %v2223_v35 = vpack.c.bf16 %v2172_v31, %v2170_v22  ;;  %3301 = vmatpush.bf16.msra.mxu3 %v6208_v45 }
 0x60f   : > { %v2650_v46 = vpack.c.bf16 %v2516_v48, %v2516_v48 }
 0x610   : > { %5498 = vmatmul.msk.bf16.gmra.mxu3 %vm1112_vm9, %v2223_v35 }
 0x611   : > { %v2680_v12 = vunpack.c.l.b16 %v2650_v46 }
 0x612   : > { %3302 = vmatpush.bf16.msra.mxu3 %v6207_v15 }
 0x614   : > { %v2517_v40 = vpop.f32.mrf.mxu2 }
 0x615   : > { %v2416_v41 = vpop.f32.mrf.mxu1  ;;  %v2518_v9 = vadd.f32 %v6350_v54, %v2517_v40 }
 0x616   : > { %v2417_v61 = vadd.f32 %v7561_v26, %v2416_v41 }
 0x617   : > { %v2651_v30 = vpack.c.bf16 %v2518_v9, %v2518_v9 }
 0x618   : > { %v2634_v34 = vmul.f32 0.17677669, %v2417_v61 }
 0x619   : > { %v2681_v62 = vunpack.c.l.b16 %v2651_v30 }
 0x61a   : > { %v2642_v21 = vpack.c.bf16 %v2634_v34, %v2634_v34 }
 0x61b   : > { %v2684_v42 = vpack.c.b16 %v2681_v62, %v2680_v12  ;;  %v6204_v62 = vld [vmem:[%s8672_s5 + $0xd8] sm:$0xff] }
 0x61c   : > { %v2520_v39 = vpop.f32.mrf.mxu2  ;;  %v2670_v58 = vunpack.c.l.b16 %v2642_v21 }
 0x61d   : > { %v2418_v16 = vpop.f32.mrf.mxu1  ;;  %v2521_v43 = vadd.f32 %v6350_v54, %v2520_v39  ;;  %v2693_v32 = vsel %vm1112_vm9, %v2684_v42, 0 }
 0x61e   : > { %v2419_v47 = vadd.f32 %v7561_v26, %v2418_v16 }
 0x61f   : > { %v2652_v49 = vpack.c.bf16 %v2521_v43, %v2521_v43 }
 0x620   : > { %5499 = vmatmul.msk.bf16.gmra.mxu3 %vm1112_vm9, %v2224_v53  ;;  %v2635_v13 = vmul.f32 0.17677669, %v2419_v47  ;;  %v6206_v53 = vld [vmem:[%s8672_s5 + $0xe8] sm:$0xff] }
 0x621   : > { %v2682_v57 = vunpack.c.l.b16 %v2652_v49  ;;  %3303 = vmatpush.bf16.msra.mxu3 %v6206_v53 }
 0x622   : > { %v2643_v55 = vpack.c.bf16 %v2635_v13, %v2635_v13  ;;  %v6203_v13 = vld [vmem:[%s8672_s5 + $0xd0] sm:$0xff] }
 0x624   : > { %v2522_v36 = vpop.f32.mrf.mxu2  ;;  %v2671_v50 = vunpack.c.l.b16 %v2643_v55 }
 0x625   : > { %v2523_v27 = vadd.f32 %v6350_v54, %v2522_v36  ;;  %v2421_v38 = vpop.f32.mrf.mxu1 }
 0x626   : > { %v2674_v28 = vpack.c.b16 %v2671_v50, %v2670_v58  ;;  %v2422_v44 = vadd.f32 %v7561_v26, %v2421_v38  ;;  %v6201_v58 = vld [vmem:[%s8672_s5 + $0xc0] sm:$0xff] }
 0x627   : > { %v2653_v63 = vpack.c.bf16 %v2523_v27, %v2523_v27 }
 0x628   : > { %v2636_v31 = vmul.f32 0.17677669, %v2422_v44 }
 0x629   : > { %v2683_v60 = vunpack.c.l.b16 %v2653_v63 }
 0x62a   : > { %v2644_v25 = vpack.c.bf16 %v2636_v31, %v2636_v31 }
 0x62b   : > { %v2685_v1 = vpack.c.b16 %v2683_v60, %v2682_v57 }
 0x62c   : > { %v2525_v0 = vpop.f32.mrf.mxu2  ;;  %v2672_v9 = vunpack.c.l.b16 %v2644_v25 }
 0x62d   : > { %v2696_v59 = vsel %vm1112_vm9, %v2685_v1, 0  ;;  %v2423_v56 = vpop.f32.mrf.mxu1  ;;  %v2526_v23 = vadd.f32 %v6350_v54, %v2525_v0 }
 0x62e   : > { %2704 = vmatpush.bf16.xpose.msrb.mxu0 %v2696_v59  ;;  %v2424_v33 = vadd.f32 %v7561_v26, %v2423_v56 }
 0x62f   : > { %v2654_v48 = vpack.c.bf16 %v2526_v23, %v2526_v23 }
 0x630   : > { %5500 = vmatmul.msk.bf16.gmra.mxu3 %vm1112_vm9, %v2225_v17  ;;  %v2637_v2 = vmul.f32 0.17677669, %v2424_v33 }
 0x631   : > { %v2731_v0 = vunpack.c.l.b16 %v2654_v48 }
 0x632   : > { %v2645_v29 = vpack.c.bf16 %v2637_v2, %v2637_v2 }
 0x634   : > { %v2527_v20 = vpop.f32.mrf.mxu2  ;;  %v2673_v43 = vunpack.c.l.b16 %v2645_v29 }
 0x635   : > { %v2426_v19 = vpop.f32.mrf.mxu1  ;;  %v2528_v52 = vadd.f32 %v6350_v54, %v2527_v20  ;;  %v6202_v20 = vld [vmem:[%s8672_s5 + $0xc8] sm:$0xff] }
 0x636   : > { %2705 = vmatpush.bf16.xpose.msrb.mxu0 %v2693_v32  ;;  %v2675_v63 = vpack.c.b16 %v2673_v43, %v2672_v9  ;;  %v2427_v46 = vadd.f32 %v7561_v26, %v2426_v19 }
 0x637   : > { %v2655_v49 = vpack.c.bf16 %v2528_v52, %v2528_v52 }
 0x638   : > { %v2638_v61 = vmul.f32 0.17677669, %v2427_v46 }
 0x639   : > { %v2732_v60 = vunpack.c.l.b16 %v2655_v49 }
 0x63a   : > { %v2646_v56 = vpack.c.bf16 %v2638_v61, %v2638_v61 }
 0x63b   : > { %v2735_v59 = vpack.c.b16 %v2732_v60, %v2731_v0  ;;  %v6352_v0 = vld [vmem:[%s8675_s8 + $0x2] ss:$0 sm:$0xff] }
 0x63c   : > { %v2530_v22 = vpop.f32.mrf.mxu2  ;;  %v2721_v21 = vunpack.c.l.b16 %v2646_v56 }
 0x63d   : > { %5660 = vmatmul.msk.bf16.vlgmr.msrb.gmra.mxu0 %vm1112_vm9, %v2674_v28  ;;  %v2531_v35 = vadd.f32 %v6350_v54, %v2530_v22  ;;  %v2428_v40 = vpop.f32.mrf.mxu1  ;;  %v2744_v34 = vsel %vm1112_vm9, %v2735_v59, 0 }
 0x63e   : > { %v2429_v30 = vadd.f32 %v7561_v26, %v2428_v40 }
 0x63f   : > { %v2656_v39 = vpack.c.bf16 %v2531_v35, %v2531_v35  ;;  %v7606_v35 = vpop.f32.mrf.mxu0 }
 0x640   : > { %2613 = vmatmul.bf16.vlgmr.msrb.gmra.mxu3 %v6991_v14  ;;  %v2639_v17 = vmul.f32 0.17677669, %v2429_v30 }
 0x641   : > { %v2733_v27 = vunpack.c.l.b16 %v2656_v39 }
 0x642   : > { %v2647_v12 = vpack.c.bf16 %v2639_v17, %v2639_v17 }
 0x644   : > { %v2532_v41 = vpop.f32.mrf.mxu2  ;;  %v2722_v42 = vunpack.c.l.b16 %v2647_v12 }
 0x645   : > { %v2533_v16 = vadd.f32 %v6350_v54, %v2532_v41  ;;  %v6205_v54 = vld [vmem:[%s8672_s5 + $0xe0] sm:$0xff]  ;;  %v2431_v1 = vpop.f32.mrf.mxu1 }
 0x646   : > { %3304 = vmatpush.bf16.msra.mxu3 %v6205_v54  ;;  %v2725_v32 = vpack.c.b16 %v2722_v42, %v2721_v21  ;;  %v2432_v19 = vadd.f32 %v7561_v26, %v2431_v1 }
 0x647   : > { %v2657_v36 = vpack.c.bf16 %v2533_v16, %v2533_v16  ;;  %v7610_v15 = vpop.f32.mrf.mxu0 }
 0x648   : > { %v2640_v33 = vmul.f32 0.17677669, %v2432_v19 }
 0x649   : > { %v2734_v38 = vunpack.c.l.b16 %v2657_v36 }
 0x64a   : > { %3305 = vmatpush.bf16.msra.mxu3 %v6204_v62  ;;  %v2648_v44 = vpack.c.bf16 %v2640_v33, %v2640_v33 }
 0x64b   : > { %v2736_v57 = vpack.c.b16 %v2734_v38, %v2733_v27 }
 0x64c   : > { %v2723_v45 = vunpack.c.l.b16 %v2648_v44 }
 0x64d   : > { %5661 = vmatmul.msk.bf16.gmra.mxu0 %vm1112_vm9, %v2675_v63  ;;  %v2747_v47 = vsel %vm1112_vm9, %v2736_v57, 0  ;;  %v2433_v55 = vpop.f32.mrf.mxu1 }
 0x64e   : > { %2755 = vmatpush.bf16.xpose.msra.mxu1 %v2747_v47  ;;  %3306 = vmatpush.bf16.msra.mxu3 %v6203_v13  ;;  %v2434_v50 = vadd.f32 %v7561_v26, %v2433_v55 }
 0x64f   : > { %v7613_v26 = vpop.f32.mrf.mxu0 }
 0x650   : > { %2618 = vmatmul.bf16.gmra.mxu3 %v7027_v51  ;;  %v2641_v28 = vmul.f32 0.17677669, %v2434_v50 }
 0x652   : > { %3307 = vmatpush.bf16.msra.mxu3 %v6202_v20  ;;  %v2649_v22 = vpack.c.bf16 %v2641_v28, %v2641_v28 }
 0x654   : > { %v2724_v2 = vunpack.c.l.b16 %v2649_v22 }
 0x656   : > { %2756 = vmatpush.bf16.xpose.msra.mxu1 %v2744_v34  ;;  %3308 = vmatpush.bf16.msra.mxu3 %v6201_v58  ;;  %v2726_v31 = vpack.c.b16 %v2724_v2, %v2723_v45 }
 0x657   : > { %v7617_v40 = vpop.f32.mrf.mxu0 }
 0x65d   : > { %5662 = vmatmul.msk.bf16.vlgmr.msra.gmra.mxu1 %vm1112_vm9, %v2725_v32 }
 0x65f   : > { %v7624_v52 = vpop.f32.mrf.mxu0 }
 0x660   : > { %2623 = vmatmul.bf16.gmra.mxu3 %v7020_v24 }
 0x667   : > { %v7628_v16 = vpop.f32.mrf.mxu0 }
 0x66d   : > { %5663 = vmatmul.msk.bf16.gmra.mxu1 %vm1112_vm9, %v2726_v31 }
 0x66f   : > { %v7633_v23 = vpop.f32.mrf.mxu0 }
 0x670   : > { %2628 = vmatmul.bf16.gmra.mxu3 %v7036_v37 }
 0x677   : > { %v7638_v36 = vpop.f32.mrf.mxu0 }
 0x680   : > { %3309 = vmatmul.bf16.vlgmr.msra.gmra.mxu3 %v6991_v14 }
 0x683   : > { %v7615_v29 = vpop.f32.mrf.mxu3 }
 0x68b   : > { %v7619_v41 = vpop.f32.mrf.mxu3 }
 0x690   : > { %3314 = vmatmul.bf16.gmra.mxu3 %v7027_v51 }
 0x693   : > { %v7622_v25 = vpop.f32.mrf.mxu3 }
 0x69b   : > { %v7626_v39 = vpop.f32.mrf.mxu3 }
 0x6a0   : > { %3319 = vmatmul.bf16.gmra.mxu3 %v7020_v24 }
 0x6a3   : > { %v7631_v53 = vpop.f32.mrf.mxu3 }
 0x6ab   : > { %v7635_v43 = vpop.f32.mrf.mxu3 }
 0x6b0   : > { %3324 = vmatmul.bf16.gmra.mxu3 %v7036_v37 }
 0x6b3   : > { %v7640_v9 = vpop.f32.mrf.mxu3 }
 0x6ba   : > { %v7642_v49 = vpop.f32.mrf.mxu0 }
 0x6bb   : > { %v7644_v27 = vpop.f32.mrf.mxu3  ;;  %v2768_v38 = vsel %vm1112_vm9, %v7642_v49, -inf }
 0x6bc   : > { %2769 = vmax.xlane.f32.xlu0 %v2768_v38 }
 0x6c2   : > { %v7648_v48 = vpop.f32.mrf.mxu0 }
 0x6c3   : > { %v2614_v63 = vpop.f32.mrf.mxu3  ;;  %v2771_v30 = vsel %vm1112_vm9, %v7648_v48, -inf }
 0x6c4   : > { %2772 = vmax.xlane.f32.xlu1 %v2771_v30  ;;  %v2615_v12 = vadd.f32 %v6352_v0, %v2614_v63 }
 0x6c6   : > { %v2658_v20 = vpack.c.bf16 %v2615_v12, %v2615_v12 }
 0x6c8   : > { %v2982_v33 = vunpack.c.l.b16 %v2658_v20 }
 0x6ca   : > { %v7652_v57 = vpop.f32.mrf.mxu0 }
 0x6cb   : > { %v2616_v60 = vpop.f32.mrf.mxu3  ;;  %v2774_v46 = vsel %vm1112_vm9, %v7652_v57, -inf }
 0x6cc   : > { %2775 = vmax.xlane.f32.xlu2 %v2774_v46  ;;  %v2617_v62 = vadd.f32 %v6352_v0, %v2616_v60 }
 0x6ce   : > { %v2659_v42 = vpack.c.bf16 %v2617_v62, %v2617_v62 }
 0x6d0   : > { %v2983_v50 = vunpack.c.l.b16 %v2659_v42  ;;  %v6192_v42 = vld [vmem:[%s8676_s9 + $0x28] sm:$0xff] }
 0x6d1   : > { %3101 = vmatpush.bf16.msrb.mxu1 %v6192_v42 }
 0x6d2   : > { %v7656_v47 = vpop.f32.mrf.mxu0  ;;  %v2986_v44 = vpack.c.b16 %v2983_v50, %v2982_v33 }
 0x6d3   : > { %v2619_v54 = vpop.f32.mrf.mxu3  ;;  %v2777_v1 = vsel %vm1112_vm9, %v7656_v47, -inf }
 0x6d4   : > { %2778 = vmax.xlane.f32.xlu0 %v2777_v1  ;;  %v2620_v17 = vadd.f32 %v6352_v0, %v2619_v54 }
 0x6d6   : > { %v2660_v13 = vpack.c.bf16 %v2620_v17, %v2620_v17 }
 0x6d8   : > { %v2984_v21 = vunpack.c.l.b16 %v2660_v13 }
 0x6da   : > { %v7663_v61 = vpop.f32.mrf.mxu1 }
 0x6db   : > { %v2621_v59 = vpop.f32.mrf.mxu3  ;;  %v2780_v56 = vsel %vm1112_vm9, %v7663_v61, -inf }
 0x6dc   : > { %v2622_v34 = vadd.f32 %v6352_v0, %v2621_v59  ;;  %2781 = vmax.xlane.f32.xlu1 %v2780_v56 }
 0x6de   : > { %v2661_v55 = vpack.c.bf16 %v2622_v34, %v2622_v34 }
 0x6e0   : > { %v2985_v32 = vunpack.c.l.b16 %v2661_v55 }
 0x6e2   : > { %v2987_v58 = vpack.c.b16 %v2985_v32, %v2984_v21  ;;  %v7667_v19 = vpop.f32.mrf.mxu1 }
 0x6e3   : > { %v2624_v28 = vpop.f32.mrf.mxu3  ;;  %v2783_v22 = vsel %vm1112_vm9, %v7667_v19, -inf }
 0x6e4   : > { %3002 = vmatpush.bf16.msrb.mxu2 %v2987_v58  ;;  %2784 = vmax.xlane.f32.xlu2 %v2783_v22  ;;  %v2625_v46 = vadd.f32 %v6352_v0, %v2624_v28  ;;  %v7684_v58 = vld [vmem:[%s8673_s6 + $0x3] ss:$0 sm:$0xff] }
 0x6e6   : > { %v2662_v59 = vpack.c.bf16 %v2625_v46, %v2625_v46 }
 0x6e8   : > { %3003 = vmatpush.bf16.msrb.mxu2 %v2986_v44  ;;  %v3029_v20 = vunpack.c.l.b16 %v2662_v59 }
 0x6ea   : > { %v7671_v2 = vpop.f32.mrf.mxu1 }
 0x6eb   : > { %v2626_v45 = vpop.f32.mrf.mxu3  ;;  %v2786_v31 = vsel %vm1112_vm9, %v7671_v2, -inf }
 0x6ec   : > { %2787 = vmax.xlane.f32.xlu2 %v2786_v31  ;;  %v2627_v30 = vadd.f32 %v6352_v0, %v2626_v45 }
 0x6ee   : > { %v2663_v17 = vpack.c.bf16 %v2627_v30, %v2627_v30 }
 0x6f0   : > { %v3030_v56 = vunpack.c.l.b16 %v2663_v17 }
 0x6f2   : > { %v3033_v21 = vpack.c.b16 %v3030_v56, %v3029_v20 }
 0x6f3   : > { %v2629_v38 = vpop.f32.mrf.mxu3 }
 0x6f4   : > { %v2630_v63 = vadd.f32 %v6352_v0, %v2629_v38 }
 0x6f6   : > { %v2664_v54 = vpack.c.bf16 %v2630_v63, %v2630_v63 }
 0x6f8   : > { %v3031_v12 = vunpack.c.l.b16 %v2664_v54 }
 0x6fb   : > { %v2631_v60 = vpop.f32.mrf.mxu3 }
 0x6fc   : > { %v2632_v1 = vadd.f32 %v6352_v0, %v2631_v60  ;;  %v6191_v0 = vld [vmem:[%s8676_s9 + $0x20] sm:$0xff] }
 0x6fd   : > { %3102 = vmatpush.bf16.msrb.mxu1 %v6191_v0 }
 0x6fe   : > { %v2665_v62 = vpack.c.bf16 %v2632_v1, %v2632_v1 }
 0x700   : > { %v3032_v13 = vunpack.c.l.b16 %v2665_v62 }
 0x702   : > { %v3034_v34 = vpack.c.b16 %v3032_v13, %v3031_v12 }
 0x703   : > { %v3310_v55 = vpop.f32.mrf.mxu3 }
 0x704   : > { %3049 = vmatpush.bf16.msra.mxu0 %v3034_v34  ;;  %v3311_v31 = vadd.f32 %v7684_v58, %v3310_v55 }
 0x706   : > { %v3445_v46 = vpack.c.bf16 %v3311_v31, %v3311_v31 }
 0x708   : > { %3050 = vmatpush.bf16.msra.mxu0 %v3033_v21  ;;  %v3475_v62 = vunpack.c.l.b16 %v3445_v46 }
 0x70b   : > { %v3312_v32 = vpop.f32.mrf.mxu3 }
 0x70c   : > { %v3313_v22 = vadd.f32 %v7684_v58, %v3312_v32 }
 0x70e   : > { %v3446_v63 = vpack.c.bf16 %v3313_v22, %v3313_v22 }
 0x710   : > { %v3476_v1 = vunpack.c.l.b16 %v3446_v63 }
 0x712   : > { %v3479_v59 = vpack.c.b16 %v3476_v1, %v3475_v62 }
 0x713   : > { %v3315_v50 = vpop.f32.mrf.mxu3 }
 0x714   : > { %v3316_v28 = vadd.f32 %v7684_v58, %v3315_v50  ;;  %v3488_v12 = vsel %vm1112_vm9, %v3479_v59, 0  ;;  %v7698_v50 = vpop.f32.mrf.mxu1 }
 0x716   : > { %v3447_v44 = vpack.c.bf16 %v3316_v28, %v3316_v28 }
 0x718   : > { %v3477_v30 = vunpack.c.l.b16 %v3447_v44 }
 0x71b   : > { %v3317_v33 = vpop.f32.mrf.mxu3 }
 0x71c   : > { %v3318_v45 = vadd.f32 %v7684_v58, %v3317_v33 }
 0x71e   : > { %v3448_v38 = vpack.c.bf16 %v3318_v45, %v3318_v45 }
 0x720   : > { %v3478_v60 = vunpack.c.l.b16 %v3448_v38 }
 0x722   : > { %v3480_v54 = vpack.c.b16 %v3478_v60, %v3477_v30 }
 0x724   : > { %v3491_v17 = vsel %vm1112_vm9, %v3480_v54, 0 }
 0x725   : > { %3499 = vmatpush.bf16.xpose.msra.mxu1 %v3491_v17 }
 0x72d   : > { %3500 = vmatpush.bf16.xpose.msra.mxu1 %v3488_v12 }
 0x72f   : > { %v2770_v13 = vpop.xlane.xlu0 %2769 }
 0x730   : > { %v2792_v56 = vsub.f32 %v7642_v49, %v2770_v13 }
 0x732   : > { %v2800_v34 = vmul.f32 1.442695, %v2792_v56 }
 0x734   : > { %6442 = vpow2.f32 %v2800_v34 }
 0x737   : > { %v2773_v42 = vpop.xlane.xlu1 %2772 }
 0x738   : > { %v2793_v55 = vsub.f32 %v7648_v48, %v2773_v42  ;;  %v2789_v48 = vsel %vm1112_vm9, %v7698_v50, -inf }
 0x73a   : > { %v7694_v20 = vpop.eup %6442  ;;  %v2802_v21 = vmul.f32 1.442695, %v2793_v55  ;;  %v6200_v55 = vld [vmem:[%s8670_s3 + $0xf8] sm:$0xff] }
 0x73b   : > { %v2816_v0 = vsel %vm1112_vm9, %v7694_v20, 0.0  ;;  %3202 = vmatpush.bf16.msra.mxu2 %v6200_v55 }
 0x73c   : > { %6444 = vpow2.f32 %v2802_v21  ;;  %2817 = vadd.xlane.f32.xlu0 %v2816_v0  ;;  %v6198_v21 = vld [vmem:[%s8670_s3 + $0xe8] sm:$0xff]  ;;  %v7740_v0 = vpop.f32.mrf.mxu3 }
 0x73f   : > { %v2776_v32 = vpop.xlane.xlu2 %2775 }
 0x740   : > { %v2794_v28 = vsub.f32 %v7652_v57, %v2776_v32  ;;  %v6197_v32 = vld [vmem:[%s8670_s3 + $0xe0] sm:$0xff] }
 0x742   : > { %v7701_v33 = vpop.eup %6444  ;;  %v2804_v49 = vmul.f32 1.442695, %v2794_v28  ;;  %v6196_v28 = vld [vmem:[%s8670_s3 + $0xd8] sm:$0xff] }
 0x743   : > { %v2819_v22 = vsel %vm1112_vm9, %v7701_v33, 0.0 }
 0x744   : > { %6446 = vpow2.f32 %v2804_v49  ;;  %2820 = vadd.xlane.f32.xlu1 %v2819_v22  ;;  %2790 = vmax.xlane.f32.xlu0 %v2789_v48  ;;  %v6195_v49 = vld [vmem:[%s8670_s3 + $0xd0] sm:$0xff]  ;;  %v3322_v22 = vpop.f32.mrf.mxu3  ;;  %v6194_v48 = vld [vmem:[%s8670_s3 + $0xc8] sm:$0xff] }
 0x747   : > { %v2779_v44 = vpop.xlane.xlu0 %2778 }
 0x748   : > { %v2795_v45 = vsub.f32 %v7656_v47, %v2779_v44 }
 0x74a   : > { %v7708_v31 = vpop.eup %6446  ;;  %v2806_v38 = vmul.f32 1.442695, %v2795_v45  ;;  %v6193_v45 = vld [vmem:[%s8670_s3 + $0xc0] sm:$0xff] }
 0x74b   : > { %v2822_v57 = vsel %vm1112_vm9, %v7708_v31, 0.0 }
 0x74c   : > { %6448 = vpow2.f32 %v2806_v38  ;;  %2823 = vadd.xlane.f32.xlu1 %v2822_v57  ;;  %v3325_v38 = vpop.f32.mrf.mxu3 }
 0x74f   : > { %v2782_v63 = vpop.xlane.xlu1 %2781 }
 0x750   : > { %v2796_v30 = vsub.f32 %v7663_v61, %v2782_v63 }
 0x752   : > { %v7713_v60 = vpop.eup %6448  ;;  %v2808_v46 = vmul.f32 1.442695, %v2796_v30 }
 0x753   : > { %v2825_v54 = vsel %vm1112_vm9, %v7713_v60, 0.0 }
 0x754   : > { %6450 = vpow2.f32 %v2808_v46  ;;  %2826 = vadd.xlane.f32.xlu2 %v2825_v54 }
 0x757   : > { %v2785_v47 = vpop.xlane.xlu2 %2784 }
 0x758   : > { %v2797_v1 = vsub.f32 %v7667_v19, %v2785_v47 }
 0x75a   : > { %v7718_v17 = vpop.eup %6450  ;;  %v2810_v62 = vmul.f32 1.442695, %v2797_v1 }
 0x75b   : > { %v2828_v59 = vsel %vm1112_vm9, %v7718_v17, 0.0 }
 0x75c   : > { %6452 = vpow2.f32 %v2810_v62  ;;  %2829 = vadd.xlane.f32.xlu0 %v2828_v59 }
 0x75f   : > { %v2788_v61 = vpop.xlane.xlu2 %2787 }
 0x760   : > { %v2798_v12 = vsub.f32 %v7671_v2, %v2788_v61  ;;  %v6199_v2 = vld [vmem:[%s8670_s3 + $0xf0] sm:$0xff]  ;;  %v3327_v61 = vpop.f32.mrf.mxu3 }
 0x761   : > { %3203 = vmatpush.bf16.msra.mxu2 %v6199_v2 }
 0x762   : > { %v7723_v13 = vpop.eup %6452  ;;  %v2812_v56 = vmul.f32 1.442695, %v2798_v12 }
 0x763   : > { %v2831_v34 = vsel %vm1112_vm9, %v7723_v13, 0.0 }
 0x764   : > { %6454 = vpow2.f32 %v2812_v56  ;;  %2832 = vadd.xlane.f32.xlu1 %v2831_v34 }
 0x765   : > { %3204 = vmatpush.bf16.msra.mxu2 %v6198_v21  ;;  %v3328_v21 = vadd.f32 %v7684_v58, %v3327_v61 }
 0x769   : > { %3205 = vmatpush.bf16.msra.mxu2 %v6197_v32 }
 0x76a   : > { %v7727_v19 = vpop.eup %6454 }
 0x76b   : > { %v2834_v42 = vsel %vm1112_vm9, %v7727_v19, 0.0 }
 0x76c   : > { %2835 = vadd.xlane.f32.xlu2 %v2834_v42 }
 0x76d   : > { %3206 = vmatpush.bf16.msra.mxu2 %v6196_v28  ;;  %v3326_v28 = vadd.f32 %v7684_v58, %v3325_v38 }
 0x771   : > { %3207 = vmatpush.bf16.msra.mxu2 %v6195_v49 }
 0x775   : > { %3208 = vmatpush.bf16.msra.mxu2 %v6194_v48 }
 0x779   : > { %3209 = vmatpush.bf16.msra.mxu2 %v6193_v45 }
 0x7af   : > { %v2818_v44 = vpop.xlane.xlu0 %2817 }
 0x7b0   : > { %6456 = vrcp.f32 %v2818_v44  ;;  %v2851_v59 = vand.u32 2147483648, %v2818_v44  ;;  %vm2845_vm15 = vweird.f32 %v2818_v44  ;;  %v2849_v56 = vand.u32 2147483647, %v2818_v44 }
 0x7b2   : > { %v2852_v32 = vor.u32 1.1754944e-38, %v2851_v59  ;;  %vm2850_vm1 = vcmp.eq.f32.partialorder %v2849_v56, 8.507059e+37  ;;  %v3323_v56 = vadd.f32 %v7684_v58, %v3322_v22 }
 0x7b6   : > { %v6457_v57 = vpop.eup %6456 }
 0x7b7   : > { %v2841_v63 = vmul.f32 %v6457_v57, %v2818_v44  ;;  %v2821_v30 = vpop.xlane.xlu1 %2820  ;;  %v2791_v46 = vpop.xlane.xlu0 %2790  ;;  %vm2846_vm14 = vweird.f32 %v6457_v57 }
 0x7b8   : > { %6458 = vrcp.f32 %v2821_v30  ;;  %v2799_v47 = vsub.f32 %v7698_v50, %v2791_v46  ;;  %vm2847_vm0 = vmor %vm2845_vm15, %vm2846_vm14  ;;  %v2866_v48 = vand.u32 2147483648, %v2821_v30  ;;  %v2864_v44 = vand.u32 2147483647, %v2821_v30 }
 0x7b9   : > { %v2842_v54 = vsub.f32 1.0, %v2841_v63  ;;  %v3452_v46 = vpack.c.bf16 %v3328_v21, %v3328_v21  ;;  %vm2860_vm3 = vweird.f32 %v2821_v30 }
 0x7ba   : > { %v2814_v62 = vmul.f32 1.442695, %v2799_v47  ;;  %v2867_v38 = vor.u32 1.1754944e-38, %v2866_v48  ;;  %vm2865_vm5 = vcmp.eq.f32.partialorder %v2864_v44, 8.507059e+37 }
 0x7bb   : > { %v2843_v1 = vmul.f32 %v6457_v57, %v2842_v54 }
 0x7bc   : > { %6460 = vpow2.f32 %v2814_v62  ;;  %v3451_v62 = vpack.c.bf16 %v3326_v28, %v3326_v28 }
 0x7bd   : > { %v2844_v12 = vadd.f32 %v6457_v57, %v2843_v1 }
 0x7be   : > { %v6459_v34 = vpop.eup %6458 }
 0x7bf   : > { %v2848_v42 = vsel %vm2847_vm0, %v6457_v57, %v2844_v12  ;;  %v2856_v55 = vmul.f32 %v6459_v34, %v2821_v30  ;;  %v2824_v2 = vpop.xlane.xlu1 %2823  ;;  %vm2861_vm2 = vweird.f32 %v6459_v34  ;;  %v3321_v30 = vadd.f32 %v7684_v58, %v7740_v0 }
 0x7c0   : > { %6462 = vrcp.f32 %v2824_v2  ;;  %v2853_v49 = vsel %vm2850_vm1, %v2852_v32, %v2848_v42  ;;  %vm2862_vm4 = vmor %vm2860_vm3, %vm2861_vm2  ;;  %v3529_v42 = vunpack.c.l.b16 %v3452_v46  ;;  %vm2875_vm7 = vweird.f32 %v2824_v2 }
 0x7c1   : > { %v2857_v50 = vsub.f32 1.0, %v2856_v55  ;;  %v2854_v54 = vmul.f32 %v7694_v20, %v2853_v49 }
 0x7c2   : > { %v7760_v45 = vpop.eup %6460 }
 0x7c3   : > { %v2858_v63 = vmul.f32 %v6459_v34, %v2857_v50  ;;  %v2837_v57 = vsel %vm1112_vm9, %v7760_v45, 0.0  ;;  %v2960_v21 = vpack.c.bf16 %v2854_v54, %v2854_v54  ;;  %v3528_v50 = vunpack.c.l.b16 %v3451_v62 }
 0x7c4   : > { %2838 = vadd.xlane.f32.xlu0 %v2837_v57  ;;  %v2879_v57 = vand.u32 2147483647, %v2824_v2  ;;  %v3449_v54 = vpack.c.bf16 %v3321_v30, %v3321_v30 }
 0x7c5   : > { %v2859_v47 = vadd.f32 %v6459_v34, %v2858_v63  ;;  %v3531_v48 = vpack.c.b16 %v3529_v42, %v3528_v50  ;;  %v2881_v63 = vand.u32 2147483648, %v2824_v2  ;;  %v2972_v44 = vunpack.c.l.b16 %v2960_v21 }
 0x7c6   : > { %v6463_v1 = vpop.eup %6462  ;;  %vm2880_vm10 = vcmp.eq.f32.partialorder %v2879_v57, 8.507059e+37 }
 0x7c7   : > { %v2863_v59 = vsel %vm2862_vm4, %v6459_v34, %v2859_v47  ;;  %v2871_v61 = vmul.f32 %v6463_v1, %v2824_v2  ;;  %v2827_v12 = vpop.xlane.xlu2 %2826  ;;  %vm2876_vm6 = vweird.f32 %v6463_v1  ;;  %v3450_v34 = vpack.c.bf16 %v3323_v56, %v3323_v56 }
 0x7c8   : > { %v2868_v55 = vsel %vm2865_vm5, %v2867_v38, %v2863_v59  ;;  %6464 = vrcp.f32 %v2827_v12  ;;  %vm2877_vm8 = vmor %vm2875_vm7, %vm2876_vm6  ;;  %v3542_v56 = vsel %vm1112_vm9, %v3531_v48, 0  ;;  %v3526_v2 = vunpack.c.l.b16 %v3449_v54 }
 0x7c9   : > { %v2869_v32 = vmul.f32 %v7701_v33, %v2868_v55  ;;  %v2872_v20 = vsub.f32 1.0, %v2871_v61  ;;  %v2882_v61 = vor.u32 1.1754944e-38, %v2881_v63  ;;  %v3527_v58 = vunpack.c.l.b16 %v3450_v34 }
 0x7ca   : > { %v2896_v55 = vand.u32 2147483648, %v2827_v12  ;;  %vm2890_vm12 = vweird.f32 %v2827_v12 }
 0x7cb   : > { %v2961_v28 = vpack.c.bf16 %v2869_v32, %v2869_v32  ;;  %v2873_v49 = vmul.f32 %v6463_v1, %v2872_v20  ;;  %v2894_v32 = vand.u32 2147483647, %v2827_v12  ;;  %v3530_v20 = vpack.c.b16 %v3527_v58, %v3526_v2 }
 0x7cd   : > { %v2973_v22 = vunpack.c.l.b16 %v2961_v28  ;;  %v2874_v46 = vadd.f32 %v6463_v1, %v2873_v49  ;;  %v2897_v28 = vor.u32 1.1754944e-38, %v2896_v55  ;;  %vm2895_vm14 = vcmp.eq.f32.partialorder %v2894_v32, 8.507059e+37 }
 0x7ce   : > { %v6465_v47 = vpop.eup %6464 }
 0x7cf   : > { %v2976_v33 = vpack.c.b16 %v2973_v22, %v2972_v44  ;;  %v2878_v38 = vsel %vm2877_vm8, %v6463_v1, %v2874_v46  ;;  %v2886_v62 = vmul.f32 %v6465_v47, %v2827_v12  ;;  %v2830_v59 = vpop.xlane.xlu0 %2829  ;;  %vm2891_vm11 = vweird.f32 %v6465_v47 }
 0x7d0   : > { %6466 = vrcp.f32 %v2830_v59  ;;  %v2883_v42 = vsel %vm2880_vm10, %v2882_v61, %v2878_v38  ;;  %vm2892_vm13 = vmor %vm2890_vm12, %vm2891_vm11  ;;  %v3539_v22 = vsel %vm1112_vm9, %v3530_v20, 0  ;;  %vm2905_vm0 = vweird.f32 %v2830_v59 }
 0x7d1   : > { %v2887_v0 = vsub.f32 1.0, %v2886_v62  ;;  %5664 = vmatmul.msk.bf16.vlgmr.msrb.gmra.mxu2 %vm1112_vm9, %v2976_v33  ;;  %v2884_v50 = vmul.f32 %v7708_v31, %v2883_v42  ;;  %v2911_v31 = vand.u32 2147483648, %v2830_v59  ;;  %v2909_v38 = vand.u32 2147483647, %v2830_v59 }
 0x7d2   : > { %3550 = vmatpush.bf16.xpose.msrb.mxu2 %v3542_v56 }
 0x7d3   : > { %v2888_v21 = vmul.f32 %v6465_v47, %v2887_v0  ;;  %v2962_v57 = vpack.c.bf16 %v2884_v50, %v2884_v50  ;;  %v2912_v42 = vor.u32 1.1754944e-38, %v2911_v31  ;;  %vm2910_vm2 = vcmp.eq.f32.partialorder %v2909_v38, 8.507059e+37  ;;  %v6212_v31 = vld [vmem:[%s8674_s7 + $0xd8] sm:$0xff]  ;;  %v6211_v38 = vld [vmem:[%s8674_s7 + $0xd0] sm:$0xff] }
 0x7d5   : > { %v2889_v1 = vadd.f32 %v6465_v47, %v2888_v21 }
 0x7d6   : > { %v6467_v30 = vpop.eup %6466 }
 0x7d7   : > { %v2893_v49 = vsel %vm2892_vm13, %v6465_v47, %v2889_v1  ;;  %v2901_v34 = vmul.f32 %v6467_v30, %v2830_v59  ;;  %v2833_v63 = vpop.xlane.xlu1 %2832  ;;  %vm2906_vm15 = vweird.f32 %v6467_v30  ;;  %v2974_v47 = vunpack.c.l.b16 %v2962_v57  ;;  %v6213_v57 = vld [vmem:[%s8674_s7 + $0xe0] sm:$0xff] }
 0x7d8   : > { %v2898_v48 = vsel %vm2895_vm14, %v2897_v28, %v2893_v49  ;;  %6468 = vrcp.f32 %v2833_v63  ;;  %vm2907_vm1 = vmor %vm2905_vm0, %vm2906_vm15  ;;  %v2926_v2 = vand.u32 2147483648, %v2833_v63  ;;  %v2924_v32 = vand.u32 2147483647, %v2833_v63 }
 0x7d9   : > { %v2902_v44 = vsub.f32 1.0, %v2901_v34  ;;  %v2899_v46 = vmul.f32 %v7713_v60, %v2898_v48  ;;  %vm2920_vm4 = vweird.f32 %v2833_v63 }
 0x7da   : > { %3551 = vmatpush.bf16.xpose.msrb.mxu2 %v3539_v22  ;;  %v2927_v1 = vor.u32 1.1754944e-38, %v2926_v2  ;;  %vm2925_vm6 = vcmp.eq.f32.partialorder %v2924_v32, 8.507059e+37 }
 0x7db   : > { %v2903_v54 = vmul.f32 %v6467_v30, %v2902_v44  ;;  %v2963_v12 = vpack.c.bf16 %v2899_v46, %v2899_v46  ;;  %v6214_v46 = vld [vmem:[%s8674_s7 + $0xe8] sm:$0xff] }
 0x7dd   : > { %v2904_v33 = vadd.f32 %v6467_v30, %v2903_v54  ;;  %v2975_v62 = vunpack.c.l.b16 %v2963_v12 }
 0x7de   : > { %v6469_v61 = vpop.eup %6468 }
 0x7df   : > { %v2908_v58 = vsel %vm2907_vm1, %v6467_v30, %v2904_v33  ;;  %v2916_v0 = vmul.f32 %v6469_v61, %v2833_v63  ;;  %v2977_v56 = vpack.c.b16 %v2975_v62, %v2974_v47  ;;  %vm2921_vm3 = vweird.f32 %v6469_v61  ;;  %v2836_v63 = vpop.xlane.xlu2 %2835 }
 0x7e0   : > { %v2913_v60 = vsel %vm2910_vm2, %v2912_v42, %v2908_v58  ;;  %vm2922_vm5 = vmor %vm2920_vm4, %vm2921_vm3  ;;  %6470 = vrcp.f32 %v2836_v63  ;;  %vm2935_vm8 = vweird.f32 %v2836_v63  ;;  %v2939_v42 = vand.u32 2147483647, %v2836_v63 }
 0x7e1   : > { %v2917_v55 = vsub.f32 1.0, %v2916_v0  ;;  %5665 = vmatmul.msk.bf16.gmra.mxu2 %vm1112_vm9, %v2977_v56  ;;  %v2914_v20 = vmul.f32 %v7718_v17, %v2913_v60  ;;  %v6216_v17 = vld [vmem:[%s8674_s7 + $0xf8] sm:$0xff]  ;;  %v2941_v0 = vand.u32 2147483648, %v2836_v63  ;;  %v6209_v56 = vld [vmem:[%s8674_s7 + $0xc0] sm:$0xff] }
 0x7e2   : > { %3400 = vmatpush.bf16.msrb.mxu0 %v6216_v17  ;;  %vm2940_vm11 = vcmp.eq.f32.partialorder %v2939_v42, 8.507059e+37 }
 0x7e3   : > { %v2918_v21 = vmul.f32 %v6469_v61, %v2917_v55  ;;  %v2964_v28 = vpack.c.bf16 %v2914_v20, %v2914_v20 }
 0x7e5   : > { %v2919_v59 = vadd.f32 %v6469_v61, %v2918_v21  ;;  %v3019_v48 = vunpack.c.l.b16 %v2964_v28  ;;  %v2942_v21 = vor.u32 1.1754944e-38, %v2941_v0 }
 0x7e6   : > { %v6471_v54 = vpop.eup %6470 }
 0x7e7   : > { %v2923_v50 = vsel %vm2922_vm5, %v6469_v61, %v2919_v59  ;;  %v2931_v12 = vmul.f32 %v6471_v54, %v2836_v63  ;;  %v6210_v61 = vld [vmem:[%s8674_s7 + $0xc8] sm:$0xff]  ;;  %vm2936_vm7 = vweird.f32 %v6471_v54 }
 0x7e8   : > { %v2928_v30 = vsel %vm2925_vm6, %v2927_v1, %v2923_v50  ;;  %vm2937_vm10 = vmor %vm2935_vm8, %vm2936_vm7 }
 0x7e9   : > { %v2929_v49 = vmul.f32 %v7723_v13, %v2928_v30  ;;  %v6215_v13 = vld [vmem:[%s8674_s7 + $0xf0] sm:$0xff]  ;;  %v2932_v33 = vsub.f32 1.0, %v2931_v12 }
 0x7ea   : > { %3401 = vmatpush.bf16.msrb.mxu0 %v6215_v13 }
 0x7eb   : > { %v2965_v34 = vpack.c.bf16 %v2929_v49, %v2929_v49  ;;  %v2933_v47 = vmul.f32 %v6471_v54, %v2932_v33 }
 0x7ed   : > { %v3020_v44 = vunpack.c.l.b16 %v2965_v34  ;;  %v2934_v58 = vadd.f32 %v6471_v54, %v2933_v47 }
 0x7ee   : > { %3402 = vmatpush.bf16.msrb.mxu0 %v6214_v46 }
 0x7ef   : > { %v3023_v22 = vpack.c.b16 %v3020_v44, %v3019_v48  ;;  %v2938_v60 = vsel %vm2937_vm10, %v6471_v54, %v2934_v58 }
 0x7f0   : > { %v2943_v20 = vsel %vm2940_vm11, %v2942_v21, %v2938_v60 }
 0x7f1   : > { %5666 = vmatmul.msk.bf16.vlgmr.msra.gmra.mxu0 %vm1112_vm9, %v3023_v22  ;;  %3210 = vmatmul.bf16.vlgmr.msra.gmra.mxu2 %v6991_v14  ;;  %v2944_v28 = vmul.f32 %v7727_v19, %v2943_v20 }
 0x7f2   : > { %3403 = vmatpush.bf16.msrb.mxu0 %v6213_v57 }
 0x7f3   : > { %v2966_v22 = vpack.c.bf16 %v2944_v28, %v2944_v28 }
 0x7f5   : > { %v3021_v63 = vunpack.c.l.b16 %v2966_v22 }
 0x7f6   : > { %3404 = vmatpush.bf16.msrb.mxu0 %v6212_v31 }
 0x7fa   : > { %3405 = vmatpush.bf16.msrb.mxu0 %v6211_v38  ;;  %v6354_v38 = vld [vmem:[%s8671_s4 + $0x3] ss:$0 sm:$0xff] }
 0x7fe   : > { %3406 = vmatpush.bf16.msrb.mxu0 %v6210_v61 }
 0x801   : > { %3215 = vmatmul.bf16.gmra.mxu2 %v7027_v51 }
 0x802   : > { %3407 = vmatpush.bf16.msrb.mxu0 %v6209_v56 }
 0x811   : > { %3220 = vmatmul.bf16.gmra.mxu2 %v7020_v24 }
 0x821   : > { %3225 = vmatmul.bf16.gmra.mxu2 %v7036_v37 }
 0x837   : > { %v2839_v62 = vpop.xlane.xlu0 %2838 }
 0x838   : > { %6472 = vrcp.f32 %v2839_v62  ;;  %v2956_v59 = vand.u32 2147483648, %v2839_v62  ;;  %v2954_v50 = vand.u32 2147483647, %v2839_v62  ;;  %vm2950_vm13 = vweird.f32 %v2839_v62 }
 0x83a   : > { %v2957_v49 = vor.u32 1.1754944e-38, %v2956_v59  ;;  %vm2955_vm15 = vcmp.eq.f32.partialorder %v2954_v50, 8.507059e+37 }
 0x83e   : > { %v6473_v55 = vpop.eup %6472 }
 0x83f   : > { %v2946_v2 = vmul.f32 %v6473_v55, %v2839_v62  ;;  %vm2951_vm12 = vweird.f32 %v6473_v55 }
 0x840   : > { %vm2952_vm14 = vmor %vm2950_vm13, %vm2951_vm12 }
 0x841   : > { %v2947_v32 = vsub.f32 1.0, %v2946_v2 }
 0x843   : > { %v2948_v1 = vmul.f32 %v6473_v55, %v2947_v32 }
 0x845   : > { %v2949_v30 = vadd.f32 %v6473_v55, %v2948_v1 }
 0x847   : > { %v2953_v34 = vsel %vm2952_vm14, %v6473_v55, %v2949_v30 }
 0x848   : > { %v2958_v48 = vsel %vm2955_vm15, %v2957_v49, %v2953_v34 }
 0x849   : > { %v2959_v44 = vmul.f32 %v7760_v45, %v2958_v48 }
 0x84b   : > { %v2967_v17 = vpack.c.bf16 %v2959_v44, %v2959_v44 }
 0x84d   : > { %v3022_v13 = vunpack.c.l.b16 %v2967_v17 }
 0x84f   : > { %v3024_v46 = vpack.c.b16 %v3022_v13, %v3021_v63 }
 0x851   : > { %5667 = vmatmul.msk.bf16.gmra.mxu0 %vm1112_vm9, %v3024_v46 }
 0x854   : > { %v3005_v57 = vpop.f32.mrf.mxu2 }
 0x85c   : > { %v3007_v54 = vpop.f32.mrf.mxu2 }
 0x85d   : > { %v3062_v12 = vpack.c.bf16 %v3007_v54, %v3005_v57 }
 0x85f   : > { %5680 = vmatmul.msk.bf16.vlgmr.msrb.gmra.mxu1 %vm1112_vm9, %v3062_v12 }
 0x861   : > { %3408 = vmatmul.bf16.vlgmr.msrb.gmra.mxu0 %v6991_v14 }
 0x864   : > { %v3010_v19 = vpop.f32.mrf.mxu2 }
 0x86c   : > { %v3012_v31 = vpop.f32.mrf.mxu2 }
 0x86d   : > { %v3063_v33 = vpack.c.bf16 %v3012_v31, %v3010_v19 }
 0x86e   : > { %v3052_v45 = vpop.f32.mrf.mxu0 }
 0x86f   : > { %5681 = vmatmul.msk.bf16.gmra.mxu1 %vm1112_vm9, %v3063_v33 }
 0x871   : > { %3413 = vmatmul.bf16.gmra.mxu0 %v7027_v51 }
 0x874   : > { %v3211_v47 = vpop.f32.mrf.mxu2 }
 0x875   : > { %v3212_v62 = vadd.f32 %v6354_v38, %v3211_v47 }
 0x876   : > { %v3054_v61 = vpop.f32.mrf.mxu0 }
 0x877   : > { %v3429_v58 = vmul.f32 0.17677669, %v3212_v62  ;;  %v3064_v56 = vpack.c.bf16 %v3054_v61, %v3052_v45 }
 0x879   : > { %v3437_v14 = vpack.c.bf16 %v3429_v58, %v3429_v58 }
 0x87b   : > { %v3465_v2 = vunpack.c.l.b16 %v3437_v14 }
 0x87c   : > { %v3213_v0 = vpop.f32.mrf.mxu2 }
 0x87d   : > { %v3214_v42 = vadd.f32 %v6354_v38, %v3213_v0 }
 0x87f   : > { %v3430_v55 = vmul.f32 0.17677669, %v3214_v42  ;;  %5682 = vmatmul.msk.bf16.gmra.mxu1 %vm1112_vm9, %v3064_v56 }
 0x881   : > { %v3438_v60 = vpack.c.bf16 %v3430_v55, %v3430_v55  ;;  %3418 = vmatmul.bf16.gmra.mxu0 %v7020_v24 }
 0x883   : > { %v3466_v21 = vunpack.c.l.b16 %v3438_v60 }
 0x884   : > { %v3216_v32 = vpop.f32.mrf.mxu2 }
 0x885   : > { %v3469_v20 = vpack.c.b16 %v3466_v21, %v3465_v2  ;;  %v3217_v59 = vadd.f32 %v6354_v38, %v3216_v32  ;;  %v2318_v21 = vadd.f32 %v7606_v35, %v7615_v29  ;;  %v6355_v35 = vld [vmem:[%s8675_s8 + $0x3] ss:$0 sm:$0xff] }
 0x887   : > { %v3431_v51 = vmul.f32 0.17677669, %v3217_v59 }
 0x889   : > { %v3439_v30 = vpack.c.bf16 %v3431_v51, %v3431_v51 }
 0x88b   : > { %v3467_v34 = vunpack.c.l.b16 %v3439_v30 }
 0x88c   : > { %v3218_v1 = vpop.f32.mrf.mxu2 }
 0x88d   : > { %v3219_v50 = vadd.f32 %v6354_v38, %v3218_v1 }
 0x88f   : > { %v3432_v28 = vmul.f32 0.17677669, %v3219_v50  ;;  %v2323_v50 = vadd.f32 %v7613_v26, %v7622_v25  ;;  %v2328_v26 = vadd.f32 %v7624_v52, %v7631_v53 }
 0x891   : > { %v3440_v49 = vpack.c.bf16 %v3432_v28, %v3432_v28  ;;  %3423 = vmatmul.bf16.gmra.mxu0 %v7036_v37 }
 0x893   : > { %v3468_v48 = vunpack.c.l.b16 %v3440_v49 }
 0x894   : > { %v3221_v44 = vpop.f32.mrf.mxu2 }
 0x895   : > { %v3470_v22 = vpack.c.b16 %v3468_v48, %v3467_v34  ;;  %v3222_v17 = vadd.f32 %v6354_v38, %v3221_v44 }
 0x897   : > { %v3433_v63 = vmul.f32 0.17677669, %v3222_v17 }
 0x899   : > { %v3441_v46 = vpack.c.bf16 %v3433_v63, %v3433_v63 }
 0x89b   : > { %v3516_v12 = vunpack.c.l.b16 %v3441_v46 }
 0x89c   : > { %v3223_v24 = vpop.f32.mrf.mxu2 }
 0x89d   : > { %v3224_v13 = vadd.f32 %v6354_v38, %v3223_v24 }
 0x89f   : > { %v3434_v57 = vmul.f32 0.17677669, %v3224_v13 }
 0x8a1   : > { %v3442_v54 = vpack.c.bf16 %v3434_v57, %v3434_v57 }
 0x8a3   : > { %v3517_v19 = vunpack.c.l.b16 %v3442_v54 }
 0x8a4   : > { %v3226_v31 = vpop.f32.mrf.mxu2 }
 0x8a5   : > { %v3520_v33 = vpack.c.b16 %v3517_v19, %v3516_v12  ;;  %v3227_v45 = vadd.f32 %v6354_v38, %v3226_v31 }
 0x8a7   : > { %5833 = vmatmul.msk.bf16.vlgmr.msrb.gmra.mxu2 %vm1112_vm9, %v3520_v33  ;;  %v3435_v47 = vmul.f32 0.17677669, %v3227_v45 }
 0x8a9   : > { %v3443_v61 = vpack.c.bf16 %v3435_v47, %v3435_v47 }
 0x8ab   : > { %v3518_v56 = vunpack.c.l.b16 %v3443_v61 }
 0x8ac   : > { %v3228_v37 = vpop.f32.mrf.mxu2 }
 0x8ad   : > { %v3229_v62 = vadd.f32 %v6354_v38, %v3228_v37 }
 0x8af   : > { %v3436_v58 = vmul.f32 0.17677669, %v3229_v62 }
 0x8b1   : > { %v3444_v0 = vpack.c.bf16 %v3436_v58, %v3436_v58 }
 0x8b3   : > { %v3519_v42 = vunpack.c.l.b16 %v3444_v0 }
 0x8b5   : > { %v3521_v14 = vpack.c.b16 %v3519_v42, %v3518_v56 }
 0x8b7   : > { %5834 = vmatmul.msk.bf16.gmra.mxu2 %vm1112_vm9, %v3521_v14 }
 0x8ce   : > { %v3057_v55 = vpop.f32.mrf.mxu0 }
 0x8d6   : > { %v3059_v60 = vpop.f32.mrf.mxu0 }
 0x8d7   : > { %v3065_v2 = vpack.c.bf16 %v3059_v60, %v3057_v55 }
 0x8d9   : > { %5683 = vmatmul.msk.bf16.gmra.mxu1 %vm1112_vm9, %v3065_v2 }
 0x8dc   : > { %v3104_v32 = vpop.f32.mrf.mxu1 }
 0x8dd   : > { %v7824_v59 = vadd.f32 %v3104_v32, %v2318_v21 }
 0x8de   : > { %v3409_v38 = vpop.f32.mrf.mxu0 }
 0x8df   : > { %v3410_v17 = vadd.f32 %v6355_v35, %v3409_v38 }
 0x8e1   : > { %v3453_v25 = vpack.c.bf16 %v3410_v17, %v3410_v17 }
 0x8e3   : > { %v3777_v45 = vunpack.c.l.b16 %v3453_v25 }
 0x8e4   : > { %v7826_v51 = vpop.f32.mrf.mxu1 }
 0x8e6   : > { %v3411_v1 = vpop.f32.mrf.mxu0 }
 0x8e7   : > { %v3412_v48 = vadd.f32 %v6355_v35, %v3411_v1 }
 0x8e9   : > { %5831 = vmatmul.msk.bf16.vlgmr.msra.gmra.mxu1 %vm1112_vm9, %v3469_v20  ;;  %v3454_v20 = vpack.c.bf16 %v3412_v48, %v3412_v48 }
 0x8eb   : > { %v3778_v19 = vunpack.c.l.b16 %v3454_v20 }
 0x8ec   : > { %v3109_v30 = vpop.f32.mrf.mxu1 }
 0x8ed   : > { %v7831_v28 = vadd.f32 %v3109_v30, %v2323_v50  ;;  %v3781_v47 = vpack.c.b16 %v3778_v19, %v3777_v45  ;;  %v2333_v50 = vadd.f32 %v7633_v23, %v7640_v9 }
 0x8ee   : > { %v3414_v49 = vpop.f32.mrf.mxu0 }
 0x8ef   : > { %v3415_v29 = vadd.f32 %v6355_v35, %v3414_v49 }
 0x8f1   : > { %v3455_v63 = vpack.c.bf16 %v3415_v29, %v3415_v29 }
 0x8f3   : > { %v3779_v46 = vunpack.c.l.b16 %v3455_v63 }
 0x8f4   : > { %v7836_v34 = vpop.f32.mrf.mxu1 }
 0x8f6   : > { %v3416_v44 = vpop.f32.mrf.mxu0 }
 0x8f7   : > { %v3417_v24 = vadd.f32 %v6355_v35, %v3416_v44 }
 0x8f9   : > { %v3456_v13 = vpack.c.bf16 %v3417_v24, %v3417_v24  ;;  %5832 = vmatmul.msk.bf16.gmra.mxu1 %vm1112_vm9, %v3470_v22 }
 0x8fb   : > { %v3780_v57 = vunpack.c.l.b16 %v3456_v13 }
 0x8fc   : > { %v3114_v54 = vpop.f32.mrf.mxu1 }
 0x8fd   : > { %v7841_v12 = vadd.f32 %v3114_v54, %v2328_v26  ;;  %v3782_v31 = vpack.c.b16 %v3780_v57, %v3779_v46 }
 0x8fe   : > { %v3419_v33 = vpop.f32.mrf.mxu0 }
 0x8ff   : > { %3797 = vmatpush.bf16.msrb.mxu3 %v3782_v31  ;;  %v3420_v0 = vadd.f32 %v6355_v35, %v3419_v33 }
 0x901   : > { %v3457_v14 = vpack.c.bf16 %v3420_v0, %v3420_v0 }
 0x903   : > { %3798 = vmatpush.bf16.msrb.mxu3 %v3781_v47  ;;  %v3824_v32 = vunpack.c.l.b16 %v3457_v14 }
 0x904   : > { %v7843_v1 = vpop.f32.mrf.mxu1 }
 0x906   : > { %v3421_v37 = vpop.f32.mrf.mxu0 }
 0x907   : > { %v3422_v22 = vadd.f32 %v6355_v35, %v3421_v37 }
 0x909   : > { %v3458_v56 = vpack.c.bf16 %v3422_v22, %v3422_v22 }
 0x90b   : > { %v3825_v2 = vunpack.c.l.b16 %v3458_v56 }
 0x90d   : > { %v3828_v38 = vpack.c.b16 %v3825_v2, %v3824_v32 }
 0x90e   : > { %v3424_v62 = vpop.f32.mrf.mxu0 }
 0x90f   : > { %v3425_v61 = vadd.f32 %v6355_v35, %v3424_v62 }
 0x911   : > { %v3459_v52 = vpack.c.bf16 %v3425_v61, %v3425_v61 }
 0x913   : > { %v3826_v55 = vunpack.c.l.b16 %v3459_v52 }
 0x916   : > { %v3426_v58 = vpop.f32.mrf.mxu0 }
 0x917   : > { %v3427_v53 = vadd.f32 %v6355_v35, %v3426_v58 }
 0x919   : > { %v3460_v42 = vpack.c.bf16 %v3427_v53, %v3427_v53 }
 0x91b   : > { %v3827_v60 = vunpack.c.l.b16 %v3460_v42 }
 0x91d   : > { %v3829_v21 = vpack.c.b16 %v3827_v60, %v3826_v55 }
 0x91f   : > { %3844 = vmatpush.bf16.msra.mxu0 %v3829_v21 }
 0x923   : > { %3845 = vmatpush.bf16.msra.mxu0 %v3828_v38 }
 0x92a   : > { %v3553_v63 = vpop.f32.mrf.mxu2 }
 0x92b   : > { %v3575_v20 = vsel %vm1112_vm9, %v3553_v63, -inf }
 0x932   : > { %v3555_v23 = vpop.f32.mrf.mxu2 }
 0x933   : > { %v3578_v26 = vsel %vm1112_vm9, %v3555_v23, -inf }
 0x93a   : > { %v3558_v46 = vpop.f32.mrf.mxu2 }
 0x93b   : > { %v3581_v57 = vsel %vm1112_vm9, %v3558_v46, -inf }
 0x942   : > { %v3560_v58 = vpop.f32.mrf.mxu2 }
 0x943   : > { %v3584_v55 = vsel %vm1112_vm9, %v3560_v58, -inf }
 0x956   : > { %v3119_v30 = vpop.f32.mrf.mxu1 }
 0x957   : > { %v7847_v49 = vadd.f32 %v3119_v30, %v2333_v50 }
 0x95e   : > { %v7849_v35 = vpop.f32.mrf.mxu1 }
 0x966   : > { %v3502_v29 = vpop.f32.mrf.mxu1 }
 0x967   : > { %v3563_v48 = vsel %vm1112_vm9, %v3502_v29, -inf }
 0x968   : > { %3564 = vmax.xlane.f32.xlu1 %v3563_v48 }
 0x96e   : > { %v3504_v44 = vpop.f32.mrf.mxu1 }
 0x96f   : > { %v3566_v17 = vsel %vm1112_vm9, %v3504_v44, -inf }
 0x970   : > { %3567 = vmax.xlane.f32.xlu2 %v3566_v17 }
 0x976   : > { %v3507_v24 = vpop.f32.mrf.mxu1 }
 0x977   : > { %v3569_v13 = vsel %vm1112_vm9, %v3507_v24, -inf }
 0x978   : > { %3576 = vmax.xlane.f32.xlu2 %v3575_v20  ;;  %3570 = vmax.xlane.f32.xlu0 %v3569_v13 }
 0x97e   : > { %v3509_v9 = vpop.f32.mrf.mxu1 }
 0x97f   : > { %v3572_v25 = vsel %vm1112_vm9, %v3509_v9, -inf }
 0x980   : > { %3579 = vmax.xlane.f32.xlu0 %v3578_v26  ;;  %3573 = vmax.xlane.f32.xlu1 %v3572_v25 }
 0x988   : > { %3582 = vmax.xlane.f32.xlu0 %v3581_v57 }
 0x9db   : > { %v3565_v54 = vpop.xlane.xlu1 %3564 }
 0x9dc   : > { %v3587_v19 = vsub.f32 %v3502_v29, %v3565_v54 }
 0x9de   : > { %v3595_v31 = vmul.f32 1.442695, %v3587_v19 }
 0x9e0   : > { %6474 = vpow2.f32 %v3595_v31 }
 0x9e3   : > { %v3568_v33 = vpop.xlane.xlu2 %3567 }
 0x9e4   : > { %v3588_v45 = vsub.f32 %v3504_v44, %v3568_v33 }
 0x9e6   : > { %v7858_v47 = vpop.eup %6474  ;;  %v3597_v37 = vmul.f32 1.442695, %v3588_v45 }
 0x9e7   : > { %v3611_v62 = vsel %vm1112_vm9, %v7858_v47, 0.0 }
 0x9e8   : > { %6476 = vpow2.f32 %v3597_v37  ;;  %3612 = vadd.xlane.f32.xlu1 %v3611_v62 }
 0x9eb   : > { %v3577_v61 = vpop.xlane.xlu2 %3576  ;;  %v3571_v22 = vpop.xlane.xlu0 %3570 }
 0x9ec   : > { %v3591_v0 = vsub.f32 %v3553_v63, %v3577_v61  ;;  %v3589_v52 = vsub.f32 %v3507_v24, %v3571_v22 }
 0x9ee   : > { %v7862_v53 = vpop.eup %6476  ;;  %v3603_v56 = vmul.f32 1.442695, %v3591_v0  ;;  %v3599_v42 = vmul.f32 1.442695, %v3589_v52 }
 0x9ef   : > { %v3614_v14 = vsel %vm1112_vm9, %v7862_v53, 0.0 }
 0x9f0   : > { %6478 = vpow2.f32 %v3603_v56  ;;  %3615 = vadd.xlane.f32.xlu2 %v3614_v14  ;;  %3585 = vmax.xlane.f32.xlu1 %v3584_v55 }
 0x9f1   : > { %6480 = vpow2.f32 %v3599_v42 }
 0x9f3   : > { %v3580_v60 = vpop.xlane.xlu0 %3579  ;;  %v3574_v2 = vpop.xlane.xlu1 %3573 }
 0x9f4   : > { %v3592_v21 = vsub.f32 %v3555_v23, %v3580_v60  ;;  %v3590_v32 = vsub.f32 %v3509_v9, %v3574_v2 }
 0x9f6   : > { %v7867_v38 = vpop.eup %6478  ;;  %v3605_v50 = vmul.f32 1.442695, %v3592_v21  ;;  %v3601_v30 = vmul.f32 1.442695, %v3590_v32 }
 0x9f7   : > { %v7869_v29 = vpop.eup %6480  ;;  %v3623_v48 = vsel %vm1112_vm9, %v7867_v38, 0.0 }
 0x9f8   : > { %6482 = vpow2.f32 %v3605_v50  ;;  %v3617_v44 = vsel %vm1112_vm9, %v7869_v29, 0.0  ;;  %3624 = vadd.xlane.f32.xlu1 %v3623_v48 }
 0x9f9   : > { %6484 = vpow2.f32 %v3601_v30  ;;  %3618 = vadd.xlane.f32.xlu2 %v3617_v44 }
 0x9fb   : > { %v3583_v17 = vpop.xlane.xlu0 %3582 }
 0x9fc   : > { %v3593_v63 = vsub.f32 %v3558_v46, %v3583_v17 }
 0x9fe   : > { %v7875_v24 = vpop.eup %6482  ;;  %v3607_v20 = vmul.f32 1.442695, %v3593_v63 }
 0x9ff   : > { %v7877_v13 = vpop.eup %6484  ;;  %v3626_v23 = vsel %vm1112_vm9, %v7875_v24, 0.0 }
 0xa00   : > { %6486 = vpow2.f32 %v3607_v20  ;;  %v3620_v9 = vsel %vm1112_vm9, %v7877_v13, 0.0 }
 0xa01   : > { %3627 = vadd.xlane.f32.xlu2 %v3626_v23  ;;  %3621 = vadd.xlane.f32.xlu0 %v3620_v9 }
 0xa06   : > { %v7883_v26 = vpop.eup %6486 }
 0xa07   : > { %v3629_v25 = vsel %vm1112_vm9, %v7883_v26, 0.0 }
 0xa09   : > { %3630 = vadd.xlane.f32.xlu0 %v3629_v25 }
 0xa5b   : > { %v3613_v46 = vpop.xlane.xlu1 %3612 }
 0xa5c   : > { %6488 = vrcp.f32 %v3613_v46  ;;  %v3646_v61 = vand.u32 2147483648, %v3613_v46  ;;  %vm3640_vm1 = vweird.f32 %v3613_v46  ;;  %v3644_v0 = vand.u32 2147483647, %v3613_v46 }
 0xa5e   : > { %v3647_v55 = vor.u32 1.1754944e-38, %v3646_v61  ;;  %vm3645_vm3 = vcmp.eq.f32.partialorder %v3644_v0, 8.507059e+37 }
 0xa62   : > { %v6489_v57 = vpop.eup %6488 }
 0xa63   : > { %v3636_v54 = vmul.f32 %v6489_v57, %v3613_v46  ;;  %v3616_v19 = vpop.xlane.xlu2 %3615  ;;  %v3586_v31 = vpop.xlane.xlu1 %3585  ;;  %vm3641_vm0 = vweird.f32 %v6489_v57 }
 0xa64   : > { %6490 = vrcp.f32 %v3616_v19  ;;  %v3594_v45 = vsub.f32 %v3560_v58, %v3586_v31  ;;  %vm3642_vm2 = vmor %vm3640_vm1, %vm3641_vm0  ;;  %v3661_v21 = vand.u32 2147483648, %v3616_v19  ;;  %v3659_v30 = vand.u32 2147483647, %v3616_v19 }
 0xa65   : > { %v3637_v33 = vsub.f32 1.0, %v3636_v54  ;;  %vm3655_vm5 = vweird.f32 %v3616_v19 }
 0xa66   : > { %v3609_v62 = vmul.f32 1.442695, %v3594_v45  ;;  %v3662_v20 = vor.u32 1.1754944e-38, %v3661_v21  ;;  %vm3660_vm7 = vcmp.eq.f32.partialorder %v3659_v30, 8.507059e+37 }
 0xa67   : > { %v3638_v37 = vmul.f32 %v6489_v57, %v3637_v33 }
 0xa68   : > { %6492 = vpow2.f32 %v3609_v62 }
 0xa69   : > { %v3639_v22 = vadd.f32 %v6489_v57, %v3638_v37 }
 0xa6a   : > { %v6491_v52 = vpop.eup %6490 }
 0xa6b   : > { %v3643_v56 = vsel %vm3642_vm2, %v6489_v57, %v3639_v22  ;;  %v3651_v42 = vmul.f32 %v6491_v52, %v3616_v19  ;;  %v7887_v14 = vpop.xlane.xlu1 %3624  ;;  %vm3656_vm4 = vweird.f32 %v6491_v52 }
 0xa6c   : > { %v3619_v60 = vpop.xlane.xlu2 %3618  ;;  %6494 = vrcp.f32 %v7887_v14  ;;  %v3648_v2 = vsel %vm3645_vm3, %v3647_v55, %v3643_v56  ;;  %vm3657_vm6 = vmor %vm3655_vm5, %vm3656_vm4  ;;  %vm3700_vm8 = vweird.f32 %v7887_v14  ;;  %v3706_v22 = vand.u32 2147483648, %v7887_v14 }
 0xa6d   : > { %v3652_v58 = vsub.f32 1.0, %v3651_v42  ;;  %6496 = vrcp.f32 %v3619_v60  ;;  %v3649_v44 = vmul.f32 %v7858_v47, %v3648_v2  ;;  %v3674_v55 = vand.u32 2147483647, %v3619_v60 }
 0xa6e   : > { %v7890_v32 = vpop.eup %6492  ;;  %vm3670_vm12 = vweird.f32 %v3619_v60 }
 0xa6f   : > { %v3653_v50 = vmul.f32 %v6491_v52, %v3652_v58  ;;  %v3632_v48 = vsel %vm1112_vm9, %v7890_v32, 0.0  ;;  %v3755_v33 = vpack.c.bf16 %v3649_v44, %v3649_v44  ;;  %v3704_v58 = vand.u32 2147483647, %v7887_v14 }
 0xa70   : > { %3633 = vadd.xlane.f32.xlu1 %v3632_v48  ;;  %vm3675_vm15 = vcmp.eq.f32.partialorder %v3674_v55, 8.507059e+37 }
 0xa71   : > { %v3654_v17 = vadd.f32 %v6491_v52, %v3653_v50  ;;  %v3767_v0 = vunpack.c.l.b16 %v3755_v33  ;;  %vm3705_vm0 = vcmp.eq.f32.partialorder %v3704_v58, 8.507059e+37 }
 0xa72   : > { %v6495_v63 = vpop.eup %6494 }
 0xa73   : > { %v6497_v23 = vpop.eup %6496  ;;  %v3658_v9 = vsel %vm3657_vm6, %v6491_v52, %v3654_v17  ;;  %v3696_v25 = vmul.f32 %v6495_v63, %v7887_v14  ;;  %vm3701_vm10 = vweird.f32 %v6495_v63 }
 0xa74   : > { %v3663_v46 = vsel %vm3660_vm7, %v3662_v20, %v3658_v9  ;;  %v3666_v57 = vmul.f32 %v6497_v23, %v3619_v60  ;;  %v3628_v54 = vpop.xlane.xlu2 %3627  ;;  %v7896_v31 = vpop.xlane.xlu0 %3621  ;;  %vm3671_vm11 = vweird.f32 %v6497_v23  ;;  %vm3702_vm13 = vmor %vm3700_vm8, %vm3701_vm10  ;;  %v3707_v20 = vor.u32 1.1754944e-38, %v3706_v22 }
 0xa75   : > { %v3664_v45 = vmul.f32 %v7862_v53, %v3663_v46  ;;  %v3697_v47 = vsub.f32 1.0, %v3696_v25  ;;  %6498 = vrcp.f32 %v3628_v54  ;;  %v3676_v53 = vand.u32 2147483648, %v3619_v60  ;;  %vm7903_vm14 = vmor %vm3670_vm12, %vm3671_vm11 }
 0xa76   : > { %v3667_v19 = vsub.f32 1.0, %v3666_v57  ;;  %6500 = vrcp.f32 %v7896_v31  ;;  %v3719_v46 = vand.u32 2147483647, %v3628_v54  ;;  %v3721_v57 = vand.u32 2147483648, %v3628_v54 }
 0xa77   : > { %v3756_v37 = vpack.c.bf16 %v3664_v45, %v3664_v45  ;;  %v3698_v62 = vmul.f32 %v6495_v63, %v3697_v47  ;;  %v3677_v14 = vor.u32 1.1754944e-38, %v3676_v53  ;;  %vm3715_vm3 = vweird.f32 %v3628_v54 }
 0xa78   : > { %v3668_v61 = vmul.f32 %v6497_v23, %v3667_v19  ;;  %vm3685_vm5 = vweird.f32 %v7896_v31  ;;  %vm3720_vm6 = vcmp.eq.f32.partialorder %v3719_v46, 8.507059e+37 }
 0xa79   : > { %v3768_v52 = vunpack.c.l.b16 %v3756_v37  ;;  %v3699_v56 = vadd.f32 %v6495_v63, %v3698_v62 }
 0xa7a   : > { %v3669_v42 = vadd.f32 %v6497_v23, %v3668_v61  ;;  %v3722_v61 = vor.u32 1.1754944e-38, %v3721_v57 }
 0xa7b   : > { %v6499_v2 = vpop.eup %6498  ;;  %v3771_v21 = vpack.c.b16 %v3768_v52, %v3767_v0  ;;  %v3703_v48 = vsel %vm3702_vm13, %v6495_v63, %v3699_v56  ;;  %v3691_v63 = vand.u32 2147483648, %v7896_v31 }
 0xa7c   : > { %v6501_v50 = vpop.eup %6500  ;;  %v3711_v44 = vmul.f32 %v6499_v2, %v3628_v54  ;;  %v3673_v17 = vsel %vm7903_vm14, %v6497_v23, %v3669_v42  ;;  %v3708_v25 = vsel %vm3705_vm0, %v3707_v20, %v3703_v48  ;;  %vm3716_vm1 = vweird.f32 %v6499_v2 }
 0xa7d   : > { %v3681_v9 = vmul.f32 %v6501_v50, %v7896_v31  ;;  %5835 = vmatmul.msk.bf16.vlgmr.msrb.gmra.mxu3 %vm1112_vm9, %v3771_v21  ;;  %v3678_v45 = vsel %vm3675_vm15, %v3677_v14, %v3673_v17  ;;  %vm3686_vm2 = vweird.f32 %v6501_v50  ;;  %v3689_v23 = vand.u32 2147483647, %v7896_v31  ;;  %vm3717_vm4 = vmor %vm3715_vm3, %vm3716_vm1 }
 0xa7e   : > { %v3712_v60 = vsub.f32 1.0, %v3711_v44  ;;  %v3709_v37 = vmul.f32 %v7867_v38, %v3708_v25  ;;  %v3679_v0 = vmul.f32 %v7869_v29, %v3678_v45  ;;  %vm3687_vm7 = vmor %vm3685_vm5, %vm3686_vm2  ;;  %v3692_v56 = vor.u32 1.1754944e-38, %v3691_v63 }
 0xa7f   : > { %v3682_v33 = vsub.f32 1.0, %v3681_v9  ;;  %vm3690_vm8 = vcmp.eq.f32.partialorder %v3689_v23, 8.507059e+37 }
 0xa80   : > { %v3713_v47 = vmul.f32 %v6499_v2, %v3712_v60  ;;  %v3759_v53 = vpack.c.bf16 %v3709_v37, %v3709_v37  ;;  %v3757_v21 = vpack.c.bf16 %v3679_v0, %v3679_v0 }
 0xa81   : > { %v3683_v19 = vmul.f32 %v6501_v50, %v3682_v33  ;;  %v6217_v33 = vld [vmem:[%s8676_s9 + $0x30] sm:$0xff] }
 0xa82   : > { %v3714_v62 = vadd.f32 %v6499_v2, %v3713_v47  ;;  %v3814_v44 = vunpack.c.l.b16 %v3759_v53  ;;  %v3769_v17 = vunpack.c.l.b16 %v3757_v21 }
 0xa83   : > { %v3684_v22 = vadd.f32 %v6501_v50, %v3683_v19 }
 0xa84   : > { %v3718_v52 = vsel %vm3717_vm4, %v6499_v2, %v3714_v62 }
 0xa85   : > { %v3723_v42 = vsel %vm3720_vm6, %v3722_v61, %v3718_v52  ;;  %v3688_v55 = vsel %vm3687_vm7, %v6501_v50, %v3684_v22  ;;  %v3631_v50 = vpop.xlane.xlu0 %3630 }
 0xa86   : > { %v3724_v58 = vmul.f32 %v7875_v24, %v3723_v42  ;;  %v3693_v38 = vsel %vm3690_vm8, %v3692_v56, %v3688_v55  ;;  %6502 = vrcp.f32 %v3631_v50  ;;  %v3736_v57 = vand.u32 2147483648, %v3631_v50 }
 0xa87   : > { %v3694_v54 = vmul.f32 %v7877_v13, %v3693_v38  ;;  %v6218_v13 = vld [vmem:[%s8676_s9 + $0x38] sm:$0xff]  ;;  %vm3730_vm11 = vweird.f32 %v3631_v50  ;;  %v3734_v45 = vand.u32 2147483647, %v3631_v50 }
 0xa88   : > { %v3760_v30 = vpack.c.bf16 %v3724_v58, %v3724_v58  ;;  %3896 = vmatpush.bf16.msrb.mxu1 %v6218_v13  ;;  %v3737_v23 = vor.u32 1.1754944e-38, %v3736_v57  ;;  %v6356_v13 = vld [vmem:[%s8677_s10] ss:$0 sm:$0xff]  ;;  %v2320_v57 = vadd.f32 %v7610_v15, %v7619_v41 }
 0xa89   : > { %v3758_v48 = vpack.c.bf16 %v3694_v54, %v3694_v54  ;;  %vm3735_vm13 = vcmp.eq.f32.partialorder %v3734_v45, 8.507059e+37 }
 0xa8a   : > { %v3815_v31 = vunpack.c.l.b16 %v3760_v30  ;;  %v3125_v45 = vadd.f32 %v7826_v51, %v2320_v57  ;;  %v6247_v57 = vld [vmem:[%s8680_s13 + $0xe4] sm:$0xf] }
 0xa8b   : > { %v3770_v29 = vunpack.c.l.b16 %v3758_v48 }
 0xa8c   : > { %v3818_v2 = vpack.c.b16 %v3815_v31, %v3814_v44  ;;  %v6503_v9 = vpop.eup %6502  ;;  %3897 = vmatpush.bf16.msrb.mxu1 %v6217_v33 }
 0xa8d   : > { %v3772_v20 = vpack.c.b16 %v3770_v29, %v3769_v17  ;;  %v3726_v24 = vmul.f32 %v6503_v9, %v3631_v50  ;;  %vm3731_vm10 = vweird.f32 %v6503_v9 }
 0xa8e   : > { %5837 = vmatmul.msk.bf16.vlgmr.msra.gmra.mxu0 %vm1112_vm9, %v3818_v2  ;;  %vm3732_vm12 = vmor %vm3730_vm11, %vm3731_vm10 }
 0xa8f   : > { %5836 = vmatmul.msk.bf16.gmra.mxu3 %vm1112_vm9, %v3772_v20  ;;  %v3727_v14 = vsub.f32 1.0, %v3726_v24 }
 0xa91   : > { %v3728_v60 = vmul.f32 %v6503_v9, %v3727_v14 }
 0xa93   : > { %v3729_v46 = vadd.f32 %v6503_v9, %v3728_v60 }
 0xa95   : > { %v3733_v63 = vsel %vm3732_vm12, %v6503_v9, %v3729_v46 }
 0xa96   : > { %v3738_v62 = vsel %vm3735_vm13, %v3737_v23, %v3733_v63 }
 0xa97   : > { %v3739_v56 = vmul.f32 %v7883_v26, %v3738_v62 }
 0xa99   : > { %v3761_v38 = vpack.c.bf16 %v3739_v56, %v3739_v56 }
 0xa9b   : > { %v3816_v21 = vunpack.c.l.b16 %v3761_v38 }
 0xae3   : > { %v3634_v25 = vpop.xlane.xlu1 %3633 }
 0xae4   : > { %6504 = vrcp.f32 %v3634_v25  ;;  %v3751_v61 = vand.u32 2147483648, %v3634_v25  ;;  %v3749_v0 = vand.u32 2147483647, %v3634_v25  ;;  %vm3745_vm15 = vweird.f32 %v3634_v25 }
 0xae6   : > { %v3752_v42 = vor.u32 1.1754944e-38, %v3751_v61  ;;  %vm3750_vm1 = vcmp.eq.f32.partialorder %v3749_v0, 8.507059e+37 }
 0xaea   : > { %v6505_v47 = vpop.eup %6504 }
 0xaeb   : > { %v3741_v19 = vmul.f32 %v6505_v47, %v3634_v25  ;;  %vm3746_vm14 = vweird.f32 %v6505_v47 }
 0xaec   : > { %vm3747_vm0 = vmor %vm3745_vm15, %vm3746_vm14 }
 0xaed   : > { %v3742_v37 = vsub.f32 1.0, %v3741_v19 }
 0xaef   : > { %v3743_v22 = vmul.f32 %v6505_v47, %v3742_v37 }
 0xaf1   : > { %v3744_v52 = vadd.f32 %v6505_v47, %v3743_v22 }
 0xaf3   : > { %v3748_v55 = vsel %vm3747_vm0, %v6505_v47, %v3744_v52 }
 0xaf4   : > { %v3753_v53 = vsel %vm3750_vm1, %v3752_v42, %v3748_v55 }
 0xaf5   : > { %v3754_v58 = vmul.f32 %v7890_v32, %v3753_v53 }
 0xaf7   : > { %v3762_v54 = vpack.c.bf16 %v3754_v58, %v3754_v58  ;;  %v2335_v58 = vadd.f32 %v7638_v36, %v7644_v27 }
 0xaf9   : > { %v3817_v30 = vunpack.c.l.b16 %v3762_v54  ;;  %v3131_v38 = vadd.f32 %v7849_v35, %v2335_v58  ;;  %v5945_v58 = vld [vmem:[%s8680_s13 + $0xa8] sm:$0xf] }
 0xafb   : > { %v3819_v48 = vpack.c.b16 %v3817_v30, %v3816_v21 }
 0xafd   : > { %5838 = vmatmul.msk.bf16.gmra.mxu0 %vm1112_vm9, %v3819_v48 }
 0xb00   : > { %v3800_v44 = vpop.f32.mrf.mxu3 }
 0xb08   : > { %v3802_v31 = vpop.f32.mrf.mxu3 }
 0xb09   : > { %v3857_v17 = vpack.c.bf16 %v3802_v31, %v3800_v44 }
 0xb0b   : > { %5851 = vmatmul.msk.bf16.vlgmr.msrb.gmra.mxu1 %vm1112_vm9, %v3857_v17  ;;  %v3847_v20 = vpop.f32.mrf.mxu0 }
 0xb12   : > { %v3805_v26 = vpop.f32.mrf.mxu3 }
 0xb13   : > { %v3849_v50 = vpop.f32.mrf.mxu0 }
 0xb14   : > { %v3859_v32 = vpack.c.bf16 %v3849_v50, %v3847_v20 }
 0xb1a   : > { %v3807_v29 = vpop.f32.mrf.mxu3 }
 0xb1b   : > { %v3858_v2 = vpack.c.bf16 %v3807_v29, %v3805_v26 }
 0xb1d   : > { %5852 = vmatmul.msk.bf16.gmra.mxu1 %vm1112_vm9, %v3858_v2 }
 0xb2d   : > { %5853 = vmatmul.msk.bf16.gmra.mxu1 %vm1112_vm9, %v3859_v32 }
 0xb7a   : > { %v3852_v9 = vpop.f32.mrf.mxu0 }
 0xb82   : > { %v3854_v24 = vpop.f32.mrf.mxu0 }
 0xb83   : > { %v3860_v14 = vpack.c.bf16 %v3854_v24, %v3852_v9 }
 0xb85   : > { %5854 = vmatmul.msk.bf16.gmra.mxu1 %vm1112_vm9, %v3860_v14 }
 0xb88   : > { %v3899_v60 = vpop.f32.mrf.mxu1 }
 0xb89   : > { %v3919_v25 = vadd.f32 %v3899_v60, %v7824_v59 }
 0xb8b   : > { %v3931_v46 = vadd.f32 %v6356_v13, %v3919_v25  ;;  %v5969_v25 = vld [vmem:[%s8680_s13 + $0xe0] sm:$0xf] }
 0xb8d   : > { %v7940_v33 = vadd.f32 %v6705_v5, %v3931_v46  ;;  %v2325_v5 = vadd.f32 %v7617_v40, %v7626_v39  ;;  %v6249_v46 = vld [vmem:[%s8680_s13 + $0xec] sm:$0xf0] }
 0xb8f   : > { %3949 = vadd.xlane.f32.xlu2 %v7940_v33  ;;  %v3127_v41 = vadd.f32 %v7836_v34, %v2325_v5  ;;  %v5979_v5 = vld [vmem:[%s8680_s13 + $0xf8] sm:$0xf0] }
 0xb90   : > { %v3901_v47 = vpop.f32.mrf.mxu1 }
 0xb91   : > { %v3920_v63 = vadd.f32 %v3901_v47, %v3125_v45  ;;  %v5970_v45 = vor.u32 %v6249_v46, %v5969_v25  ;;  %v5971_v47 = vld [vmem:[%s8680_s13 + $0xf0] sm:$0xf0]  ;;  %v6233_v25 = vld [vmem:[%s8680_s13 + $0x6c] sm:$0xf0]  ;;  %v6231_v46 = vld [vmem:[%s8680_s13 + $0x64] sm:$0xf] }
 0xb93   : > { %v3932_v19 = vadd.f32 %v6356_v13, %v3920_v63  ;;  %v5977_v63 = vld [vmem:[%s8680_s13 + $0xe8] sm:$0xf]  ;;  %4337 = vmatpush.bf16.msra.mxu2 %v5970_v45  ;;  %v5907_v45 = vld [vmem:[%s8680_s13 + $0x70] sm:$0xf0] }
 0xb95   : > { %v7945_v23 = vadd.f32 %v6714_v8, %v3932_v19  ;;  %v6250_v19 = vld [vmem:[%s8680_s13 + $0xf4] sm:$0xf0] }
 0xb97   : > { %3951 = vadd.xlane.f32.xlu0 %v7945_v23 }
 0xb9a   : > { %v3904_v59 = vpop.f32.mrf.mxu1 }
 0xb9b   : > { %v3921_v37 = vadd.f32 %v3904_v59, %v7831_v28  ;;  %v5974_v59 = vor.u32 %v6247_v57, %v5971_v47  ;;  %v5913_v47 = vld [vmem:[%s8680_s13 + $0x68] sm:$0xf] }
 0xb9d   : > { %v3933_v62 = vadd.f32 %v6356_v13, %v3921_v37  ;;  %v5978_v37 = vor.u32 %v6250_v19, %v5977_v63  ;;  %4366 = vmatpush.bf16.msra.mxu3 %v5974_v59  ;;  %v6234_v63 = vld [vmem:[%s8680_s13 + $0x74] sm:$0xf0]  ;;  %v5910_v19 = vor.u32 %v6231_v46, %v5907_v45  ;;  %v5867_v45 = vld [vmem:[%s8680_s13 + $0x18] sm:$0xf0] }
 0xb9e   : > { %v5914_v59 = vor.u32 %v6234_v63, %v5913_v47 }
 0xb9f   : > { %v7952_v15 = vadd.f32 %v6703_v4, %v3933_v62  ;;  %v2330_v4 = vadd.f32 %v7628_v16, %v7635_v43  ;;  %v6248_v62 = vld [vmem:[%s8680_s13 + $0xec] sm:$0xf]  ;;  %4395 = vmatpush.bf16.msrb.mxu0 %v5978_v37 }
 0xba0   : > { %v6232_v37 = vld [vmem:[%s8680_s13 + $0x6c] sm:$0xf] }
 0xba1   : > { %3953 = vadd.xlane.f32.xlu1 %v7952_v15  ;;  %v3129_v39 = vadd.f32 %v7843_v1, %v2330_v4  ;;  %v6246_v4 = vld [vmem:[%s8680_s13 + $0xd4] sm:$0xf0] }
 0xba2   : > { %v3906_v51 = vpop.f32.mrf.mxu1 }
 0xba3   : > { %v3922_v61 = vadd.f32 %v3906_v51, %v3127_v41  ;;  %v5982_v41 = vor.u32 %v6248_v62, %v5979_v5  ;;  %v5953_v51 = vld [vmem:[%s8680_s13 + $0xc0] sm:$0xf]  ;;  %v5915_v62 = vld [vmem:[%s8680_s13 + $0x78] sm:$0xf0] }
 0xba4   : > { %v5918_v5 = vor.u32 %v6232_v37, %v5915_v62 }
 0xba5   : > { %v3934_v8 = vadd.f32 %v6356_v13, %v3922_v61  ;;  %v6245_v61 = vld [vmem:[%s8680_s13 + $0xcc] sm:$0xf0]  ;;  %4424 = vmatpush.bf16.msra.mxu1 %v5982_v41  ;;  %v5889_v41 = vld [vmem:[%s8680_s13 + $0x40] sm:$0xf] }
 0xba7   : > { %v7957_v22 = vadd.f32 %v6712_v7, %v3934_v8  ;;  %v6243_v8 = vld [vmem:[%s8680_s13 + $0xc4] sm:$0xf] }
 0xba9   : > { %3955 = vadd.xlane.f32.xlu2 %v7957_v22 }
 0xbaa   : > { %v3909_v28 = vpop.f32.mrf.mxu1 }
 0xbab   : > { %v3923_v0 = vadd.f32 %v3909_v28, %v7841_v12  ;;  %v5954_v28 = vor.u32 %v6245_v61, %v5953_v51  ;;  %v6229_v51 = vld [vmem:[%s8680_s13 + $0x4c] sm:$0xf0]  ;;  %v6227_v61 = vld [vmem:[%s8680_s13 + $0x44] sm:$0xf] }
 0xbad   : > { %v3935_v52 = vadd.f32 %v6356_v13, %v3923_v0  ;;  %v5955_v0 = vld [vmem:[%s8680_s13 + $0xd0] sm:$0xf0]  ;;  %4338 = vmatpush.bf16.msra.mxu2 %v5954_v28 }
 0xbae   : > { %v5891_v28 = vld [vmem:[%s8680_s13 + $0x50] sm:$0xf0] }
 0xbaf   : > { %v7964_v40 = vadd.f32 %v6701_v3, %v3935_v52  ;;  %v5961_v52 = vld [vmem:[%s8680_s13 + $0xc8] sm:$0xf] }
 0xbb1   : > { %3957 = vadd.xlane.f32.xlu0 %v7964_v40 }
 0xbb2   : > { %v3911_v34 = vpop.f32.mrf.mxu1 }
 0xbb3   : > { %v3924_v56 = vadd.f32 %v3911_v34, %v3129_v39  ;;  %v5958_v39 = vor.u32 %v6243_v8, %v5955_v0  ;;  %v5962_v34 = vor.u32 %v6246_v4, %v5961_v52  ;;  %v5890_v8 = vor.u32 %v6229_v51, %v5889_v41  ;;  %v5897_v0 = vld [vmem:[%s8680_s13 + $0x48] sm:$0xf]  ;;  %v6230_v52 = vld [vmem:[%s8680_s13 + $0x54] sm:$0xf0] }
 0xbb4   : > { %v5894_v4 = vor.u32 %v6227_v61, %v5891_v28 }
 0xbb5   : > { %v3936_v7 = vadd.f32 %v6356_v13, %v3924_v56  ;;  %v6244_v56 = vld [vmem:[%s8680_s13 + $0xcc] sm:$0xf]  ;;  %4367 = vmatpush.bf16.msra.mxu3 %v5958_v39  ;;  %4396 = vmatpush.bf16.msrb.mxu0 %v5962_v34  ;;  %v5898_v39 = vor.u32 %v6230_v52, %v5897_v0 }
 0xbb6   : > { %v6228_v34 = vld [vmem:[%s8680_s13 + $0x4c] sm:$0xf] }
 0xbb7   : > { %v7969_v42 = vadd.f32 %v6710_v6, %v3936_v7  ;;  %v5963_v7 = vld [vmem:[%s8680_s13 + $0xd8] sm:$0xf0] }
 0xbb9   : > { %3959 = vadd.xlane.f32.xlu1 %v7969_v42 }
 0xc02   : > { %v3950_v12 = vpop.xlane.xlu2 %3949  ;;  %v3914_v53 = vpop.f32.mrf.mxu1 }
 0xc03   : > { %v3965_v55 = vmul.f32 %v3950_v12, %v6725_v18  ;;  %v3925_v16 = vadd.f32 %v3914_v53, %v7847_v49  ;;  %v5966_v12 = vor.u32 %v6244_v56, %v5963_v7  ;;  %v6241_v53 = vld [vmem:[%s8680_s13 + $0xac] sm:$0xf0]  ;;  %v5899_v56 = vld [vmem:[%s8680_s13 + $0x58] sm:$0xf0] }
 0xc05   : > { %v7975_v3 = vsub.f32 %v7940_v33, %v3965_v55  ;;  %v3937_v43 = vadd.f32 %v6356_v13, %v3925_v16  ;;  %v5937_v55 = vld [vmem:[%s8680_s13 + $0xa0] sm:$0xf]  ;;  %v6239_v16 = vld [vmem:[%s8680_s13 + $0xa4] sm:$0xf]  ;;  %4425 = vmatpush.bf16.msra.mxu1 %v5966_v12  ;;  %v5902_v12 = vor.u32 %v6228_v34, %v5899_v56 }
 0xc07   : > { %v3981_v1 = vmul.f32 %v7975_v3, %v7975_v3  ;;  %v7982_v6 = vadd.f32 %v6721_v11, %v3937_v43  ;;  %v5938_v43 = vor.u32 %v6241_v53, %v5937_v55 }
 0xc09   : > { %3989 = vadd.xlane.f32.xlu2 %v3981_v1  ;;  %3961 = vadd.xlane.f32.xlu1 %v7982_v6  ;;  %v5939_v1 = vld [vmem:[%s8680_s13 + $0xb0] sm:$0xf0] }
 0xc0a   : > { %v3952_v54 = vpop.xlane.xlu0 %3951  ;;  %v3916_v21 = vpop.f32.mrf.mxu1  ;;  %4339 = vmatpush.bf16.msra.mxu2 %v5938_v43  ;;  %v6225_v43 = vld [vmem:[%s8680_s13 + $0x2c] sm:$0xf0] }
 0xc0b   : > { %v3966_v49 = vmul.f32 %v3952_v54, %v6725_v18  ;;  %v3926_v30 = vadd.f32 %v3916_v21, %v3131_v38  ;;  %v6242_v38 = vld [vmem:[%s8680_s13 + $0xb4] sm:$0xf0]  ;;  %v5942_v54 = vor.u32 %v6239_v16, %v5939_v1  ;;  %v6240_v21 = vld [vmem:[%s8680_s13 + $0xac] sm:$0xf]  ;;  %v5873_v16 = vld [vmem:[%s8680_s13 + $0x20] sm:$0xf] }
 0xc0c   : > { %v6223_v1 = vld [vmem:[%s8680_s13 + $0x24] sm:$0xf] }
 0xc0d   : > { %v7988_v48 = vsub.f32 %v7945_v23, %v3966_v49  ;;  %v3938_v44 = vadd.f32 %v6356_v13, %v3926_v30  ;;  %v5946_v49 = vor.u32 %v6242_v38, %v5945_v58  ;;  %v5947_v30 = vld [vmem:[%s8680_s13 + $0xb8] sm:$0xf0]  ;;  %4368 = vmatpush.bf16.msra.mxu3 %v5942_v54  ;;  %v5874_v38 = vor.u32 %v6225_v43, %v5873_v16  ;;  %v5875_v54 = vld [vmem:[%s8680_s13 + $0x30] sm:$0xf0] }
 0xc0f   : > { %v3982_v36 = vmul.f32 %v7988_v48, %v7988_v48  ;;  %v7993_v11 = vadd.f32 %v6719_v10, %v3938_v44  ;;  %v5950_v44 = vor.u32 %v6240_v21, %v5947_v30  ;;  %4397 = vmatpush.bf16.msrb.mxu0 %v5946_v49  ;;  %v5881_v49 = vld [vmem:[%s8680_s13 + $0x28] sm:$0xf]  ;;  %v6226_v21 = vld [vmem:[%s8680_s13 + $0x34] sm:$0xf0] }
 0xc11   : > { %3991 = vadd.xlane.f32.xlu0 %v3982_v36  ;;  %3963 = vadd.xlane.f32.xlu2 %v7993_v11  ;;  %v5921_v36 = vld [vmem:[%s8680_s13 + $0x80] sm:$0xf] }
 0xc12   : > { %4426 = vmatpush.bf16.msra.mxu1 %v5950_v44  ;;  %v5878_v44 = vor.u32 %v6223_v1, %v5875_v54  ;;  %v8230_v1 = vld [vmem:[%s8678_s11] ss:$0 sm:$0xff] }
 0xc14   : > { %v3954_v27 = vpop.xlane.xlu1 %3953 }
 0xc15   : > { %v3967_v35 = vmul.f32 %v3954_v27, %v6725_v18  ;;  %v6237_v27 = vld [vmem:[%s8680_s13 + $0x8c] sm:$0xf0] }
 0xc17   : > { %v7998_v31 = vsub.f32 %v7952_v15, %v3967_v35  ;;  %v6235_v35 = vld [vmem:[%s8680_s13 + $0x84] sm:$0xf] }
 0xc19   : > { %v3983_v17 = vmul.f32 %v7998_v31, %v7998_v31 }
 0xc1b   : > { %3993 = vadd.xlane.f32.xlu0 %v3983_v17  ;;  %v5922_v17 = vor.u32 %v6237_v27, %v5921_v36  ;;  %v5882_v36 = vor.u32 %v6226_v21, %v5881_v49  ;;  %v6224_v27 = vld [vmem:[%s8680_s13 + $0x2c] sm:$0xf] }
 0xc1c   : > { %v3956_v26 = vpop.xlane.xlu2 %3955 }
 0xc1d   : > { %v3968_v29 = vmul.f32 %v3956_v26, %v6725_v18  ;;  %v5923_v26 = vld [vmem:[%s8680_s13 + $0x90] sm:$0xf0]  ;;  %4340 = vmatpush.bf16.msra.mxu2 %v5922_v17 }
 0xc1f   : > { %v8004_v2 = vsub.f32 %v7957_v22, %v3968_v29  ;;  %v5929_v29 = vld [vmem:[%s8680_s13 + $0x88] sm:$0xf] }
 0xc21   : > { %v3984_v10 = vmul.f32 %v8004_v2, %v8004_v2 }
 0xc23   : > { %3995 = vadd.xlane.f32.xlu1 %v3984_v10  ;;  %v6238_v10 = vld [vmem:[%s8680_s13 + $0x94] sm:$0xf0] }
 0xc24   : > { %v3958_v20 = vpop.xlane.xlu0 %3957 }
 0xc25   : > { %v3969_v50 = vmul.f32 %v3958_v20, %v6725_v18  ;;  %v5926_v20 = vor.u32 %v6235_v35, %v5923_v26  ;;  %v5883_v35 = vld [vmem:[%s8680_s13 + $0x38] sm:$0xf0] }
 0xc26   : > { %v5886_v26 = vor.u32 %v6224_v27, %v5883_v35 }
 0xc27   : > { %v8010_v32 = vsub.f32 %v7964_v40, %v3969_v50  ;;  %v5930_v50 = vor.u32 %v6238_v10, %v5929_v29  ;;  %4369 = vmatpush.bf16.msra.mxu3 %v5926_v20  ;;  %v5857_v29 = vld [vmem:[%s8680_s13] sm:$0xf]  ;;  %v6221_v10 = vld [vmem:[%s8680_s13 + $0xc] sm:$0xf0]  ;;  %v6219_v20 = vld [vmem:[%s8680_s13 + $0x4] sm:$0xf] }
 0xc29   : > { %v3985_v9 = vmul.f32 %v8010_v32, %v8010_v32  ;;  %4398 = vmatpush.bf16.msrb.mxu0 %v5930_v50 }
 0xc2b   : > { %3997 = vadd.xlane.f32.xlu2 %v3985_v9  ;;  %v6236_v9 = vld [vmem:[%s8680_s13 + $0x8c] sm:$0xf]  ;;  %4370 = vmatpush.bf16.msra.mxu3 %v5910_v19 }
 0xc2c   : > { %v3960_v24 = vpop.xlane.xlu1 %3959 }
 0xc2d   : > { %v3970_v14 = vmul.f32 %v3960_v24, %v6725_v18  ;;  %v5931_v24 = vld [vmem:[%s8680_s13 + $0x98] sm:$0xf0]  ;;  %4399 = vmatpush.bf16.msrb.mxu0 %v5914_v59 }
 0xc2f   : > { %v8016_v13 = vsub.f32 %v7969_v42, %v3970_v14  ;;  %v5934_v14 = vor.u32 %v6236_v9, %v5931_v24  ;;  %4371 = vmatpush.bf16.msra.mxu3 %v5894_v4  ;;  %v5858_v9 = vor.u32 %v6221_v10, %v5857_v29  ;;  %v5859_v24 = vld [vmem:[%s8680_s13 + $0x10] sm:$0xf0] }
 0xc31   : > { %v3986_v60 = vmul.f32 %v8016_v13, %v8016_v13  ;;  %4427 = vmatpush.bf16.msra.mxu1 %v5934_v14  ;;  %4400 = vmatpush.bf16.msrb.mxu0 %v5898_v39  ;;  %v5865_v14 = vld [vmem:[%s8680_s13 + $0x8] sm:$0xf] }
 0xc33   : > { %3999 = vadd.xlane.f32.xlu0 %v3986_v60  ;;  %v5905_v60 = vld [vmem:[%s8680_s13 + $0x60] sm:$0xf]  ;;  %4372 = vmatpush.bf16.msra.mxu3 %v5878_v44 }
 0xc34   : > { %v5906_v57 = vor.u32 %v6233_v25, %v5905_v60  ;;  %v6222_v60 = vld [vmem:[%s8680_s13 + $0x14] sm:$0xf0]  ;;  %v5862_v25 = vor.u32 %v6219_v20, %v5859_v24 }
 0xc35   : > { %4428 = vmatpush.bf16.msra.mxu1 %v5918_v5  ;;  %4401 = vmatpush.bf16.msrb.mxu0 %v5882_v36  ;;  %v5866_v46 = vor.u32 %v6222_v60, %v5865_v14  ;;  %v8237_v36 = vld [vmem:[%s8679_s12] ss:$0 sm:$0xff] }
 0xc36   : > { %4341 = vmatpush.bf16.msra.mxu2 %v5906_v57  ;;  %v6220_v57 = vld [vmem:[%s8680_s13 + $0xc] sm:$0xf] }
 0xc37   : > { %v5870_v63 = vor.u32 %v6220_v57, %v5867_v45  ;;  %4373 = vmatpush.bf16.msra.mxu3 %v5862_v25 }
 0xc39   : > { %4429 = vmatpush.bf16.msra.mxu1 %v5902_v12  ;;  %4402 = vmatpush.bf16.msrb.mxu0 %v5866_v46 }
 0xc3a   : > { %4342 = vmatpush.bf16.msra.mxu2 %v5890_v8 }
 0xc3d   : > { %4430 = vmatpush.bf16.msra.mxu1 %v5886_v26 }
 0xc3e   : > { %4343 = vmatpush.bf16.msra.mxu2 %v5874_v38 }
 0xc41   : > { %4431 = vmatpush.bf16.msra.mxu1 %v5870_v63 }
 0xc42   : > { %4344 = vmatpush.bf16.msra.mxu2 %v5858_v9 }
 0xc7c   : > { %v3990_v7 = vpop.xlane.xlu2 %3989  ;;  %v3962_v53 = vpop.xlane.xlu1 %3961 }
 0xc7d   : > { %v4005_v55 = vmul.f32 %v3990_v7, %v6725_v18  ;;  %v3971_v58 = vmul.f32 %v3962_v53, %v6725_v18 }
 0xc7f   : > { %v4013_v30 = vadd.f32 1e-05, %v4005_v55  ;;  %v8191_v17 = vsub.f32 %v7982_v6, %v3971_v58 }
 0xc81   : > { %6506 = vrsqrt.f32 %v4013_v30  ;;  %v3987_v50 = vmul.f32 %v8191_v17, %v8191_v17  ;;  %vm4027_vm2 = vweird.f32 %v4013_v30 }
 0xc83   : > { %4001 = vadd.xlane.f32.xlu1 %v3987_v50 }
 0xc84   : > { %v3992_v47 = vpop.xlane.xlu0 %3991  ;;  %v3964_v59 = vpop.xlane.xlu2 %3963 }
 0xc85   : > { %v4006_v19 = vmul.f32 %v3992_v47, %v6725_v18  ;;  %v3972_v37 = vmul.f32 %v3964_v59, %v6725_v18 }
 0xc87   : > { %v6507_v62 = vpop.eup %6506  ;;  %v4014_v5 = vadd.f32 1e-05, %v4006_v19  ;;  %v8222_v51 = vsub.f32 %v7993_v11, %v3972_v37 }
 0xc88   : > { %v4022_v41 = vmul.f32 %v6507_v62, %v4013_v30  ;;  %vm4028_vm9 = vweird.f32 %v6507_v62 }
 0xc89   : > { %6508 = vrsqrt.f32 %v4014_v5  ;;  %v3988_v8 = vmul.f32 %v8222_v51, %v8222_v51  ;;  %vm4029_vm3 = vmor %vm4027_vm2, %vm4028_vm9  ;;  %vm4037_vm5 = vweird.f32 %v4014_v5 }
 0xc8a   : > { %v4023_v61 = vmul.f32 %v6507_v62, %v4022_v41 }
 0xc8b   : > { %4003 = vadd.xlane.f32.xlu2 %v3988_v8 }
 0xc8c   : > { %v4024_v28 = vmul.f32 0.5, %v4023_v61 }
 0xc8e   : > { %v4025_v0 = vsub.f32 1.5, %v4024_v28  ;;  %v3994_v52 = vpop.xlane.xlu0 %3993 }
 0xc8f   : > { %v6509_v4 = vpop.eup %6508  ;;  %v4007_v39 = vmul.f32 %v3994_v52, %v6725_v18 }
 0xc90   : > { %v4026_v34 = vmul.f32 %v6507_v62, %v4025_v0  ;;  %v4032_v56 = vmul.f32 %v6509_v4, %v4014_v5  ;;  %vm4038_vm4 = vweird.f32 %v6509_v4 }
 0xc91   : > { %v4015_v7 = vadd.f32 1e-05, %v4007_v39  ;;  %vm4039_vm6 = vmor %vm4037_vm5, %vm4038_vm4 }
 0xc92   : > { %v4033_v12 = vmul.f32 %v6509_v4, %v4032_v56  ;;  %v4030_v55 = vsel %vm4029_vm3, %v6507_v62, %v4026_v34 }
 0xc93   : > { %6510 = vrsqrt.f32 %v4015_v7  ;;  %v4101_v58 = vmul.f32 %v4030_v55, %v7975_v3  ;;  %vm4047_vm8 = vweird.f32 %v4015_v7 }
 0xc94   : > { %v4034_v53 = vmul.f32 0.5, %v4033_v12 }
 0xc95   : > { %v4112_v27 = vmul.f32 %v8230_v1, %v4101_v58 }
 0xc96   : > { %v4035_v16 = vsub.f32 1.5, %v4034_v53  ;;  %v3996_v43 = vpop.xlane.xlu1 %3995 }
 0xc97   : > { %v4008_v38 = vmul.f32 %v3996_v43, %v6725_v18  ;;  %v4123_v20 = vadd.f32 %v8237_v36, %v4112_v27 }
 0xc98   : > { %v4036_v54 = vmul.f32 %v6509_v4, %v4035_v16 }
 0xc99   : > { %v6511_v49 = vpop.eup %6510  ;;  %v4016_v21 = vadd.f32 1e-05, %v4008_v38 }
 0xc9a   : > { %v4040_v30 = vsel %vm4039_vm6, %v6509_v4, %v4036_v54  ;;  %v4042_v44 = vmul.f32 %v6511_v49, %v4015_v7  ;;  %vm4048_vm7 = vweird.f32 %v6511_v49 }
 0xc9b   : > { %v4102_v35 = vmul.f32 %v4040_v30, %v7988_v48  ;;  %6512 = vrsqrt.f32 %v4016_v21  ;;  %vm4049_vm10 = vmor %vm4047_vm8, %vm4048_vm7  ;;  %vm4057_vm12 = vweird.f32 %v4016_v21 }
 0xc9c   : > { %v4043_v3 = vmul.f32 %v6511_v49, %v4042_v44 }
 0xc9d   : > { %v4113_v26 = vmul.f32 %v8230_v1, %v4102_v35 }
 0xc9e   : > { %v4044_v29 = vmul.f32 0.5, %v4043_v3  ;;  %v3998_v10 = vpop.xlane.xlu2 %3997 }
 0xc9f   : > { %v4124_v50 = vadd.f32 %v8237_v36, %v4113_v26  ;;  %v4009_v9 = vmul.f32 %v3998_v10, %v6725_v18 }
 0xca0   : > { %v4045_v24 = vsub.f32 1.5, %v4044_v29 }
 0xca1   : > { %v6513_v14 = vpop.eup %6512  ;;  %v4017_v60 = vadd.f32 1e-05, %v4009_v9  ;;  %v4131_v25 = vpack.c.bf16 %v4124_v50, %v4123_v20 }
 0xca2   : > { %v4046_v46 = vmul.f32 %v6511_v49, %v4045_v24  ;;  %v4052_v57 = vmul.f32 %v6513_v14, %v4016_v21  ;;  %vm4058_vm11 = vweird.f32 %v6513_v14 }
 0xca3   : > { %6514 = vrsqrt.f32 %v4017_v60  ;;  %4345 = vmatmul.bf16.vlgmr.msra.gmra.mxu2 %v4131_v25  ;;  %4374 = vmatmul.bf16.vlgmr.msra.gmra.mxu3 %v4131_v25  ;;  %vm4059_vm13 = vmor %vm4057_vm12, %vm4058_vm11  ;;  %vm4067_vm15 = vweird.f32 %v4017_v60 }
 0xca4   : > { %v4053_v48 = vmul.f32 %v6513_v14, %v4052_v57  ;;  %4403 = vmatmul.bf16.vlgmr.msrb.gmra.mxu0 %v4131_v25  ;;  %4432 = vmatmul.bf16.vlgmr.msra.gmra.mxu1 %v4131_v25  ;;  %v4050_v45 = vsel %vm4049_vm10, %v6511_v49, %v4046_v46  ;;  %v6282_v25 = vld [vmem:[%s8682_s15 + $0xf8] sm:$0xff] }
 0xca5   : > { %v4103_v62 = vmul.f32 %v4050_v45, %v7998_v31  ;;  %5104 = vmatpush.bf16.msrb.mxu1 %v6282_v25  ;;  %v6273_v45 = vld [vmem:[%s8682_s15 + $0xb0] sm:$0xff] }
 0xca6   : > { %v4054_v47 = vmul.f32 0.5, %v4053_v48  ;;  %v4000_v63 = vpop.xlane.xlu0 %3999  ;;  %v6261_v25 = vld [vmem:[%s8682_s15 + $0x50] sm:$0xff] }
 0xca7   : > { %v4010_v19 = vmul.f32 %v4000_v63, %v6725_v18  ;;  %v4114_v52 = vmul.f32 %v8230_v1, %v4103_v62 }
 0xca8   : > { %v4055_v59 = vsub.f32 1.5, %v4054_v47  ;;  %v6281_v47 = vld [vmem:[%s8682_s15 + $0xf0] sm:$0xff] }
 0xca9   : > { %v6515_v37 = vpop.eup %6514  ;;  %v4018_v5 = vadd.f32 1e-05, %v4010_v19  ;;  %v4125_v7 = vadd.f32 %v8237_v36, %v4114_v52  ;;  %5105 = vmatpush.bf16.msrb.mxu1 %v6281_v47  ;;  %v6258_v19 = vld [vmem:[%s8682_s15 + $0x38] sm:$0xff]  ;;  %v6275_v47 = vld [vmem:[%s8682_s15 + $0xc0] sm:$0xff] }
 0xcaa   : > { %v4056_v41 = vmul.f32 %v6513_v14, %v4055_v59  ;;  %v4062_v61 = vmul.f32 %v6515_v37, %v4017_v60  ;;  %vm4068_vm14 = vweird.f32 %v6515_v37  ;;  %v6274_v60 = vld [vmem:[%s8682_s15 + $0xb8] sm:$0xff]  ;;  %5017 = vmatpush.bf16.msrb.mxu2 %v6258_v19 }
 0xcab   : > { %6516 = vrsqrt.f32 %v4018_v5  ;;  %vm4069_vm0 = vmor %vm4067_vm15, %vm4068_vm14  ;;  %vm4077_vm9 = vweird.f32 %v4018_v5  ;;  %5075 = vmatpush.bf16.msra.mxu0 %v6274_v60  ;;  %v6266_v59 = vld [vmem:[%s8682_s15 + $0x78] sm:$0xff]  ;;  %v6253_v60 = vld [vmem:[%s8682_s15 + $0x10] sm:$0xff] }
 0xcac   : > { %v4060_v8 = vsel %vm4059_vm13, %v6513_v14, %v4056_v41  ;;  %v4063_v28 = vmul.f32 %v6515_v37, %v4062_v61  ;;  %5046 = vmatpush.bf16.msrb.mxu3 %v6266_v59  ;;  %v6280_v41 = vld [vmem:[%s8682_s15 + $0xe8] sm:$0xff] }
 0xcad   : > { %v4104_v0 = vmul.f32 %v4060_v8, %v8004_v2  ;;  %5106 = vmatpush.bf16.msrb.mxu1 %v6280_v41  ;;  %v6257_v8 = vld [vmem:[%s8682_s15 + $0x30] sm:$0xff] }
 0xcae   : > { %v4064_v4 = vmul.f32 0.5, %v4063_v28  ;;  %v6265_v28 = vld [vmem:[%s8682_s15 + $0x70] sm:$0xff]  ;;  %5018 = vmatpush.bf16.msrb.mxu2 %v6257_v8  ;;  %v6252_v8 = vld [vmem:[%s8682_s15 + $0x8] sm:$0xff] }
 0xcaf   : > { %v4115_v39 = vmul.f32 %v8230_v1, %v4104_v0  ;;  %5076 = vmatpush.bf16.msra.mxu0 %v6273_v45  ;;  %v6267_v45 = vld [vmem:[%s8682_s15 + $0x80] sm:$0xff] }
 0xcb0   : > { %v4065_v34 = vsub.f32 1.5, %v4064_v4  ;;  %5047 = vmatpush.bf16.msrb.mxu3 %v6265_v28  ;;  %v6271_v4 = vld [vmem:[%s8682_s15 + $0xa0] sm:$0xff]  ;;  %v6260_v28 = vld [vmem:[%s8682_s15 + $0x48] sm:$0xff] }
 0xcb1   : > { %v6517_v56 = vpop.eup %6516  ;;  %v4126_v31 = vadd.f32 %v8237_v36, %v4115_v39  ;;  %v6279_v39 = vld [vmem:[%s8682_s15 + $0xe0] sm:$0xff] }
 0xcb2   : > { %v4066_v12 = vmul.f32 %v6515_v37, %v4065_v34  ;;  %v4072_v55 = vmul.f32 %v6517_v56, %v4018_v5  ;;  %vm4078_vm1 = vweird.f32 %v6517_v56  ;;  %v6272_v5 = vld [vmem:[%s8682_s15 + $0xa8] sm:$0xff]  ;;  %5107 = vmatpush.bf16.msrb.mxu1 %v6279_v39 }
 0xcb3   : > { %v4132_v53 = vpack.c.bf16 %v4126_v31, %v4125_v7  ;;  %vm4079_vm2 = vmor %vm4077_vm9, %vm4078_vm1  ;;  %5077 = vmatpush.bf16.msra.mxu0 %v6272_v5  ;;  %v6264_v31 = vld [vmem:[%s8682_s15 + $0x68] sm:$0xff] }
 0xcb4   : > { %v4073_v16 = vmul.f32 %v6517_v56, %v4072_v55  ;;  %v4070_v2 = vsel %vm4069_vm0, %v6515_v37, %v4066_v12  ;;  %5048 = vmatpush.bf16.msrb.mxu3 %v6264_v31  ;;  %v6278_v55 = vld [vmem:[%s8682_s15 + $0xd8] sm:$0xff] }
 0xcb5   : > { %4350 = vmatmul.bf16.gmra.mxu2 %v4132_v53  ;;  %4379 = vmatmul.bf16.gmra.mxu3 %v4132_v53  ;;  %v4105_v38 = vmul.f32 %v4070_v2, %v8010_v32  ;;  %v6263_v2 = vld [vmem:[%s8682_s15 + $0x60] sm:$0xff] }
 0xcb6   : > { %v4074_v43 = vmul.f32 0.5, %v4073_v16  ;;  %4408 = vmatmul.bf16.gmra.mxu0 %v4132_v53  ;;  %4437 = vmatmul.bf16.gmra.mxu1 %v4132_v53 }
 0xcb7   : > { %v4116_v30 = vmul.f32 %v8230_v1, %v4105_v38  ;;  %5078 = vmatpush.bf16.msra.mxu0 %v6271_v4  ;;  %5108 = vmatpush.bf16.msrb.mxu1 %v6278_v55 }
 0xcb8   : > { %v4075_v58 = vsub.f32 1.5, %v4074_v43  ;;  %v4167_v43 = vld [vmem:[%s8681_s14] sm:$0xf]  ;;  %5049 = vmatpush.bf16.msrb.mxu3 %v6263_v2 }
 0xcb9   : > { %v4127_v27 = vadd.f32 %v8237_v36, %v4116_v30  ;;  %v8325_v38 = vperm.slane %v4167_v43, 3 }
 0xcba   : > { %v4076_v54 = vmul.f32 %v6517_v56, %v4075_v58 }
 0xcbc   : > { %v4080_v49 = vsel %vm4079_vm2, %v6517_v56, %v4076_v54  ;;  %v6269_v54 = vld [vmem:[%s8682_s15 + $0x90] sm:$0xff] }
 0xcbd   : > { %v4106_v21 = vmul.f32 %v4080_v49, %v8016_v13  ;;  %v6277_v49 = vld [vmem:[%s8682_s15 + $0xd0] sm:$0xff] }
 0xcbe   : > { %5109 = vmatpush.bf16.msrb.mxu1 %v6277_v49 }
 0xcbf   : > { %v4117_v44 = vmul.f32 %v8230_v1, %v4106_v21 }
 0xcc1   : > { %v4128_v35 = vadd.f32 %v8237_v36, %v4117_v44 }
 0xcc3   : > { %v4133_v3 = vpack.c.bf16 %v4128_v35, %v4127_v27  ;;  %v6254_v35 = vld [vmem:[%s8682_s15 + $0x18] sm:$0xff] }
 0xcc5   : > { %4355 = vmatmul.bf16.gmra.mxu2 %v4133_v3  ;;  %4384 = vmatmul.bf16.gmra.mxu3 %v4133_v3 }
 0xcc6   : > { %4413 = vmatmul.bf16.gmra.mxu0 %v4133_v3  ;;  %4442 = vmatmul.bf16.gmra.mxu1 %v4133_v3  ;;  %v6262_v3 = vld [vmem:[%s8682_s15 + $0x58] sm:$0xff] }
 0xcc7   : > { %5050 = vmatpush.bf16.msrb.mxu3 %v6262_v3 }
 0xccb   : > { %5051 = vmatpush.bf16.msrb.mxu3 %v6261_v25 }
 0xccf   : > { %5052 = vmatpush.bf16.msrb.mxu3 %v6260_v28 }
 0xcf6   : > { %v4002_v32 = vpop.xlane.xlu1 %4001 }
 0xcf7   : > { %v4011_v26 = vmul.f32 %v4002_v32, %v6725_v18  ;;  %v8345_v32 = vperm.slane %v4167_v43, 0 }
 0xcf9   : > { %v4019_v29 = vadd.f32 1e-05, %v4011_v26  ;;  %v8347_v26 = vperm.slane %v4167_v43, 1 }
 0xcfb   : > { %6518 = vrsqrt.f32 %v4019_v29  ;;  %vm4087_vm4 = vweird.f32 %v4019_v29 }
 0xcfe   : > { %v4004_v10 = vpop.xlane.xlu2 %4003 }
 0xcff   : > { %v4012_v13 = vmul.f32 %v4004_v10, %v6725_v18 }
 0xd01   : > { %v6519_v20 = vpop.eup %6518  ;;  %v4020_v50 = vadd.f32 1e-05, %v4012_v13  ;;  %v6268_v13 = vld [vmem:[%s8682_s15 + $0x88] sm:$0xff] }
 0xd02   : > { %v4082_v9 = vmul.f32 %v6519_v20, %v4019_v29  ;;  %vm4088_vm3 = vweird.f32 %v6519_v20 }
 0xd03   : > { %6520 = vrsqrt.f32 %v4020_v50  ;;  %vm4089_vm5 = vmor %vm4087_vm4, %vm4088_vm3  ;;  %vm4097_vm7 = vweird.f32 %v4020_v50 }
 0xd04   : > { %v4083_v24 = vmul.f32 %v6519_v20, %v4082_v9 }
 0xd06   : > { %v4084_v14 = vmul.f32 0.5, %v4083_v24 }
 0xd08   : > { %v4085_v46 = vsub.f32 1.5, %v4084_v14 }
 0xd09   : > { %v6521_v57 = vpop.eup %6520 }
 0xd0a   : > { %v4086_v48 = vmul.f32 %v6519_v20, %v4085_v46  ;;  %v4092_v18 = vmul.f32 %v6521_v57, %v4020_v50  ;;  %vm4098_vm6 = vweird.f32 %v6521_v57 }
 0xd0b   : > { %vm4099_vm8 = vmor %vm4097_vm7, %vm4098_vm6 }
 0xd0c   : > { %v4093_v63 = vmul.f32 %v6521_v57, %v4092_v18  ;;  %v4090_v37 = vsel %vm4089_vm5, %v6519_v20, %v4086_v48  ;;  %v6276_v20 = vld [vmem:[%s8682_s15 + $0xc8] sm:$0xff] }
 0xd0d   : > { %v4107_v0 = vmul.f32 %v4090_v37, %v8191_v17  ;;  %v6256_v17 = vld [vmem:[%s8682_s15 + $0x28] sm:$0xff]  ;;  %5110 = vmatpush.bf16.msrb.mxu1 %v6276_v20 }
 0xd0e   : > { %v4094_v62 = vmul.f32 0.5, %v4093_v63  ;;  %5019 = vmatpush.bf16.msrb.mxu2 %v6256_v17 }
 0xd0f   : > { %v4118_v7 = vmul.f32 %v8230_v1, %v4107_v0 }
 0xd10   : > { %v4095_v61 = vsub.f32 1.5, %v4094_v62 }
 0xd11   : > { %v4129_v53 = vadd.f32 %v8237_v36, %v4118_v7  ;;  %5111 = vmatpush.bf16.msrb.mxu1 %v6275_v47 }
 0xd12   : > { %v4096_v52 = vmul.f32 %v6521_v57, %v4095_v61 }
 0xd14   : > { %v4100_v34 = vsel %vm4099_vm8, %v6521_v57, %v4096_v52 }
 0xd15   : > { %v4108_v56 = vmul.f32 %v4100_v34, %v8222_v51  ;;  %v6270_v51 = vld [vmem:[%s8682_s15 + $0x98] sm:$0xff] }
 0xd16   : > { %5079 = vmatpush.bf16.msra.mxu0 %v6270_v51 }
 0xd17   : > { %v4119_v12 = vmul.f32 %v8230_v1, %v4108_v56  ;;  %v6255_v1 = vld [vmem:[%s8682_s15 + $0x20] sm:$0xff] }
 0xd18   : > { %5020 = vmatpush.bf16.msrb.mxu2 %v6255_v1 }
 0xd19   : > { %v4130_v16 = vadd.f32 %v8237_v36, %v4119_v12  ;;  %v8323_v36 = vperm.slane %v4167_v43, 2 }
 0xd1a   : > { %5080 = vmatpush.bf16.msra.mxu0 %v6269_v54 }
 0xd1b   : > { %v4134_v58 = vpack.c.bf16 %v4130_v16, %v4129_v53  ;;  %v6251_v53 = vld [vmem:[%s8682_s15] sm:$0xff] }
 0xd1c   : > { %5021 = vmatpush.bf16.msrb.mxu2 %v6254_v35  ;;  %v6259_v16 = vld [vmem:[%s8682_s15 + $0x40] sm:$0xff] }
 0xd1d   : > { %4360 = vmatmul.bf16.gmra.mxu2 %v4134_v58  ;;  %4389 = vmatmul.bf16.gmra.mxu3 %v4134_v58 }
 0xd1e   : > { %4418 = vmatmul.bf16.gmra.mxu0 %v4134_v58  ;;  %4447 = vmatmul.bf16.gmra.mxu1 %v4134_v58 }
 0xd1f   : > { %5081 = vmatpush.bf16.msra.mxu0 %v6268_v13  ;;  %5053 = vmatpush.bf16.msrb.mxu3 %v6259_v16 }
 0xd20   : > { %5022 = vmatpush.bf16.msrb.mxu2 %v6253_v60 }
 0xd21   : > { %v4404_v21 = vpop.f32.mrf.mxu0  ;;  %v4433_v30 = vpop.f32.mrf.mxu1 }
 0xd22   : > { %v8334_v44 = vadd.f32 %v4404_v21, %v8323_v36  ;;  %v8337_v27 = vadd.f32 %v4433_v30, %v8325_v38 }
 0xd23   : > { %5082 = vmatpush.bf16.msra.mxu0 %v6267_v45 }
 0xd24   : > { %v4455_v29 = vmul.f32 %v8334_v44, %v8334_v44  ;;  %v4456_v10 = vmul.f32 %v8337_v27, %v8337_v27  ;;  %5023 = vmatpush.bf16.msrb.mxu2 %v6252_v8 }
 0xd26   : > { %v4487_v50 = vmul.f32 %v4455_v29, %v8334_v44  ;;  %v4488_v9 = vmul.f32 %v4456_v10, %v8337_v27  ;;  %v4346_v24 = vpop.f32.mrf.mxu2  ;;  %v4375_v14 = vpop.f32.mrf.mxu3 }
 0xd27   : > { %v8368_v46 = vadd.f32 %v4346_v24, %v8345_v32  ;;  %v8371_v57 = vadd.f32 %v4375_v14, %v8347_v26 }
 0xd28   : > { %v4519_v48 = vmul.f32 0.044715, %v4487_v50  ;;  %v4520_v18 = vmul.f32 0.044715, %v4488_v9  ;;  %5024 = vmatpush.bf16.msrb.mxu2 %v6251_v53 }
 0xd29   : > { %v4453_v63 = vmul.f32 %v8368_v46, %v8368_v46  ;;  %v4454_v19 = vmul.f32 %v8371_v57, %v8371_v57  ;;  %v4406_v59 = vpop.f32.mrf.mxu0  ;;  %v4435_v37 = vpop.f32.mrf.mxu1 }
 0xd2a   : > { %v4551_v62 = vadd.f32 %v4519_v48, %v8334_v44  ;;  %v4552_v5 = vadd.f32 %v4520_v18, %v8337_v27  ;;  %v8386_v41 = vadd.f32 %v4406_v59, %v8323_v36  ;;  %v8389_v61 = vadd.f32 %v4435_v37, %v8325_v38 }
 0xd2b   : > { %v4485_v0 = vmul.f32 %v4453_v63, %v8368_v46  ;;  %v4486_v52 = vmul.f32 %v4454_v19, %v8371_v57 }
 0xd2c   : > { %v4583_v4 = vmul.f32 0.7978846, %v4551_v62  ;;  %v4584_v39 = vmul.f32 0.7978846, %v4552_v5  ;;  %v4459_v34 = vmul.f32 %v8386_v41, %v8386_v41  ;;  %v4460_v56 = vmul.f32 %v8389_v61, %v8389_v61 }
 0xd2d   : > { %v4517_v7 = vmul.f32 0.044715, %v4485_v0  ;;  %v4518_v17 = vmul.f32 0.044715, %v4486_v52 }
 0xd2e   : > { %6522 = vtanh.f32 %v4583_v4  ;;  %v4491_v31 = vmul.f32 %v4459_v34, %v8386_v41  ;;  %v4492_v12 = vmul.f32 %v4460_v56, %v8389_v61  ;;  %v4348_v51 = vpop.f32.mrf.mxu2  ;;  %v4377_v55 = vpop.f32.mrf.mxu3 }
 0xd2f   : > { %6524 = vtanh.f32 %v4584_v39  ;;  %v4549_v1 = vadd.f32 %v4517_v7, %v8368_v46  ;;  %v4550_v2 = vadd.f32 %v4518_v17, %v8371_v57  ;;  %v8414_v43 = vadd.f32 %v4348_v51, %v8345_v32 }
 0xd30   : > { %v4523_v58 = vmul.f32 0.044715, %v4491_v31  ;;  %v4524_v54 = vmul.f32 0.044715, %v4492_v12  ;;  %v8417_v49 = vadd.f32 %v4377_v55, %v8347_v26 }
 0xd31   : > { %v4581_v21 = vmul.f32 0.7978846, %v4549_v1  ;;  %v4582_v30 = vmul.f32 0.7978846, %v4550_v2  ;;  %v4457_v35 = vmul.f32 %v8414_v43, %v8414_v43 }
 0xd32   : > { %v4555_v3 = vadd.f32 %v4523_v58, %v8386_v41  ;;  %v4556_v29 = vadd.f32 %v4524_v54, %v8389_v61  ;;  %v4458_v10 = vmul.f32 %v8417_v49, %v8417_v49 }
 0xd33   : > { %6526 = vtanh.f32 %v4581_v21  ;;  %v4489_v13 = vmul.f32 %v4457_v35, %v8414_v43  ;;  %v4409_v20 = vpop.f32.mrf.mxu0  ;;  %v4438_v50 = vpop.f32.mrf.mxu1 }
 0xd34   : > { %v6523_v9 = vpop.eup %6522  ;;  %6528 = vtanh.f32 %v4582_v30  ;;  %v4587_v24 = vmul.f32 0.7978846, %v4555_v3  ;;  %v4588_v14 = vmul.f32 0.7978846, %v4556_v29  ;;  %v4490_v60 = vmul.f32 %v4458_v10, %v8417_v49 }
 0xd35   : > { %v6525_v25 = vpop.eup %6524  ;;  %v4647_v48 = vadd.f32 1.0, %v6523_v9  ;;  %v4521_v18 = vmul.f32 0.044715, %v4489_v13  ;;  %v8428_v45 = vadd.f32 %v4409_v20, %v8323_v36  ;;  %v8431_v47 = vadd.f32 %v4438_v50, %v8325_v38 }
 0xd36   : > { %v4648_v63 = vadd.f32 1.0, %v6525_v25  ;;  %6530 = vtanh.f32 %v4587_v24  ;;  %v4522_v19 = vmul.f32 0.044715, %v4490_v60 }
 0xd37   : > { %v4679_v59 = vmul.f32 0.5, %v4647_v48  ;;  %6532 = vtanh.f32 %v4588_v14  ;;  %v4553_v37 = vadd.f32 %v4521_v18, %v8414_v43  ;;  %v4463_v62 = vmul.f32 %v8428_v45, %v8428_v45 }
 0xd38   : > { %v4680_v5 = vmul.f32 0.5, %v4648_v63  ;;  %v4554_v8 = vadd.f32 %v4522_v19, %v8417_v49  ;;  %v4464_v28 = vmul.f32 %v8431_v47, %v8431_v47  ;;  %v4351_v0 = vpop.f32.mrf.mxu2  ;;  %v4380_v52 = vpop.f32.mrf.mxu3 }
 0xd39   : > { %v6527_v4 = vpop.eup %6526  ;;  %v8440_v39 = vmul.f32 %v4679_v59, %v8334_v44  ;;  %v4585_v34 = vmul.f32 0.7978846, %v4553_v37  ;;  %v4495_v56 = vmul.f32 %v4463_v62, %v8428_v45  ;;  %v8444_v7 = vadd.f32 %v4351_v0, %v8345_v32 }
 0xd3a   : > { %v6529_v17 = vpop.eup %6528  ;;  %v8447_v31 = vmul.f32 %v4680_v5, %v8337_v27  ;;  %v4645_v12 = vadd.f32 1.0, %v6527_v4  ;;  %v4586_v51 = vmul.f32 0.7978846, %v4554_v8  ;;  %v4496_v55 = vmul.f32 %v4464_v28, %v8431_v47 }
 0xd3b   : > { %v4646_v53 = vadd.f32 1.0, %v6529_v17  ;;  %6534 = vtanh.f32 %v4585_v34  ;;  %v4527_v16 = vmul.f32 0.044715, %v4495_v56  ;;  %v4461_v44 = vmul.f32 %v8444_v7, %v8444_v7  ;;  %v4411_v1 = vpop.f32.mrf.mxu0  ;;  %v4440_v2 = vpop.f32.mrf.mxu1 }
 0xd3c   : > { %v6531_v58 = vpop.eup %6530  ;;  %v4677_v54 = vmul.f32 0.5, %v4645_v12  ;;  %6536 = vtanh.f32 %v4586_v51  ;;  %v4528_v21 = vmul.f32 0.044715, %v4496_v55  ;;  %v8453_v30 = vadd.f32 %v4380_v52, %v8347_v26 }
 0xd3d   : > { %v6533_v27 = vpop.eup %6532  ;;  %v4678_v35 = vmul.f32 0.5, %v4646_v53  ;;  %v4651_v3 = vadd.f32 1.0, %v6531_v58  ;;  %v4559_v29 = vadd.f32 %v4527_v16, %v8428_v45  ;;  %v4493_v10 = vmul.f32 %v4461_v44, %v8444_v7 }
 0xd3e   : > { %v8458_v13 = vmul.f32 %v4677_v54, %v8368_v46  ;;  %v4652_v20 = vadd.f32 1.0, %v6533_v27  ;;  %v4560_v50 = vadd.f32 %v4528_v21, %v8431_v47  ;;  %v4462_v9 = vmul.f32 %v8453_v30, %v8453_v30 }
 0xd3f   : > { %v8464_v24 = vmul.f32 %v4678_v35, %v8371_v57  ;;  %v4683_v14 = vmul.f32 0.5, %v4651_v3  ;;  %v4591_v60 = vmul.f32 0.7978846, %v4559_v29  ;;  %v4525_v25 = vmul.f32 0.044715, %v4493_v10 }
 0xd40   : > { %v4684_v48 = vmul.f32 0.5, %v4652_v20  ;;  %v4592_v18 = vmul.f32 0.7978846, %v4560_v50  ;;  %v4494_v63 = vmul.f32 %v4462_v9, %v8453_v30  ;;  %v8468_v19 = vadd.f32 %v4411_v1, %v8323_v36  ;;  %v4353_v46 = vpop.f32.mrf.mxu2  ;;  %v4382_v59 = vpop.f32.mrf.mxu3 }
 0xd41   : > { %v6535_v37 = vpop.eup %6534  ;;  %v4715_v62 = vmul.f32 %v4683_v14, %v8386_v41  ;;  %6538 = vtanh.f32 %v4591_v60  ;;  %v4557_v5 = vadd.f32 %v4525_v25, %v8444_v7  ;;  %v8473_v57 = vadd.f32 %v4440_v2, %v8325_v38 }
 0xd42   : > { %v6537_v8 = vpop.eup %6536  ;;  %v4716_v28 = vmul.f32 %v4684_v48, %v8389_v61  ;;  %v4649_v0 = vadd.f32 1.0, %v6535_v37  ;;  %6540 = vtanh.f32 %v4592_v18  ;;  %v4526_v52 = vmul.f32 0.044715, %v4494_v63 }
 0xd43   : > { %v4743_v4 = vpack.c.bf16 %v4715_v62, %v8440_v39  ;;  %v4650_v34 = vadd.f32 1.0, %v6537_v8  ;;  %v4589_v56 = vmul.f32 0.7978846, %v4557_v5  ;;  %v4467_v17 = vmul.f32 %v8468_v19, %v8468_v19  ;;  %v4414_v41 = vpop.f32.mrf.mxu0  ;;  %v4443_v12 = vpop.f32.mrf.mxu1 }
 0xd44   : > { %v4744_v51 = vpack.c.bf16 %v4716_v28, %v8447_v31  ;;  %v4681_v55 = vmul.f32 0.5, %v4649_v0  ;;  %v4558_v53 = vadd.f32 %v4526_v52, %v8453_v30  ;;  %v4468_v61 = vmul.f32 %v8473_v57, %v8473_v57 }
 0xd45   : > { %v4682_v16 = vmul.f32 0.5, %v4650_v34  ;;  %6542 = vtanh.f32 %v4589_v56  ;;  %v4499_v44 = vmul.f32 %v4467_v17, %v8468_v19  ;;  %v8485_v39 = vadd.f32 %v4353_v46, %v8345_v32  ;;  %5083 = vmatmul.bf16.vlgmr.msra.gmra.mxu0 %v4743_v4 }
 0xd46   : > { %v4713_v1 = vmul.f32 %v4681_v55, %v8414_v43  ;;  %v4590_v2 = vmul.f32 0.7978846, %v4558_v53  ;;  %v4500_v58 = vmul.f32 %v4468_v61, %v8473_v57  ;;  %v8490_v31 = vadd.f32 %v4382_v59, %v8347_v26  ;;  %5112 = vmatmul.bf16.vlgmr.msrb.gmra.mxu1 %v4744_v51 }
 0xd47   : > { %v8492_v54 = vpop.eup %6538  ;;  %v4714_v21 = vmul.f32 %v4682_v16, %v8417_v49  ;;  %v4531_v27 = vmul.f32 0.044715, %v4499_v44  ;;  %v4465_v35 = vmul.f32 %v8485_v39, %v8485_v39  ;;  %v8498_v3 = vadd.f32 %v4414_v41, %v8323_v36 }
 0xd48   : > { %v8500_v29 = vpop.eup %6540  ;;  %v4741_v43 = vpack.c.bf16 %v4713_v1, %v8458_v13  ;;  %6544 = vtanh.f32 %v4590_v2  ;;  %v4532_v10 = vmul.f32 0.044715, %v4500_v58  ;;  %v4466_v20 = vmul.f32 %v8490_v31, %v8490_v31  ;;  %v4356_v50 = vpop.f32.mrf.mxu2 }
 0xd49   : > { %v4385_v9 = vpop.f32.mrf.mxu3  ;;  %v4742_v49 = vpack.c.bf16 %v4714_v21, %v8464_v24  ;;  %v4563_v14 = vadd.f32 %v4531_v27, %v8468_v19  ;;  %v4497_v60 = vmul.f32 %v4465_v35, %v8485_v39  ;;  %v4471_v25 = vmul.f32 %v8498_v3, %v8498_v3 }
 0xd4a   : > { %v4564_v48 = vadd.f32 %v4532_v10, %v8473_v57  ;;  %v4498_v13 = vmul.f32 %v4466_v20, %v8490_v31  ;;  %v8513_v18 = vadd.f32 %v4443_v12, %v8325_v38  ;;  %v8516_v63 = vadd.f32 %v4356_v50, %v8345_v32  ;;  %5025 = vmatmul.bf16.vlgmr.msrb.gmra.mxu2 %v4741_v43 }
 0xd4b   : > { %v8518_v46 = vpop.eup %6542  ;;  %v4595_v24 = vmul.f32 0.7978846, %v4563_v14  ;;  %v4529_v59 = vmul.f32 0.044715, %v4497_v60  ;;  %v4503_v37 = vmul.f32 %v4471_v25, %v8498_v3  ;;  %v8522_v62 = vadd.f32 %v4385_v9, %v8347_v26  ;;  %5054 = vmatmul.bf16.vlgmr.msrb.gmra.mxu3 %v4742_v49  ;;  %v4416_v52 = vpop.f32.mrf.mxu0 }
 0xd4c   : > { %v4596_v5 = vmul.f32 0.7978846, %v4564_v48  ;;  %v4530_v8 = vmul.f32 0.044715, %v4498_v13  ;;  %v4472_v28 = vmul.f32 %v8513_v18, %v8513_v18  ;;  %v4469_v0 = vmul.f32 %v8516_v63, %v8516_v63  ;;  %v4445_v17 = vpop.f32.mrf.mxu1 }
 0xd4d   : > { %6546 = vtanh.f32 %v4595_v24  ;;  %v4561_v4 = vadd.f32 %v4529_v59, %v8485_v39  ;;  %v4535_v34 = vmul.f32 0.044715, %v4503_v37  ;;  %v4470_v56 = vmul.f32 %v8522_v62, %v8522_v62 }
 0xd4e   : > { %v8531_v41 = vpop.eup %6544  ;;  %6548 = vtanh.f32 %v4596_v5  ;;  %v4562_v12 = vadd.f32 %v4530_v8, %v8490_v31  ;;  %v4504_v51 = vmul.f32 %v4472_v28, %v8513_v18  ;;  %v4501_v55 = vmul.f32 %v4469_v0, %v8516_v63 }
 0xd4f   : > { %v4593_v53 = vmul.f32 0.7978846, %v4561_v4  ;;  %v4567_v61 = vadd.f32 %v4535_v34, %v8498_v3  ;;  %v4502_v16 = vmul.f32 %v4470_v56, %v8522_v62  ;;  %v8539_v44 = vadd.f32 %v4416_v52, %v8323_v36 }
 0xd50   : > { %v4594_v1 = vmul.f32 0.7978846, %v4562_v12  ;;  %v4536_v2 = vmul.f32 0.044715, %v4504_v51  ;;  %v4533_v58 = vmul.f32 0.044715, %v4501_v55  ;;  %v8542_v21 = vadd.f32 %v4445_v17, %v8325_v38  ;;  %v4358_v27 = vpop.f32.mrf.mxu2 }
 0xd51   : > { %6550 = vtanh.f32 %v4593_v53  ;;  %v4599_v35 = vmul.f32 0.7978846, %v4567_v61  ;;  %v4534_v43 = vmul.f32 0.044715, %v4502_v16  ;;  %v4475_v10 = vmul.f32 %v8539_v44, %v8539_v44  ;;  %v4387_v20 = vpop.f32.mrf.mxu3 }
 0xd52   : > { %6552 = vtanh.f32 %v4594_v1  ;;  %v4568_v50 = vadd.f32 %v4536_v2, %v8513_v18  ;;  %v4565_v9 = vadd.f32 %v4533_v58, %v8516_v63  ;;  %v4476_v49 = vmul.f32 %v8542_v21, %v8542_v21 }
 0xd53   : > { %v6547_v14 = vpop.eup %6546  ;;  %6554 = vtanh.f32 %v4599_v35  ;;  %v4566_v60 = vadd.f32 %v4534_v43, %v8522_v62  ;;  %v4507_v25 = vmul.f32 %v4475_v10, %v8539_v44  ;;  %v8553_v48 = vadd.f32 %v4358_v27, %v8345_v32 }
 0xd54   : > { %v6549_v13 = vpop.eup %6548  ;;  %v4600_v24 = vmul.f32 0.7978846, %v4568_v50  ;;  %v4597_v59 = vmul.f32 0.7978846, %v4565_v9  ;;  %v4508_v37 = vmul.f32 %v4476_v49, %v8542_v21  ;;  %v8557_v5 = vadd.f32 %v4387_v20, %v8347_v26 }
 0xd55   : > { %v4598_v8 = vmul.f32 0.7978846, %v4566_v60  ;;  %v4539_v28 = vmul.f32 0.044715, %v4507_v25  ;;  %v4473_v0 = vmul.f32 %v8553_v48, %v8553_v48  ;;  %v4655_v52 = vadd.f32 1.0, %v8492_v54 }
 0xd56   : > { %6556 = vtanh.f32 %v4600_v24  ;;  %v4540_v4 = vmul.f32 0.044715, %v4508_v37  ;;  %v4474_v34 = vmul.f32 %v8557_v5, %v8557_v5  ;;  %v4659_v56 = vadd.f32 1.0, %v6547_v14 }
 0xd57   : > { %v6551_v17 = vpop.eup %6550  ;;  %6558 = vtanh.f32 %v4597_v59  ;;  %v4571_v12 = vadd.f32 %v4539_v28, %v8539_v44  ;;  %v4505_v51 = vmul.f32 %v4473_v0, %v8553_v48  ;;  %v4687_v55 = vmul.f32 0.5, %v4655_v52 }
 0xd58   : > { %v6553_v53 = vpop.eup %6552  ;;  %6560 = vtanh.f32 %v4598_v8  ;;  %v4572_v61 = vadd.f32 %v4540_v4, %v8542_v21  ;;  %v4506_v16 = vmul.f32 %v4474_v34, %v8557_v5  ;;  %v4691_v54 = vmul.f32 0.5, %v4659_v56 }
 0xd59   : > { %v6555_v1 = vpop.eup %6554  ;;  %v4603_v2 = vmul.f32 0.7978846, %v4571_v12  ;;  %v4537_v58 = vmul.f32 0.044715, %v4505_v51  ;;  %v4719_v27 = vmul.f32 %v4687_v55, %v8428_v45  ;;  %v4656_v35 = vadd.f32 1.0, %v8500_v29 }
 0xd5a   : > { %v4604_v43 = vmul.f32 0.7978846, %v4572_v61  ;;  %v4538_v10 = vmul.f32 0.044715, %v4506_v16  ;;  %v4723_v20 = vmul.f32 %v4691_v54, %v8468_v19  ;;  %v4660_v50 = vadd.f32 1.0, %v6549_v13 }
 0xd5b   : > { %6562 = vtanh.f32 %v4603_v2  ;;  %v4569_v9 = vadd.f32 %v4537_v58, %v8553_v48  ;;  %v4688_v49 = vmul.f32 0.5, %v4656_v35  ;;  %v4653_v14 = vadd.f32 1.0, %v8518_v46 }
 0xd5c   : > { %v6557_v60 = vpop.eup %6556  ;;  %6564 = vtanh.f32 %v4604_v43  ;;  %v4570_v25 = vadd.f32 %v4538_v10, %v8557_v5  ;;  %v4747_v24 = vpack.c.bf16 %v4723_v20, %v4719_v27  ;;  %v4692_v59 = vmul.f32 0.5, %v4660_v50 }
 0xd5d   : > { %v6559_v45 = vpop.eup %6558  ;;  %v4601_v37 = vmul.f32 0.7978846, %v4569_v9  ;;  %v4720_v29 = vmul.f32 %v4688_v49, %v8431_v47  ;;  %v4657_v8 = vadd.f32 1.0, %v6551_v17  ;;  %v4685_v28 = vmul.f32 0.5, %v4653_v14 }
 0xd5e   : > { %v6561_v19 = vpop.eup %6560  ;;  %v4602_v13 = vmul.f32 0.7978846, %v4570_v25  ;;  %5088 = vmatmul.bf16.gmra.mxu0 %v4747_v24  ;;  %v4724_v0 = vmul.f32 %v4692_v59, %v8473_v57  ;;  %v4654_v52 = vadd.f32 1.0, %v8531_v41  ;;  %v4658_v46 = vadd.f32 1.0, %v6553_v53 }
 0xd5f   : > { %6566 = vtanh.f32 %v4601_v37  ;;  %v4689_v4 = vmul.f32 0.5, %v4657_v8  ;;  %v4663_v34 = vadd.f32 1.0, %v6555_v1  ;;  %v4717_v47 = vmul.f32 %v4685_v28, %v8444_v7 }
 0xd60   : > { %6568 = vtanh.f32 %v4602_v13  ;;  %v4748_v56 = vpack.c.bf16 %v4724_v0, %v4720_v29  ;;  %v4686_v12 = vmul.f32 0.5, %v4654_v52  ;;  %v4690_v51 = vmul.f32 0.5, %v4658_v46 }
 0xd61   : > { %v6563_v55 = vpop.eup %6562  ;;  %v4721_v17 = vmul.f32 %v4689_v4, %v8485_v39  ;;  %v4695_v1 = vmul.f32 0.5, %v4663_v34  ;;  %v4664_v27 = vadd.f32 1.0, %v6557_v60  ;;  %v4661_v20 = vadd.f32 1.0, %v6559_v45 }
 0xd62   : > { %v6565_v61 = vpop.eup %6564  ;;  %5117 = vmatmul.bf16.gmra.mxu1 %v4748_v56  ;;  %v4718_v16 = vmul.f32 %v4686_v12, %v8453_v30  ;;  %v4722_v57 = vmul.f32 %v4690_v51, %v8490_v31  ;;  %v4667_v41 = vadd.f32 1.0, %v6563_v55  ;;  %v4662_v9 = vadd.f32 1.0, %v6561_v19 }
 0xd63   : > { %v4745_v53 = vpack.c.bf16 %v4721_v17, %v4717_v47  ;;  %v4668_v54 = vadd.f32 1.0, %v6565_v61  ;;  %v4727_v30 = vmul.f32 %v4695_v1, %v8498_v3  ;;  %v4696_v31 = vmul.f32 0.5, %v4664_v27 }
 0xd64   : > { %v4746_v2 = vpack.c.bf16 %v4722_v57, %v4718_v16  ;;  %v4699_v58 = vmul.f32 0.5, %v4667_v41  ;;  %v4693_v60 = vmul.f32 0.5, %v4661_v20  ;;  %v4694_v37 = vmul.f32 0.5, %v4662_v9 }
 0xd65   : > { %v6567_v35 = vpop.eup %6566  ;;  %5030 = vmatmul.bf16.gmra.mxu2 %v4745_v53  ;;  %v4700_v39 = vmul.f32 0.5, %v4668_v54  ;;  %v4728_v59 = vmul.f32 %v4696_v31, %v8513_v18 }
 0xd66   : > { %v6569_v43 = vpop.eup %6568  ;;  %5059 = vmatmul.bf16.gmra.mxu3 %v4746_v2  ;;  %v4731_v7 = vmul.f32 %v4699_v58, %v8539_v44  ;;  %v4665_v10 = vadd.f32 1.0, %v6567_v35  ;;  %v4725_v8 = vmul.f32 %v4693_v60, %v8516_v63  ;;  %v4726_v3 = vmul.f32 %v4694_v37, %v8522_v62 }
 0xd67   : > { %v4666_v50 = vadd.f32 1.0, %v6569_v43  ;;  %v4732_v25 = vmul.f32 %v4700_v39, %v8542_v21 }
 0xd68   : > { %v4697_v49 = vmul.f32 0.5, %v4665_v10  ;;  %v4751_v14 = vpack.c.bf16 %v4731_v7, %v4727_v30 }
 0xd69   : > { %v4698_v24 = vmul.f32 0.5, %v4666_v50  ;;  %v4752_v44 = vpack.c.bf16 %v4732_v25, %v4728_v59 }
 0xd6a   : > { %v4729_v29 = vmul.f32 %v4697_v49, %v8553_v48 }
 0xd6b   : > { %v4730_v45 = vmul.f32 %v4698_v24, %v8557_v5 }
 0xd6c   : > { %v4749_v28 = vpack.c.bf16 %v4729_v29, %v4725_v8 }
 0xd6d   : > { %v4750_v19 = vpack.c.bf16 %v4730_v45, %v4726_v3 }
 0xd6e   : > { %5093 = vmatmul.bf16.gmra.mxu0 %v4751_v14 }
 0xd72   : > { %5122 = vmatmul.bf16.gmra.mxu1 %v4752_v44 }
 0xd75   : > { %5035 = vmatmul.bf16.gmra.mxu2 %v4749_v28 }
 0xd76   : > { %5064 = vmatmul.bf16.gmra.mxu3 %v4750_v19 }
 0xd9b   : > { %v4419_v21 = vpop.f32.mrf.mxu0  ;;  %v4448_v13 = vpop.f32.mrf.mxu1 }
 0xd9c   : > { %v8590_v18 = vadd.f32 %v4419_v21, %v8323_v36  ;;  %v8593_v48 = vadd.f32 %v4448_v13, %v8325_v38 }
 0xd9e   : > { %v4479_v5 = vmul.f32 %v8590_v18, %v8590_v18  ;;  %v4480_v63 = vmul.f32 %v8593_v48, %v8593_v48 }
 0xda0   : > { %v4511_v62 = vmul.f32 %v4479_v5, %v8590_v18  ;;  %v4512_v0 = vmul.f32 %v4480_v63, %v8593_v48  ;;  %v4361_v52 = vpop.f32.mrf.mxu2  ;;  %v4390_v46 = vpop.f32.mrf.mxu3 }
 0xda1   : > { %v8602_v4 = vadd.f32 %v4361_v52, %v8345_v32  ;;  %v8605_v34 = vadd.f32 %v4390_v46, %v8347_v26 }
 0xda2   : > { %v4543_v56 = vmul.f32 0.044715, %v4511_v62  ;;  %v4544_v12 = vmul.f32 0.044715, %v4512_v0 }
 0xda3   : > { %v4477_v51 = vmul.f32 %v8602_v4, %v8602_v4  ;;  %v4478_v55 = vmul.f32 %v8605_v34, %v8605_v34  ;;  %v4421_v47 = vpop.f32.mrf.mxu0  ;;  %v4450_v17 = vpop.f32.mrf.mxu1 }
 0xda4   : > { %v4575_v61 = vadd.f32 %v4543_v56, %v8590_v18  ;;  %v4576_v16 = vadd.f32 %v4544_v12, %v8593_v48  ;;  %v4422_v57 = vadd.f32 %v4421_v47, %v8323_v36  ;;  %v8615_v41 = vadd.f32 %v4450_v17, %v8325_v38 }
 0xda5   : > { %v4509_v53 = vmul.f32 %v4477_v51, %v8602_v4  ;;  %v4510_v54 = vmul.f32 %v4478_v55, %v8605_v34 }
 0xda6   : > { %v4607_v2 = vmul.f32 0.7978846, %v4575_v61  ;;  %v4483_v1 = vmul.f32 %v4422_v57, %v4422_v57  ;;  %v4484_v58 = vmul.f32 %v8615_v41, %v8615_v41  ;;  %v4608_v27 = vmul.f32 0.7978846, %v4576_v16 }
 0xda7   : > { %v4541_v35 = vmul.f32 0.044715, %v4509_v53  ;;  %v4542_v43 = vmul.f32 0.044715, %v4510_v54 }
 0xda8   : > { %v4515_v7 = vmul.f32 %v4483_v1, %v4422_v57  ;;  %v4516_v39 = vmul.f32 %v4484_v58, %v8615_v41  ;;  %v4363_v10 = vpop.f32.mrf.mxu2  ;;  %v4392_v36 = vpop.f32.mrf.mxu3  ;;  %6570 = vtanh.f32 %v4607_v2 }
 0xda9   : > { %v4573_v38 = vadd.f32 %v4541_v35, %v8602_v4  ;;  %v4574_v20 = vadd.f32 %v4542_v43, %v8605_v34  ;;  %v4364_v50 = vadd.f32 %v4363_v10, %v8345_v32  ;;  %v4393_v9 = vadd.f32 %v4392_v36, %v8347_v26 }
 0xdaa   : > { %v4547_v30 = vmul.f32 0.044715, %v4515_v7  ;;  %v4548_v31 = vmul.f32 0.044715, %v4516_v39  ;;  %6572 = vtanh.f32 %v4608_v27 }
 0xdab   : > { %v4605_v49 = vmul.f32 0.7978846, %v4573_v38  ;;  %v4606_v14 = vmul.f32 0.7978846, %v4574_v20  ;;  %v4481_v25 = vmul.f32 %v4364_v50, %v4364_v50  ;;  %v4482_v59 = vmul.f32 %v4393_v9, %v4393_v9 }
 0xdac   : > { %v4579_v24 = vadd.f32 %v4547_v30, %v4422_v57  ;;  %v4580_v60 = vadd.f32 %v4548_v31, %v8615_v41 }
 0xdad   : > { %v4513_v37 = vmul.f32 %v4481_v25, %v4364_v50  ;;  %6574 = vtanh.f32 %v4605_v49  ;;  %v4514_v45 = vmul.f32 %v4482_v59, %v4393_v9 }
 0xdae   : > { %v4611_v29 = vmul.f32 0.7978846, %v4579_v24  ;;  %v4612_v44 = vmul.f32 0.7978846, %v4580_v60  ;;  %6576 = vtanh.f32 %v4606_v14  ;;  %v6571_v8 = vpop.eup %6570 }
 0xdaf   : > { %v4545_v32 = vmul.f32 0.044715, %v4513_v37  ;;  %v4546_v3 = vmul.f32 0.044715, %v4514_v45  ;;  %v4671_v13 = vadd.f32 1.0, %v6571_v8 }
 0xdb0   : > { %6578 = vtanh.f32 %v4611_v29  ;;  %v6573_v28 = vpop.eup %6572 }
 0xdb1   : > { %6580 = vtanh.f32 %v4612_v44  ;;  %v4577_v26 = vadd.f32 %v4545_v32, %v4364_v50  ;;  %v4578_v19 = vadd.f32 %v4546_v3, %v4393_v9  ;;  %v4672_v62 = vadd.f32 1.0, %v6573_v28 }
 0xdb2   : > { %v4703_v12 = vmul.f32 0.5, %v4671_v13 }
 0xdb3   : > { %v4609_v21 = vmul.f32 0.7978846, %v4577_v26  ;;  %v6575_v5 = vpop.eup %6574  ;;  %v4610_v63 = vmul.f32 0.7978846, %v4578_v19  ;;  %v4704_v55 = vmul.f32 0.5, %v4672_v62 }
 0xdb4   : > { %v6577_v0 = vpop.eup %6576  ;;  %v4669_v47 = vadd.f32 1.0, %v6575_v5  ;;  %v4735_v54 = vmul.f32 %v4703_v12, %v8590_v18 }
 0xdb5   : > { %6582 = vtanh.f32 %v4609_v21  ;;  %v4670_v61 = vadd.f32 1.0, %v6577_v0  ;;  %v4736_v58 = vmul.f32 %v4704_v55, %v8593_v48 }
 0xdb6   : > { %v6579_v52 = vpop.eup %6578  ;;  %6584 = vtanh.f32 %v4610_v63  ;;  %v4701_v43 = vmul.f32 0.5, %v4669_v47 }
 0xdb7   : > { %v6581_v46 = vpop.eup %6580  ;;  %v4675_v56 = vadd.f32 1.0, %v6579_v52  ;;  %v4702_v10 = vmul.f32 0.5, %v4670_v61 }
 0xdb8   : > { %v4676_v51 = vadd.f32 1.0, %v6581_v46  ;;  %v4733_v30 = vmul.f32 %v4701_v43, %v8602_v4 }
 0xdb9   : > { %v4707_v17 = vmul.f32 0.5, %v4675_v56  ;;  %v4734_v18 = vmul.f32 %v4702_v10, %v8605_v34 }
 0xdba   : > { %v4708_v16 = vmul.f32 0.5, %v4676_v51 }
 0xdbb   : > { %v6583_v53 = vpop.eup %6582  ;;  %v4739_v2 = vmul.f32 %v4707_v17, %v4422_v57 }
 0xdbc   : > { %v6585_v1 = vpop.eup %6584  ;;  %v4740_v27 = vmul.f32 %v4708_v16, %v8615_v41  ;;  %v4673_v35 = vadd.f32 1.0, %v6583_v53  ;;  %v8635_v41 = vld [vmem:[%s8683_s16] ss:$0 sm:$0xff] }
 0xdbd   : > { %v4755_v7 = vpack.c.bf16 %v4739_v2, %v4735_v54  ;;  %v4674_v39 = vadd.f32 1.0, %v6585_v1 }
 0xdbe   : > { %v4756_v36 = vpack.c.bf16 %v4740_v27, %v4736_v58  ;;  %v4705_v38 = vmul.f32 0.5, %v4673_v35 }
 0xdbf   : > { %5098 = vmatmul.bf16.gmra.mxu0 %v4755_v7  ;;  %v4706_v20 = vmul.f32 0.5, %v4674_v39 }
 0xdc0   : > { %5127 = vmatmul.bf16.gmra.mxu1 %v4756_v36  ;;  %v4737_v31 = vmul.f32 %v4705_v38, %v4364_v50 }
 0xdc1   : > { %v4738_v57 = vmul.f32 %v4706_v20, %v4393_v9 }
 0xdc2   : > { %v4753_v49 = vpack.c.bf16 %v4737_v31, %v4733_v30  ;;  %v5084_v60 = vpop.f32.mrf.mxu0 }
 0xdc3   : > { %v4754_v48 = vpack.c.bf16 %v4738_v57, %v4734_v18  ;;  %v5113_v4 = vpop.f32.mrf.mxu1 }
 0xdc4   : > { %5040 = vmatmul.bf16.gmra.mxu2 %v4753_v49 }
 0xdc5   : > { %5069 = vmatmul.bf16.gmra.mxu3 %v4754_v48 }
 0xdca   : > { %v5086_v44 = vpop.f32.mrf.mxu0 }
 0xdcb   : > { %v5115_v8 = vpop.f32.mrf.mxu1 }
 0xdcd   : > { %v5026_v14 = vpop.f32.mrf.mxu2 }
 0xdce   : > { %v5027_v25 = vadd.f32 %v8635_v41, %v5026_v14  ;;  %v5055_v24 = vpop.f32.mrf.mxu3 }
 0xdd0   : > { %v5056_v50 = vadd.f32 %v5055_v24, %v5027_v25 }
 0xdd2   : > { %v5085_v34 = vadd.f32 %v5084_v60, %v5056_v50 }
 0xdd4   : > { %v5114_v45 = vadd.f32 %v5113_v4, %v5085_v34 }
 0xdd5   : > { %v5028_v59 = vpop.f32.mrf.mxu2 }
 0xdd6   : > { %v5029_v9 = vadd.f32 %v8635_v41, %v5028_v59  ;;  %v5057_v37 = vpop.f32.mrf.mxu3  ;;  %v5133_v28 = vadd.f32 %v5114_v45, %v7940_v33 }
 0xdd8   : > { %v5058_v29 = vadd.f32 %v5057_v37, %v5029_v9 }
 0xdda   : > { %v5087_v32 = vadd.f32 %v5086_v44, %v5058_v29 }
 0xddb   : > { %v5089_v21 = vpop.f32.mrf.mxu0 }
 0xddc   : > { %v5116_v3 = vadd.f32 %v5115_v8, %v5087_v32 }
 0xdde   : > { %v5134_v26 = vadd.f32 %v5116_v3, %v7945_v23 }
 0xddf   : > { %v5118_v13 = vpop.f32.mrf.mxu1 }
 0xde0   : > { %v6302_v19 = vpack.c.bf16 %v5134_v26, %v5133_v28 }
 0xde2   : > { %6303 = vst [vmem:[%s8646_s29] sm:$0xff] %v6302_v19  }
 0xde3   : > { %v5091_v52 = vpop.f32.mrf.mxu0 }
 0xde7   : > { %v5120_v12 = vpop.f32.mrf.mxu1 }
 0xde8   : > { %v5031_v5 = vpop.f32.mrf.mxu2 }
 0xde9   : > { %v5032_v63 = vadd.f32 %v8635_v41, %v5031_v5  ;;  %v5060_v62 = vpop.f32.mrf.mxu3 }
 0xdeb   : > { %v5061_v0 = vadd.f32 %v5060_v62, %v5032_v63  ;;  %v5094_v1 = vpop.f32.mrf.mxu0 }
 0xded   : > { %v5090_v46 = vadd.f32 %v5089_v21, %v5061_v0 }
 0xdef   : > { %v5119_v55 = vadd.f32 %v5118_v13, %v5090_v46  ;;  %v5123_v27 = vpop.f32.mrf.mxu1 }
 0xdf0   : > { %v5033_v33 = vpop.f32.mrf.mxu2 }
 0xdf1   : > { %v5034_v23 = vadd.f32 %v8635_v41, %v5033_v33  ;;  %v5062_v56 = vpop.f32.mrf.mxu3  ;;  %v5135_v16 = vadd.f32 %v5119_v55, %v7952_v15 }
 0xdf3   : > { %v5063_v51 = vadd.f32 %v5062_v56, %v5034_v23  ;;  %v5096_v38 = vpop.f32.mrf.mxu0 }
 0xdf5   : > { %v5092_v47 = vadd.f32 %v5091_v52, %v5063_v51 }
 0xdf7   : > { %v5121_v17 = vadd.f32 %v5120_v12, %v5092_v47  ;;  %v5125_v30 = vpop.f32.mrf.mxu1 }
 0xdf8   : > { %v5036_v61 = vpop.f32.mrf.mxu2 }
 0xdf9   : > { %v5136_v53 = vadd.f32 %v5121_v17, %v7957_v22  ;;  %v5037_v54 = vadd.f32 %v8635_v41, %v5036_v61  ;;  %v5065_v2 = vpop.f32.mrf.mxu3 }
 0xdfb   : > { %v6307_v58 = vpack.c.bf16 %v5136_v53, %v5135_v16  ;;  %v5066_v35 = vadd.f32 %v5065_v2, %v5037_v54 }
 0xdfd   : > { %6322 = vst [vmem:[%s8646_s29 + $0x8] sm:$0xff] %v6307_v58   ;;  %v5095_v7 = vadd.f32 %v5094_v1, %v5066_v35 }
 0xdff   : > { %v5124_v20 = vadd.f32 %v5123_v27, %v5095_v7 }
 0xe00   : > { %v5038_v43 = vpop.f32.mrf.mxu2 }
 0xe01   : > { %v5039_v39 = vadd.f32 %v8635_v41, %v5038_v43  ;;  %v5067_v10 = vpop.f32.mrf.mxu3  ;;  %v5137_v31 = vadd.f32 %v5124_v20, %v7964_v40 }
 0xe03   : > { %v5068_v36 = vadd.f32 %v5067_v10, %v5039_v39 }
 0xe05   : > { %v5097_v15 = vadd.f32 %v5096_v38, %v5068_v36 }
 0xe07   : > { %v5126_v22 = vadd.f32 %v5125_v30, %v5097_v15 }
 0xe09   : > { %v5138_v18 = vadd.f32 %v5126_v22, %v7969_v42 }
 0xe0b   : > { %v6312_v57 = vpack.c.bf16 %v5138_v18, %v5137_v31 }
 0xe0d   : > { %6323 = vst [vmem:[%s8646_s29 + $0x10] sm:$0xff] %v6312_v57  }
 0xe3c   : > { %v5099_v25 = vpop.f32.mrf.mxu0 }
 0xe3d   : > { %v5128_v24 = vpop.f32.mrf.mxu1 }
 0xe44   : > { %v5101_v37 = vpop.f32.mrf.mxu0 }
 0xe45   : > { %v5130_v42 = vpop.f32.mrf.mxu1 }
 0xe47   : > { %v5041_v49 = vpop.f32.mrf.mxu2 }
 0xe48   : > { %v5042_v48 = vadd.f32 %v8635_v41, %v5041_v49  ;;  %v5070_v14 = vpop.f32.mrf.mxu3 }
 0xe4a   : > { %v5071_v60 = vadd.f32 %v5070_v14, %v5042_v48 }
 0xe4c   : > { %v5100_v50 = vadd.f32 %v5099_v25, %v5071_v60 }
 0xe4e   : > { %v5129_v40 = vadd.f32 %v5128_v24, %v5100_v50 }
 0xe4f   : > { %v5043_v4 = vpop.f32.mrf.mxu2 }
 0xe50   : > { %v5044_v59 = vadd.f32 %v8635_v41, %v5043_v4  ;;  %v5072_v34 = vpop.f32.mrf.mxu3  ;;  %v5139_v45 = vadd.f32 %v5129_v40, %v7982_v6 }
 0xe52   : > { %v5073_v9 = vadd.f32 %v5072_v34, %v5044_v59 }
 0xe54   : > { %v5102_v29 = vadd.f32 %v5101_v37, %v5073_v9 }
 0xe56   : > { %v5131_v44 = vadd.f32 %v5130_v42, %v5102_v29 }
 0xe58   : > { %v5140_v32 = vadd.f32 %v5131_v44, %v7993_v11 }
 0xe5a   : > { %v6317_v8 = vpack.c.bf16 %v5140_v32, %v5139_v45 }
 0xe5c   : > { %6324 = vst [vmem:[%s8646_s29 + $0x18] sm:$0xff] %v6317_v8  }
 0xe5d PF: > { %s27_s24 = sadd.s32 1, %s6592_s24  }
 0xe5e   : > { %p24_p4 = scmp.ge.s32.totalorder %s27_s24, 4  }
 0xe60   :  { %26 = sbr.rel (!%p24_p4) target bundleno = 3 (0x3), region = 139 }

</bundles_post_ra>
